<compile_context>
chip_gen: v5e
topology: v5e:2x2
jax: 0.10.0
libtpu: 0.0.40
codegen_flags: <defaults>
</compile_context>

<pallas_src>
import functools

import jax
import jax.numpy as jnp
import numpy as np
from jax import lax
from jax.experimental import pallas as pl
from jax.experimental.pallas import tpu as pltpu

EPS = 1e-5
_VMEM_LIMIT = 32 * 1024 * 1024         # safe on v5e/v6e (128 MiB) and v7x (64 MiB)
_MAX_TILE_ROWS = 512                   # ~85%+ of HBM roofline per measured data
_TILE_BUDGET_BYTES = 6 * 1024 * 1024   # per-tile working-set budget (double-buffered)


def _pick_row_tile(rows, bytes_per_row):
    """Largest multiple-of-8 divisor of `rows` fitting the VMEM tile budget."""
    if rows % 8 != 0:
        return rows                    # single full block (block == full dims is legal)
    cap = max(8, min(_MAX_TILE_ROWS, _TILE_BUDGET_BYTES // max(bytes_per_row, 1)))
    tile = 8
    for cand in range(8, rows + 1, 8):
        if rows % cand == 0 and cand <= cap:
            tile = cand
    return tile


# ---------------------------------------------------------------------------
# Kernels
# ---------------------------------------------------------------------------
def _stats_block(z):
    # per-tile channel sum and sum-of-squares -> (1, 2, C)
    return jnp.concatenate([jnp.sum(z, axis=0, keepdims=True),
                            jnp.sum(z * z, axis=0, keepdims=True)], axis=0)[None]


def _conv1_kernel(x_ref, w_ref, z_ref, st_ref):
    """z = x @ w (bf16 MXU operands, f32 accumulation) + BN partial sums."""
    z = jnp.dot(x_ref[...].astype(jnp.bfloat16), w_ref[...],
                preferred_element_type=jnp.float32)
    z_ref[...] = z
    st_ref[...] = _stats_block(z)


def _bnrelu_conv1x1_kernel(z_in_ref, s_ref, b_ref, w_ref, z_ref, st_ref):
    """h = relu(z_in * s + b) (f32); z = h @ w (bf16 MXU) + BN partial sums."""
    h = jnp.maximum(z_in_ref[...] * s_ref[...] + b_ref[...], 0.0)
    z = jnp.dot(h.astype(jnp.bfloat16), w_ref[...],
                preferred_element_type=jnp.float32)
    z_ref[...] = z
    st_ref[...] = _stats_block(z)


def _conv3x3_kernel(H, W, z1_ref, s_ref, b_ref, mask_ref, w_ref,
                    z_ref, st_ref, pad_ref):
    """Per-image: h = relu(bn1(z1)); 3x3 zero-padded conv as one wide-K matmul."""
    HW = H * W
    P = W + 1                                   # halo rows on each side
    width = z1_ref.shape[2]

    h = jnp.maximum(z1_ref[0] * s_ref[...] + b_ref[...], 0.0)   # (HW, width) f32

    # Zero-padded scratch: vertical out-of-image taps read real zeros.
    halo = jnp.zeros((P, width), dtype=jnp.float32)
    pad_ref[0:P, :] = halo
    pad_ref[P + HW:P + HW + P, :] = halo
    pad_ref[P:P + HW, :] = h

    mask = mask_ref[...]                        # (HW, 3) horizontal validity (f32)
    taps = []
    for di in range(3):
        for dj in range(3):
            shift = (di - 1) * W + (dj - 1)
            tap = pad_ref[P + shift:P + shift + HW, :]      # static-offset load
            if dj != 1:                                     # only horizontal edges
                tap = tap * mask[:, dj:dj + 1]              # need masking
            taps.append(tap)
    stacked = jnp.concatenate(taps, axis=1)                 # (HW, 9*width)
    z = jnp.dot(stacked.astype(jnp.bfloat16), w_ref[...],
                preferred_element_type=jnp.float32)
    z_ref[0] = z
    st_ref[...] = _stats_block(z)


def _bn_add_relu_kernel(z_ref, s_ref, b_ref, res_ref, o_ref):
    o_ref[...] = jnp.maximum(
        z_ref[...] * s_ref[...] + b_ref[...] + res_ref[...], 0.0)


# ---------------------------------------------------------------------------
# Wrapper
# ---------------------------------------------------------------------------
def _fold_bn(partial_stats, count, gamma, beta):
    """Finish global BN stats (one pass sum/sum-sq) -> per-channel scale/bias."""
    tot = jnp.sum(partial_stats, axis=0)                   # (2, C)
    mean = tot[0] / count
    var = jnp.maximum(tot[1] / count - mean * mean, 0.0)   # biased variance
    scale = gamma.reshape(-1) * lax.rsqrt(var + EPS)
    bias = beta.reshape(-1) - mean * scale
    return (scale.reshape(1, -1).astype(jnp.float32),
            bias.reshape(1, -1).astype(jnp.float32))
    # TODO(synk): running_mean / running_var buffer updates are not modeled
    # (they do not affect the forward output).


def bottleneck_forward(x_nchw, params):
    w1, g1, b1, w2, g2, b2, w3, g3, b3 = params
    N, Cin, H, W = x_nchw.shape
    width = w1.shape[1]
    Cout = w3.shape[1]
    assert Cin == Cout, "identity shortcut (downsample=None) needs Cin == Cout"
    HW = H * W
    rows = N * HW

    # Layout plumbing: NCHW -> NHWC -> (rows, C); channels on the lane axis.
    x2d = jnp.transpose(x_nchw, (0, 2, 3, 1)).reshape(rows, Cin).astype(jnp.float32)

    # Weights in matmul layout; bf16 operands for the MXU (f32 accumulation).
    w1b = w1.astype(jnp.bfloat16)                               # (Cin, width)
    w2b = w2.reshape(9 * width, width).astype(jnp.bfloat16)     # taps stacked on K
    w3b = w3.astype(jnp.bfloat16)                               # (width, Cout)

    cparams = pltpu.CompilerParams(dimension_semantics=("parallel",),
                                   vmem_limit_bytes=_VMEM_LIMIT)

    # ---- stage 1: conv1 (1x1) + BN1 partial stats ---------------------------
    rt1 = _pick_row_tile(rows, 4 * (Cin + width) * 3)
    nt1 = rows // rt1
    z1, st1 = pl.pallas_call(
        _conv1_kernel,
        grid=(nt1,),
        in_specs=[pl.BlockSpec((rt1, Cin), lambda i: (i, 0)),
                  pl.BlockSpec((Cin, width), lambda i: (0, 0))],
        out_specs=(pl.BlockSpec((rt1, width), lambda i: (i, 0)),
                   pl.BlockSpec((1, 2, width), lambda i: (i, 0, 0))),
        out_shape=(jax.ShapeDtypeStruct((rows, width), jnp.float32),
                   jax.ShapeDtypeStruct((nt1, 2, width), jnp.float32)),
        compiler_params=cparams,
        cost_estimate=pl.CostEstimate(
            flops=2 * rows * Cin * width, transcendentals=0,
            bytes_accessed=4 * rows * (Cin + width) + 2 * Cin * width),
    )(x2d, w1b)
    s1, t1 = _fold_bn(st1, rows, g1, b1)

    # ---- stage 2: bn1+relu -> conv2 (3x3, pad=1, stride=1) + BN2 stats ------
    # One image per grid step so the 3x3 halo never crosses a tile boundary.
    ww = np.arange(HW, dtype=np.int32) % W
    mask_np = np.stack([(ww >= 1), np.ones(HW, dtype=bool), (ww <= W - 2)],
                       axis=1).astype(np.float32)               # (HW, 3)
    mask_h = jnp.asarray(mask_np)

    z2, st2 = pl.pallas_call(
        functools.partial(_conv3x3_kernel, H, W),
        grid=(N,),
        in_specs=[pl.BlockSpec((1, HW, width), lambda b: (b, 0, 0)),
                  pl.BlockSpec((1, width), lambda b: (0, 0)),
                  pl.BlockSpec((1, width), lambda b: (0, 0)),
                  pl.BlockSpec((HW, 3), lambda b: (0, 0)),
                  pl.BlockSpec((9 * width, width), lambda b: (0, 0))],
        out_specs=(pl.BlockSpec((1, HW, width), lambda b: (b, 0, 0)),
                   pl.BlockSpec((1, 2, width), lambda b: (b, 0, 0))),
        out_shape=(jax.ShapeDtypeStruct((N, HW, width), jnp.float32),
                   jax.ShapeDtypeStruct((N, 2, width), jnp.float32)),
        scratch_shapes=[pltpu.VMEM((HW + 2 * (W + 1), width), jnp.float32)],
        compiler_params=cparams,
        cost_estimate=pl.CostEstimate(
            flops=2 * rows * 9 * width * width, transcendentals=0,
            bytes_accessed=8 * rows * width + 2 * 9 * width * width),
    )(z1.reshape(N, HW, width), s1, t1, mask_h, w2b)
    s2, t2 = _fold_bn(st2, rows, g2, b2)

    # ---- stage 3: bn2+relu -> conv3 (1x1) + BN3 partial stats ---------------
    rt3 = _pick_row_tile(rows, 4 * (width + Cout) * 3)
    nt3 = rows // rt3
    z3, st3 = pl.pallas_call(
        _bnrelu_conv1x1_kernel,
        grid=(nt3,),
        in_specs=[pl.BlockSpec((rt3, width), lambda i: (i, 0)),
                  pl.BlockSpec((1, width), lambda i: (0, 0)),
                  pl.BlockSpec((1, width), lambda i: (0, 0)),
                  pl.BlockSpec((width, Cout), lambda i: (0, 0))],
        out_specs=(pl.BlockSpec((rt3, Cout), lambda i: (i, 0)),
                   pl.BlockSpec((1, 2, Cout), lambda i: (i, 0, 0))),
        out_shape=(jax.ShapeDtypeStruct((rows, Cout), jnp.float32),
                   jax.ShapeDtypeStruct((nt3, 2, Cout), jnp.float32)),
        compiler_params=cparams,
        cost_estimate=pl.CostEstimate(
            flops=2 * rows * width * Cout, transcendentals=0,
            bytes_accessed=4 * rows * (width + Cout) + 2 * width * Cout),
    )(z2.reshape(rows, width), s2, t2, w3b)
    s3, t3 = _fold_bn(st3, rows, g3, b3)

    # ---- stage 4: bn3 + identity residual + relu ----------------------------
    rt4 = _pick_row_tile(rows, 4 * (2 * Cout + Cin) * 3)
    nt4 = rows // rt4
    out2d = pl.pallas_call(
        _bn_add_relu_kernel,
        grid=(nt4,),
        in_specs=[pl.BlockSpec((rt4, Cout), lambda i: (i, 0)),
                  pl.BlockSpec((1, Cout), lambda i: (0, 0)),
                  pl.BlockSpec((1, Cout), lambda i: (0, 0)),
                  pl.BlockSpec((rt4, Cin), lambda i: (i, 0))],
        out_specs=pl.BlockSpec((rt4, Cout), lambda i: (i, 0)),
        out_shape=jax.ShapeDtypeStruct((rows, Cout), jnp.float32),
        compiler_params=cparams,
    )(z3, s3, t3, x2d)

    # (rows, Cout) -> NHWC -> NCHW
    return jnp.transpose(out2d.reshape(N, H, W, Cout), (0, 3, 1, 2)).astype(x_nchw.dtype)


# ---------------------------------------------------------------------------
# Pure-JAX reference (ground truth)
# ---------------------------------------------------------------------------
def bottleneck_reference(x, params):
    w1, g1, b1, w2, g2, b2, w3, g3, b3 = params
    N, Cin, H, W = x.shape

    def bn(z, g, bta):
        mean = jnp.mean(z, axis=(0, 2, 3), keepdims=True)
        var = jnp.mean((z - mean) ** 2, axis=(0, 2, 3), keepdims=True)
        return ((z - mean) * (g.reshape(1, -1, 1, 1) / jnp.sqrt(var + EPS))
                + bta.reshape(1, -1, 1, 1))

    def c1x1(z, wmat):
        return jnp.einsum('nchw,cd->ndhw', z, wmat, precision='highest')

    def c3x3(z, wstk):
        zp = jnp.pad(z, ((0, 0), (0, 0), (1, 1), (1, 1)))
        out = 0.0
        for di in range(3):
            for dj in range(3):
                patch = zp[:, :, di:di + H, dj:dj + W]
                out = out + jnp.einsum('nchw,cd->ndhw', patch,
                                       wstk[di * 3 + dj], precision='highest')
        return out

    h = jax.nn.relu(bn(c1x1(x, w1), g1, b1))
    h = jax.nn.relu(bn(c3x3(h, w2), g2, b2))
    h = bn(c1x1(h, w3), g3, b3)
    return jax.nn.relu(h + x)


# ---------------------------------------------------------------------------
if __name__ == "__main__":
    # Bottleneck(inplanes=128, planes=32): width = 32, out = planes*4 = 128 ==
    # inplanes so the identity shortcut (downsample=None) is valid; output
    # channels are lane-dense (128).
    N, Cin, H, W = 2, 128, 24, 24
    planes = 32
    width = planes                      # base_width=64, groups=1
    Cout = planes * 4                   # expansion = 4

    key = jax.random.PRNGKey(0)
    ks = jax.random.split(key, 10)

    def bf16_grid(a):
        # keep test inputs exactly representable in bf16 so the bf16-MXU path
        # and the f32 reference agree tightly
        return a.astype(jnp.bfloat16).astype(jnp.float32)

    x = bf16_grid(jax.random.normal(ks[0], (N, Cin, H, W), jnp.float32))

    # conv weights stored directly in matmul layout: (Cin, Cout) / (9, Cin, Cout)
    w1 = bf16_grid(0.3 * jax.random.normal(ks[1], (Cin, width), jnp.float32))
    w2 = bf16_grid(0.2 * jax.random.normal(ks[2], (9, width, width), jnp.float32))
    w3 = bf16_grid(0.3 * jax.random.normal(ks[3], (width, Cout), jnp.float32))
    g1 = (1.0 + 0.1 * jax.random.normal(ks[4], (width,))).astype(jnp.float32)
    b1 = (0.1 * jax.random.normal(ks[5], (width,))).astype(jnp.float32)
    g2 = (1.0 + 0.1 * jax.random.normal(ks[6], (width,))).astype(jnp.float32)
    b2 = (0.1 * jax.random.normal(ks[7], (width,))).astype(jnp.float32)
    g3 = (1.0 + 0.1 * jax.random.normal(ks[8], (Cout,))).astype(jnp.float32)
    b3 = (0.1 * jax.random.normal(ks[9], (Cout,))).astype(jnp.float32)

    params = (w1, g1, b1, w2, g2, b2, w3, g3, b3)

    out = jax.block_until_ready(jax.jit(bottleneck_forward)(x, params))
    ref = jax.block_until_ready(bottleneck_reference(x, params))

    assert out.shape == (N, Cout, H, W)
    np.testing.assert_allclose(np.asarray(out), np.asarray(ref),
                               rtol=5e-2, atol=5e-2)
    print("KERNEL_OK")
</pallas_src>

<mosaic_0001>
module attributes {stable_mosaic.version = 11 : i64} {
  func.func @_conv1_kernel(%arg0: i32, %arg1: memref<384x128xf32, #tpu.memory_space<vmem>>, %arg2: memref<128x32xbf16, #tpu.memory_space<vmem>>, %arg3: memref<384x32xf32, #tpu.memory_space<vmem>>, %arg4: memref<1x2x32xf32, #tpu.memory_space<vmem>>) attributes {dimension_semantics = [#tpu.dimension_semantics<parallel>], iteration_bounds = array<i64: 3>, scalar_prefetch = 0 : i64, scratch_operands = 0 : i64, tpu.core_type = #tpu.core_type<tc>, window_params = [{transform_indices = @transform_0, window_bounds = array<i64: 384, 128>}, {pipeline_mode = #tpu.pipeline_mode<synchronous>, transform_indices = @transform_1, window_bounds = array<i64: 128, 32>}, {transform_indices = @transform_2, window_bounds = array<i64: 384, 32>}, {transform_indices = @transform_3, window_bounds = array<i64: 1, 2, 32>}]} {
    %c0 = arith.constant 0 : index
    %c0_0 = arith.constant 0 : index
    %0 = vector.load %arg1[%c0, %c0_0] : memref<384x128xf32, #tpu.memory_space<vmem>>, vector<384x128xf32>
    %1 = arith.truncf %0 : vector<384x128xf32> to vector<384x128xbf16>
    %c0_1 = arith.constant 0 : index
    %c0_2 = arith.constant 0 : index
    %2 = vector.load %arg2[%c0_1, %c0_2] : memref<128x32xbf16, #tpu.memory_space<vmem>>, vector<128x32xbf16>
    %cst = arith.constant dense<0.000000e+00> : vector<384x32xf32>
    %3 = tpu.matmul %1, %2, %cst {dimension_numbers = #tpu.dot_dimension_numbers<[1], [0], [0], [1], [0, 0, 1, 1], [], []>} : vector<384x128xbf16>, vector<128x32xbf16>, vector<384x32xf32> -> vector<384x32xf32>
    %c0_3 = arith.constant 0 : index
    %c0_4 = arith.constant 0 : index
    %4 = vector.load %arg3[%c0_3, %c0_4] : memref<384x32xf32, #tpu.memory_space<vmem>>, vector<384x32xf32>
    tpu.vector_store %arg3[%c0_3, %c0_4], %3 {strides = array<i32>} : memref<384x32xf32, #tpu.memory_space<vmem>>, vector<384x32xf32>,
    %cst_5 = arith.constant dense<0.000000e+00> : vector<32xf32>
    %5 = vector.multi_reduction <add>, %3, %cst_5 [0] : vector<384x32xf32> to vector<32xf32>
    %6 = vector.shape_cast %5 : vector<32xf32> to vector<1x32xf32>
    %7 = arith.mulf %3, %3 : vector<384x32xf32>
    %cst_6 = arith.constant dense<0.000000e+00> : vector<32xf32>
    %8 = vector.multi_reduction <add>, %7, %cst_6 [0] : vector<384x32xf32> to vector<32xf32>
    %9 = vector.shape_cast %8 : vector<32xf32> to vector<1x32xf32>
    %10 = tpu.concatenate %6, %9 in 0 : vector<1x32xf32>, vector<1x32xf32> -> vector<2x32xf32>
    %11 = vector.shape_cast %10 : vector<2x32xf32> to vector<1x2x32xf32>
    %c0_7 = arith.constant 0 : index
    %c0_8 = arith.constant 0 : index
    %c0_9 = arith.constant 0 : index
    %12 = vector.load %arg4[%c0_7, %c0_8, %c0_9] : memref<1x2x32xf32, #tpu.memory_space<vmem>>, vector<1x2x32xf32>
    tpu.vector_store %arg4[%c0_7, %c0_8, %c0_9], %11 {strides = array<i32>} : memref<1x2x32xf32, #tpu.memory_space<vmem>>, vector<1x2x32xf32>,
    return
  }
  func.func @transform_0(%arg0: i32) -> (i32, i32) {
    %c0_i32 = arith.constant 0 : i32
    %c0_i32_0 = arith.constant 0 : i32
    return %arg0, %c0_i32 : i32, i32
  }
  func.func @transform_1(%arg0: i32) -> (i32, i32) {
    %c0_i32 = arith.constant 0 : i32
    %c0_i32_0 = arith.constant 0 : i32
    %c0_i32_1 = arith.constant 0 : i32
    return %c0_i32, %c0_i32_0 : i32, i32
  }
  func.func @transform_2(%arg0: i32) -> (i32, i32) {
    %c0_i32 = arith.constant 0 : i32
    %c0_i32_0 = arith.constant 0 : i32
    return %arg0, %c0_i32 : i32, i32
  }
  func.func @transform_3(%arg0: i32) -> (i32, i32, i32) {
    %c0_i32 = arith.constant 0 : i32
    %c0_i32_0 = arith.constant 0 : i32
    %c0_i32_1 = arith.constant 0 : i32
    return %arg0, %c0_i32, %c0_i32_0 : i32, i32, i32
  }
}

module attributes {stable_mosaic.version = 11 : i64} {
  func.func @_conv3x3_kernel(%arg0: i32, %arg1: memref<1x576x32xf32, #tpu.memory_space<vmem>>, %arg2: memref<1x32xf32, #tpu.memory_space<vmem>>, %arg3: memref<1x32xf32, #tpu.memory_space<vmem>>, %arg4: memref<576x3xf32, #tpu.memory_space<vmem>>, %arg5: memref<288x32xbf16, #tpu.memory_space<vmem>>, %arg6: memref<1x576x32xf32, #tpu.memory_space<vmem>>, %arg7: memref<1x2x32xf32, #tpu.memory_space<vmem>>, %arg8: memref<626x32xf32, #tpu.memory_space<vmem>>) attributes {dimension_semantics = [#tpu.dimension_semantics<parallel>], iteration_bounds = array<i64: 2>, scalar_prefetch = 0 : i64, scratch_operands = 1 : i64, tpu.core_type = #tpu.core_type<tc>, window_params = [{transform_indices = @transform_0, window_bounds = array<i64: 1, 576, 32>}, {pipeline_mode = #tpu.pipeline_mode<synchronous>, transform_indices = @transform_1, window_bounds = array<i64: 1, 32>}, {pipeline_mode = #tpu.pipeline_mode<synchronous>, transform_indices = @transform_2, window_bounds = array<i64: 1, 32>}, {pipeline_mode = #tpu.pipeline_mode<synchronous>, transform_indices = @transform_3, window_bounds = array<i64: 576, 3>}, {pipeline_mode = #tpu.pipeline_mode<synchronous>, transform_indices = @transform_4, window_bounds = array<i64: 288, 32>}, {transform_indices = @transform_5, window_bounds = array<i64: 1, 576, 32>}, {transform_indices = @transform_6, window_bounds = array<i64: 1, 2, 32>}]} {
    %c0 = arith.constant 0 : index
    %c0_0 = arith.constant 0 : index
    %c0_1 = arith.constant 0 : index
    %0 = vector.load %arg1[%c0, %c0_0, %c0_1] : memref<1x576x32xf32, #tpu.memory_space<vmem>>, vector<1x576x32xf32>
    %1 = vector.shape_cast %0 : vector<1x576x32xf32> to vector<576x32xf32>
    %c0_2 = arith.constant 0 : index
    %c0_3 = arith.constant 0 : index
    %2 = vector.load %arg2[%c0_2, %c0_3] : memref<1x32xf32, #tpu.memory_space<vmem>>, vector<1x32xf32>
    %3 = vector.broadcast %2 : vector<1x32xf32> to vector<576x32xf32>
    %4 = arith.mulf %1, %3 : vector<576x32xf32>
    %c0_4 = arith.constant 0 : index
    %c0_5 = arith.constant 0 : index
    %5 = vector.load %arg3[%c0_4, %c0_5] : memref<1x32xf32, #tpu.memory_space<vmem>>, vector<1x32xf32>
    %6 = vector.broadcast %5 : vector<1x32xf32> to vector<576x32xf32>
    %7 = arith.addf %4, %6 : vector<576x32xf32>
    %cst = arith.constant 0.000000e+00 : f32
    %8 = vector.broadcast %cst : f32 to vector<576x32xf32>
    %9 = arith.maximumf %7, %8 : vector<576x32xf32>
    %cst_6 = arith.constant 0.000000e+00 : f32
    %10 = vector.broadcast %cst_6 : f32 to vector<25x32xf32>
    %c0_7 = arith.constant 0 : index
    %c0_8 = arith.constant 0 : index
    %11 = vector.load %arg8[%c0_7, %c0_8] : memref<626x32xf32, #tpu.memory_space<vmem>>, vector<25x32xf32>
    tpu.vector_store %arg8[%c0_7, %c0_8], %10 {strides = array<i32>} : memref<626x32xf32, #tpu.memory_space<vmem>>, vector<25x32xf32>,
    %c601 = arith.constant 601 : index
    %c0_9 = arith.constant 0 : index
    %12 = vector.load %arg8[%c601, %c0_9] : memref<626x32xf32, #tpu.memory_space<vmem>>, vector<25x32xf32>
    tpu.vector_store %arg8[%c601, %c0_9], %10 {strides = array<i32>} : memref<626x32xf32, #tpu.memory_space<vmem>>, vector<25x32xf32>,
    %c25 = arith.constant 25 : index
    %c0_10 = arith.constant 0 : index
    %13 = vector.load %arg8[%c25, %c0_10] : memref<626x32xf32, #tpu.memory_space<vmem>>, vector<576x32xf32>
    tpu.vector_store %arg8[%c25, %c0_10], %9 {strides = array<i32>} : memref<626x32xf32, #tpu.memory_space<vmem>>, vector<576x32xf32>,
    %c0_11 = arith.constant 0 : index
    %c0_12 = arith.constant 0 : index
    %14 = vector.load %arg4[%c0_11, %c0_12] : memref<576x3xf32, #tpu.memory_space<vmem>>, vector<576x3xf32>
    %c0_13 = arith.constant 0 : index
    %c0_14 = arith.constant 0 : index
    %15 = vector.load %arg8[%c0_13, %c0_14] : memref<626x32xf32, #tpu.memory_space<vmem>>, vector<576x32xf32>
    %16 = vector.extract_strided_slice %14 {offsets = [0, 0], sizes = [576, 1], strides = [1, 1]} : vector<576x3xf32> to vector<576x1xf32>
    %17 = vector.broadcast %16 : vector<576x1xf32> to vector<576x32xf32>
    %18 = arith.mulf %15, %17 : vector<576x32xf32>
    %c1 = arith.constant 1 : index
    %c0_15 = arith.constant 0 : index
    %19 = vector.load %arg8[%c1, %c0_15] : memref<626x32xf32, #tpu.memory_space<vmem>>, vector<576x32xf32>
    %c2 = arith.constant 2 : index
    %c0_16 = arith.constant 0 : index
    %20 = vector.load %arg8[%c2, %c0_16] : memref<626x32xf32, #tpu.memory_space<vmem>>, vector<576x32xf32>
    %21 = vector.extract_strided_slice %14 {offsets = [0, 2], sizes = [576, 1], strides = [1, 1]} : vector<576x3xf32> to vector<576x1xf32>
    %22 = vector.broadcast %21 : vector<576x1xf32> to vector<576x32xf32>
    %23 = arith.mulf %20, %22 : vector<576x32xf32>
    %c24 = arith.constant 24 : index
    %c0_17 = arith.constant 0 : index
    %24 = vector.load %arg8[%c24, %c0_17] : memref<626x32xf32, #tpu.memory_space<vmem>>, vector<576x32xf32>
    %25 = vector.extract_strided_slice %14 {offsets = [0, 0], sizes = [576, 1], strides = [1, 1]} : vector<576x3xf32> to vector<576x1xf32>
    %26 = vector.broadcast %25 : vector<576x1xf32> to vector<576x32xf32>
    %27 = arith.mulf %24, %26 : vector<576x32xf32>
    %c25_18 = arith.constant 25 : index
    %c0_19 = arith.constant 0 : index
    %28 = vector.load %arg8[%c25_18, %c0_19] : memref<626x32xf32, #tpu.memory_space<vmem>>, vector<576x32xf32>
    %c26 = arith.constant 26 : index
    %c0_20 = arith.constant 0 : index
    %29 = vector.load %arg8[%c26, %c0_20] : memref<626x32xf32, #tpu.memory_space<vmem>>, vector<576x32xf32>
    %30 = vector.extract_strided_slice %14 {offsets = [0, 2], sizes = [576, 1], strides = [1, 1]} : vector<576x3xf32> to vector<576x1xf32>
    %31 = vector.broadcast %30 : vector<576x1xf32> to vector<576x32xf32>
    %32 = arith.mulf %29, %31 : vector<576x32xf32>
    %c48 = arith.constant 48 : index
    %c0_21 = arith.constant 0 : index
    %33 = vector.load %arg8[%c48, %c0_21] : memref<626x32xf32, #tpu.memory_space<vmem>>, vector<576x32xf32>
    %34 = vector.extract_strided_slice %14 {offsets = [0, 0], sizes = [576, 1], strides = [1, 1]} : vector<576x3xf32> to vector<576x1xf32>
    %35 = vector.broadcast %34 : vector<576x1xf32> to vector<576x32xf32>
    %36 = arith.mulf %33, %35 : vector<576x32xf32>
    %c49 = arith.constant 49 : index
    %c0_22 = arith.constant 0 : index
    %37 = vector.load %arg8[%c49, %c0_22] : memref<626x32xf32, #tpu.memory_space<vmem>>, vector<576x32xf32>
    %c50 = arith.constant 50 : index
    %c0_23 = arith.constant 0 : index
    %38 = vector.load %arg8[%c50, %c0_23] : memref<626x32xf32, #tpu.memory_space<vmem>>, vector<576x32xf32>
    %39 = vector.extract_strided_slice %14 {offsets = [0, 2], sizes = [576, 1], strides = [1, 1]} : vector<576x3xf32> to vector<576x1xf32>
    %40 = vector.broadcast %39 : vector<576x1xf32> to vector<576x32xf32>
    %41 = arith.mulf %38, %40 : vector<576x32xf32>
    %42 = tpu.concatenate %18, %19, %23, %27, %28, %32, %36, %37, %41 in 1 : vector<576x32xf32>, vector<576x32xf32>, vector<576x32xf32>, vector<576x32xf32>, vector<576x32xf32>, vector<576x32xf32>, vector<576x32xf32>, vector<576x32xf32>, vector<576x32xf32> -> vector<576x288xf32>
    %43 = arith.truncf %42 : vector<576x288xf32> to vector<576x288xbf16>
    %c0_24 = arith.constant 0 : index
    %c0_25 = arith.constant 0 : index
    %44 = vector.load %arg5[%c0_24, %c0_25] : memref<288x32xbf16, #tpu.memory_space<vmem>>, vector<288x32xbf16>
    %cst_26 = arith.constant dense<0.000000e+00> : vector<576x32xf32>
    %45 = tpu.matmul %43, %44, %cst_26 {dimension_numbers = #tpu.dot_dimension_numbers<[1], [0], [0], [1], [0, 0, 1, 1], [], []>} : vector<576x288xbf16>, vector<288x32xbf16>, vector<576x32xf32> -> vector<576x32xf32>
    %c0_27 = arith.constant 0 : index
    %c0_28 = arith.constant 0 : index
    %c0_29 = arith.constant 0 : index
    %46 = vector.load %arg6[%c0_27, %c0_28, %c0_29] : memref<1x576x32xf32, #tpu.memory_space<vmem>>, vector<1x576x32xf32>
    %47 = vector.shape_cast %46 : vector<1x576x32xf32> to vector<576x32xf32>
    %48 = vector.shape_cast %45 : vector<576x32xf32> to vector<1x576x32xf32>
    tpu.vector_store %arg6[%c0_27, %c0_28, %c0_29], %48 {strides = array<i32>} : memref<1x576x32xf32, #tpu.memory_space<vmem>>, vector<1x576x32xf32>,
    %cst_30 = arith.constant dense<0.000000e+00> : vector<32xf32>
    %49 = vector.multi_reduction <add>, %45, %cst_30 [0] : vector<576x32xf32> to vector<32xf32>
    %50 = vector.shape_cast %49 : vector<32xf32> to vector<1x32xf32>
    %51 = arith.mulf %45, %45 : vector<576x32xf32>
    %cst_31 = arith.constant dense<0.000000e+00> : vector<32xf32>
    %52 = vector.multi_reduction <add>, %51, %cst_31 [0] : vector<576x32xf32> to vector<32xf32>
    %53 = vector.shape_cast %52 : vector<32xf32> to vector<1x32xf32>
    %54 = tpu.concatenate %50, %53 in 0 : vector<1x32xf32>, vector<1x32xf32> -> vector<2x32xf32>
    %55 = vector.shape_cast %54 : vector<2x32xf32> to vector<1x2x32xf32>
    %c0_32 = arith.constant 0 : index
    %c0_33 = arith.constant 0 : index
    %c0_34 = arith.constant 0 : index
    %56 = vector.load %arg7[%c0_32, %c0_33, %c0_34] : memref<1x2x32xf32, #tpu.memory_space<vmem>>, vector<1x2x32xf32>
    tpu.vector_store %arg7[%c0_32, %c0_33, %c0_34], %55 {strides = array<i32>} : memref<1x2x32xf32, #tpu.memory_space<vmem>>, vector<1x2x32xf32>,
    return
  }
  func.func @transform_0(%arg0: i32) -> (i32, i32, i32) {
    %c0_i32 = arith.constant 0 : i32
    %c0_i32_0 = arith.constant 0 : i32
    %c0_i32_1 = arith.constant 0 : i32
    return %arg0, %c0_i32, %c0_i32_0 : i32, i32, i32
  }
  func.func @transform_1(%arg0: i32) -> (i32, i32) {
    %c0_i32 = arith.constant 0 : i32
    %c0_i32_0 = arith.constant 0 : i32
    %c0_i32_1 = arith.constant 0 : i32
    return %c0_i32, %c0_i32_0 : i32, i32
  }
  func.func @transform_2(%arg0: i32) -> (i32, i32) {
    %c0_i32 = arith.constant 0 : i32
    %c0_i32_0 = arith.constant 0 : i32
    %c0_i32_1 = arith.constant 0 : i32
    return %c0_i32, %c0_i32_0 : i32, i32
  }
  func.func @transform_3(%arg0: i32) -> (i32, i32) {
    %c0_i32 = arith.constant 0 : i32
    %c0_i32_0 = arith.constant 0 : i32
    %c0_i32_1 = arith.constant 0 : i32
    return %c0_i32, %c0_i32_0 : i32, i32
  }
  func.func @transform_4(%arg0: i32) -> (i32, i32) {
    %c0_i32 = arith.constant 0 : i32
    %c0_i32_0 = arith.constant 0 : i32
    %c0_i32_1 = arith.constant 0 : i32
    return %c0_i32, %c0_i32_0 : i32, i32
  }
  func.func @transform_5(%arg0: i32) -> (i32, i32, i32) {
    %c0_i32 = arith.constant 0 : i32
    %c0_i32_0 = arith.constant 0 : i32
    %c0_i32_1 = arith.constant 0 : i32
    return %arg0, %c0_i32, %c0_i32_0 : i32, i32, i32
  }
  func.func @transform_6(%arg0: i32) -> (i32, i32, i32) {
    %c0_i32 = arith.constant 0 : i32
    %c0_i32_0 = arith.constant 0 : i32
    %c0_i32_1 = arith.constant 0 : i32
    return %arg0, %c0_i32, %c0_i32_0 : i32, i32, i32
  }
}

module attributes {stable_mosaic.version = 11 : i64} {
  func.func @_bnrelu_conv1x1_kernel(%arg0: i32, %arg1: memref<384x32xf32, #tpu.memory_space<vmem>>, %arg2: memref<1x32xf32, #tpu.memory_space<vmem>>, %arg3: memref<1x32xf32, #tpu.memory_space<vmem>>, %arg4: memref<32x128xbf16, #tpu.memory_space<vmem>>, %arg5: memref<384x128xf32, #tpu.memory_space<vmem>>, %arg6: memref<1x2x128xf32, #tpu.memory_space<vmem>>) attributes {dimension_semantics = [#tpu.dimension_semantics<parallel>], iteration_bounds = array<i64: 3>, scalar_prefetch = 0 : i64, scratch_operands = 0 : i64, tpu.core_type = #tpu.core_type<tc>, window_params = [{transform_indices = @transform_0, window_bounds = array<i64: 384, 32>}, {pipeline_mode = #tpu.pipeline_mode<synchronous>, transform_indices = @transform_1, window_bounds = array<i64: 1, 32>}, {pipeline_mode = #tpu.pipeline_mode<synchronous>, transform_indices = @transform_2, window_bounds = array<i64: 1, 32>}, {pipeline_mode = #tpu.pipeline_mode<synchronous>, transform_indices = @transform_3, window_bounds = array<i64: 32, 128>}, {transform_indices = @transform_4, window_bounds = array<i64: 384, 128>}, {transform_indices = @transform_5, window_bounds = array<i64: 1, 2, 128>}]} {
    %c0 = arith.constant 0 : index
    %c0_0 = arith.constant 0 : index
    %0 = vector.load %arg1[%c0, %c0_0] : memref<384x32xf32, #tpu.memory_space<vmem>>, vector<384x32xf32>
    %c0_1 = arith.constant 0 : index
    %c0_2 = arith.constant 0 : index
    %1 = vector.load %arg2[%c0_1, %c0_2] : memref<1x32xf32, #tpu.memory_space<vmem>>, vector<1x32xf32>
    %2 = vector.broadcast %1 : vector<1x32xf32> to vector<384x32xf32>
    %3 = arith.mulf %0, %2 : vector<384x32xf32>
    %c0_3 = arith.constant 0 : index
    %c0_4 = arith.constant 0 : index
    %4 = vector.load %arg3[%c0_3, %c0_4] : memref<1x32xf32, #tpu.memory_space<vmem>>, vector<1x32xf32>
    %5 = vector.broadcast %4 : vector<1x32xf32> to vector<384x32xf32>
    %6 = arith.addf %3, %5 : vector<384x32xf32>
    %cst = arith.constant 0.000000e+00 : f32
    %7 = vector.broadcast %cst : f32 to vector<384x32xf32>
    %8 = arith.maximumf %6, %7 : vector<384x32xf32>
    %9 = arith.truncf %8 : vector<384x32xf32> to vector<384x32xbf16>
    %c0_5 = arith.constant 0 : index
    %c0_6 = arith.constant 0 : index
    %10 = vector.load %arg4[%c0_5, %c0_6] : memref<32x128xbf16, #tpu.memory_space<vmem>>, vector<32x128xbf16>
    %cst_7 = arith.constant dense<0.000000e+00> : vector<384x128xf32>
    %11 = tpu.matmul %9, %10, %cst_7 {dimension_numbers = #tpu.dot_dimension_numbers<[1], [0], [0], [1], [0, 0, 1, 1], [], []>} : vector<384x32xbf16>, vector<32x128xbf16>, vector<384x128xf32> -> vector<384x128xf32>
    %c0_8 = arith.constant 0 : index
    %c0_9 = arith.constant 0 : index
    %12 = vector.load %arg5[%c0_8, %c0_9] : memref<384x128xf32, #tpu.memory_space<vmem>>, vector<384x128xf32>
    tpu.vector_store %arg5[%c0_8, %c0_9], %11 {strides = array<i32>} : memref<384x128xf32, #tpu.memory_space<vmem>>, vector<384x128xf32>,
    %cst_10 = arith.constant dense<0.000000e+00> : vector<128xf32>
    %13 = vector.multi_reduction <add>, %11, %cst_10 [0] : vector<384x128xf32> to vector<128xf32>
    %14 = vector.shape_cast %13 : vector<128xf32> to vector<1x128xf32>
    %15 = arith.mulf %11, %11 : vector<384x128xf32>
    %cst_11 = arith.constant dense<0.000000e+00> : vector<128xf32>
    %16 = vector.multi_reduction <add>, %15, %cst_11 [0] : vector<384x128xf32> to vector<128xf32>
    %17 = vector.shape_cast %16 : vector<128xf32> to vector<1x128xf32>
    %18 = tpu.concatenate %14, %17 in 0 : vector<1x128xf32>, vector<1x128xf32> -> vector<2x128xf32>
    %19 = vector.shape_cast %18 : vector<2x128xf32> to vector<1x2x128xf32>
    %c0_12 = arith.constant 0 : index
    %c0_13 = arith.constant 0 : index
    %c0_14 = arith.constant 0 : index
    %20 = vector.load %arg6[%c0_12, %c0_13, %c0_14] : memref<1x2x128xf32, #tpu.memory_space<vmem>>, vector<1x2x128xf32>
    tpu.vector_store %arg6[%c0_12, %c0_13, %c0_14], %19 {strides = array<i32>} : memref<1x2x128xf32, #tpu.memory_space<vmem>>, vector<1x2x128xf32>,
    return
  }
  func.func @transform_0(%arg0: i32) -> (i32, i32) {
    %c0_i32 = arith.constant 0 : i32
    %c0_i32_0 = arith.constant 0 : i32
    return %arg0, %c0_i32 : i32, i32
  }
  func.func @transform_1(%arg0: i32) -> (i32, i32) {
    %c0_i32 = arith.constant 0 : i32
    %c0_i32_0 = arith.constant 0 : i32
    %c0_i32_1 = arith.constant 0 : i32
    return %c0_i32, %c0_i32_0 : i32, i32
  }
  func.func @transform_2(%arg0: i32) -> (i32, i32) {
    %c0_i32 = arith.constant 0 : i32
    %c0_i32_0 = arith.constant 0 : i32
    %c0_i32_1 = arith.constant 0 : i32
    return %c0_i32, %c0_i32_0 : i32, i32
  }
  func.func @transform_3(%arg0: i32) -> (i32, i32) {
    %c0_i32 = arith.constant 0 : i32
    %c0_i32_0 = arith.constant 0 : i32
    %c0_i32_1 = arith.constant 0 : i32
    return %c0_i32, %c0_i32_0 : i32, i32
  }
  func.func @transform_4(%arg0: i32) -> (i32, i32) {
    %c0_i32 = arith.constant 0 : i32
    %c0_i32_0 = arith.constant 0 : i32
    return %arg0, %c0_i32 : i32, i32
  }
  func.func @transform_5(%arg0: i32) -> (i32, i32, i32) {
    %c0_i32 = arith.constant 0 : i32
    %c0_i32_0 = arith.constant 0 : i32
    %c0_i32_1 = arith.constant 0 : i32
    return %arg0, %c0_i32, %c0_i32_0 : i32, i32, i32
  }
}

module attributes {stable_mosaic.version = 11 : i64} {
  func.func @_bn_add_relu_kernel(%arg0: i32, %arg1: memref<384x128xf32, #tpu.memory_space<vmem>>, %arg2: memref<1x128xf32, #tpu.memory_space<vmem>>, %arg3: memref<1x128xf32, #tpu.memory_space<vmem>>, %arg4: memref<384x128xf32, #tpu.memory_space<vmem>>, %arg5: memref<384x128xf32, #tpu.memory_space<vmem>>) attributes {dimension_semantics = [#tpu.dimension_semantics<parallel>], iteration_bounds = array<i64: 3>, scalar_prefetch = 0 : i64, scratch_operands = 0 : i64, tpu.core_type = #tpu.core_type<tc>, window_params = [{transform_indices = @transform_0, window_bounds = array<i64: 384, 128>}, {pipeline_mode = #tpu.pipeline_mode<synchronous>, transform_indices = @transform_1, window_bounds = array<i64: 1, 128>}, {pipeline_mode = #tpu.pipeline_mode<synchronous>, transform_indices = @transform_2, window_bounds = array<i64: 1, 128>}, {transform_indices = @transform_3, window_bounds = array<i64: 384, 128>}, {transform_indices = @transform_4, window_bounds = array<i64: 384, 128>}]} {
    %c0 = arith.constant 0 : index
    %c0_0 = arith.constant 0 : index
    %0 = vector.load %arg1[%c0, %c0_0] : memref<384x128xf32, #tpu.memory_space<vmem>>, vector<384x128xf32>
    %c0_1 = arith.constant 0 : index
    %c0_2 = arith.constant 0 : index
    %1 = vector.load %arg2[%c0_1, %c0_2] : memref<1x128xf32, #tpu.memory_space<vmem>>, vector<1x128xf32>
    %2 = vector.broadcast %1 : vector<1x128xf32> to vector<384x128xf32>
    %3 = arith.mulf %0, %2 : vector<384x128xf32>
    %c0_3 = arith.constant 0 : index
    %c0_4 = arith.constant 0 : index
    %4 = vector.load %arg3[%c0_3, %c0_4] : memref<1x128xf32, #tpu.memory_space<vmem>>, vector<1x128xf32>
    %5 = vector.broadcast %4 : vector<1x128xf32> to vector<384x128xf32>
    %6 = arith.addf %3, %5 : vector<384x128xf32>
    %c0_5 = arith.constant 0 : index
    %c0_6 = arith.constant 0 : index
    %7 = vector.load %arg4[%c0_5, %c0_6] : memref<384x128xf32, #tpu.memory_space<vmem>>, vector<384x128xf32>
    %8 = arith.addf %6, %7 : vector<384x128xf32>
    %cst = arith.constant 0.000000e+00 : f32
    %9 = vector.broadcast %cst : f32 to vector<384x128xf32>
    %10 = arith.maximumf %8, %9 : vector<384x128xf32>
    %c0_7 = arith.constant 0 : index
    %c0_8 = arith.constant 0 : index
    %11 = vector.load %arg5[%c0_7, %c0_8] : memref<384x128xf32, #tpu.memory_space<vmem>>, vector<384x128xf32>
    tpu.vector_store %arg5[%c0_7, %c0_8], %10 {strides = array<i32>} : memref<384x128xf32, #tpu.memory_space<vmem>>, vector<384x128xf32>,
    return
  }
  func.func @transform_0(%arg0: i32) -> (i32, i32) {
    %c0_i32 = arith.constant 0 : i32
    %c0_i32_0 = arith.constant 0 : i32
    return %arg0, %c0_i32 : i32, i32
  }
  func.func @transform_1(%arg0: i32) -> (i32, i32) {
    %c0_i32 = arith.constant 0 : i32
    %c0_i32_0 = arith.constant 0 : i32
    %c0_i32_1 = arith.constant 0 : i32
    return %c0_i32, %c0_i32_0 : i32, i32
  }
  func.func @transform_2(%arg0: i32) -> (i32, i32) {
    %c0_i32 = arith.constant 0 : i32
    %c0_i32_0 = arith.constant 0 : i32
    %c0_i32_1 = arith.constant 0 : i32
    return %c0_i32, %c0_i32_0 : i32, i32
  }
  func.func @transform_3(%arg0: i32) -> (i32, i32) {
    %c0_i32 = arith.constant 0 : i32
    %c0_i32_0 = arith.constant 0 : i32
    return %arg0, %c0_i32 : i32, i32
  }
  func.func @transform_4(%arg0: i32) -> (i32, i32) {
    %c0_i32 = arith.constant 0 : i32
    %c0_i32_0 = arith.constant 0 : i32
    return %arg0, %c0_i32 : i32, i32
  }
}

</mosaic_0001>

<bundles_post_ra>
// kernel: bottleneck_forward.4
= control target key start
LH: loop header
LB: loop body
LE: loop exit
PB: predicated region body
PF: predicated region fallthrough
CT: control target
= control target key end

     0   :  { %9 = vsyncpa [#allocation3], 0  ;;  %s1658_s0 = inlined_call_operand.hbm [shape: f32[1152,128], index: 0, kind: input, shape index: {}]   ;;  %s1659_s1 = inlined_call_operand.vmem [shape: bf16[128,32], index: 1, kind: input, shape index: {}]   ;;  %s1660_s2 = inlined_call_operand.vmem [shape: f32[1152,32], index: 2, kind: output, shape index: {0}]   ;;  %s1661_s3 = inlined_call_operand.vmem [shape: f32[3,2,32], index: 3, kind: output, shape index: {1}]  }
   0x1   :  { %11 = vsyncpa [#allocation3 + $0x1], 0  ;;  %s1078_s12 = smov 0   ;;  %s1080_s13 = smov 0  }
   0x2   :  { %s1082_s14 = smov 0   ;;  %s1084_s15 = smov 0  }
   0x3 LB: > { %s1097_s16 = sadd.s32 4294967295, %s1054_s15   ;;  %s1100_s17 = sadd.s32 1, %s1054_s15   ;;  %s1054_s15 = sphi %s1084_s15, %s1667_s15   ;;  %s1050_s14 = sphi %s1082_s14, %s1666_s14   ;;  %s1046_s13 = sphi %s1080_s13, %s1665_s13   ;;  %s1042_s12 = sphi %s1078_s12, %s1664_s12  }
   0x4   : > { %s21_s18 = ssub.s32 %s1054_s15, %s1100_s17  ;;  %s24_s19 = sadd.s32 1, %s1050_s14 }
   0x5   : > { %p22_p0 = scmp.eq.s32.totalorder %s21_s18, 0  ;;  %p31_p1 = scmp.ne.s32.totalorder %s1050_s14, %s1046_s13 }
   0x6   : > { %p32_p2 = scmp.eq.s32.totalorder %s1054_s15, 0  ;;  %p37_p3 = scmp.ne.s32.totalorder %s1046_s13, %s1042_s12 }
   0x7   : > { %s1110_s20 = scalar_select %p22_p0, %s1050_s14, %s24_s19  }
   0x8   : > { %p33_p4 = por %p32_p2, %p31_p1  ;;  %p38_p5 = scmp.eq.s32.totalorder %s1097_s16, 0 }
   0x9   : > { %p955_p6 = scmp.lt.s32.totalorder %s1054_s15, 3  ;;  %s137_s22 = sand.u32 1, %s1050_s14  }
   0xa   : > { %p1114_p7 = por %p38_p5, %p37_p3  ;;  %s947_s23 = smul.u32 384, %s137_s22 }
   0xb   : > { %s914_s24 = smul.u32 384, %s1054_s15  ;;  %p1120_p8 = pnand %p955_p6, %p33_p4 }
   0xc   : > { %s141_s29 = scalar_lea.vmem [#allocation2], %s947_s23  ;;  %p877_p9 = scmp.ge.s32.totalorder %s1054_s15, 1 }
   0xd   : > { %s146_s28 = scalar_lea.hbm %s1658_s0, %s914_s24  ;;  %s149_s30 = sshll.u32 %s141_s29, 4  ;;  %s150_s30 = int_to_ptr.vmem [resolvable:$true] %s149_s30 }
   0xe   : > { %s147_s4 = sshll.u32 %s146_s28, 4  ;;  %s138_s5 = scalar_lea.sflag [#allocation3], %s137_s22  ;;  %s148_s4 = int_to_ptr.hbm [resolvable:$true] %s147_s4 }
   0xf   : > { %s990_s6 = sshra.s32 %s148_s4, 4  ;;  %p994_p11 = pneg %p1120_p8  ;;  %s991_s6 = int_to_ptr.hbm [resolvable:$true] %s990_s6 }
  0x10   : > { %s992_s7 = scalar_lea.hbm %s991_s6, 384  ;;  %s997_s10 = scalar_lea.hbm %s1658_s0, 1152 }
  0x11   : > { %p993_p10 = scmp.ne.s32.totalorder %s991_s6, %s992_s7  ;;  %p998_p0 = scmp.lt.s32.totalorder %s991_s6, %s1658_s0 }
  0x12   : > { %p999_p1 = scmp.lt.s32.totalorder %s997_s10, %s992_s7 }
  0x13   : > { %p995_p12 = pnand %p994_p11, %p993_p10 }
  0x14   : > { %p1000_p2 = por %p999_p1, %p998_p0 }
  0x15   : > { %p996_p13 = pneg %p995_p12 }
  0x17   : > { %p1001_p3 = pnand %p1000_p2, %p996_p13 }
  0x19   : > { %1004 = shalt.err (!%p1001_p3)
}
  0x1a   : > { %s1056_s18 = smov 128   ;;  %s1057_s19 = smov 8  }
  0x1b   : > { %954 = dma.hbm_to_vmem [thread:$0]  (!%p1120_p8), %s148_s4, 6144, %s150_s30, %s138_s5, %s1056_s18, %s1056_s18, %s1057_s19  }
  0x1c   : > { %p157_p4 = scmp.lt.s32.totalorder %s1054_s15, 4 }
  0x1e   : > { %p158_p5 = pnand %p877_p9, %p157_p4 }
  0x1f   : > { %s163_s22 = sand.u32 (!%p158_p5), 1, %s1046_s13  }
  0x20   : > { %161 = sbr.rel (%p158_p5) target bundleno = 375 (0x177), region = 28  ;;  %s164_s24 = scalar_lea.sflag (!%p158_p5), [#allocation3], %s163_s22 }
  0x21   : > { %s948_s23 = smul.u32 (!%p158_p5), 384, %s163_s22 }
  0x23   : > { %s1142_s26 = scalar_lea.vmem (!%p158_p5), [#allocation2], %s948_s23 }
  0x25   : > { %1037 = dma.done.wait (%p1114_p7), %s164_s24, 6144  }
  0x26   : > { %1039 = vsyncadd (%p1114_p7), %s164_s24, 4294961152  ;;  %v922_v0 = vld [vmem:[%s1659_s1 + $0x38] sm:$0xff]  ;;  %v921_v1 = vld [vmem:[%s1659_s1 + $0x30] sm:$0xff]  ;;  %s196_s18 = smul.u32 48, %s1097_s16  ;;  %vm471_vm0 = vcmask 261120   ;;  %p202_p7 = scmp.lt.s32.totalorder %s1097_s16, 2 }
  0x27   : > { %342 = vmatpush.bf16.msra.mxu0 %v922_v0  ;;  %923 = vmatpush.bf16.msra.mxu1 %v922_v0  ;;  %v920_v2 = vld [vmem:[%s1659_s1 + $0x28] sm:$0xff]  ;;  %v919_v3 = vld [vmem:[%s1659_s1 + $0x20] sm:$0xff]  ;;  %v918_v4 = vld [vmem:[%s1659_s1 + $0x18] sm:$0xff]  ;;  %vm770_vm1 = vcmask 1040384   ;;  %vm772_vm2 = vcmask 254976  }
  0x28   : > { %924 = vmatpush.bf16.msra.mxu2 %v922_v0  ;;  %925 = vmatpush.bf16.msra.mxu3 %v922_v0  ;;  %v917_v5 = vld [vmem:[%s1659_s1 + $0x10] sm:$0xff]  ;;  %v916_v6 = vld [vmem:[%s1659_s1 + $0x8] sm:$0xff]  ;;  %v915_v7 = vld [vmem:[%s1659_s1] sm:$0xff]  ;;  %p197_p6 = scmp.lt.s32.totalorder %s196_s18, 143  ;;  %s1671_s16 = smov (!%p202_p7, %s1097_s16), 2 }
  0x29   : > { %v206_v8 = vld [vmem:[%s1142_s26] sm:$0xff]  ;;  %v207_v9 = vld [vmem:[%s1142_s26 + $0x8] sm:$0xff]  ;;  %v208_v17 = vld [vmem:[%s1142_s26 + $0x10] sm:$0xff] }
  0x2a   : > { %v218_v10 = vld [vmem:[%s1142_s26 + $0x60] sm:$0xff]  ;;  %v219_v11 = vld [vmem:[%s1142_s26 + $0x68] sm:$0xff]  ;;  %v254_v12 = vpack.c.bf16 %v207_v9, %v206_v8  ;;  %v209_v18 = vld [vmem:[%s1142_s26 + $0x18] sm:$0xff]  ;;  %s1669_s18 = smov (!%p197_p6, %s196_s18), 143 }
  0x2b   : > { %343 = vmatpush.bf16.msra.mxu0 %v921_v1  ;;  %926 = vmatpush.bf16.msra.mxu1 %v921_v1  ;;  %v260_v13 = vpack.c.bf16 %v219_v11, %v218_v10  ;;  %v230_v14 = vld [vmem:[%s1142_s26 + $0xc0] sm:$0xff]  ;;  %v231_v15 = vld [vmem:[%s1142_s26 + $0xc8] sm:$0xff]  ;;  %v220_v19 = vld [vmem:[%s1142_s26 + $0x70] sm:$0xff]  ;;  %v255_v21 = vpack.c.bf16 %v209_v18, %v208_v17  ;;  %s878_s19 = sshll.u32 %s1669_s18, 3 }
  0x2c   : > { %927 = vmatpush.bf16.msra.mxu2 %v921_v1  ;;  %928 = vmatpush.bf16.msra.mxu3 %v921_v1  ;;  %v266_v16 = vpack.c.bf16 %v231_v15, %v230_v14  ;;  %v221_v20 = vld [vmem:[%s1142_s26 + $0x78] sm:$0xff]  ;;  %v232_v23 = vld [vmem:[%s1142_s26 + $0xd0] sm:$0xff]  ;;  %v242_v26 = vld [vmem:[%s1142_s26 + $0x120] sm:$0xff]  ;;  %s1224_s24 = scalar_lea.vmem %s1660_s2, %s878_s19 }
  0x2d   : > { %v261_v22 = vpack.c.bf16 %v221_v20, %v220_v19  ;;  %v233_v24 = vld [vmem:[%s1142_s26 + $0xd8] sm:$0xff]  ;;  %v243_v27 = vld [vmem:[%s1142_s26 + $0x128] sm:$0xff]  ;;  %v210_v29 = vld [vmem:[%s1142_s26 + $0x20] sm:$0xff] }
  0x2e   : > { %v267_v25 = vpack.c.bf16 %v233_v24, %v232_v23  ;;  %v272_v28 = vpack.c.bf16 %v243_v27, %v242_v26  ;;  %v211_v30 = vld [vmem:[%s1142_s26 + $0x28] sm:$0xff]  ;;  %v222_v31 = vld [vmem:[%s1142_s26 + $0x80] sm:$0xff]  ;;  %v244_v38 = vld [vmem:[%s1142_s26 + $0x130] sm:$0xff] }
  0x2f   : > { %344 = vmatpush.bf16.msra.mxu0 %v920_v2  ;;  %929 = vmatpush.bf16.msra.mxu1 %v920_v2  ;;  %v223_v32 = vld [vmem:[%s1142_s26 + $0x88] sm:$0xff]  ;;  %v256_v33 = vpack.c.bf16 %v211_v30, %v210_v29  ;;  %v234_v35 = vld [vmem:[%s1142_s26 + $0xe0] sm:$0xff]  ;;  %v245_v39 = vld [vmem:[%s1142_s26 + $0x138] sm:$0xff] }
  0x30   : > { %930 = vmatpush.bf16.msra.mxu2 %v920_v2  ;;  %931 = vmatpush.bf16.msra.mxu3 %v920_v2  ;;  %v262_v34 = vpack.c.bf16 %v223_v32, %v222_v31  ;;  %v235_v36 = vld [vmem:[%s1142_s26 + $0xe8] sm:$0xff]  ;;  %v273_v40 = vpack.c.bf16 %v245_v39, %v244_v38  ;;  %v212_v41 = vld [vmem:[%s1142_s26 + $0x30] sm:$0xff]  ;;  %v213_v42 = vld [vmem:[%s1142_s26 + $0x38] sm:$0xff] }
  0x31   : > { %v268_v37 = vpack.c.bf16 %v235_v36, %v234_v35  ;;  %v224_v43 = vld [vmem:[%s1142_s26 + $0x90] sm:$0xff]  ;;  %v225_v44 = vld [vmem:[%s1142_s26 + $0x98] sm:$0xff]  ;;  %v257_v45 = vpack.c.bf16 %v213_v42, %v212_v41  ;;  %v246_v50 = vld [vmem:[%s1142_s26 + $0x140] sm:$0xff] }
  0x32   : > { %v263_v46 = vpack.c.bf16 %v225_v44, %v224_v43  ;;  %v236_v47 = vld [vmem:[%s1142_s26 + $0xf0] sm:$0xff]  ;;  %v237_v48 = vld [vmem:[%s1142_s26 + $0xf8] sm:$0xff]  ;;  %v247_v51 = vld [vmem:[%s1142_s26 + $0x148] sm:$0xff] }
  0x33   : > { %345 = vmatpush.bf16.msra.mxu0 %v919_v3  ;;  %932 = vmatpush.bf16.msra.mxu1 %v919_v3  ;;  %v269_v49 = vpack.c.bf16 %v237_v48, %v236_v47  ;;  %v274_v52 = vpack.c.bf16 %v247_v51, %v246_v50  ;;  %v214_v53 = vld [vmem:[%s1142_s26 + $0x40] sm:$0xff]  ;;  %v215_v54 = vld [vmem:[%s1142_s26 + $0x48] sm:$0xff]  ;;  %v248_v61 = vld [vmem:[%s1142_s26 + $0x150] sm:$0xff] }
  0x34   : > { %933 = vmatpush.bf16.msra.mxu2 %v919_v3  ;;  %934 = vmatpush.bf16.msra.mxu3 %v919_v3  ;;  %v226_v55 = vld [vmem:[%s1142_s26 + $0xa0] sm:$0xff]  ;;  %v227_v56 = vld [vmem:[%s1142_s26 + $0xa8] sm:$0xff]  ;;  %v258_v59 = vpack.c.bf16 %v215_v54, %v214_v53  ;;  %v249_v62 = vld [vmem:[%s1142_s26 + $0x158] sm:$0xff] }
  0x35   : > { %v238_v57 = vld [vmem:[%s1142_s26 + $0x100] sm:$0xff]  ;;  %v239_v58 = vld [vmem:[%s1142_s26 + $0x108] sm:$0xff]  ;;  %v264_v60 = vpack.c.bf16 %v227_v56, %v226_v55  ;;  %v275_v0 = vpack.c.bf16 %v249_v62, %v248_v61  ;;  %v216_v1 = vld [vmem:[%s1142_s26 + $0x50] sm:$0xff] }
  0x36   : > { %v270_v63 = vpack.c.bf16 %v239_v58, %v238_v57  ;;  %v217_v2 = vld [vmem:[%s1142_s26 + $0x58] sm:$0xff]  ;;  %v228_v3 = vld [vmem:[%s1142_s26 + $0xb0] sm:$0xff]  ;;  %v250_v9 = vld [vmem:[%s1142_s26 + $0x160] sm:$0xff] }
  0x37   : > { %346 = vmatpush.bf16.msra.mxu0 %v918_v4  ;;  %935 = vmatpush.bf16.msra.mxu1 %v918_v4  ;;  %v251_v10 = vld [vmem:[%s1142_s26 + $0x168] sm:$0xff]  ;;  %v253_v14 = vld [vmem:[%s1142_s26 + $0x178] sm:$0xff] }
  0x38   : > { %936 = vmatpush.bf16.msra.mxu2 %v918_v4  ;;  %937 = vmatpush.bf16.msra.mxu3 %v918_v4  ;;  %v229_v4 = vld [vmem:[%s1142_s26 + $0xb8] sm:$0xff] }
  0x39   : > { %v265_v8 = vpack.c.bf16 %v229_v4, %v228_v3 }
  0x3b   : > { %347 = vmatpush.bf16.msra.mxu0 %v917_v5  ;;  %938 = vmatpush.bf16.msra.mxu1 %v917_v5 }
  0x3c   : > { %939 = vmatpush.bf16.msra.mxu2 %v917_v5  ;;  %940 = vmatpush.bf16.msra.mxu3 %v917_v5  ;;  %v240_v5 = vld [vmem:[%s1142_s26 + $0x110] sm:$0xff] }
  0x3f   : > { %348 = vmatpush.bf16.msra.mxu0 %v916_v6  ;;  %941 = vmatpush.bf16.msra.mxu1 %v916_v6 }
  0x40   : > { %942 = vmatpush.bf16.msra.mxu2 %v916_v6  ;;  %943 = vmatpush.bf16.msra.mxu3 %v916_v6  ;;  %v241_v6 = vld [vmem:[%s1142_s26 + $0x118] sm:$0xff] }
  0x41   : > { %v271_v11 = vpack.c.bf16 %v241_v6, %v240_v5 }
  0x43   : > { %349 = vmatpush.bf16.msra.mxu0 %v915_v7  ;;  %944 = vmatpush.bf16.msra.mxu1 %v915_v7 }
  0x44   : > { %945 = vmatpush.bf16.msra.mxu2 %v915_v7  ;;  %946 = vmatpush.bf16.msra.mxu3 %v915_v7  ;;  %v259_v7 = vpack.c.bf16 %v217_v2, %v216_v1 }
  0x46   : > { %350 = vmatmul.bf16.vlgmr.msra.gmra.mxu0 %v254_v12  ;;  %380 = vmatmul.bf16.vlgmr.msra.gmra.mxu1 %v260_v13  ;;  %v276_v12 = vpack.c.bf16 %v251_v10, %v250_v9  ;;  %v252_v13 = vld [vmem:[%s1142_s26 + $0x170] sm:$0xff]  ;;  %s879_s26 = sshll.u32 %s1671_s16, 1 }
  0x47   : > { %410 = vmatmul.bf16.vlgmr.msra.gmra.mxu2 %v266_v16  ;;  %440 = vmatmul.bf16.vlgmr.msra.gmra.mxu3 %v272_v28  ;;  %v277_v15 = vpack.c.bf16 %v253_v14, %v252_v13  ;;  %s205_s15 = scalar_lea.vmem %s1661_s3, %s879_s26 }
  0x56   : > { %355 = vmatmul.bf16.gmra.mxu0 %v255_v21  ;;  %385 = vmatmul.bf16.gmra.mxu1 %v261_v22 }
  0x57   : > { %415 = vmatmul.bf16.gmra.mxu2 %v267_v25  ;;  %445 = vmatmul.bf16.gmra.mxu3 %v273_v40 }
  0x66   : > { %360 = vmatmul.bf16.gmra.mxu0 %v256_v33  ;;  %390 = vmatmul.bf16.gmra.mxu1 %v262_v34 }
  0x67   : > { %420 = vmatmul.bf16.gmra.mxu2 %v268_v37  ;;  %450 = vmatmul.bf16.gmra.mxu3 %v274_v52 }
  0x76   : > { %365 = vmatmul.bf16.gmra.mxu0 %v257_v45  ;;  %395 = vmatmul.bf16.gmra.mxu1 %v263_v46 }
  0x77   : > { %425 = vmatmul.bf16.gmra.mxu2 %v269_v49  ;;  %455 = vmatmul.bf16.gmra.mxu3 %v275_v0 }
  0x86   : > { %370 = vmatmul.bf16.gmra.mxu0 %v258_v59  ;;  %400 = vmatmul.bf16.gmra.mxu1 %v264_v60 }
  0x87   : > { %430 = vmatmul.bf16.gmra.mxu2 %v270_v63  ;;  %460 = vmatmul.bf16.gmra.mxu3 %v276_v12 }
  0x96   : > { %375 = vmatmul.bf16.gmra.mxu0 %v259_v7  ;;  %405 = vmatmul.bf16.gmra.mxu1 %v265_v8 }
  0x97   : > { %435 = vmatmul.bf16.gmra.mxu2 %v271_v11  ;;  %465 = vmatmul.bf16.gmra.mxu3 %v277_v15 }
  0xc3   : > { %v1226_v16 = vpop.f32.mrf.mxu0  ;;  %v1228_v17 = vpop.f32.mrf.mxu1 }
  0xc4   : > { %472 = vst.msk [vmem:[%s1224_s24] sm:$0xff] %vm471_vm0, %v1226_v16  ;;  %v621_v48 = vmul.f32 %v1226_v16, %v1226_v16  ;;  %v520_v51 = vsel %vm471_vm0, %v1226_v16, 0.0 }
  0xc5   : > { %484 = vst.msk [vmem:[%s1224_s24 + $0x60] sm:$0xff] %vm471_vm0, %v1228_v17 }
  0xc6   : > { %v669_v56 = vsel %vm471_vm0, %v621_v48, 0.0 }
  0xca   : > { %v1240_v20 = vpop.f32.mrf.mxu2  ;;  %v1278_v30 = vpop.f32.mrf.mxu3 }
  0xcb   : > { %v353_v18 = vpop.f32.mrf.mxu0  ;;  %v1236_v19 = vpop.f32.mrf.mxu1  ;;  %496 = vst.msk [vmem:[%s1224_s24 + $0xc0] sm:$0xff] %vm471_vm0, %v1240_v20 }
  0xcc   : > { %473 = vst.msk [vmem:[%s1224_s24 + $0x8] sm:$0xff] %vm471_vm0, %v353_v18  ;;  %v622_v45 = vmul.f32 %v353_v18, %v353_v18  ;;  %v521_v49 = vsel %vm471_vm0, %v353_v18, 0.0 }
  0xcd   : > { %485 = vst.msk [vmem:[%s1224_s24 + $0x68] sm:$0xff] %vm471_vm0, %v1236_v19  ;;  %v522_v55 = vadd.f32 %v521_v49, %v520_v51 }
  0xce   : > { %508 = vst.msk [vmem:[%s1224_s24 + $0x120] sm:$0xff] %vm471_vm0, %v1278_v30  ;;  %v670_v52 = vsel %vm471_vm0, %v622_v45, 0.0 }
  0xcf   : > { %v671_v60 = vadd.f32 %v670_v52, %v669_v56 }
  0xd2   : > { %v1252_v23 = vpop.f32.mrf.mxu2  ;;  %v1295_v34 = vpop.f32.mrf.mxu3 }
  0xd3   : > { %v356_v21 = vpop.f32.mrf.mxu0  ;;  %v1248_v22 = vpop.f32.mrf.mxu1  ;;  %497 = vst.msk [vmem:[%s1224_s24 + $0xc8] sm:$0xff] %vm471_vm0, %v1252_v23 }
  0xd4   : > { %474 = vst.msk [vmem:[%s1224_s24 + $0x10] sm:$0xff] %vm471_vm0, %v356_v21  ;;  %v623_v50 = vmul.f32 %v356_v21, %v356_v21  ;;  %v523_v53 = vsel %vm471_vm0, %v356_v21, 0.0 }
  0xd5   : > { %486 = vst.msk [vmem:[%s1224_s24 + $0x70] sm:$0xff] %vm471_vm0, %v1248_v22  ;;  %v524_v61 = vadd.f32 %v523_v53, %v522_v55 }
  0xd6   : > { %509 = vst.msk [vmem:[%s1224_s24 + $0x128] sm:$0xff] %vm471_vm0, %v1295_v34  ;;  %v672_v57 = vsel %vm471_vm0, %v623_v50, 0.0 }
  0xd7   : > { %v673_v5 = vadd.f32 %v672_v57, %v671_v60 }
  0xda   : > { %v1264_v26 = vpop.f32.mrf.mxu2  ;;  %v1312_v38 = vpop.f32.mrf.mxu3 }
  0xdb   : > { %v358_v24 = vpop.f32.mrf.mxu0  ;;  %v1260_v25 = vpop.f32.mrf.mxu1  ;;  %498 = vst.msk [vmem:[%s1224_s24 + $0xd0] sm:$0xff] %vm471_vm0, %v1264_v26 }
  0xdc   : > { %475 = vst.msk [vmem:[%s1224_s24 + $0x18] sm:$0xff] %vm471_vm0, %v358_v24  ;;  %v624_v54 = vmul.f32 %v358_v24, %v358_v24  ;;  %v525_v58 = vsel %vm471_vm0, %v358_v24, 0.0 }
  0xdd   : > { %487 = vst.msk [vmem:[%s1224_s24 + $0x78] sm:$0xff] %vm471_vm0, %v1260_v25  ;;  %v526_v6 = vadd.f32 %v525_v58, %v524_v61 }
  0xde   : > { %510 = vst.msk [vmem:[%s1224_s24 + $0x130] sm:$0xff] %vm471_vm0, %v1312_v38  ;;  %v674_v0 = vsel %vm471_vm0, %v624_v54, 0.0 }
  0xdf   : > { %v675_v10 = vadd.f32 %v674_v0, %v673_v5 }
  0xe2   : > { %v1276_v29 = vpop.f32.mrf.mxu2  ;;  %v1329_v42 = vpop.f32.mrf.mxu3 }
  0xe3   : > { %v361_v27 = vpop.f32.mrf.mxu0  ;;  %v1272_v28 = vpop.f32.mrf.mxu1  ;;  %499 = vst.msk [vmem:[%s1224_s24 + $0xd8] sm:$0xff] %vm471_vm0, %v1276_v29 }
  0xe4   : > { %476 = vst.msk [vmem:[%s1224_s24 + $0x20] sm:$0xff] %vm471_vm0, %v361_v27  ;;  %v625_v59 = vmul.f32 %v361_v27, %v361_v27  ;;  %v527_v1 = vsel %vm471_vm0, %v361_v27, 0.0 }
  0xe5   : > { %488 = vst.msk [vmem:[%s1224_s24 + $0x80] sm:$0xff] %vm471_vm0, %v1272_v28  ;;  %v528_v11 = vadd.f32 %v527_v1, %v526_v6  ;;  %v633_v6 = vmul.f32 %v1228_v17, %v1228_v17 }
  0xe6   : > { %511 = vst.msk [vmem:[%s1224_s24 + $0x138] sm:$0xff] %vm471_vm0, %v1329_v42  ;;  %v676_v7 = vsel %vm471_vm0, %v625_v59, 0.0 }
  0xe7   : > { %v677_v15 = vadd.f32 %v676_v7, %v675_v10 }
  0xea   : > { %v1293_v33 = vpop.f32.mrf.mxu2  ;;  %v1346_v47 = vpop.f32.mrf.mxu3 }
  0xeb   : > { %v363_v31 = vpop.f32.mrf.mxu0  ;;  %v1289_v32 = vpop.f32.mrf.mxu1  ;;  %500 = vst.msk [vmem:[%s1224_s24 + $0xe0] sm:$0xff] %vm471_vm0, %v1293_v33 }
  0xec   : > { %477 = vst.msk [vmem:[%s1224_s24 + $0x28] sm:$0xff] %vm471_vm0, %v363_v31  ;;  %v626_v2 = vmul.f32 %v363_v31, %v363_v31  ;;  %v529_v8 = vsel %vm471_vm0, %v363_v31, 0.0 }
  0xed   : > { %489 = vst.msk [vmem:[%s1224_s24 + $0x88] sm:$0xff] %vm471_vm0, %v1289_v32  ;;  %v530_v16 = vadd.f32 %v529_v8, %v528_v11 }
  0xee   : > { %512 = vst.msk [vmem:[%s1224_s24 + $0x140] sm:$0xff] %vm471_vm0, %v1346_v47  ;;  %v678_v12 = vsel %vm471_vm0, %v626_v2, 0.0 }
  0xef   : > { %v679_v27 = vadd.f32 %v678_v12, %v677_v15 }
  0xf2   : > { %v1310_v37 = vpop.f32.mrf.mxu2  ;;  %v1375_v4 = vpop.f32.mrf.mxu3 }
  0xf3   : > { %v366_v35 = vpop.f32.mrf.mxu0  ;;  %v1306_v36 = vpop.f32.mrf.mxu1  ;;  %501 = vst.msk [vmem:[%s1224_s24 + $0xe8] sm:$0xff] %vm471_vm0, %v1310_v37 }
  0xf4   : > { %478 = vst.msk [vmem:[%s1224_s24 + $0x30] sm:$0xff] %vm471_vm0, %v366_v35  ;;  %v627_v9 = vmul.f32 %v366_v35, %v366_v35  ;;  %v531_v13 = vsel %vm471_vm0, %v366_v35, 0.0 }
  0xf5   : > { %490 = vst.msk [vmem:[%s1224_s24 + $0x90] sm:$0xff] %vm471_vm0, %v1306_v36  ;;  %v532_v31 = vadd.f32 %v531_v13, %v530_v16  ;;  %v543_v13 = vsel %vm471_vm0, %v1228_v17, 0.0  ;;  %v635_v17 = vmul.f32 %v1248_v22, %v1248_v22 }
  0xf6   : > { %513 = vst.msk [vmem:[%s1224_s24 + $0x148] sm:$0xff] %vm471_vm0, %v1375_v4  ;;  %v680_v18 = vsel %vm471_vm0, %v627_v9, 0.0 }
  0xfa   : > { %v1327_v41 = vpop.f32.mrf.mxu2  ;;  %v1400_v52 = vpop.f32.mrf.mxu3 }
  0xfb   : > { %v368_v39 = vpop.f32.mrf.mxu0  ;;  %v1323_v40 = vpop.f32.mrf.mxu1  ;;  %502 = vst.msk [vmem:[%s1224_s24 + $0xf0] sm:$0xff] %vm471_vm0, %v1327_v41 }
  0xfc   : > { %479 = vst.msk [vmem:[%s1224_s24 + $0x38] sm:$0xff] %vm471_vm0, %v368_v39  ;;  %v628_v14 = vmul.f32 %v368_v39, %v368_v39  ;;  %v533_v21 = vsel %vm471_vm0, %v368_v39, 0.0  ;;  %v681_v39 = vadd.f32 %v680_v18, %v679_v27 }
  0xfd   : > { %491 = vst.msk [vmem:[%s1224_s24 + $0x98] sm:$0xff] %vm471_vm0, %v1323_v40  ;;  %v534_v53 = vadd.f32 %v533_v21, %v532_v31  ;;  %v692_v21 = vsel %vm471_vm0, %v633_v6, 0.0  ;;  %v555_v6 = vsel %vm471_vm0, %v1306_v36, 0.0 }
  0xfe   : > { %v682_v49 = vsel %vm471_vm0, %v628_v14, 0.0  ;;  %514 = vst.msk [vmem:[%s1224_s24 + $0x150] sm:$0xff] %vm471_vm0, %v1400_v52  ;;  %v634_v14 = vmul.f32 %v1236_v19, %v1236_v19 }
 0x102   : > { %v1344_v46 = vpop.f32.mrf.mxu2  ;;  %v1425_v10 = vpop.f32.mrf.mxu3 }
 0x103   : > { %v371_v43 = vpop.f32.mrf.mxu0  ;;  %v1340_v44 = vpop.f32.mrf.mxu1  ;;  %503 = vst.msk [vmem:[%s1224_s24 + $0xf8] sm:$0xff] %vm471_vm0, %v1344_v46 }
 0x104   : > { %480 = vst.msk [vmem:[%s1224_s24 + $0x40] sm:$0xff] %vm471_vm0, %v371_v43  ;;  %v629_v24 = vmul.f32 %v371_v43, %v371_v43  ;;  %v535_v35 = vsel %vm471_vm0, %v371_v43, 0.0  ;;  %v683_v43 = vadd.f32 %v682_v49, %v681_v39  ;;  %v547_v49 = vsel %vm471_vm0, %v1248_v22, 0.0 }
 0x105   : > { %492 = vst.msk [vmem:[%s1224_s24 + $0xa0] sm:$0xff] %vm471_vm0, %v1340_v44  ;;  %v536_v57 = vadd.f32 %v535_v35, %v534_v53  ;;  %v636_v35 = vmul.f32 %v1260_v25, %v1260_v25  ;;  %v696_v53 = vsel %vm471_vm0, %v635_v17, 0.0 }
 0x106   : > { %v684_v54 = vsel %vm471_vm0, %v629_v24, 0.0  ;;  %515 = vst.msk [vmem:[%s1224_s24 + $0x158] sm:$0xff] %vm471_vm0, %v1425_v10  ;;  %v545_v24 = vsel %vm471_vm0, %v1236_v19, 0.0  ;;  %v549_v19 = vsel %vm471_vm0, %v1260_v25, 0.0  ;;  %v638_v25 = vmul.f32 %v1289_v32, %v1289_v32 }
 0x107   : > { %v685_v60 = vadd.f32 %v684_v54, %v683_v43  ;;  %v637_v54 = vmul.f32 %v1272_v28, %v1272_v28  ;;  %v698_v22 = vsel %vm471_vm0, %v636_v35, 0.0 }
 0x10a   : > { %v1373_v3 = vpop.f32.mrf.mxu2 }
 0x10b   : > { %v373_v62 = vpop.f32.mrf.mxu0  ;;  %v1367_v63 = vpop.f32.mrf.mxu1  ;;  %504 = vst.msk [vmem:[%s1224_s24 + $0x100] sm:$0xff] %vm471_vm0, %v1373_v3 }
 0x10c   : > { %481 = vst.msk [vmem:[%s1224_s24 + $0x48] sm:$0xff] %vm471_vm0, %v373_v62  ;;  %v630_v50 = vmul.f32 %v373_v62, %v373_v62  ;;  %v537_v55 = vsel %vm471_vm0, %v373_v62, 0.0 }
 0x10d   : > { %493 = vst.msk [vmem:[%s1224_s24 + $0xa8] sm:$0xff] %vm471_vm0, %v1367_v63  ;;  %v538_v61 = vadd.f32 %v537_v55, %v536_v57 }
 0x10e   : > { %v686_v58 = vsel %vm471_vm0, %v630_v50, 0.0 }
 0x10f   : > { %v687_v62 = vadd.f32 %v686_v58, %v685_v60  ;;  %v551_v58 = vsel %vm471_vm0, %v1272_v28, 0.0  ;;  %v702_v28 = vsel %vm471_vm0, %v638_v25, 0.0 }
 0x112   : > { %v1398_v51 = vpop.f32.mrf.mxu2 }
 0x113   : > { %v376_v45 = vpop.f32.mrf.mxu0  ;;  %v1392_v48 = vpop.f32.mrf.mxu1  ;;  %505 = vst.msk [vmem:[%s1224_s24 + $0x108] sm:$0xff] %vm471_vm0, %v1398_v51 }
 0x114   : > { %482 = vst.msk [vmem:[%s1224_s24 + $0x50] sm:$0xff] %vm471_vm0, %v376_v45  ;;  %v631_v56 = vmul.f32 %v376_v45, %v376_v45  ;;  %v539_v59 = vsel %vm471_vm0, %v376_v45, 0.0  ;;  %v694_v45 = vsel %vm471_vm0, %v634_v14, 0.0 }
 0x115   : > { %494 = vst.msk [vmem:[%s1224_s24 + $0xb0] sm:$0xff] %vm471_vm0, %v1392_v48  ;;  %v540_v1 = vadd.f32 %v539_v59, %v538_v61  ;;  %v700_v61 = vsel %vm471_vm0, %v637_v54, 0.0 }
 0x116   : > { %v688_v0 = vsel %vm471_vm0, %v631_v56, 0.0  ;;  %v1458_v56 = vpop.f32.mrf.mxu3 }
 0x117   : > { %v689_v11 = vadd.f32 %v688_v0, %v687_v62  ;;  %516 = vst.msk [vmem:[%s1224_s24 + $0x160] sm:$0xff] %vm471_vm0, %v1458_v56  ;;  %v553_v0 = vsel %vm471_vm0, %v1289_v32, 0.0  ;;  %v639_v62 = vmul.f32 %v1306_v36, %v1306_v36  ;;  %v557_v32 = vsel %vm471_vm0, %v1323_v40, 0.0 }
 0x11a   : > { %v1423_v9 = vpop.f32.mrf.mxu2 }
 0x11b   : > { %v378_v2 = vpop.f32.mrf.mxu0  ;;  %v1416_v5 = vpop.f32.mrf.mxu1  ;;  %506 = vst.msk [vmem:[%s1224_s24 + $0x110] sm:$0xff] %vm471_vm0, %v1423_v9 }
 0x11c   : > { %483 = vst.msk [vmem:[%s1224_s24 + $0x58] sm:$0xff] %vm471_vm0, %v378_v2  ;;  %v541_v7 = vsel %vm471_vm0, %v378_v2, 0.0  ;;  %v632_v8 = vmul.f32 %v378_v2, %v378_v2  ;;  %v565_v54 = vsel %vm471_vm0, %v1416_v5, 0.0 }
 0x11d   : > { %v542_v12 = vadd.f32 %v541_v7, %v540_v1  ;;  %495 = vst.msk [vmem:[%s1224_s24 + $0xb8] sm:$0xff] %vm471_vm0, %v1416_v5  ;;  %v640_v7 = vmul.f32 %v1323_v40, %v1323_v40 }
 0x11e   : > { %v690_v15 = vsel %vm471_vm0, %v632_v8, 0.0  ;;  %v1486_v14 = vpop.f32.mrf.mxu3 }
 0x11f   : > { %v544_v16 = vadd.f32 %v543_v13, %v542_v12  ;;  %v691_v18 = vadd.f32 %v690_v15, %v689_v11  ;;  %v704_v12 = vsel %vm471_vm0, %v639_v62, 0.0  ;;  %v641_v13 = vmul.f32 %v1340_v44, %v1340_v44  ;;  %517 = vst.msk [vmem:[%s1224_s24 + $0x168] sm:$0xff] %vm471_vm0, %v1486_v14 }
 0x120   : > { %v706_v36 = vsel %vm471_vm0, %v640_v7, 0.0 }
 0x121   : > { %v546_v27 = vadd.f32 %v545_v24, %v544_v16  ;;  %v693_v31 = vadd.f32 %v692_v21, %v691_v18  ;;  %v559_v18 = vsel %vm471_vm0, %v1340_v44, 0.0  ;;  %v642_v21 = vmul.f32 %v1367_v63, %v1367_v63 }
 0x122   : > { %v1456_v55 = vpop.f32.mrf.mxu2  ;;  %v708_v17 = vsel %vm471_vm0, %v641_v13, 0.0  ;;  %v563_v44 = vsel %vm471_vm0, %v1392_v48, 0.0 }
 0x123   : > { %v548_v50 = vadd.f32 %v547_v49, %v546_v27  ;;  %v695_v39 = vadd.f32 %v694_v45, %v693_v31  ;;  %507 = vst.msk [vmem:[%s1224_s24 + $0x118] sm:$0xff] %vm471_vm0, %v1456_v55  ;;  %v561_v27 = vsel %vm471_vm0, %v1367_v63, 0.0  ;;  %v643_v31 = vmul.f32 %v1392_v48, %v1392_v48 }
 0x124   : > { %v710_v35 = vsel %vm471_vm0, %v642_v21, 0.0  ;;  %v567_v48 = vsel %vm471_vm0, %v1240_v20, 0.0  ;;  %v577_v21 = vsel %vm471_vm0, %v1310_v37, 0.0 }
 0x125   : > { %v550_v43 = vadd.f32 %v549_v19, %v548_v50  ;;  %v697_v57 = vadd.f32 %v696_v53, %v695_v39  ;;  %v644_v50 = vmul.f32 %v1416_v5, %v1416_v5  ;;  %v645_v19 = vmul.f32 %v1240_v20, %v1240_v20 }
 0x126   : > { %v712_v63 = vsel %vm471_vm0, %v643_v31, 0.0  ;;  %v569_v5 = vsel %vm471_vm0, %v1252_v23, 0.0  ;;  %v652_v31 = vmul.f32 %v1344_v46, %v1344_v46 }
 0x127   : > { %v552_v59 = vadd.f32 %v551_v58, %v550_v43  ;;  %v699_v60 = vadd.f32 %v698_v22, %v697_v57  ;;  %v1511_v43 = vpop.f32.mrf.mxu3  ;;  %v646_v58 = vmul.f32 %v1252_v23, %v1252_v23  ;;  %v714_v25 = vsel %vm471_vm0, %v644_v50, 0.0 }
 0x128   : > { %518 = vst.msk [vmem:[%s1224_s24 + $0x170] sm:$0xff] %vm471_vm0, %v1511_v43  ;;  %v573_v23 = vsel %vm471_vm0, %v1276_v29, 0.0 }
 0x129   : > { %v701_v1 = vadd.f32 %v700_v61, %v699_v60  ;;  %v554_v2 = vadd.f32 %v553_v0, %v552_v59  ;;  %v716_v61 = vsel %vm471_vm0, %v645_v19, 0.0  ;;  %v647_v0 = vmul.f32 %v1264_v26, %v1264_v26 }
 0x12a   : > { %v718_v20 = vsel %vm471_vm0, %v646_v58, 0.0  ;;  %v654_v19 = vmul.f32 %v1398_v51, %v1398_v51 }
 0x12b   : > { %v556_v8 = vadd.f32 %v555_v6, %v554_v2  ;;  %v703_v11 = vadd.f32 %v702_v28, %v701_v1  ;;  %v571_v2 = vsel %vm471_vm0, %v1264_v26, 0.0  ;;  %v648_v28 = vmul.f32 %v1276_v29, %v1276_v29 }
 0x12d   : > { %v558_v15 = vadd.f32 %v557_v32, %v556_v8  ;;  %v705_v16 = vadd.f32 %v704_v12, %v703_v11  ;;  %v720_v8 = vsel %vm471_vm0, %v647_v0, 0.0  ;;  %v649_v11 = vmul.f32 %v1293_v33, %v1293_v33 }
 0x12e   : > { %v722_v26 = vsel %vm471_vm0, %v648_v28, 0.0  ;;  %v589_v0 = vsel %vm471_vm0, %v1456_v55, 0.0 }
 0x12f   : > { %v560_v24 = vadd.f32 %v559_v18, %v558_v15  ;;  %v707_v40 = vadd.f32 %v706_v36, %v705_v16  ;;  %v1536_v12 = vpop.f32.mrf.mxu3  ;;  %v575_v15 = vsel %vm471_vm0, %v1293_v33, 0.0  ;;  %v650_v16 = vmul.f32 %v1310_v37, %v1310_v37 }
 0x130   : > { %519 = vst.msk [vmem:[%s1224_s24 + $0x178] sm:$0xff] %vm471_vm0, %v1536_v12  ;;  %v724_v18 = vsel %vm471_vm0, %v649_v11, 0.0  ;;  %v579_v33 = vsel %vm471_vm0, %v1327_v41, 0.0  ;;  %v581_v37 = vsel %vm471_vm0, %v1344_v46, 0.0  ;;  %v585_v46 = vsel %vm471_vm0, %v1398_v51, 0.0 }
 0x131   : > { %v562_v45 = vadd.f32 %v561_v27, %v560_v24  ;;  %v709_v49 = vadd.f32 %v708_v17, %v707_v40  ;;  %v651_v24 = vmul.f32 %v1327_v41, %v1327_v41  ;;  %v726_v27 = vsel %vm471_vm0, %v650_v16, 0.0 }
 0x132   : > { %v583_v41 = vsel %vm471_vm0, %v1373_v3, 0.0 }
 0x133   : > { %v711_v39 = vadd.f32 %v710_v35, %v709_v49  ;;  %v564_v53 = vadd.f32 %v563_v44, %v562_v45  ;;  %v728_v35 = vsel %vm471_vm0, %v651_v24, 0.0  ;;  %v653_v44 = vmul.f32 %v1373_v3, %v1373_v3 }
 0x134   : > { %v587_v3 = vsel %vm471_vm0, %v1423_v9, 0.0  ;;  %v662_v24 = vmul.f32 %v1375_v4, %v1375_v4 }
 0x135   : > { %v713_v57 = vadd.f32 %v712_v63, %v711_v39  ;;  %v566_v22 = vadd.f32 %v565_v54, %v564_v53  ;;  %v730_v53 = vsel %vm471_vm0, %v652_v31, 0.0 }
 0x137   : > { %v568_v59 = vadd.f32 %v567_v48, %v566_v22  ;;  %v715_v60 = vadd.f32 %v714_v25, %v713_v57  ;;  %v732_v57 = vsel %vm471_vm0, %v653_v44, 0.0  ;;  %v655_v22 = vmul.f32 %v1423_v9, %v1423_v9 }
 0x138   : > { %v734_v25 = vsel %vm471_vm0, %v654_v19, 0.0  ;;  %v658_v9 = vmul.f32 %v1295_v34, %v1295_v34 }
 0x139   : > { %v570_v62 = vadd.f32 %v569_v5, %v568_v59  ;;  %v717_v1 = vadd.f32 %v716_v61, %v715_v60  ;;  %v656_v59 = vmul.f32 %v1456_v55, %v1456_v55  ;;  %v657_v5 = vmul.f32 %v1278_v30, %v1278_v30 }
 0x13a   : > { %v736_v51 = vsel %vm471_vm0, %v655_v22, 0.0  ;;  %v659_v55 = vmul.f32 %v1312_v38, %v1312_v38  ;;  %v667_v22 = vmul.f32 %v1511_v43, %v1511_v43 }
 0x13b   : > { %v572_v6 = vadd.f32 %v571_v2, %v570_v62  ;;  %v719_v7 = vadd.f32 %v718_v20, %v717_v1  ;;  %v591_v20 = vsel %vm471_vm0, %v1278_v30, 0.0  ;;  %v738_v2 = vsel %vm471_vm0, %v656_v59, 0.0 }
 0x13c   : > { %v595_v30 = vsel %vm471_vm0, %v1312_v38, 0.0  ;;  %v744_v16 = vsel %vm471_vm0, %v659_v55, 0.0  ;;  %v599_v38 = vsel %vm471_vm0, %v1346_v47, 0.0 }
 0x13d   : > { %v574_v32 = vadd.f32 %v573_v23, %v572_v6  ;;  %v721_v13 = vadd.f32 %v720_v8, %v719_v7  ;;  %v740_v7 = vsel %vm471_vm0, %v657_v5, 0.0  ;;  %v593_v8 = vsel %vm471_vm0, %v1295_v34, 0.0 }
 0x13e   : > { %v597_v34 = vsel %vm471_vm0, %v1329_v42, 0.0 }
 0x13f   : > { %v723_v36 = vadd.f32 %v722_v26, %v721_v13  ;;  %v576_v29 = vadd.f32 %v575_v15, %v574_v32  ;;  %v742_v32 = vsel %vm471_vm0, %v658_v9, 0.0  ;;  %v660_v13 = vmul.f32 %v1329_v42, %v1329_v42 }
 0x140   : > { %v601_v42 = vsel %vm471_vm0, %v1375_v4, 0.0  ;;  %v605_v4 = vsel %vm471_vm0, %v1425_v10, 0.0 }
 0x141   : > { %v578_v40 = vadd.f32 %v577_v21, %v576_v29  ;;  %v725_v17 = vadd.f32 %v724_v18, %v723_v36  ;;  %v661_v36 = vmul.f32 %v1346_v47, %v1346_v47  ;;  %v746_v21 = vsel %vm471_vm0, %v660_v13, 0.0 }
 0x142   : > { %v603_v47 = vsel %vm471_vm0, %v1400_v52, 0.0 }
 0x143   : > { %v580_v45 = vadd.f32 %v579_v33, %v578_v40  ;;  %v727_v49 = vadd.f32 %v726_v27, %v725_v17  ;;  %v748_v27 = vsel %vm471_vm0, %v661_v36, 0.0  ;;  %v663_v33 = vmul.f32 %v1400_v52, %v1400_v52 }
 0x144   : > { %v607_v52 = vsel %vm471_vm0, %v1458_v56, 0.0 }
 0x145   : > { %v582_v50 = vadd.f32 %v581_v37, %v580_v45  ;;  %v729_v39 = vadd.f32 %v728_v35, %v727_v49  ;;  %v750_v49 = vsel %vm471_vm0, %v662_v24, 0.0  ;;  %v664_v35 = vmul.f32 %v1425_v10, %v1425_v10 }
 0x146   : > { %v609_v10 = vsel %vm471_vm0, %v1486_v14, 0.0 }
 0x147   : > { %v584_v63 = vadd.f32 %v583_v41, %v582_v50  ;;  %v731_v54 = vadd.f32 %v730_v53, %v729_v39  ;;  %v752_v50 = vsel %vm471_vm0, %v663_v33, 0.0  ;;  %v665_v39 = vmul.f32 %v1458_v56, %v1458_v56 }
 0x148   : > { %v754_v19 = vsel %vm471_vm0, %v664_v35, 0.0  ;;  %v611_v56 = vsel %vm471_vm0, %v1511_v43, 0.0 }
 0x149   : > { %v733_v48 = vadd.f32 %v732_v57, %v731_v54  ;;  %v586_v58 = vadd.f32 %v585_v46, %v584_v63  ;;  %v666_v63 = vmul.f32 %v1486_v14, %v1486_v14  ;;  %v756_v46 = vsel %vm471_vm0, %v665_v39, 0.0 }
 0x14a   : > { %v613_v14 = vsel %vm471_vm0, %v1536_v12, 0.0 }
 0x14b   : > { %v735_v60 = vadd.f32 %v734_v25, %v733_v48  ;;  %v588_v61 = vadd.f32 %v587_v3, %v586_v58  ;;  %v758_v25 = vsel %vm471_vm0, %v666_v63, 0.0  ;;  %v668_v3 = vmul.f32 %v1536_v12, %v1536_v12 }
 0x14d   : > { %v737_v62 = vadd.f32 %v736_v51, %v735_v60  ;;  %v590_v1 = vadd.f32 %v589_v0, %v588_v61  ;;  %v760_v61 = vsel %vm471_vm0, %v667_v22, 0.0  ;;  %v762_v0 = vsel %vm471_vm0, %v668_v3, 0.0 }
 0x14f   : > { %v592_v28 = vadd.f32 %v591_v20, %v590_v1  ;;  %v739_v6 = vadd.f32 %v738_v2, %v737_v62 }
 0x151   : > { %v594_v23 = vadd.f32 %v593_v8, %v592_v28  ;;  %v741_v11 = vadd.f32 %v740_v7, %v739_v6 }
 0x153   : > { %v596_v26 = vadd.f32 %v595_v30, %v594_v23  ;;  %v743_v15 = vadd.f32 %v742_v32, %v741_v11 }
 0x155   : > { %v598_v29 = vadd.f32 %v597_v34, %v596_v26  ;;  %v745_v18 = vadd.f32 %v744_v16, %v743_v15 }
 0x157   : > { %v747_v40 = vadd.f32 %v746_v21, %v745_v18  ;;  %v600_v17 = vadd.f32 %v599_v38, %v598_v29 }
 0x159   : > { %v602_v31 = vadd.f32 %v601_v42, %v600_v17  ;;  %v749_v45 = vadd.f32 %v748_v27, %v747_v40 }
 0x15b   : > { %v604_v37 = vadd.f32 %v603_v47, %v602_v31  ;;  %v751_v44 = vadd.f32 %v750_v49, %v749_v45 }
 0x15d   : > { %v606_v53 = vadd.f32 %v605_v4, %v604_v37  ;;  %v753_v41 = vadd.f32 %v752_v50, %v751_v44 }
 0x15f   : > { %v608_v54 = vadd.f32 %v607_v52, %v606_v53  ;;  %v755_v57 = vadd.f32 %v754_v19, %v753_v41 }
 0x161   : > { %v757_v48 = vadd.f32 %v756_v46, %v755_v57  ;;  %v610_v58 = vadd.f32 %v609_v10, %v608_v54 }
 0x163   : > { %v759_v59 = vadd.f32 %v758_v25, %v757_v48  ;;  %v612_v60 = vadd.f32 %v611_v56, %v610_v58 }
 0x165   : > { %v761_v5 = vadd.f32 %v760_v61, %v759_v59  ;;  %v614_v51 = vadd.f32 %v613_v14, %v612_v60 }
 0x167   : > { %v615_v62 = vrot.slane %v614_v51, 4  ;;  %v763_v1 = vadd.f32 %v762_v0, %v761_v5 }
 0x169   : > { %v616_v20 = vadd.f32 %v615_v62, %v614_v51  ;;  %v764_v43 = vrot.slane %v763_v1, 4 }
 0x16b   : > { %v617_v9 = vrot.slane %v616_v20, 2  ;;  %v765_v2 = vadd.f32 %v764_v43, %v763_v1 }
 0x16d   : > { %v618_v28 = vadd.f32 %v617_v9, %v616_v20  ;;  %v766_v6 = vrot.slane %v765_v2, 2 }
 0x16f   : > { %v619_v7 = vrot.slane %v618_v28, 1  ;;  %v767_v8 = vadd.f32 %v766_v6, %v765_v2 }
 0x171   : > { %v768_v55 = vrot.slane %v767_v8, 1  ;;  %v620_v12 = vadd.f32 %v619_v7, %v618_v28 }
 0x173   : > { %v769_v23 = vadd.f32 %v768_v55, %v767_v8 }
 0x175   : > { %v771_v11 = vsel %vm770_vm1, %v620_v12, %v769_v23 }
 0x176   : > { %773 = vst.msk [vmem:[%s205_s15] sm:$0x3] %vm772_vm2, %v771_v11 }
 0x177 PF: > { %p14_p8 = scmp.ge.s32.totalorder %s1100_s17, 5   ;;  %s1664_s12 = smov %s1046_s13 }
 0x178   : > { %s1665_s13 = smov %s1050_s14  ;;  %s1666_s14 = smov %s1110_s20 }
 0x179   : > { %s1667_s15 = smov %s1100_s17  ;;  %16 = sbr.rel (!%p14_p8) target bundleno = 3 (0x3), region = 80 }
 0x17e   :  { %810 = vsyncpa [#allocation3], 1 }
 0x17f   :  { %812 = vsyncpa [#allocation3 + $0x1], 1 }

// kernel: bottleneck_forward.6
= control target key start
LH: loop header
LB: loop body
LE: loop exit
PB: predicated region body
PF: predicated region fallthrough
CT: control target
= control target key end

     0   :  { %s1072_s18 = smov 0   ;;  %s1538_s0 = inlined_call_operand.vmem [shape: f32[1152,32], index: 0, kind: input, shape index: {}]   ;;  %s1539_s1 = inlined_call_operand.vmem [shape: f32[1,32], index: 1, kind: input, shape index: {}]   ;;  %s1540_s2 = inlined_call_operand.vmem [shape: f32[1,32], index: 2, kind: input, shape index: {}]   ;;  %s1541_s3 = inlined_call_operand.vmem [shape: bf16[32,128], index: 3, kind: input, shape index: {}]   ;;  %s1542_s4 = inlined_call_operand.vmem [shape: f32[1152,128], index: 4, kind: output, shape index: {0}]   ;;  %s1543_s5 = inlined_call_operand.vmem [shape: f32[3,2,128], index: 5, kind: output, shape index: {1}]  }
   0x1 LB: > { %s1078_s19 = sadd.s32 4294967295, %s1040_s18   ;;  %p978_p0 = scmp.ge.s32.totalorder %s1040_s18, 1  ;;  %s1040_s18 = sphi %s1072_s18, %s16_s18  }
   0x2   : > { %p191_p1 = scmp.lt.s32.totalorder %s1040_s18, 4 }
   0x4   : > { %p192_p2 = pnand %p978_p0, %p191_p1 }
   0x5   : > { %s223_s22 = smul.u32 (!%p192_p2), 48, %s1078_s19  ;;  %p235_p4 = scmp.lt.s32.totalorder (!%p192_p2), %s1078_s19, 2 }
   0x6   : > { %195 = sbr.rel (%p192_p2) target bundleno = 327 (0x147), region = 36 }
   0x7   : > { %p224_p3 = scmp.lt.s32.totalorder (!%p192_p2), %s223_s22, 143 }
   0xb   : > { %v1017_v0 = vld [vmem:[%s1541_s3 + $0x8] sm:$0xff]  ;;  %v1016_v1 = vld [vmem:[%s1541_s3] sm:$0xff]  ;;  %s1545_s22 = smov (!%p224_p3, %s223_s22), 143  ;;  %vm480_vm0 = vcmask 261120   ;;  %s1547_s19 = smov (!%p235_p4, %s1078_s19), 2  ;;  %vm884_vm1 = vcmask 1040384  }
   0xc   : > { %559 = vmatpush.bf16.msra.mxu0 %v1017_v0  ;;  %1018 = vmatpush.bf16.msra.mxu1 %v1017_v0  ;;  %v1094_v2 = vld [vmem:[%s1539_s1] ss:$0 sm:$0xff]  ;;  %s979_s27 = sshll.u32 %s1545_s22, 3  ;;  %s981_s11 = sshll.u32 %s1547_s19, 1 }
   0xd   : > { %1019 = vmatpush.bf16.msra.mxu2 %v1017_v0  ;;  %1020 = vmatpush.bf16.msra.mxu3 %v1017_v0  ;;  %s1102_s30 = scalar_lea.vmem %s1538_s0, %s979_s27  ;;  %v1107_v3 = vld [vmem:[%s1540_s2] ss:$0 sm:$0xff]  ;;  %s1282_s10 = scalar_lea.vmem %s1542_s4, %s979_s27 }
   0xe   : > { %v240_v4 = vld [vmem:[%s1102_s30] sm:$0xff]  ;;  %v241_v5 = vld [vmem:[%s1102_s30 + $0x8] sm:$0xff]  ;;  %v242_v19 = vld [vmem:[%s1102_s30 + $0x10] sm:$0xff]  ;;  %s238_s14 = scalar_lea.vmem %s1543_s5, %s981_s11 }
   0xf   : > { %v292_v6 = vmul.f32 %v1094_v2, %v240_v4  ;;  %v293_v7 = vmul.f32 %v1094_v2, %v241_v5  ;;  %v252_v8 = vld [vmem:[%s1102_s30 + $0x60] sm:$0xff]  ;;  %v253_v9 = vld [vmem:[%s1102_s30 + $0x68] sm:$0xff]  ;;  %v243_v20 = vld [vmem:[%s1102_s30 + $0x18] sm:$0xff]  ;;  %v294_v29 = vmul.f32 %v1094_v2, %v242_v19 }
  0x10   : > { %560 = vmatpush.bf16.msra.mxu0 %v1016_v1  ;;  %1021 = vmatpush.bf16.msra.mxu1 %v1016_v1  ;;  %v304_v10 = vmul.f32 %v1094_v2, %v252_v8  ;;  %v305_v11 = vmul.f32 %v1094_v2, %v253_v9  ;;  %v264_v18 = vld [vmem:[%s1102_s30 + $0xc0] sm:$0xff]  ;;  %v265_v23 = vld [vmem:[%s1102_s30 + $0xc8] sm:$0xff]  ;;  %v254_v25 = vld [vmem:[%s1102_s30 + $0x70] sm:$0xff]  ;;  %v295_v30 = vmul.f32 %v1094_v2, %v243_v20 }
  0x11   : > { %1022 = vmatpush.bf16.msra.mxu2 %v1016_v1  ;;  %1023 = vmatpush.bf16.msra.mxu3 %v1016_v1  ;;  %v344_v12 = vadd.f32 %v1107_v3, %v292_v6  ;;  %v345_v13 = vadd.f32 %v1107_v3, %v293_v7  ;;  %v255_v26 = vld [vmem:[%s1102_s30 + $0x78] sm:$0xff]  ;;  %v316_v28 = vmul.f32 %v1094_v2, %v264_v18  ;;  %v266_v47 = vld [vmem:[%s1102_s30 + $0xd0] sm:$0xff]  ;;  %v244_v54 = vld [vmem:[%s1102_s30 + $0x20] sm:$0xff] }
  0x12   : > { %v356_v14 = vadd.f32 %v1107_v3, %v304_v10  ;;  %v357_v15 = vadd.f32 %v1107_v3, %v305_v11  ;;  %v317_v31 = vmul.f32 %v1094_v2, %v265_v23  ;;  %v306_v32 = vmul.f32 %v1094_v2, %v254_v25  ;;  %v267_v48 = vld [vmem:[%s1102_s30 + $0xd8] sm:$0xff]  ;;  %v245_v55 = vld [vmem:[%s1102_s30 + $0x28] sm:$0xff]  ;;  %v256_v57 = vld [vmem:[%s1102_s30 + $0x80] sm:$0xff] }
  0x13   : > { %v392_v16 = vmax.f32 %v344_v12, 0.0  ;;  %v393_v17 = vmax.f32 %v345_v13, 0.0  ;;  %v307_v33 = vmul.f32 %v1094_v2, %v255_v26  ;;  %v368_v34 = vadd.f32 %v1107_v3, %v316_v28  ;;  %v257_v58 = vld [vmem:[%s1102_s30 + $0x88] sm:$0xff]  ;;  %v276_v63 = vld [vmem:[%s1102_s30 + $0x120] sm:$0xff]  ;;  %v246_v28 = vld [vmem:[%s1102_s30 + $0x30] sm:$0xff] }
  0x14   : > { %v404_v21 = vmax.f32 %v356_v14, 0.0  ;;  %v405_v22 = vmax.f32 %v357_v15, 0.0  ;;  %v369_v35 = vadd.f32 %v1107_v3, %v317_v31  ;;  %v346_v37 = vadd.f32 %v1107_v3, %v294_v29  ;;  %v277_v0 = vld [vmem:[%s1102_s30 + $0x128] sm:$0xff]  ;;  %v247_v29 = vld [vmem:[%s1102_s30 + $0x38] sm:$0xff]  ;;  %v258_v31 = vld [vmem:[%s1102_s30 + $0x90] sm:$0xff] }
  0x15   : > { %v440_v24 = vpack.c.bf16 %v393_v17, %v392_v16  ;;  %v416_v36 = vmax.f32 %v368_v34, 0.0  ;;  %v347_v38 = vadd.f32 %v1107_v3, %v295_v30  ;;  %v358_v40 = vadd.f32 %v1107_v3, %v306_v32  ;;  %v259_v32 = vld [vmem:[%s1102_s30 + $0x98] sm:$0xff] }
  0x16   : > { %v446_v27 = vpack.c.bf16 %v405_v22, %v404_v21  ;;  %v417_v39 = vmax.f32 %v369_v35, 0.0  ;;  %v359_v41 = vadd.f32 %v1107_v3, %v307_v33  ;;  %v394_v43 = vmax.f32 %v346_v37, 0.0  ;;  %v268_v21 = vld [vmem:[%s1102_s30 + $0xe0] sm:$0xff]  ;;  %v269_v22 = vld [vmem:[%s1102_s30 + $0xe8] sm:$0xff]  ;;  %v278_v37 = vld [vmem:[%s1102_s30 + $0x130] sm:$0xff] }
  0x17   : > { %990 = vmatmul.msk.bf16.vlgmr.msra.gmra.mxu0 %vm480_vm0, %v440_v24  ;;  %v395_v44 = vmax.f32 %v347_v38, 0.0  ;;  %v406_v45 = vmax.f32 %v358_v40, 0.0  ;;  %v318_v49 = vmul.f32 %v1094_v2, %v266_v47  ;;  %v319_v50 = vmul.f32 %v1094_v2, %v267_v48  ;;  %v279_v38 = vld [vmem:[%s1102_s30 + $0x138] sm:$0xff] }
  0x18   : > { %996 = vmatmul.msk.bf16.vlgmr.msra.gmra.mxu1 %vm480_vm0, %v446_v27  ;;  %v452_v42 = vpack.c.bf16 %v417_v39, %v416_v36  ;;  %v407_v46 = vmax.f32 %v359_v41, 0.0  ;;  %v296_v59 = vmul.f32 %v1094_v2, %v244_v54  ;;  %v297_v60 = vmul.f32 %v1094_v2, %v245_v55 }
  0x19   : > { %v441_v51 = vpack.c.bf16 %v395_v44, %v394_v43  ;;  %v370_v52 = vadd.f32 %v1107_v3, %v318_v49  ;;  %v371_v53 = vadd.f32 %v1107_v3, %v319_v50  ;;  %v308_v1 = vmul.f32 %v1094_v2, %v256_v57  ;;  %v270_v57 = vld [vmem:[%s1102_s30 + $0xf0] sm:$0xff] }
  0x1a   : > { %1002 = vmatmul.msk.bf16.vlgmr.msra.gmra.mxu2 %vm480_vm0, %v452_v42  ;;  %v447_v56 = vpack.c.bf16 %v407_v46, %v406_v45  ;;  %v309_v4 = vmul.f32 %v1094_v2, %v257_v58  ;;  %v328_v5 = vmul.f32 %v1094_v2, %v276_v63  ;;  %v329_v6 = vmul.f32 %v1094_v2, %v277_v0  ;;  %v271_v58 = vld [vmem:[%s1102_s30 + $0xf8] sm:$0xff]  ;;  %v248_v0 = vld [vmem:[%s1102_s30 + $0x40] sm:$0xff] }
  0x1b   : > { %v418_v61 = vmax.f32 %v370_v52, 0.0  ;;  %v419_v62 = vmax.f32 %v371_v53, 0.0  ;;  %v348_v9 = vadd.f32 %v1107_v3, %v296_v59  ;;  %v349_v10 = vadd.f32 %v1107_v3, %v297_v60 }
  0x1c   : > { %v380_v7 = vadd.f32 %v1107_v3, %v328_v5  ;;  %v381_v8 = vadd.f32 %v1107_v3, %v329_v6  ;;  %v360_v12 = vadd.f32 %v1107_v3, %v308_v1  ;;  %v361_v13 = vadd.f32 %v1107_v3, %v309_v4  ;;  %v249_v1 = vld [vmem:[%s1102_s30 + $0x48] sm:$0xff]  ;;  %v260_v5 = vld [vmem:[%s1102_s30 + $0xa0] sm:$0xff] }
  0x1d   : > { %v453_v11 = vpack.c.bf16 %v419_v62, %v418_v61  ;;  %v396_v17 = vmax.f32 %v348_v9, 0.0  ;;  %v397_v18 = vmax.f32 %v349_v10, 0.0  ;;  %v320_v23 = vmul.f32 %v1094_v2, %v268_v21  ;;  %v261_v6 = vld [vmem:[%s1102_s30 + $0xa8] sm:$0xff] }
  0x1e   : > { %v428_v14 = vmax.f32 %v380_v7, 0.0  ;;  %v429_v15 = vmax.f32 %v381_v8, 0.0  ;;  %v408_v19 = vmax.f32 %v360_v12, 0.0  ;;  %v409_v20 = vmax.f32 %v361_v13, 0.0  ;;  %v281_v12 = vld [vmem:[%s1102_s30 + $0x148] sm:$0xff] }
  0x1f   : > { %v321_v24 = vmul.f32 %v1094_v2, %v269_v22  ;;  %v442_v25 = vpack.c.bf16 %v397_v18, %v396_v17  ;;  %v372_v26 = vadd.f32 %v1107_v3, %v320_v23  ;;  %v298_v33 = vmul.f32 %v1094_v2, %v246_v28  ;;  %v282_v28 = vld [vmem:[%s1102_s30 + $0x150] sm:$0xff] }
  0x20   : > { %v458_v16 = vpack.c.bf16 %v429_v15, %v428_v14  ;;  %v448_v30 = vpack.c.bf16 %v409_v20, %v408_v19  ;;  %v299_v34 = vmul.f32 %v1094_v2, %v247_v29  ;;  %v310_v39 = vmul.f32 %v1094_v2, %v258_v31  ;;  %v283_v29 = vld [vmem:[%s1102_s30 + $0x158] sm:$0xff] }
  0x21   : > { %v373_v27 = vadd.f32 %v1107_v3, %v321_v24  ;;  %v420_v35 = vmax.f32 %v372_v26, 0.0  ;;  %v311_v40 = vmul.f32 %v1094_v2, %v259_v32  ;;  %v330_v41 = vmul.f32 %v1094_v2, %v278_v37  ;;  %v272_v26 = vld [vmem:[%s1102_s30 + $0x100] sm:$0xff] }
  0x22   : > { %1008 = vmatmul.msk.bf16.vlgmr.msra.gmra.mxu3 %vm480_vm0, %v458_v16  ;;  %v331_v42 = vmul.f32 %v1094_v2, %v279_v38  ;;  %v350_v45 = vadd.f32 %v1107_v3, %v298_v33  ;;  %v351_v46 = vadd.f32 %v1107_v3, %v299_v34  ;;  %v362_v48 = vadd.f32 %v1107_v3, %v310_v39 }
  0x23   : > { %v421_v36 = vmax.f32 %v373_v27, 0.0  ;;  %v382_v43 = vadd.f32 %v1107_v3, %v330_v41  ;;  %v363_v49 = vadd.f32 %v1107_v3, %v311_v40  ;;  %v322_v59 = vmul.f32 %v1094_v2, %v270_v57  ;;  %v273_v27 = vld [vmem:[%s1102_s30 + $0x108] sm:$0xff] }
  0x24   : > { %v383_v44 = vadd.f32 %v1107_v3, %v331_v42  ;;  %v398_v53 = vmax.f32 %v350_v45, 0.0  ;;  %v399_v54 = vmax.f32 %v351_v46, 0.0  ;;  %v410_v55 = vmax.f32 %v362_v48, 0.0  ;;  %v250_v42 = vld [vmem:[%s1102_s30 + $0x50] sm:$0xff]  ;;  %v263_v48 = vld [vmem:[%s1102_s30 + $0xb8] sm:$0xff] }
  0x25   : > { %v454_v47 = vpack.c.bf16 %v421_v36, %v420_v35  ;;  %v430_v50 = vmax.f32 %v382_v43, 0.0  ;;  %v323_v60 = vmul.f32 %v1094_v2, %v271_v58  ;;  %v374_v62 = vadd.f32 %v1107_v3, %v322_v59  ;;  %v251_v43 = vld [vmem:[%s1102_s30 + $0x58] sm:$0xff] }
  0x26   : > { %v443_v61 = vpack.c.bf16 %v399_v54, %v398_v53  ;;  %v300_v7 = vmul.f32 %v1094_v2, %v248_v0  ;;  %v301_v8 = vmul.f32 %v1094_v2, %v249_v1  ;;  %v312_v13 = vmul.f32 %v1094_v2, %v260_v5  ;;  %v275_v0 = vld [vmem:[%s1102_s30 + $0x118] sm:$0xff]  ;;  %v284_v1 = vld [vmem:[%s1102_s30 + $0x160] sm:$0xff] }
  0x27   : > { %991 = vmatmul.msk.bf16.gmra.mxu0 %vm480_vm0, %v441_v51  ;;  %v431_v51 = vmax.f32 %v383_v44, 0.0  ;;  %v375_v63 = vadd.f32 %v1107_v3, %v323_v60  ;;  %v422_v9 = vmax.f32 %v374_v62, 0.0  ;;  %v313_v14 = vmul.f32 %v1094_v2, %v261_v6 }
  0x28   : > { %997 = vmatmul.msk.bf16.gmra.mxu1 %vm480_vm0, %v447_v56  ;;  %v411_v56 = vmax.f32 %v363_v49, 0.0  ;;  %v333_v16 = vmul.f32 %v1094_v2, %v281_v12  ;;  %v352_v19 = vadd.f32 %v1107_v3, %v300_v7  ;;  %v353_v20 = vadd.f32 %v1107_v3, %v301_v8 }
  0x29   : > { %v459_v52 = vpack.c.bf16 %v431_v51, %v430_v50  ;;  %v423_v10 = vmax.f32 %v375_v63, 0.0  ;;  %v364_v22 = vadd.f32 %v1107_v3, %v312_v13  ;;  %v365_v23 = vadd.f32 %v1107_v3, %v313_v14  ;;  %v274_v63 = vld [vmem:[%s1102_s30 + $0x110] sm:$0xff] }
  0x2a   : > { %1003 = vmatmul.msk.bf16.gmra.mxu2 %vm480_vm0, %v453_v11  ;;  %v449_v4 = vpack.c.bf16 %v411_v56, %v410_v55  ;;  %v280_v11 = vld [vmem:[%s1102_s30 + $0x140] sm:$0xff]  ;;  %v385_v18 = vadd.f32 %v1107_v3, %v333_v16  ;;  %v400_v31 = vmax.f32 %v352_v19, 0.0  ;;  %v401_v32 = vmax.f32 %v353_v20, 0.0 }
  0x2b   : > { %v332_v15 = vmul.f32 %v1094_v2, %v280_v11  ;;  %v455_v21 = vpack.c.bf16 %v423_v10, %v422_v9  ;;  %v324_v33 = vmul.f32 %v1094_v2, %v272_v26  ;;  %v325_v34 = vmul.f32 %v1094_v2, %v273_v27  ;;  %v287_v26 = vld [vmem:[%s1102_s30 + $0x178] sm:$0xff] }
  0x2c   : > { %v412_v35 = vmax.f32 %v364_v22, 0.0  ;;  %v413_v36 = vmax.f32 %v365_v23, 0.0  ;;  %v334_v37 = vmul.f32 %v1094_v2, %v282_v28  ;;  %v335_v38 = vmul.f32 %v1094_v2, %v283_v29 }
  0x2d   : > { %v384_v17 = vadd.f32 %v1107_v3, %v332_v15  ;;  %v444_v39 = vpack.c.bf16 %v401_v32, %v400_v31  ;;  %v376_v40 = vadd.f32 %v1107_v3, %v324_v33  ;;  %v377_v41 = vadd.f32 %v1107_v3, %v325_v34 }
  0x2e   : > { %v450_v44 = vpack.c.bf16 %v413_v36, %v412_v35  ;;  %v386_v45 = vadd.f32 %v1107_v3, %v334_v37  ;;  %v387_v46 = vadd.f32 %v1107_v3, %v335_v38  ;;  %v302_v49 = vmul.f32 %v1094_v2, %v250_v42 }
  0x2f   : > { %v432_v24 = vmax.f32 %v384_v17, 0.0  ;;  %v303_v50 = vmul.f32 %v1094_v2, %v251_v43  ;;  %v424_v51 = vmax.f32 %v376_v40, 0.0  ;;  %v315_v54 = vmul.f32 %v1094_v2, %v263_v48 }
  0x30   : > { %v434_v55 = vmax.f32 %v386_v45, 0.0  ;;  %v435_v56 = vmax.f32 %v387_v46, 0.0  ;;  %v354_v57 = vadd.f32 %v1107_v3, %v302_v49  ;;  %v326_v7 = vmul.f32 %v1094_v2, %v274_v63 }
  0x31   : > { %v355_v58 = vadd.f32 %v1107_v3, %v303_v50  ;;  %v327_v8 = vmul.f32 %v1094_v2, %v275_v0  ;;  %v336_v11 = vmul.f32 %v1094_v2, %v284_v1  ;;  %v339_v28 = vmul.f32 %v1094_v2, %v287_v26 }
  0x32   : > { %1009 = vmatmul.msk.bf16.gmra.mxu3 %vm480_vm0, %v459_v52  ;;  %v425_v52 = vmax.f32 %v377_v41, 0.0  ;;  %v461_v62 = vpack.c.bf16 %v435_v56, %v434_v55  ;;  %v402_v5 = vmax.f32 %v354_v57, 0.0  ;;  %v378_v14 = vadd.f32 %v1107_v3, %v326_v7 }
  0x33   : > { %v403_v6 = vmax.f32 %v355_v58, 0.0  ;;  %v379_v15 = vadd.f32 %v1107_v3, %v327_v8  ;;  %v388_v17 = vadd.f32 %v1107_v3, %v336_v11 }
  0x34   : > { %v456_v59 = vpack.c.bf16 %v425_v52, %v424_v51  ;;  %v426_v19 = vmax.f32 %v378_v14, 0.0 }
  0x35   : > { %v445_v13 = vpack.c.bf16 %v403_v6, %v402_v5  ;;  %v427_v20 = vmax.f32 %v379_v15, 0.0 }
  0x37   : > { %992 = vmatmul.msk.bf16.gmra.mxu0 %vm480_vm0, %v442_v25  ;;  %v433_v25 = vmax.f32 %v385_v18, 0.0  ;;  %v457_v23 = vpack.c.bf16 %v427_v20, %v426_v19 }
  0x38   : > { %998 = vmatmul.msk.bf16.gmra.mxu1 %vm480_vm0, %v448_v30 }
  0x39   : > { %v460_v30 = vpack.c.bf16 %v433_v25, %v432_v24  ;;  %v286_v25 = vld [vmem:[%s1102_s30 + $0x170] sm:$0xff] }
  0x3a   : > { %1004 = vmatmul.msk.bf16.gmra.mxu2 %vm480_vm0, %v454_v47  ;;  %v262_v47 = vld [vmem:[%s1102_s30 + $0xb0] sm:$0xff]  ;;  %v338_v27 = vmul.f32 %v1094_v2, %v286_v25 }
  0x3b   : > { %v314_v53 = vmul.f32 %v1094_v2, %v262_v47 }
  0x3c   : > { %v390_v29 = vadd.f32 %v1107_v3, %v338_v27 }
  0x3d   : > { %v366_v60 = vadd.f32 %v1107_v3, %v314_v53 }
  0x3e   : > { %v438_v31 = vmax.f32 %v390_v29, 0.0 }
  0x3f   : > { %v414_v9 = vmax.f32 %v366_v60, 0.0 }
  0x42   : > { %1010 = vmatmul.msk.bf16.gmra.mxu3 %vm480_vm0, %v460_v30  ;;  %v391_v30 = vadd.f32 %v1107_v3, %v339_v28 }
  0x44   : > { %v439_v32 = vmax.f32 %v391_v30, 0.0 }
  0x46   : > { %v463_v33 = vpack.c.bf16 %v439_v32, %v438_v31 }
  0x47   : > { %993 = vmatmul.msk.bf16.gmra.mxu0 %vm480_vm0, %v443_v61  ;;  %v367_v61 = vadd.f32 %v1107_v3, %v315_v54 }
  0x48   : > { %999 = vmatmul.msk.bf16.gmra.mxu1 %vm480_vm0, %v449_v4  ;;  %v285_v4 = vld [vmem:[%s1102_s30 + $0x168] sm:$0xff] }
  0x49   : > { %v415_v10 = vmax.f32 %v367_v61, 0.0  ;;  %v337_v12 = vmul.f32 %v1094_v2, %v285_v4 }
  0x4a   : > { %1005 = vmatmul.msk.bf16.gmra.mxu2 %vm480_vm0, %v455_v21  ;;  %v436_v21 = vmax.f32 %v388_v17, 0.0 }
  0x4b   : > { %v451_v16 = vpack.c.bf16 %v415_v10, %v414_v9  ;;  %v389_v18 = vadd.f32 %v1107_v3, %v337_v12 }
  0x4d   : > { %v437_v22 = vmax.f32 %v389_v18, 0.0 }
  0x4f   : > { %v462_v24 = vpack.c.bf16 %v437_v22, %v436_v21 }
  0x52   : > { %1011 = vmatmul.msk.bf16.gmra.mxu3 %vm480_vm0, %v461_v62 }
  0x57   : > { %994 = vmatmul.msk.bf16.gmra.mxu0 %vm480_vm0, %v444_v39 }
  0x58   : > { %1000 = vmatmul.msk.bf16.gmra.mxu1 %vm480_vm0, %v450_v44 }
  0x5a   : > { %1006 = vmatmul.msk.bf16.gmra.mxu2 %vm480_vm0, %v456_v59 }
  0x62   : > { %1012 = vmatmul.msk.bf16.gmra.mxu3 %vm480_vm0, %v462_v24 }
  0x67   : > { %995 = vmatmul.msk.bf16.gmra.mxu0 %vm480_vm0, %v445_v13 }
  0x68   : > { %1001 = vmatmul.msk.bf16.gmra.mxu1 %vm480_vm0, %v451_v16 }
  0x6a   : > { %1007 = vmatmul.msk.bf16.gmra.mxu2 %vm480_vm0, %v457_v23 }
  0x72   : > { %1013 = vmatmul.msk.bf16.gmra.mxu3 %vm480_vm0, %v463_v33 }
  0x94   : > { %v562_v2 = vpop.f32.mrf.mxu0 }
  0x95   : > { %682 = vst [vmem:[%s1282_s10] sm:$0xff] %v562_v2  ;;  %v1285_v3 = vpop.f32.mrf.mxu1  ;;  %v783_v63 = vmul.f32 %v562_v2, %v562_v2 }
  0x96   : > { %694 = vst [vmem:[%s1282_s10 + $0x60] sm:$0xff] %v1285_v3 }
  0x9c   : > { %v564_v34 = vpop.f32.mrf.mxu0 }
  0x9d   : > { %683 = vst [vmem:[%s1282_s10 + $0x8] sm:$0xff] %v564_v34  ;;  %v1290_v35 = vpop.f32.mrf.mxu1  ;;  %v1294_v36 = vpop.f32.mrf.mxu2  ;;  %v784_v62 = vmul.f32 %v564_v34, %v564_v34  ;;  %v730_v0 = vadd.f32 %v564_v34, %v562_v2 }
  0x9e   : > { %695 = vst [vmem:[%s1282_s10 + $0x68] sm:$0xff] %v1290_v35 }
  0x9f   : > { %706 = vst [vmem:[%s1282_s10 + $0xc0] sm:$0xff] %v1294_v36  ;;  %v831_v5 = vadd.f32 %v784_v62, %v783_v63 }
  0xa4   : > { %v567_v37 = vpop.f32.mrf.mxu0 }
  0xa5   : > { %684 = vst [vmem:[%s1282_s10 + $0x10] sm:$0xff] %v567_v37  ;;  %v1299_v38 = vpop.f32.mrf.mxu1  ;;  %v1303_v39 = vpop.f32.mrf.mxu2  ;;  %v785_v1 = vmul.f32 %v567_v37, %v567_v37  ;;  %v731_v6 = vadd.f32 %v730_v0, %v567_v37  ;;  %v795_v0 = vmul.f32 %v1285_v3, %v1285_v3 }
  0xa6   : > { %696 = vst [vmem:[%s1282_s10 + $0x70] sm:$0xff] %v1299_v38  ;;  %v1316_v44 = vpop.f32.mrf.mxu3 }
  0xa7   : > { %707 = vst [vmem:[%s1282_s10 + $0xc8] sm:$0xff] %v1303_v39  ;;  %v832_v10 = vadd.f32 %v831_v5, %v785_v1 }
  0xa8   : > { %718 = vst [vmem:[%s1282_s10 + $0x120] sm:$0xff] %v1316_v44 }
  0xac   : > { %v569_v40 = vpop.f32.mrf.mxu0 }
  0xad   : > { %685 = vst [vmem:[%s1282_s10 + $0x18] sm:$0xff] %v569_v40  ;;  %v1308_v41 = vpop.f32.mrf.mxu1  ;;  %v1312_v42 = vpop.f32.mrf.mxu2  ;;  %v786_v7 = vmul.f32 %v569_v40, %v569_v40  ;;  %v732_v11 = vadd.f32 %v731_v6, %v569_v40  ;;  %v796_v6 = vmul.f32 %v1290_v35, %v1290_v35 }
  0xae   : > { %697 = vst [vmem:[%s1282_s10 + $0x78] sm:$0xff] %v1308_v41  ;;  %v1329_v48 = vpop.f32.mrf.mxu3 }
  0xaf   : > { %708 = vst [vmem:[%s1282_s10 + $0xd0] sm:$0xff] %v1312_v42  ;;  %v833_v14 = vadd.f32 %v832_v10, %v786_v7 }
  0xb0   : > { %719 = vst [vmem:[%s1282_s10 + $0x128] sm:$0xff] %v1329_v48 }
  0xb4   : > { %v572_v43 = vpop.f32.mrf.mxu0 }
  0xb5   : > { %686 = vst [vmem:[%s1282_s10 + $0x20] sm:$0xff] %v572_v43  ;;  %v1319_v45 = vpop.f32.mrf.mxu1  ;;  %v1325_v46 = vpop.f32.mrf.mxu2  ;;  %v787_v12 = vmul.f32 %v572_v43, %v572_v43  ;;  %v733_v15 = vadd.f32 %v732_v11, %v572_v43  ;;  %v797_v11 = vmul.f32 %v1299_v38, %v1299_v38 }
  0xb6   : > { %698 = vst [vmem:[%s1282_s10 + $0x80] sm:$0xff] %v1319_v45  ;;  %v1342_v52 = vpop.f32.mrf.mxu3 }
  0xb7   : > { %709 = vst [vmem:[%s1282_s10 + $0xd8] sm:$0xff] %v1325_v46  ;;  %v834_v17 = vadd.f32 %v833_v14, %v787_v12 }
  0xb8   : > { %720 = vst [vmem:[%s1282_s10 + $0x130] sm:$0xff] %v1342_v52 }
  0xbc   : > { %v574_v47 = vpop.f32.mrf.mxu0 }
  0xbd   : > { %687 = vst [vmem:[%s1282_s10 + $0x28] sm:$0xff] %v574_v47  ;;  %v1332_v49 = vpop.f32.mrf.mxu1  ;;  %v1338_v50 = vpop.f32.mrf.mxu2  ;;  %v788_v16 = vmul.f32 %v574_v47, %v574_v47  ;;  %v734_v18 = vadd.f32 %v733_v15, %v574_v47  ;;  %v798_v15 = vmul.f32 %v1308_v41, %v1308_v41 }
  0xbe   : > { %699 = vst [vmem:[%s1282_s10 + $0x88] sm:$0xff] %v1332_v49  ;;  %v1355_v56 = vpop.f32.mrf.mxu3 }
  0xbf   : > { %710 = vst [vmem:[%s1282_s10 + $0xe0] sm:$0xff] %v1338_v50  ;;  %v835_v21 = vadd.f32 %v834_v17, %v788_v16  ;;  %v799_v17 = vmul.f32 %v1319_v45, %v1319_v45 }
  0xc0   : > { %721 = vst [vmem:[%s1282_s10 + $0x138] sm:$0xff] %v1355_v56 }
  0xc4   : > { %v577_v51 = vpop.f32.mrf.mxu0 }
  0xc5   : > { %688 = vst [vmem:[%s1282_s10 + $0x30] sm:$0xff] %v577_v51  ;;  %v1345_v53 = vpop.f32.mrf.mxu1  ;;  %v1351_v54 = vpop.f32.mrf.mxu2  ;;  %v789_v19 = vmul.f32 %v577_v51, %v577_v51  ;;  %v735_v22 = vadd.f32 %v734_v18, %v577_v51 }
  0xc6   : > { %700 = vst [vmem:[%s1282_s10 + $0x90] sm:$0xff] %v1345_v53  ;;  %v1368_v60 = vpop.f32.mrf.mxu3 }
  0xc7   : > { %711 = vst [vmem:[%s1282_s10 + $0xe8] sm:$0xff] %v1351_v54  ;;  %v836_v26 = vadd.f32 %v835_v21, %v789_v19  ;;  %v800_v19 = vmul.f32 %v1332_v49, %v1332_v49 }
  0xc8   : > { %722 = vst [vmem:[%s1282_s10 + $0x140] sm:$0xff] %v1368_v60 }
  0xcc   : > { %v579_v55 = vpop.f32.mrf.mxu0 }
  0xcd   : > { %689 = vst [vmem:[%s1282_s10 + $0x38] sm:$0xff] %v579_v55  ;;  %v1358_v57 = vpop.f32.mrf.mxu1  ;;  %v1364_v58 = vpop.f32.mrf.mxu2  ;;  %v790_v23 = vmul.f32 %v579_v55, %v579_v55  ;;  %v736_v27 = vadd.f32 %v735_v22, %v579_v55 }
  0xce   : > { %701 = vst [vmem:[%s1282_s10 + $0x98] sm:$0xff] %v1358_v57  ;;  %v1381_v9 = vpop.f32.mrf.mxu3 }
  0xcf   : > { %712 = vst [vmem:[%s1282_s10 + $0xf0] sm:$0xff] %v1364_v58  ;;  %v837_v30 = vadd.f32 %v836_v26, %v790_v23 }
  0xd0   : > { %723 = vst [vmem:[%s1282_s10 + $0x148] sm:$0xff] %v1381_v9 }
  0xd4   : > { %v582_v59 = vpop.f32.mrf.mxu0 }
  0xd5   : > { %690 = vst [vmem:[%s1282_s10 + $0x40] sm:$0xff] %v582_v59  ;;  %v1371_v61 = vpop.f32.mrf.mxu1  ;;  %v1377_v4 = vpop.f32.mrf.mxu2  ;;  %v791_v28 = vmul.f32 %v582_v59, %v582_v59  ;;  %v737_v31 = vadd.f32 %v736_v27, %v582_v59 }
  0xd6   : > { %702 = vst [vmem:[%s1282_s10 + $0xa0] sm:$0xff] %v1371_v61  ;;  %v1394_v25 = vpop.f32.mrf.mxu3 }
  0xd7   : > { %713 = vst [vmem:[%s1282_s10 + $0xf8] sm:$0xff] %v1377_v4  ;;  %v838_v33 = vadd.f32 %v837_v30, %v791_v28 }
  0xd8   : > { %724 = vst [vmem:[%s1282_s10 + $0x150] sm:$0xff] %v1394_v25 }
  0xdc   : > { %v584_v8 = vpop.f32.mrf.mxu0 }
  0xdd   : > { %691 = vst [vmem:[%s1282_s10 + $0x48] sm:$0xff] %v584_v8  ;;  %v1384_v13 = vpop.f32.mrf.mxu1  ;;  %v1390_v20 = vpop.f32.mrf.mxu2  ;;  %v792_v32 = vmul.f32 %v584_v8, %v584_v8  ;;  %v738_v2 = vadd.f32 %v737_v31, %v584_v8 }
  0xde   : > { %703 = vst [vmem:[%s1282_s10 + $0xa8] sm:$0xff] %v1384_v13  ;;  %v1404_v51 = vpop.f32.mrf.mxu3 }
  0xdf   : > { %714 = vst [vmem:[%s1282_s10 + $0x100] sm:$0xff] %v1390_v20  ;;  %v839_v40 = vadd.f32 %v838_v33, %v792_v32  ;;  %v804_v33 = vmul.f32 %v1384_v13, %v1384_v13 }
  0xe0   : > { %725 = vst [vmem:[%s1282_s10 + $0x158] sm:$0xff] %v1404_v51 }
  0xe4   : > { %v587_v24 = vpop.f32.mrf.mxu0 }
  0xe5   : > { %692 = vst [vmem:[%s1282_s10 + $0x50] sm:$0xff] %v587_v24  ;;  %v617_v29 = vpop.f32.mrf.mxu1  ;;  %v793_v34 = vmul.f32 %v587_v24, %v587_v24  ;;  %v1400_v37 = vpop.f32.mrf.mxu2  ;;  %v739_v43 = vadd.f32 %v738_v2, %v587_v24 }
  0xe6   : > { %704 = vst [vmem:[%s1282_s10 + $0xb0] sm:$0xff] %v617_v29 }
  0xe7   : > { %715 = vst [vmem:[%s1282_s10 + $0x108] sm:$0xff] %v1400_v37  ;;  %v840_v55 = vadd.f32 %v839_v40, %v793_v34 }
  0xec   : > { %v589_v47 = vpop.f32.mrf.mxu0 }
  0xed   : > { %693 = vst [vmem:[%s1282_s10 + $0x58] sm:$0xff] %v589_v47  ;;  %v740_v59 = vadd.f32 %v739_v43, %v589_v47  ;;  %v794_v62 = vmul.f32 %v589_v47, %v589_v47  ;;  %v619_v63 = vpop.f32.mrf.mxu1  ;;  %v1416_v10 = vpop.f32.mrf.mxu2  ;;  %v805_v43 = vmul.f32 %v617_v29, %v617_v29 }
  0xee   : > { %705 = vst [vmem:[%s1282_s10 + $0xb8] sm:$0xff] %v619_v63 }
  0xef   : > { %v741_v1 = vadd.f32 %v740_v59, %v1285_v3  ;;  %v841_v5 = vadd.f32 %v840_v55, %v794_v62  ;;  %716 = vst [vmem:[%s1282_s10 + $0x110] sm:$0xff] %v1416_v10  ;;  %v1423_v3 = vpop.f32.mrf.mxu3  ;;  %v806_v59 = vmul.f32 %v619_v63, %v619_v63 }
  0xf0   : > { %726 = vst [vmem:[%s1282_s10 + $0x160] sm:$0xff] %v1423_v3 }
  0xf1   : > { %v742_v7 = vadd.f32 %v741_v1, %v1290_v35  ;;  %v842_v8 = vadd.f32 %v841_v5, %v795_v0  ;;  %v809_v5 = vmul.f32 %v1312_v42, %v1312_v42 }
  0xf3   : > { %v743_v12 = vadd.f32 %v742_v7, %v1299_v38  ;;  %v843_v14 = vadd.f32 %v842_v8, %v796_v6  ;;  %v810_v8 = vmul.f32 %v1325_v46, %v1325_v46 }
  0xf5   : > { %v744_v16 = vadd.f32 %v743_v12, %v1308_v41  ;;  %v844_v35 = vadd.f32 %v843_v14, %v797_v11  ;;  %v649_v23 = vpop.f32.mrf.mxu2  ;;  %v801_v41 = vmul.f32 %v1345_v53, %v1345_v53 }
  0xf6   : > { %717 = vst [vmem:[%s1282_s10 + $0x118] sm:$0xff] %v649_v23 }
  0xf7   : > { %v745_v38 = vadd.f32 %v744_v16, %v1319_v45  ;;  %v845_v18 = vadd.f32 %v844_v35, %v798_v15  ;;  %v1440_v27 = vpop.f32.mrf.mxu3  ;;  %v802_v45 = vmul.f32 %v1358_v57, %v1358_v57  ;;  %v813_v35 = vmul.f32 %v1364_v58, %v1364_v58 }
  0xf8   : > { %727 = vst [vmem:[%s1282_s10 + $0x168] sm:$0xff] %v1440_v27 }
  0xf9   : > { %v846_v21 = vadd.f32 %v845_v18, %v799_v17  ;;  %v746_v22 = vadd.f32 %v745_v38, %v1332_v49  ;;  %v803_v49 = vmul.f32 %v1371_v61, %v1371_v61  ;;  %v814_v38 = vmul.f32 %v1377_v4, %v1377_v4 }
  0xfb   : > { %v747_v24 = vadd.f32 %v746_v22, %v1345_v53  ;;  %v847_v26 = vadd.f32 %v846_v21, %v800_v19  ;;  %v815_v21 = vmul.f32 %v1390_v20, %v1390_v20 }
  0xfd   : > { %v748_v28 = vadd.f32 %v747_v24, %v1358_v57  ;;  %v848_v30 = vadd.f32 %v847_v26, %v801_v41  ;;  %v816_v24 = vmul.f32 %v1400_v37, %v1400_v37 }
  0xff   : > { %v749_v31 = vadd.f32 %v748_v28, %v1371_v61  ;;  %v849_v32 = vadd.f32 %v848_v30, %v802_v45  ;;  %v1453_v57 = vpop.f32.mrf.mxu3  ;;  %v807_v61 = vmul.f32 %v1294_v36, %v1294_v36  ;;  %v817_v45 = vmul.f32 %v1416_v10, %v1416_v10 }
 0x100   : > { %728 = vst [vmem:[%s1282_s10 + $0x170] sm:$0xff] %v1453_v57  ;;  %v818_v30 = vmul.f32 %v649_v23, %v649_v23 }
 0x101   : > { %v750_v53 = vadd.f32 %v749_v31, %v1384_v13  ;;  %v850_v2 = vadd.f32 %v849_v32, %v803_v49  ;;  %v808_v13 = vmul.f32 %v1303_v39, %v1303_v39  ;;  %v819_v49 = vmul.f32 %v1316_v44, %v1316_v44 }
 0x102   : > { %v820_v32 = vmul.f32 %v1329_v48, %v1329_v48 }
 0x103   : > { %v851_v34 = vadd.f32 %v850_v2, %v804_v33  ;;  %v751_v40 = vadd.f32 %v750_v53, %v617_v29  ;;  %v821_v33 = vmul.f32 %v1342_v52, %v1342_v52 }
 0x105   : > { %v852_v47 = vadd.f32 %v851_v34, %v805_v43  ;;  %v752_v55 = vadd.f32 %v751_v40, %v619_v63 }
 0x107   : > { %v753_v62 = vadd.f32 %v752_v55, %v1294_v36  ;;  %v853_v0 = vadd.f32 %v852_v47, %v806_v59  ;;  %v1466_v7 = vpop.f32.mrf.mxu3 }
 0x108   : > { %729 = vst [vmem:[%s1282_s10 + $0x178] sm:$0xff] %v1466_v7 }
 0x109   : > { %v754_v1 = vadd.f32 %v753_v62, %v1303_v39  ;;  %v854_v29 = vadd.f32 %v853_v0, %v807_v61  ;;  %v811_v39 = vmul.f32 %v1338_v50, %v1338_v50 }
 0x10b   : > { %v755_v6 = vadd.f32 %v754_v1, %v1312_v42  ;;  %v855_v63 = vadd.f32 %v854_v29, %v808_v13  ;;  %v812_v42 = vmul.f32 %v1351_v54, %v1351_v54  ;;  %v827_v1 = vmul.f32 %v1423_v3, %v1423_v3 }
 0x10d   : > { %v756_v36 = vadd.f32 %v755_v6, %v1325_v46  ;;  %v856_v11 = vadd.f32 %v855_v63, %v809_v5 }
 0x10f   : > { %v857_v12 = vadd.f32 %v856_v11, %v810_v8  ;;  %v757_v14 = vadd.f32 %v756_v36, %v1338_v50 }
 0x111   : > { %v758_v15 = vadd.f32 %v757_v14, %v1351_v54  ;;  %v858_v16 = vadd.f32 %v857_v12, %v811_v39 }
 0x113   : > { %v759_v46 = vadd.f32 %v758_v15, %v1364_v58  ;;  %v859_v17 = vadd.f32 %v858_v16, %v812_v42 }
 0x115   : > { %v760_v18 = vadd.f32 %v759_v46, %v1377_v4  ;;  %v860_v19 = vadd.f32 %v859_v17, %v813_v35 }
 0x117   : > { %v761_v50 = vadd.f32 %v760_v18, %v1390_v20  ;;  %v861_v22 = vadd.f32 %v860_v19, %v814_v38 }
 0x119   : > { %v862_v54 = vadd.f32 %v861_v22, %v815_v21  ;;  %v762_v41 = vadd.f32 %v761_v50, %v1400_v37 }
 0x11b   : > { %v863_v58 = vadd.f32 %v862_v54, %v816_v24  ;;  %v763_v26 = vadd.f32 %v762_v41, %v1416_v10 }
 0x11d   : > { %v864_v4 = vadd.f32 %v863_v58, %v817_v45  ;;  %v764_v28 = vadd.f32 %v763_v26, %v649_v23  ;;  %v822_v23 = vmul.f32 %v1355_v56, %v1355_v56 }
 0x11f   : > { %v765_v20 = vadd.f32 %v764_v28, %v1316_v44  ;;  %v865_v31 = vadd.f32 %v864_v4, %v818_v30  ;;  %v823_v44 = vmul.f32 %v1368_v60, %v1368_v60 }
 0x121   : > { %v766_v37 = vadd.f32 %v765_v20, %v1329_v48  ;;  %v866_v53 = vadd.f32 %v865_v31, %v819_v49  ;;  %v824_v48 = vmul.f32 %v1381_v9, %v1381_v9 }
 0x123   : > { %v767_v10 = vadd.f32 %v766_v37, %v1342_v52  ;;  %v867_v2 = vadd.f32 %v866_v53, %v820_v32  ;;  %v825_v52 = vmul.f32 %v1394_v25, %v1394_v25 }
 0x125   : > { %v768_v34 = vadd.f32 %v767_v10, %v1355_v56  ;;  %v868_v40 = vadd.f32 %v867_v2, %v821_v33  ;;  %v826_v56 = vmul.f32 %v1404_v51, %v1404_v51 }
 0x127   : > { %v869_v43 = vadd.f32 %v868_v40, %v822_v23  ;;  %v769_v47 = vadd.f32 %v768_v34, %v1368_v60 }
 0x129   : > { %v770_v55 = vadd.f32 %v769_v47, %v1381_v9  ;;  %v870_v59 = vadd.f32 %v869_v43, %v823_v44 }
 0x12b   : > { %v771_v61 = vadd.f32 %v770_v55, %v1394_v25  ;;  %v871_v62 = vadd.f32 %v870_v59, %v824_v48  ;;  %v828_v25 = vmul.f32 %v1440_v27, %v1440_v27 }
 0x12d   : > { %v772_v0 = vadd.f32 %v771_v61, %v1404_v51  ;;  %v872_v13 = vadd.f32 %v871_v62, %v825_v52  ;;  %v829_v51 = vmul.f32 %v1453_v57, %v1453_v57 }
 0x12f   : > { %v773_v60 = vadd.f32 %v772_v0, %v1423_v3  ;;  %v873_v9 = vadd.f32 %v872_v13, %v826_v56  ;;  %v830_v3 = vmul.f32 %v1466_v7, %v1466_v7 }
 0x131   : > { %v874_v29 = vadd.f32 %v873_v9, %v827_v1  ;;  %v774_v5 = vadd.f32 %v773_v60, %v1440_v27 }
 0x133   : > { %v875_v6 = vadd.f32 %v874_v29, %v828_v25  ;;  %v775_v63 = vadd.f32 %v774_v5, %v1453_v57 }
 0x135   : > { %v876_v8 = vadd.f32 %v875_v6, %v829_v51  ;;  %v776_v36 = vadd.f32 %v775_v63, %v1466_v7 }
 0x137   : > { %v777_v11 = vrot.slane %v776_v36, 4  ;;  %v877_v39 = vadd.f32 %v876_v8, %v830_v3 }
 0x139   : > { %v778_v12 = vadd.f32 %v777_v11, %v776_v36  ;;  %v878_v14 = vrot.slane %v877_v39, 4 }
 0x13b   : > { %v779_v42 = vrot.slane %v778_v12, 2  ;;  %v879_v15 = vadd.f32 %v878_v14, %v877_v39 }
 0x13d   : > { %v780_v27 = vadd.f32 %v779_v42, %v778_v12  ;;  %v880_v16 = vrot.slane %v879_v15, 2 }
 0x13f   : > { %v781_v35 = vrot.slane %v780_v27, 1  ;;  %v881_v46 = vadd.f32 %v880_v16, %v879_v15 }
 0x141   : > { %v882_v57 = vrot.slane %v881_v46, 1  ;;  %v782_v7 = vadd.f32 %v781_v35, %v780_v27 }
 0x143   : > { %v883_v17 = vadd.f32 %v882_v57, %v881_v46 }
 0x145   : > { %v885_v38 = vsel %vm884_vm1, %v782_v7, %v883_v17 }
 0x146   : > { %886 = vst [vmem:[%s238_s14] sm:$0x3] %v885_v38 }
 0x147 PF: > { %s16_s18 = sadd.s32 1, %s1040_s18  }
 0x148   : > { %p13_p5 = scmp.ge.s32.totalorder %s16_s18, 5  }
 0x14a   :  { %15 = sbr.rel (!%p13_p5) target bundleno = 1 (0x1), region = 78 }

// kernel: bottleneck_forward.7
= control target key start
LH: loop header
LB: loop body
LE: loop exit
PB: predicated region body
PF: predicated region fallthrough
CT: control target
= control target key end

     0   :  { %9 = vsyncpa [#allocation3], 0  ;;  %s1151_s0 = inlined_call_operand.vmem [shape: f32[1152,128], index: 0, kind: input, shape index: {}]   ;;  %s1152_s1 = inlined_call_operand.vmem [shape: f32[1,128], index: 1, kind: input, shape index: {}]   ;;  %s1153_s2 = inlined_call_operand.vmem [shape: f32[1,128], index: 2, kind: input, shape index: {}]   ;;  %s1154_s3 = inlined_call_operand.vmem [shape: f32[1152,128], index: 3, kind: input, shape index: {}]   ;;  %s1155_s4 = inlined_call_operand.hbm [shape: f32[1152,128], index: 4, kind: output, shape index: {}]  }
   0x1   :  { %11 = vsyncpa [#allocation3 + $0x1], 0  ;;  %s800_s15 = smov 0   ;;  %s802_s16 = smov 0  }
   0x2   :  { %s804_s17 = smov 0   ;;  %s806_s18 = smov 0  }
   0x3 LB: > { %s821_s19 = sadd.s32 4294967295, %s771_s18   ;;  %s655_s20 = sadd.s32 4294967294, %s771_s18   ;;  %s771_s18 = sphi %s806_s18, %s1161_s18   ;;  %s767_s17 = sphi %s804_s17, %s1160_s17   ;;  %s763_s16 = sphi %s802_s16, %s1159_s16   ;;  %s759_s15 = sphi %s800_s15, %s1158_s15  }
   0x4   : > { %s825_s21 = sadd.s32 1, %s771_s18   ;;  %s118_s22 = sadd.s32 1, %s767_s17 }
   0x5   : > { %s115_s23 = ssub.s32 %s771_s18, %s825_s21  ;;  %p128_p0 = scmp.ne.s32.totalorder %s767_s17, %s763_s16 }
   0x6   : > { %p116_p1 = scmp.eq.s32.totalorder %s115_s23, 0  ;;  %p129_p2 = scmp.eq.s32.totalorder %s821_s19, 2 }
   0x7   : > { %p134_p3 = scmp.ne.s32.totalorder %s763_s16, %s759_s15  ;;  %p135_p4 = scmp.eq.s32.totalorder %s655_s20, 2 }
   0x8   : > { %s836_s24 = scalar_select %p116_p1, %s767_s17, %s118_s22  }
   0x9   : > { %p838_p5 = por %p129_p2, %p128_p0  ;;  %p842_p6 = por %p135_p4, %p134_p3 }
   0xa   : > { %p658_p7 = scmp.ge.s32.totalorder %s771_s18, 1  ;;  %p177_p8 = scmp.lt.s32.totalorder %s771_s18, 4 }
   0xc   : > { %p178_p9 = pnand %p658_p7, %p177_p8 }
   0xd   : > { %s208_s27 = smul.u32 (!%p178_p9), 48, %s821_s19  ;;  %s205_s30 = sand.u32 (!%p178_p9), 1, %s763_s16  }
   0xe   : > { %181 = sbr.rel (%p178_p9) target bundleno = 82 (0x52), region = 36  ;;  %s729_s10 = scalar_lea.hbm (!%p178_p9), %s1155_s4, 1152 }
   0xf   : > { %p209_p10 = scmp.lt.s32.totalorder (!%p178_p9), %s208_s27, 143  ;;  %s878_s14 = smul.u32 (!%p178_p9), 384, %s205_s30 }
  0x10   : > { %s664_s22 = smul.u32 (!%p178_p9), 384, %s821_s19 }
  0x11   : > { %s912_s20 = scalar_lea.vmem (!%p178_p9), [#allocation2], %s878_s14 }
  0x12   : > { %s578_s28 = sshll.u32 (!%p178_p9), %s912_s20, 4  ;;  %s579_s28 = int_to_ptr.vmem [resolvable:$true] %s578_s28 }
  0x13   : > { %s1163_s27 = smov (!%p209_p10, %s208_s27), 143  ;;  %v852_v0 = vld [vmem:[%s1152_s1] ss:$0 sm:$0xff] }
  0x14   : > { %s659_s5 = sshll.u32 %s1163_s27, 3  ;;  %v868_v1 = vld [vmem:[%s1153_s2] ss:$0 sm:$0xff]  ;;  %s577_s27 = scalar_lea.hbm %s1155_s4, %s664_s22 }
  0x15   : > { %s858_s8 = scalar_lea.vmem %s1151_s0, %s659_s5  ;;  %s863_s11 = scalar_lea.vmem %s1154_s3, %s659_s5 }
  0x16   : > { %v221_v2 = vld [vmem:[%s858_s8] sm:$0xff]  ;;  %v222_v3 = vld [vmem:[%s858_s8 + $0x8] sm:$0xff]  ;;  %v223_v7 = vld [vmem:[%s858_s8 + $0x10] sm:$0xff]  ;;  %s580_s29 = sshll.u32 %s577_s27, 4  ;;  %s566_s5 = scalar_lea.sflag [#allocation3], %s205_s30  ;;  %s581_s29 = int_to_ptr.hbm [resolvable:$true] %s580_s29 }
  0x17   : > { %v273_v4 = vmul.f32 %v852_v0, %v221_v2  ;;  %v373_v5 = vld [vmem:[%s863_s11] sm:$0xff]  ;;  %v274_v6 = vmul.f32 %v852_v0, %v222_v3  ;;  %v374_v8 = vld [vmem:[%s863_s11 + $0x8] sm:$0xff]  ;;  %v275_v9 = vmul.f32 %v852_v0, %v223_v7  ;;  %v224_v10 = vld [vmem:[%s858_s8 + $0x18] sm:$0xff]  ;;  %s723_s6 = sshra.s32 %s581_s29, 4  ;;  %s724_s6 = int_to_ptr.hbm [resolvable:$true] %s723_s6 }
  0x18   : > { %v225_v11 = vld [vmem:[%s858_s8 + $0x20] sm:$0xff]  ;;  %v375_v14 = vld [vmem:[%s863_s11 + $0x10] sm:$0xff]  ;;  %v276_v15 = vmul.f32 %v852_v0, %v224_v10  ;;  %v376_v16 = vld [vmem:[%s863_s11 + $0x18] sm:$0xff]  ;;  %s725_s7 = scalar_lea.hbm %s724_s6, 384  ;;  %p730_p0 = scmp.lt.s32.totalorder %s724_s6, %s1155_s4 }
  0x19   : > { %v325_v12 = vadd.f32 %v868_v1, %v273_v4  ;;  %v326_v13 = vadd.f32 %v868_v1, %v274_v6  ;;  %v277_v17 = vmul.f32 %v852_v0, %v225_v11  ;;  %v226_v18 = vld [vmem:[%s858_s8 + $0x28] sm:$0xff]  ;;  %v327_v19 = vadd.f32 %v868_v1, %v275_v9  ;;  %v377_v20 = vld [vmem:[%s863_s11 + $0x20] sm:$0xff]  ;;  %v227_v22 = vld [vmem:[%s858_s8 + $0x30] sm:$0xff]  ;;  %p726_p11 = scmp.ne.s32.totalorder %s724_s6, %s725_s7  ;;  %p731_p1 = scmp.lt.s32.totalorder %s729_s10, %s725_s7 }
  0x1a   : > { %v278_v21 = vmul.f32 %v852_v0, %v226_v18  ;;  %v228_v23 = vld [vmem:[%s858_s8 + $0x38] sm:$0xff]  ;;  %v328_v26 = vadd.f32 %v868_v1, %v276_v15  ;;  %v378_v28 = vld [vmem:[%s863_s11 + $0x28] sm:$0xff]  ;;  %v279_v31 = vmul.f32 %v852_v0, %v227_v22  ;;  %v229_v33 = vld [vmem:[%s858_s8 + $0x40] sm:$0xff] }
  0x1b   : > { %v421_v24 = vadd.f32 %v373_v5, %v325_v12  ;;  %v422_v25 = vadd.f32 %v374_v8, %v326_v13  ;;  %v329_v27 = vadd.f32 %v868_v1, %v277_v17  ;;  %v423_v29 = vadd.f32 %v375_v14, %v327_v19  ;;  %v230_v34 = vld [vmem:[%s858_s8 + $0x48] sm:$0xff]  ;;  %v379_v39 = vld [vmem:[%s863_s11 + $0x30] sm:$0xff]  ;;  %v380_v40 = vld [vmem:[%s863_s11 + $0x38] sm:$0xff]  ;;  %p727_p12 = pnand %p726_p11, %p838_p5  ;;  %p732_p2 = por %p731_p1, %p730_p0 }
  0x1c   : > { %v330_v30 = vadd.f32 %v868_v1, %v278_v21  ;;  %v280_v32 = vmul.f32 %v852_v0, %v228_v23  ;;  %v424_v37 = vadd.f32 %v376_v16, %v328_v26  ;;  %v231_v41 = vld [vmem:[%s858_s8 + $0x50] sm:$0xff]  ;;  %v331_v44 = vadd.f32 %v868_v1, %v279_v31  ;;  %v232_v46 = vld [vmem:[%s858_s8 + $0x58] sm:$0xff]  ;;  %v233_v47 = vld [vmem:[%s858_s8 + $0x60] sm:$0xff] }
  0x1d   : > { %v469_v35 = vmax.f32 %v421_v24, 0.0  ;;  %v470_v36 = vmax.f32 %v422_v25, 0.0  ;;  %v425_v38 = vadd.f32 %v377_v20, %v329_v27  ;;  %v471_v42 = vmax.f32 %v423_v29, 0.0  ;;  %v234_v52 = vld [vmem:[%s858_s8 + $0x68] sm:$0xff]  ;;  %v381_v56 = vld [vmem:[%s863_s11 + $0x40] sm:$0xff]  ;;  %v383_v61 = vld [vmem:[%s863_s11 + $0x50] sm:$0xff]  ;;  %p728_p13 = pneg %p727_p12 }
  0x1e   : > { %v426_v43 = vadd.f32 %v378_v28, %v330_v30  ;;  %v332_v45 = vadd.f32 %v868_v1, %v280_v32  ;;  %v472_v48 = vmax.f32 %v424_v37, 0.0  ;;  %v281_v50 = vmul.f32 %v852_v0, %v229_v33  ;;  %v382_v57 = vld [vmem:[%s863_s11 + $0x48] sm:$0xff]  ;;  %v235_v2 = vld [vmem:[%s858_s8 + $0x70] sm:$0xff]  ;;  %v236_v3 = vld [vmem:[%s858_s8 + $0x78] sm:$0xff] }
  0x1f   : > { %517 = vst [vmem:[%s912_s20] sm:$0xff] %v469_v35  ;;  %v473_v49 = vmax.f32 %v425_v38, 0.0  ;;  %v282_v51 = vmul.f32 %v852_v0, %v230_v34  ;;  %v427_v54 = vadd.f32 %v379_v39, %v331_v44  ;;  %v283_v58 = vmul.f32 %v852_v0, %v231_v41  ;;  %v384_v7 = vld [vmem:[%s863_s11 + $0x58] sm:$0xff]  ;;  %v385_v8 = vld [vmem:[%s863_s11 + $0x60] sm:$0xff]  ;;  %v386_v14 = vld [vmem:[%s863_s11 + $0x68] sm:$0xff]  ;;  %p733_p3 = pnand %p732_p2, %p728_p13 }
  0x20   : > { %518 = vst [vmem:[%s912_s20 + $0x8] sm:$0xff] %v470_v36  ;;  %v474_v53 = vmax.f32 %v426_v43, 0.0  ;;  %v428_v55 = vadd.f32 %v380_v40, %v332_v45  ;;  %v333_v59 = vadd.f32 %v868_v1, %v281_v50  ;;  %v284_v62 = vmul.f32 %v852_v0, %v232_v46  ;;  %v237_v19 = vld [vmem:[%s858_s8 + $0x80] sm:$0xff]  ;;  %v238_v20 = vld [vmem:[%s858_s8 + $0x88] sm:$0xff]  ;;  %v387_v25 = vld [vmem:[%s863_s11 + $0x70] sm:$0xff] }
  0x21   : > { %519 = vst [vmem:[%s912_s20 + $0x10] sm:$0xff] %v471_v42  ;;  %v334_v60 = vadd.f32 %v868_v1, %v282_v51  ;;  %v285_v63 = vmul.f32 %v852_v0, %v233_v47  ;;  %v475_v4 = vmax.f32 %v427_v54, 0.0  ;;  %v335_v6 = vadd.f32 %v868_v1, %v283_v58  ;;  %v388_v26 = vld [vmem:[%s863_s11 + $0x78] sm:$0xff]  ;;  %v239_v27 = vld [vmem:[%s858_s8 + $0x90] sm:$0xff]  ;;  %v241_v33 = vld [vmem:[%s858_s8 + $0xa0] sm:$0xff] }
  0x22   : > { %520 = vst [vmem:[%s912_s20 + $0x18] sm:$0xff] %v472_v48  ;;  %v476_v5 = vmax.f32 %v428_v55, 0.0  ;;  %v286_v9 = vmul.f32 %v852_v0, %v234_v52  ;;  %v429_v10 = vadd.f32 %v381_v56, %v333_v59  ;;  %v336_v12 = vadd.f32 %v868_v1, %v284_v62  ;;  %v240_v32 = vld [vmem:[%s858_s8 + $0x98] sm:$0xff]  ;;  %v242_v38 = vld [vmem:[%s858_s8 + $0xa8] sm:$0xff]  ;;  %v389_v42 = vld [vmem:[%s863_s11 + $0x80] sm:$0xff] }
  0x23   : > { %521 = vst [vmem:[%s912_s20 + $0x20] sm:$0xff] %v473_v49  ;;  %v430_v11 = vadd.f32 %v382_v57, %v334_v60  ;;  %v337_v13 = vadd.f32 %v868_v1, %v285_v63  ;;  %v431_v15 = vadd.f32 %v383_v61, %v335_v6  ;;  %v287_v17 = vmul.f32 %v852_v0, %v235_v2  ;;  %v390_v43 = vld [vmem:[%s863_s11 + $0x88] sm:$0xff]  ;;  %v391_v47 = vld [vmem:[%s863_s11 + $0x90] sm:$0xff]  ;;  %v244_v51 = vld [vmem:[%s858_s8 + $0xb8] sm:$0xff] }
  0x24   : > { %522 = vst [vmem:[%s912_s20 + $0x28] sm:$0xff] %v474_v53  ;;  %v338_v16 = vadd.f32 %v868_v1, %v286_v9  ;;  %v288_v18 = vmul.f32 %v852_v0, %v236_v3  ;;  %v477_v21 = vmax.f32 %v429_v10, 0.0  ;;  %v432_v23 = vadd.f32 %v384_v7, %v336_v12  ;;  %v243_v50 = vld [vmem:[%s858_s8 + $0xb0] sm:$0xff]  ;;  %v392_v55 = vld [vmem:[%s863_s11 + $0x98] sm:$0xff]  ;;  %v393_v56 = vld [vmem:[%s863_s11 + $0xa0] sm:$0xff] }
  0x25   : > { %523 = vst [vmem:[%s912_s20 + $0x30] sm:$0xff] %v475_v4  ;;  %v478_v22 = vmax.f32 %v430_v11, 0.0  ;;  %v433_v24 = vadd.f32 %v385_v8, %v337_v13  ;;  %v479_v28 = vmax.f32 %v431_v15, 0.0  ;;  %v339_v30 = vadd.f32 %v868_v1, %v287_v17  ;;  %v394_v62 = vld [vmem:[%s863_s11 + $0xa8] sm:$0xff]  ;;  %v395_v11 = vld [vmem:[%s863_s11 + $0xb0] sm:$0xff]  ;;  %v396_v12 = vld [vmem:[%s863_s11 + $0xb8] sm:$0xff] }
  0x26   : > { %524 = vst [vmem:[%s912_s20 + $0x38] sm:$0xff] %v476_v5  ;;  %v434_v29 = vadd.f32 %v386_v14, %v338_v16  ;;  %v340_v31 = vadd.f32 %v868_v1, %v288_v18  ;;  %v480_v34 = vmax.f32 %v432_v23, 0.0  ;;  %v289_v36 = vmul.f32 %v852_v0, %v237_v19  ;;  %v245_v5 = vld [vmem:[%s858_s8 + $0xc0] sm:$0xff]  ;;  %v246_v6 = vld [vmem:[%s858_s8 + $0xc8] sm:$0xff]  ;;  %v247_v13 = vld [vmem:[%s858_s8 + $0xd0] sm:$0xff] }
  0x27   : > { %525 = vst [vmem:[%s912_s20 + $0x40] sm:$0xff] %v477_v21  ;;  %v481_v35 = vmax.f32 %v433_v24, 0.0  ;;  %v290_v37 = vmul.f32 %v852_v0, %v238_v20  ;;  %v435_v40 = vadd.f32 %v387_v25, %v339_v30  ;;  %v291_v44 = vmul.f32 %v852_v0, %v239_v27  ;;  %v248_v18 = vld [vmem:[%s858_s8 + $0xd8] sm:$0xff]  ;;  %v249_v19 = vld [vmem:[%s858_s8 + $0xe0] sm:$0xff]  ;;  %v250_v24 = vld [vmem:[%s858_s8 + $0xe8] sm:$0xff] }
  0x28   : > { %526 = vst [vmem:[%s912_s20 + $0x48] sm:$0xff] %v478_v22  ;;  %v482_v39 = vmax.f32 %v434_v29, 0.0  ;;  %v436_v41 = vadd.f32 %v388_v26, %v340_v31  ;;  %v341_v45 = vadd.f32 %v868_v1, %v289_v36  ;;  %v292_v48 = vmul.f32 %v852_v0, %v240_v32  ;;  %v398_v29 = vld [vmem:[%s863_s11 + $0xc8] sm:$0xff]  ;;  %v251_v36 = vld [vmem:[%s858_s8 + $0xf0] sm:$0xff] }
  0x29   : > { %527 = vst [vmem:[%s912_s20 + $0x50] sm:$0xff] %v479_v28  ;;  %v342_v46 = vadd.f32 %v868_v1, %v290_v37  ;;  %v293_v49 = vmul.f32 %v852_v0, %v241_v33  ;;  %v483_v52 = vmax.f32 %v435_v40, 0.0  ;;  %v343_v54 = vadd.f32 %v868_v1, %v291_v44  ;;  %v397_v28 = vld [vmem:[%s863_s11 + $0xc0] sm:$0xff]  ;;  %v399_v33 = vld [vmem:[%s863_s11 + $0xd0] sm:$0xff]  ;;  %v252_v37 = vld [vmem:[%s858_s8 + $0xf8] sm:$0xff] }
  0x2a   : > { %528 = vst [vmem:[%s912_s20 + $0x58] sm:$0xff] %v480_v34  ;;  %v484_v53 = vmax.f32 %v436_v41, 0.0  ;;  %v294_v57 = vmul.f32 %v852_v0, %v242_v38  ;;  %v437_v58 = vadd.f32 %v389_v42, %v341_v45  ;;  %v344_v60 = vadd.f32 %v868_v1, %v292_v48  ;;  %v400_v41 = vld [vmem:[%s863_s11 + $0xd8] sm:$0xff]  ;;  %v401_v42 = vld [vmem:[%s863_s11 + $0xe0] sm:$0xff]  ;;  %v402_v48 = vld [vmem:[%s863_s11 + $0xe8] sm:$0xff] }
  0x2b   : > { %529 = vst [vmem:[%s912_s20 + $0x60] sm:$0xff] %v481_v35  ;;  %v438_v59 = vadd.f32 %v390_v43, %v342_v46  ;;  %v345_v61 = vadd.f32 %v868_v1, %v293_v49  ;;  %v439_v63 = vadd.f32 %v391_v47, %v343_v54  ;;  %v295_v3 = vmul.f32 %v852_v0, %v243_v50  ;;  %v254_v54 = vld [vmem:[%s858_s8 + $0x108] sm:$0xff] }
  0x2c   : > { %530 = vst [vmem:[%s912_s20 + $0x68] sm:$0xff] %v482_v39  ;;  %v346_v2 = vadd.f32 %v868_v1, %v294_v57  ;;  %v296_v4 = vmul.f32 %v852_v0, %v244_v51  ;;  %v485_v7 = vmax.f32 %v437_v58, 0.0  ;;  %v440_v9 = vadd.f32 %v392_v55, %v344_v60  ;;  %v404_v60 = vld [vmem:[%s863_s11 + $0xf8] sm:$0xff] }
  0x2d   : > { %531 = vst [vmem:[%s912_s20 + $0x70] sm:$0xff] %v483_v52  ;;  %v486_v8 = vmax.f32 %v438_v59, 0.0  ;;  %v441_v10 = vadd.f32 %v393_v56, %v345_v61  ;;  %v487_v14 = vmax.f32 %v439_v63, 0.0  ;;  %v347_v16 = vadd.f32 %v868_v1, %v295_v3  ;;  %v403_v59 = vld [vmem:[%s863_s11 + $0xf0] sm:$0xff] }
  0x2e   : > { %532 = vst [vmem:[%s912_s20 + $0x78] sm:$0xff] %v484_v53  ;;  %v442_v15 = vadd.f32 %v394_v62, %v346_v2  ;;  %v348_v17 = vadd.f32 %v868_v1, %v296_v4  ;;  %v488_v20 = vmax.f32 %v440_v9, 0.0  ;;  %v297_v22 = vmul.f32 %v852_v0, %v245_v5  ;;  %v253_v53 = vld [vmem:[%s858_s8 + $0x100] sm:$0xff]  ;;  %v255_v61 = vld [vmem:[%s858_s8 + $0x110] sm:$0xff]  ;;  %v256_v4 = vld [vmem:[%s858_s8 + $0x118] sm:$0xff] }
  0x2f   : > { %533 = vst [vmem:[%s912_s20 + $0x80] sm:$0xff] %v485_v7  ;;  %v489_v21 = vmax.f32 %v441_v10, 0.0  ;;  %v298_v23 = vmul.f32 %v852_v0, %v246_v6  ;;  %v443_v26 = vadd.f32 %v395_v11, %v347_v16  ;;  %v299_v30 = vmul.f32 %v852_v0, %v247_v13  ;;  %v257_v5 = vld [vmem:[%s858_s8 + $0x120] sm:$0xff]  ;;  %v258_v10 = vld [vmem:[%s858_s8 + $0x128] sm:$0xff] }
  0x30   : > { %534 = vst [vmem:[%s912_s20 + $0x88] sm:$0xff] %v486_v8  ;;  %v490_v25 = vmax.f32 %v442_v15, 0.0  ;;  %v444_v27 = vadd.f32 %v396_v12, %v348_v17  ;;  %v349_v31 = vadd.f32 %v868_v1, %v297_v22  ;;  %v300_v34 = vmul.f32 %v852_v0, %v248_v18  ;;  %v406_v15 = vld [vmem:[%s863_s11 + $0x108] sm:$0xff]  ;;  %v259_v22 = vld [vmem:[%s858_s8 + $0x130] sm:$0xff] }
  0x31   : > { %535 = vst [vmem:[%s912_s20 + $0x90] sm:$0xff] %v487_v14  ;;  %v350_v32 = vadd.f32 %v868_v1, %v298_v23  ;;  %v301_v35 = vmul.f32 %v852_v0, %v249_v19  ;;  %v491_v38 = vmax.f32 %v443_v26, 0.0  ;;  %v351_v40 = vadd.f32 %v868_v1, %v299_v30  ;;  %v405_v14 = vld [vmem:[%s863_s11 + $0x100] sm:$0xff]  ;;  %v407_v19 = vld [vmem:[%s863_s11 + $0x110] sm:$0xff]  ;;  %v260_v23 = vld [vmem:[%s858_s8 + $0x138] sm:$0xff] }
  0x32   : > { %536 = vst [vmem:[%s912_s20 + $0x98] sm:$0xff] %v488_v20  ;;  %v492_v39 = vmax.f32 %v444_v27, 0.0  ;;  %v302_v43 = vmul.f32 %v852_v0, %v250_v24  ;;  %v445_v44 = vadd.f32 %v397_v28, %v349_v31  ;;  %v352_v46 = vadd.f32 %v868_v1, %v300_v34  ;;  %v408_v27 = vld [vmem:[%s863_s11 + $0x118] sm:$0xff]  ;;  %v409_v28 = vld [vmem:[%s863_s11 + $0x120] sm:$0xff]  ;;  %v410_v34 = vld [vmem:[%s863_s11 + $0x128] sm:$0xff] }
  0x33   : > { %537 = vst [vmem:[%s912_s20 + $0xa0] sm:$0xff] %v489_v21  ;;  %v446_v45 = vadd.f32 %v398_v29, %v350_v32  ;;  %v353_v47 = vadd.f32 %v868_v1, %v301_v35  ;;  %v447_v49 = vadd.f32 %v399_v33, %v351_v40  ;;  %v303_v51 = vmul.f32 %v852_v0, %v251_v36  ;;  %v262_v40 = vld [vmem:[%s858_s8 + $0x148] sm:$0xff] }
  0x34   : > { %538 = vst [vmem:[%s912_s20 + $0xa8] sm:$0xff] %v490_v25  ;;  %v354_v50 = vadd.f32 %v868_v1, %v302_v43  ;;  %v304_v52 = vmul.f32 %v852_v0, %v252_v37  ;;  %v493_v55 = vmax.f32 %v445_v44, 0.0  ;;  %v448_v57 = vadd.f32 %v400_v41, %v352_v46  ;;  %v412_v46 = vld [vmem:[%s863_s11 + $0x138] sm:$0xff] }
  0x35   : > { %539 = vst [vmem:[%s912_s20 + $0xb0] sm:$0xff] %v491_v38  ;;  %v494_v56 = vmax.f32 %v446_v45, 0.0  ;;  %v449_v58 = vadd.f32 %v401_v42, %v353_v47  ;;  %v495_v62 = vmax.f32 %v447_v49, 0.0  ;;  %v355_v2 = vadd.f32 %v868_v1, %v303_v51  ;;  %v411_v45 = vld [vmem:[%s863_s11 + $0x130] sm:$0xff] }
  0x36   : > { %540 = vst [vmem:[%s912_s20 + $0xb8] sm:$0xff] %v492_v39  ;;  %v450_v63 = vadd.f32 %v402_v48, %v354_v50  ;;  %v356_v3 = vadd.f32 %v868_v1, %v304_v52  ;;  %v496_v6 = vmax.f32 %v448_v57, 0.0  ;;  %v305_v8 = vmul.f32 %v852_v0, %v253_v53  ;;  %v261_v39 = vld [vmem:[%s858_s8 + $0x140] sm:$0xff]  ;;  %v263_v47 = vld [vmem:[%s858_s8 + $0x150] sm:$0xff]  ;;  %v264_v52 = vld [vmem:[%s858_s8 + $0x158] sm:$0xff] }
  0x37   : > { %541 = vst [vmem:[%s912_s20 + $0xc0] sm:$0xff] %v493_v55  ;;  %v497_v7 = vmax.f32 %v449_v58, 0.0  ;;  %v306_v9 = vmul.f32 %v852_v0, %v254_v54  ;;  %v451_v12 = vadd.f32 %v403_v59, %v355_v2  ;;  %v307_v16 = vmul.f32 %v852_v0, %v255_v61  ;;  %v265_v53 = vld [vmem:[%s858_s8 + $0x160] sm:$0xff]  ;;  %v266_v58 = vld [vmem:[%s858_s8 + $0x168] sm:$0xff] }
  0x38   : > { %542 = vst [vmem:[%s912_s20 + $0xc8] sm:$0xff] %v494_v56  ;;  %v498_v11 = vmax.f32 %v450_v63, 0.0  ;;  %v452_v13 = vadd.f32 %v404_v60, %v356_v3  ;;  %v357_v17 = vadd.f32 %v868_v1, %v305_v8  ;;  %v308_v20 = vmul.f32 %v852_v0, %v256_v4  ;;  %v414_v63 = vld [vmem:[%s863_s11 + $0x148] sm:$0xff]  ;;  %v267_v8 = vld [vmem:[%s858_s8 + $0x170] sm:$0xff] }
  0x39   : > { %543 = vst [vmem:[%s912_s20 + $0xd0] sm:$0xff] %v495_v62  ;;  %v358_v18 = vadd.f32 %v868_v1, %v306_v9  ;;  %v309_v21 = vmul.f32 %v852_v0, %v257_v5  ;;  %v499_v24 = vmax.f32 %v451_v12, 0.0  ;;  %v359_v26 = vadd.f32 %v868_v1, %v307_v16  ;;  %v413_v62 = vld [vmem:[%s863_s11 + $0x140] sm:$0xff]  ;;  %v415_v5 = vld [vmem:[%s863_s11 + $0x150] sm:$0xff]  ;;  %v268_v9 = vld [vmem:[%s858_s8 + $0x178] sm:$0xff] }
  0x3a   : > { %544 = vst [vmem:[%s912_s20 + $0xd8] sm:$0xff] %v496_v6  ;;  %v500_v25 = vmax.f32 %v452_v13, 0.0  ;;  %v310_v29 = vmul.f32 %v852_v0, %v258_v10  ;;  %v453_v30 = vadd.f32 %v405_v14, %v357_v17  ;;  %v360_v32 = vadd.f32 %v868_v1, %v308_v20  ;;  %v416_v13 = vld [vmem:[%s863_s11 + $0x158] sm:$0xff]  ;;  %v417_v14 = vld [vmem:[%s863_s11 + $0x160] sm:$0xff]  ;;  %v418_v20 = vld [vmem:[%s863_s11 + $0x168] sm:$0xff] }
  0x3b   : > { %545 = vst [vmem:[%s912_s20 + $0xe0] sm:$0xff] %v497_v7  ;;  %v454_v31 = vadd.f32 %v406_v15, %v358_v18  ;;  %v361_v33 = vadd.f32 %v868_v1, %v309_v21  ;;  %v455_v35 = vadd.f32 %v407_v19, %v359_v26  ;;  %v311_v37 = vmul.f32 %v852_v0, %v259_v22 }
  0x3c   : > { %546 = vst [vmem:[%s912_s20 + $0xe8] sm:$0xff] %v498_v11  ;;  %v362_v36 = vadd.f32 %v868_v1, %v310_v29  ;;  %v312_v38 = vmul.f32 %v852_v0, %v260_v23  ;;  %v501_v41 = vmax.f32 %v453_v30, 0.0  ;;  %v456_v43 = vadd.f32 %v408_v27, %v360_v32  ;;  %v419_v29 = vld [vmem:[%s863_s11 + $0x170] sm:$0xff]  ;;  %v420_v30 = vld [vmem:[%s863_s11 + $0x178] sm:$0xff] }
  0x3d   : > { %547 = vst [vmem:[%s912_s20 + $0xf0] sm:$0xff] %v499_v24  ;;  %v502_v42 = vmax.f32 %v454_v31, 0.0  ;;  %v457_v44 = vadd.f32 %v409_v28, %v361_v33  ;;  %v503_v48 = vmax.f32 %v455_v35, 0.0  ;;  %v363_v50 = vadd.f32 %v868_v1, %v311_v37 }
  0x3e   : > { %548 = vst [vmem:[%s912_s20 + $0xf8] sm:$0xff] %v500_v25  ;;  %v458_v49 = vadd.f32 %v410_v34, %v362_v36  ;;  %v364_v51 = vadd.f32 %v868_v1, %v312_v38  ;;  %v504_v54 = vmax.f32 %v456_v43, 0.0  ;;  %v313_v56 = vmul.f32 %v852_v0, %v261_v39 }
  0x3f   : > { %549 = vst [vmem:[%s912_s20 + $0x100] sm:$0xff] %v501_v41  ;;  %v505_v55 = vmax.f32 %v457_v44, 0.0  ;;  %v314_v57 = vmul.f32 %v852_v0, %v262_v40  ;;  %v459_v60 = vadd.f32 %v411_v45, %v363_v50  ;;  %v315_v2 = vmul.f32 %v852_v0, %v263_v47 }
  0x40   : > { %550 = vst [vmem:[%s912_s20 + $0x108] sm:$0xff] %v502_v42  ;;  %v506_v59 = vmax.f32 %v458_v49, 0.0  ;;  %v460_v61 = vadd.f32 %v412_v46, %v364_v51  ;;  %v365_v3 = vadd.f32 %v868_v1, %v313_v56  ;;  %v316_v6 = vmul.f32 %v852_v0, %v264_v52 }
  0x41   : > { %551 = vst [vmem:[%s912_s20 + $0x110] sm:$0xff] %v503_v48  ;;  %v366_v4 = vadd.f32 %v868_v1, %v314_v57  ;;  %v317_v7 = vmul.f32 %v852_v0, %v265_v53  ;;  %v507_v10 = vmax.f32 %v459_v60, 0.0  ;;  %v367_v12 = vadd.f32 %v868_v1, %v315_v2 }
  0x42   : > { %552 = vst [vmem:[%s912_s20 + $0x118] sm:$0xff] %v504_v54  ;;  %v508_v11 = vmax.f32 %v460_v61, 0.0  ;;  %v318_v15 = vmul.f32 %v852_v0, %v266_v58  ;;  %v461_v16 = vadd.f32 %v413_v62, %v365_v3  ;;  %v368_v18 = vadd.f32 %v868_v1, %v316_v6 }
  0x43   : > { %553 = vst [vmem:[%s912_s20 + $0x120] sm:$0xff] %v505_v55  ;;  %v462_v17 = vadd.f32 %v414_v63, %v366_v4  ;;  %v369_v19 = vadd.f32 %v868_v1, %v317_v7  ;;  %v463_v21 = vadd.f32 %v415_v5, %v367_v12  ;;  %v319_v23 = vmul.f32 %v852_v0, %v267_v8 }
  0x44   : > { %554 = vst [vmem:[%s912_s20 + $0x128] sm:$0xff] %v506_v59  ;;  %v370_v22 = vadd.f32 %v868_v1, %v318_v15  ;;  %v320_v24 = vmul.f32 %v852_v0, %v268_v9  ;;  %v509_v25 = vmax.f32 %v461_v16, 0.0  ;;  %v464_v27 = vadd.f32 %v416_v13, %v368_v18 }
  0x45   : > { %555 = vst [vmem:[%s912_s20 + $0x130] sm:$0xff] %v507_v10  ;;  %v510_v26 = vmax.f32 %v462_v17, 0.0  ;;  %v465_v28 = vadd.f32 %v417_v14, %v369_v19  ;;  %v511_v31 = vmax.f32 %v463_v21, 0.0  ;;  %v371_v33 = vadd.f32 %v868_v1, %v319_v23 }
  0x46   : > { %556 = vst [vmem:[%s912_s20 + $0x138] sm:$0xff] %v508_v11  ;;  %v466_v32 = vadd.f32 %v418_v20, %v370_v22  ;;  %v372_v34 = vadd.f32 %v868_v1, %v320_v24  ;;  %v512_v0 = vmax.f32 %v464_v27, 0.0 }
  0x47   : > { %557 = vst [vmem:[%s912_s20 + $0x140] sm:$0xff] %v509_v25  ;;  %v513_v35 = vmax.f32 %v465_v28, 0.0  ;;  %v467_v37 = vadd.f32 %v419_v29, %v371_v33 }
  0x48   : > { %558 = vst [vmem:[%s912_s20 + $0x148] sm:$0xff] %v510_v26  ;;  %v514_v36 = vmax.f32 %v466_v32, 0.0  ;;  %v468_v38 = vadd.f32 %v420_v30, %v372_v34 }
  0x49   : > { %559 = vst [vmem:[%s912_s20 + $0x150] sm:$0xff] %v511_v31  ;;  %v515_v1 = vmax.f32 %v467_v37, 0.0 }
  0x4a   : > { %560 = vst [vmem:[%s912_s20 + $0x158] sm:$0xff] %v512_v0  ;;  %v516_v39 = vmax.f32 %v468_v38, 0.0 }
  0x4b   : > { %561 = vst [vmem:[%s912_s20 + $0x160] sm:$0xff] %v513_v35 }
  0x4c   : > { %562 = vst [vmem:[%s912_s20 + $0x168] sm:$0xff] %v514_v36 }
  0x4d   : > { %563 = vst [vmem:[%s912_s20 + $0x170] sm:$0xff] %v515_v1 }
  0x4e   : > { %564 = vst [vmem:[%s912_s20 + $0x178] sm:$0xff] %v516_v39 }
  0x4f   : > { %736 = shalt.err (!%p733_p3)
}
  0x50   : > { %s773_s30 = smov 128   ;;  %s774_s13 = smov 8  }
  0x51   : > { %666 = dma.vmem_to_hbm [thread:$0]  (%p838_p5), %s579_s28, 6144, %s581_s29, %s566_s5, %s773_s30, %s773_s30, %s774_s13  }
  0x52 PF: > { %p672_p4 = scmp.ge.s32.totalorder %s771_s18, 2  ;;  %s595_s14 = sand.u32 1, %s759_s15  }
  0x53   : > { %s596_s20 = scalar_lea.sflag [#allocation3], %s595_s14 }
  0x54   : > { %p669_p7 = pnand %p672_p4, %p842_p6 }
  0x56   : > { %p670_p8 = pneg %p669_p7 }
  0x58   : > { %754 = dma.done.wait (%p670_p8), %s596_s20, 6144  }
  0x59   : > { %756 = vsyncadd (%p670_p8), %s596_s20, 4294961152  ;;  %p14_p9 = scmp.ge.s32.totalorder %s825_s21, 5   ;;  %s1158_s15 = smov %s763_s16 }
  0x5a   : > { %s1159_s16 = smov %s767_s17  ;;  %s1160_s17 = smov %s836_s24 }
  0x5b   : > { %s1161_s18 = smov %s825_s21  ;;  %16 = sbr.rel (!%p14_p9) target bundleno = 3 (0x3), region = 74 }
  0x60   :  { %602 = vsyncpa [#allocation3], 1 }
  0x61   :  { %604 = vsyncpa [#allocation3 + $0x1], 1 }

// kernel: bottleneck_forward.5
= control target key start
LH: loop header
LB: loop body
LE: loop exit
PB: predicated region body
PF: predicated region fallthrough
CT: control target
= control target key end

     0   :  { %s7357_s21 = smov 0   ;;  %s13083_s0 = inlined_call_operand.vmem [shape: f32[2,576,32], index: 0, kind: input, shape index: {}]   ;;  %s13084_s1 = inlined_call_operand.vmem [shape: f32[1,32], index: 1, kind: input, shape index: {}]   ;;  %s13085_s2 = inlined_call_operand.vmem [shape: f32[1,32], index: 2, kind: input, shape index: {}]   ;;  %s13086_s3 = inlined_call_operand.vmem [shape: f32[576,3], index: 3, kind: input, shape index: {}]   ;;  %s13087_s4 = inlined_call_operand.vmem [shape: bf16[288,32], index: 4, kind: input, shape index: {}]   ;;  %s13088_s5 = inlined_call_operand.vmem [shape: f32[2,576,32], index: 5, kind: output, shape index: {0}]   ;;  %s13089_s6 = inlined_call_operand.vmem [shape: f32[2,2,32], index: 6, kind: output, shape index: {1}]  }
   0x1 LB: > { %s5856_s22 = sadd.s32 4294967295, %s7314_s21   ;;  %p5860_p0 = scmp.ge.s32.totalorder %s7314_s21, 1  ;;  %s7314_s21 = sphi %s7357_s21, %s17_s21  }
   0x2   : > { %p215_p1 = scmp.lt.s32.totalorder %s7314_s21, 3 }
   0x4   : > { %p216_p2 = pnand %p5860_p0, %p215_p1 }
   0x6   : > { %219 = sbr.rel (%p216_p2) target bundleno = 1462 (0x5b6), region = 40 }
   0xb   : > { %v646_v0 = vld [vmem:[%s13086_s3 + $0x20] sm:$0xff]  ;;  %v644_v1 = vld [vmem:[%s13086_s3 + $0x10] sm:$0xff]  ;;  %v7316_v3 = vmov 0   ;;  %v647_v4 = vld [vmem:[%s13086_s3 + $0x28] sm:$0xff]  ;;  %p249_p3 = scmp.lt.s32.totalorder %s5856_s22, 1  ;;  %vm560_vm0 = vcmask 261120  }
   0xc   : > { %v642_v2 = vld [vmem:[%s13086_s3] sm:$0xff]  ;;  %6027 = vset.pattern.permute.xlu2 %v7316_v3  ;;  %6026 = vset.pattern.permute.xlu1 %v7316_v3  ;;  %v645_v5 = vld [vmem:[%s13086_s3 + $0x18] sm:$0xff]  ;;  %v643_v6 = vld [vmem:[%s13086_s3 + $0x8] sm:$0xff]  ;;  %vm564_vm1 = vcmask 253952   ;;  %s7320_s17 = smov 64   ;;  %s7321_s18 = smov 96  }
   0xd   : > { %6025 = vset.pattern.permute.xlu0 %v7316_v3  ;;  %808 = vperm.xlu2 %6027, %v646_v0   ;;  %v650_v7 = vld [vmem:[%s13086_s3 + $0x40] sm:$0xff]  ;;  %v649_v8 = vld [vmem:[%s13086_s3 + $0x38] sm:$0xff]  ;;  %v648_v9 = vld [vmem:[%s13086_s3 + $0x30] sm:$0xff]  ;;  %s14888_s22 = smov (!%p249_p3, %s5856_s22), 1  ;;  %vm4035_vm2 = vcmask 523264   ;;  %vm4108_vm3 = vcmask 785408  }
   0xe   : > { %798 = vperm.xlu1 %6026, %v644_v1   ;;  %788 = vperm.xlu0 %6025, %v642_v2   ;;  %v653_v10 = vld [vmem:[%s13086_s3 + $0x58] sm:$0xff]  ;;  %v652_v11 = vld [vmem:[%s13086_s3 + $0x50] sm:$0xff]  ;;  %v651_v12 = vld [vmem:[%s13086_s3 + $0x48] sm:$0xff]  ;;  %s6010_s19 = smul.u32 576, %s14888_s22  ;;  %vm5766_vm4 = vcmask 1040384   ;;  %vm5768_vm5 = vcmask 254976  }
   0xf   : > { %v656_v13 = vld [vmem:[%s13086_s3 + $0x70] sm:$0xff]  ;;  %v655_v14 = vld [vmem:[%s13086_s3 + $0x68] sm:$0xff]  ;;  %v654_v15 = vld [vmem:[%s13086_s3 + $0x60] sm:$0xff] }
  0x10   : > { %v659_v16 = vld [vmem:[%s13086_s3 + $0x88] sm:$0xff]  ;;  %v658_v17 = vld [vmem:[%s13086_s3 + $0x80] sm:$0xff]  ;;  %v657_v18 = vld [vmem:[%s13086_s3 + $0x78] sm:$0xff]  ;;  %s7449_s30 = scalar_lea.vmem %s13083_s0, %s6010_s19  ;;  %s12060_s24 = scalar_lea.vmem %s13088_s5, %s6010_s19 }
  0x11   : > { %v662_v19 = vld [vmem:[%s13086_s3 + $0xa0] sm:$0xff]  ;;  %v661_v20 = vld [vmem:[%s13086_s3 + $0x98] sm:$0xff]  ;;  %v660_v21 = vld [vmem:[%s13086_s3 + $0x90] sm:$0xff]  ;;  %s5863_s19 = sshll.u32 %s14888_s22, 1 }
  0x12   : > { %v665_v22 = vld [vmem:[%s13086_s3 + $0xb8] sm:$0xff]  ;;  %v664_v23 = vld [vmem:[%s13086_s3 + $0xb0] sm:$0xff]  ;;  %v663_v24 = vld [vmem:[%s13086_s3 + $0xa8] sm:$0xff] }
  0x13   : > { %v264_v25 = vld [vmem:[%s7449_s30] sm:$0xff]  ;;  %v265_v26 = vld [vmem:[%s7449_s30 + $0x8] sm:$0xff]  ;;  %v267_v27 = vld [vmem:[%s7449_s30 + $0x18] sm:$0xff] }
  0x14   : > { %v268_v28 = vld [vmem:[%s7449_s30 + $0x20] sm:$0xff]  ;;  %v270_v29 = vld [vmem:[%s7449_s30 + $0x30] sm:$0xff]  ;;  %v271_v30 = vld [vmem:[%s7449_s30 + $0x38] sm:$0xff] }
  0x15   : > { %813 = vperm.xlu2 %6027, %v647_v4   ;;  %v7460_v31 = vld [vmem:[%s13084_s1] ss:$0 sm:$0xff]  ;;  %v668_v33 = vld [vmem:[%s13086_s3 + $0xd0] sm:$0xff]  ;;  %v667_v34 = vld [vmem:[%s13086_s3 + $0xc8] sm:$0xff] }
  0x16   : > { %803 = vperm.xlu1 %6026, %v645_v5   ;;  %793 = vperm.xlu0 %6025, %v643_v6   ;;  %v7465_v32 = vld [vmem:[%s13085_s2] ss:$0 sm:$0xff]  ;;  %v340_v36 = vmul.f32 %v7460_v31, %v264_v25  ;;  %v341_v37 = vmul.f32 %v7460_v31, %v265_v26  ;;  %v343_v38 = vmul.f32 %v7460_v31, %v267_v27  ;;  %v266_v51 = vld [vmem:[%s7449_s30 + $0x10] sm:$0xff]  ;;  %v269_v52 = vld [vmem:[%s7449_s30 + $0x28] sm:$0xff] }
  0x17   : > { %v666_v35 = vld [vmem:[%s13086_s3 + $0xc0] sm:$0xff]  ;;  %v344_v39 = vmul.f32 %v7460_v31, %v268_v28  ;;  %v346_v40 = vmul.f32 %v7460_v31, %v270_v29  ;;  %v347_v41 = vmul.f32 %v7460_v31, %v271_v30  ;;  %v342_v55 = vmul.f32 %v7460_v31, %v266_v51  ;;  %v671_v59 = vld [vmem:[%s13086_s3 + $0xe8] sm:$0xff]  ;;  %v669_v61 = vld [vmem:[%s13086_s3 + $0xd8] sm:$0xff] }
  0x18   : > { %v416_v42 = vadd.f32 %v7465_v32, %v340_v36  ;;  %v417_v43 = vadd.f32 %v7465_v32, %v341_v37  ;;  %v419_v44 = vadd.f32 %v7465_v32, %v343_v38  ;;  %v272_v54 = vld [vmem:[%s7449_s30 + $0x40] sm:$0xff]  ;;  %v345_v56 = vmul.f32 %v7460_v31, %v269_v52  ;;  %v274_v2 = vld [vmem:[%s7449_s30 + $0x50] sm:$0xff]  ;;  %v275_v3 = vld [vmem:[%s7449_s30 + $0x58] sm:$0xff] }
  0x19   : > { %v420_v45 = vadd.f32 %v7465_v32, %v344_v39  ;;  %v422_v46 = vadd.f32 %v7465_v32, %v346_v40  ;;  %v423_v47 = vadd.f32 %v7465_v32, %v347_v41  ;;  %v348_v58 = vmul.f32 %v7460_v31, %v272_v54  ;;  %v670_v60 = vld [vmem:[%s13086_s3 + $0xe0] sm:$0xff]  ;;  %v277_v4 = vld [vmem:[%s7449_s30 + $0x68] sm:$0xff]  ;;  %v672_v25 = vld [vmem:[%s13086_s3 + $0xf0] sm:$0xff] }
  0x1a   : > { %v488_v48 = vmax.f32 %v416_v42, 0.0  ;;  %v489_v49 = vmax.f32 %v417_v43, 0.0  ;;  %v491_v50 = vmax.f32 %v419_v44, 0.0  ;;  %v418_v63 = vadd.f32 %v7465_v32, %v342_v55  ;;  %v283_v38 = vld [vmem:[%s7449_s30 + $0x98] sm:$0xff]  ;;  %v284_v39 = vld [vmem:[%s7449_s30 + $0xa0] sm:$0xff]  ;;  %v273_v40 = vld [vmem:[%s7449_s30 + $0x48] sm:$0xff] }
  0x1b   : > { %v492_v53 = vmax.f32 %v420_v45, 0.0  ;;  %v494_v57 = vmax.f32 %v422_v46, 0.0  ;;  %v495_v62 = vmax.f32 %v423_v47, 0.0  ;;  %v421_v0 = vadd.f32 %v7465_v32, %v345_v56  ;;  %v680_v51 = vld [vmem:[%s13086_s3 + $0x130] sm:$0xff]  ;;  %v679_v52 = vld [vmem:[%s13086_s3 + $0x128] sm:$0xff]  ;;  %v287_v56 = vld [vmem:[%s7449_s30 + $0xb8] sm:$0xff] }
  0x1c   : > { %570 = vst.msk [vmem:[#allocation2 + $0x19] sm:$0xff] %vm560_vm0, %v488_v48  ;;  %v424_v1 = vadd.f32 %v7465_v32, %v348_v58  ;;  %v490_v5 = vmax.f32 %v418_v63, 0.0  ;;  %v7317_v28 = vmov 0.0   ;;  %v359_v41 = vmul.f32 %v7460_v31, %v283_v38  ;;  %v286_v55 = vld [vmem:[%s7449_s30 + $0xb0] sm:$0xff] }
  0x1d   : > { %828 = vperm.xlu2 %6027, %v650_v7   ;;  %571 = vst.msk [vmem:[#allocation2 + $0x21] sm:$0xff] %vm560_vm0, %v489_v49  ;;  %v493_v6 = vmax.f32 %v421_v0, 0.0  ;;  %v350_v7 = vmul.f32 %v7460_v31, %v274_v2  ;;  %v360_v42 = vmul.f32 %v7460_v31, %v284_v39  ;;  %v349_v43 = vmul.f32 %v7460_v31, %v273_v40 }
  0x1e   : > { %823 = vperm.xlu1 %6026, %v649_v8   ;;  %818 = vperm.xlu0 %6025, %v648_v9   ;;  %573 = vst.msk [vmem:[#allocation2 + $0x31] sm:$0xff] %vm560_vm0, %v491_v50  ;;  %v351_v8 = vmul.f32 %v7460_v31, %v275_v3  ;;  %v278_v9 = vld [vmem:[%s7449_s30 + $0x70] sm:$0xff]  ;;  %v435_v44 = vadd.f32 %v7465_v32, %v359_v41 }
  0x1f   : > { %574 = vst.msk [vmem:[#allocation2 + $0x39] sm:$0xff] %vm560_vm0, %v492_v53  ;;  %v436_v45 = vadd.f32 %v7465_v32, %v360_v42  ;;  %v425_v46 = vadd.f32 %v7465_v32, %v349_v43  ;;  %v678_v53 = vld [vmem:[%s13086_s3 + $0x120] sm:$0xff]  ;;  %v363_v58 = vmul.f32 %v7460_v31, %v287_v56  ;;  %v689_v42 = vld [vmem:[%s13086_s3 + $0x178] sm:$0xff] }
  0x20   : > { %576 = vst.msk [vmem:[#allocation2 + $0x49] sm:$0xff] %vm560_vm0, %v494_v57  ;;  %v507_v48 = vmax.f32 %v435_v44, 0.0  ;;  %v362_v57 = vmul.f32 %v7460_v31, %v286_v55 }
  0x21   : > { %577 = vst.msk [vmem:[#allocation2 + $0x51] sm:$0xff] %vm560_vm0, %v495_v62  ;;  %v508_v49 = vmax.f32 %v436_v45, 0.0  ;;  %v497_v50 = vmax.f32 %v425_v46, 0.0  ;;  %v439_v0 = vadd.f32 %v7465_v32, %v363_v58  ;;  %v688_v45 = vld [vmem:[%s13086_s3 + $0x170] sm:$0xff]  ;;  %v687_v46 = vld [vmem:[%s13086_s3 + $0x168] sm:$0xff] }
  0x22   : > { %572 = vst.msk [vmem:[#allocation2 + $0x29] sm:$0xff] %vm560_vm0, %v490_v5  ;;  %v438_v63 = vadd.f32 %v7465_v32, %v362_v57 }
  0x23   : > { %575 = vst.msk [vmem:[#allocation2 + $0x41] sm:$0xff] %vm560_vm0, %v493_v6  ;;  %v511_v5 = vmax.f32 %v439_v0, 0.0 }
  0x24   : > { %563 = vst.msk [vmem:[#allocation2 + $0x10] sm:$0xff] %vm560_vm0, %v7317_v28 }
  0x25   : > { %843 = vperm.xlu2 %6027, %v653_v10   ;;  %v496_v10 = vmax.f32 %v424_v1, 0.0  ;;  %561 = vst.msk [vmem:[#allocation2] sm:$0xff] %vm560_vm0, %v7317_v28 }
  0x26   : > { %838 = vperm.xlu1 %6026, %v652_v11   ;;  %833 = vperm.xlu0 %6025, %v651_v12   ;;  %v353_v11 = vmul.f32 %v7460_v31, %v277_v4  ;;  %v354_v12 = vmul.f32 %v7460_v31, %v278_v9  ;;  %562 = vst.msk [vmem:[#allocation2 + $0x8] sm:$0xff] %vm560_vm0, %v7317_v28  ;;  %v510_v4 = vmax.f32 %v438_v63, 0.0  ;;  %v682_v9 = vld [vmem:[%s13086_s3 + $0x140] sm:$0xff] }
  0x27   : > { %578 = vst.msk [vmem:[#allocation2 + $0x59] sm:$0xff] %vm560_vm0, %v496_v10  ;;  %v681_v10 = vld [vmem:[%s13086_s3 + $0x138] sm:$0xff] }
  0x28   : > { %566 = vst.msk [vmem:[#allocation2 + $0x259] sm:$0xff] %vm560_vm0, %v7317_v28  ;;  %v1729_v54 = vld [vmem:[#allocation2 + $0x50] sm:$0xff] }
  0x29   : > { %567 = vst.msk [vmem:[#allocation2 + $0x261] sm:$0xff] %vm560_vm0, %v7317_v28  ;;  %v1725_v57 = vld [vmem:[#allocation2 + $0x30] sm:$0xff] }
  0x2a   : > { %568 = vst.msk [vmem:[#allocation2 + $0x269] sm:$0xff] %vm560_vm0, %v7317_v28  ;;  %v1728_v55 = vld [vmem:[#allocation2 + $0x48] sm:$0xff] }
  0x2b   : > { %565 = vst.msk [vmem:[#allocation2 + $0x18] sm:$0x1] %vm564_vm1, %v7317_v28 }
  0x2c   : > { %569 = vst.msk [vmem:[#allocation2 + $0x271] sm:$0x1] %vm564_vm1, %v7317_v28  ;;  %v293_v28 = vld [vmem:[%s7449_s30 + $0xe8] sm:$0xff] }
  0x2d   : > { %858 = vperm.xlu2 %6027, %v656_v13   ;;  %v426_v13 = vadd.f32 %v7465_v32, %v350_v7  ;;  %589 = vst.msk [vmem:[#allocation2 + $0xb1] sm:$0xff] %vm560_vm0, %v507_v48  ;;  %v683_v7 = vld [vmem:[%s13086_s3 + $0x148] sm:$0xff]  ;;  %v295_v48 = vld [vmem:[%s7449_s30 + $0xf8] sm:$0xff] }
  0x2e   : > { %853 = vperm.xlu1 %6026, %v655_v14   ;;  %848 = vperm.xlu0 %6025, %v654_v15   ;;  %v427_v14 = vadd.f32 %v7465_v32, %v351_v8  ;;  %v429_v15 = vadd.f32 %v7465_v32, %v353_v11  ;;  %590 = vst.msk [vmem:[#allocation2 + $0xb9] sm:$0xff] %vm560_vm0, %v508_v49  ;;  %v289_v11 = vld [vmem:[%s7449_s30 + $0xc8] sm:$0xff]  ;;  %v296_v49 = vld [vmem:[%s7449_s30 + $0x100] sm:$0xff] }
  0x2f   : > { %579 = vst.msk [vmem:[#allocation2 + $0x61] sm:$0xff] %vm560_vm0, %v497_v50  ;;  %v371_v50 = vmul.f32 %v7460_v31, %v295_v48 }
  0x30   : > { %592 = vst.msk [vmem:[#allocation2 + $0xc9] sm:$0xff] %vm560_vm0, %v510_v4 }
  0x31   : > { %593 = vst.msk [vmem:[#allocation2 + $0xd1] sm:$0xff] %vm560_vm0, %v511_v5  ;;  %v447_v56 = vadd.f32 %v7465_v32, %v371_v50 }
  0x33   : > { %v519_v0 = vmax.f32 %v447_v56, 0.0 }
  0x35   : > { %873 = vperm.xlu2 %6027, %v659_v16   ;;  %v430_v16 = vadd.f32 %v7465_v32, %v354_v12  ;;  %v290_v12 = vld [vmem:[%s7449_s30 + $0xd0] sm:$0xff]  ;;  %601 = vst.msk [vmem:[#allocation2 + $0x111] sm:$0xff] %vm560_vm0, %v519_v0 }
  0x36   : > { %868 = vperm.xlu1 %6026, %v658_v17   ;;  %863 = vperm.xlu0 %6025, %v657_v18   ;;  %v498_v17 = vmax.f32 %v426_v13, 0.0  ;;  %v499_v18 = vmax.f32 %v427_v14, 0.0  ;;  %v365_v13 = vmul.f32 %v7460_v31, %v289_v11  ;;  %v279_v14 = vld [vmem:[%s7449_s30 + $0x78] sm:$0xff] }
  0x38   : > { %580 = vst.msk [vmem:[#allocation2 + $0x69] sm:$0xff] %vm560_vm0, %v498_v17  ;;  %v441_v17 = vadd.f32 %v7465_v32, %v365_v13  ;;  %v690_v13 = vld [vmem:[%s13086_s3 + $0x180] sm:$0xff] }
  0x39   : > { %581 = vst.msk [vmem:[#allocation2 + $0x71] sm:$0xff] %vm560_vm0, %v499_v18 }
  0x3d   : > { %888 = vperm.xlu2 %6027, %v662_v19   ;;  %v501_v19 = vmax.f32 %v429_v15, 0.0  ;;  %v366_v15 = vmul.f32 %v7460_v31, %v290_v12 }
  0x3e   : > { %883 = vperm.xlu1 %6026, %v661_v20   ;;  %878 = vperm.xlu0 %6025, %v660_v21   ;;  %v502_v20 = vmax.f32 %v430_v16, 0.0  ;;  %v674_v21 = vld [vmem:[%s13086_s3 + $0x100] sm:$0xff]  ;;  %v355_v16 = vmul.f32 %v7460_v31, %v279_v14  ;;  %v298_v14 = vld [vmem:[%s7449_s30 + $0x110] sm:$0xff] }
  0x3f   : > { %583 = vst.msk [vmem:[#allocation2 + $0x81] sm:$0xff] %vm560_vm0, %v501_v19  ;;  %v442_v19 = vadd.f32 %v7465_v32, %v366_v15  ;;  %v299_v15 = vld [vmem:[%s7449_s30 + $0x118] sm:$0xff] }
  0x40   : > { %584 = vst.msk [vmem:[#allocation2 + $0x89] sm:$0xff] %vm560_vm0, %v502_v20  ;;  %v431_v20 = vadd.f32 %v7465_v32, %v355_v16  ;;  %v1733_v56 = vld [vmem:[#allocation2 + $0x70] sm:$0xff] }
  0x45   : > { %903 = vperm.xlu2 %6027, %v665_v22   ;;  %v280_v22 = vld [vmem:[%s7449_s30 + $0x80] sm:$0xff] }
  0x46   : > { %898 = vperm.xlu1 %6026, %v664_v23   ;;  %893 = vperm.xlu0 %6025, %v663_v24   ;;  %v281_v23 = vld [vmem:[%s7449_s30 + $0x88] sm:$0xff]  ;;  %v673_v24 = vld [vmem:[%s13086_s3 + $0xf8] sm:$0xff]  ;;  %v356_v26 = vmul.f32 %v7460_v31, %v280_v22  ;;  %v514_v22 = vmax.f32 %v442_v19, 0.0  ;;  %v375_v19 = vmul.f32 %v7460_v31, %v299_v15 }
  0x47   : > { %v357_v27 = vmul.f32 %v7460_v31, %v281_v23  ;;  %v503_v23 = vmax.f32 %v431_v20, 0.0  ;;  %v288_v20 = vld [vmem:[%s7449_s30 + $0xc0] sm:$0xff]  ;;  %v697_v15 = vld [vmem:[%s13086_s3 + $0x1b8] sm:$0xff] }
  0x48   : > { %v432_v29 = vadd.f32 %v7465_v32, %v356_v26  ;;  %v684_v26 = vld [vmem:[%s13086_s3 + $0x150] sm:$0xff]  ;;  %596 = vst.msk [vmem:[#allocation2 + $0xe9] sm:$0xff] %vm560_vm0, %v514_v22  ;;  %v364_v22 = vmul.f32 %v7460_v31, %v288_v20 }
  0x49   : > { %v433_v30 = vadd.f32 %v7465_v32, %v357_v27  ;;  %v292_v27 = vld [vmem:[%s7449_s30 + $0xe0] sm:$0xff]  ;;  %585 = vst.msk [vmem:[#allocation2 + $0x91] sm:$0xff] %vm560_vm0, %v503_v23  ;;  %v1732_v23 = vld [vmem:[#allocation2 + $0x68] sm:$0xff]  ;;  %v696_v20 = vld [vmem:[%s13086_s3 + $0x1b0] sm:$0xff] }
  0x4a   : > { %v504_v36 = vmax.f32 %v432_v29, 0.0  ;;  %v368_v29 = vmul.f32 %v7460_v31, %v292_v27  ;;  %v1731_v27 = vld [vmem:[#allocation2 + $0x60] sm:$0xff] }
  0x4b   : > { %v505_v37 = vmax.f32 %v433_v30, 0.0  ;;  %v282_v30 = vld [vmem:[%s7449_s30 + $0x90] sm:$0xff] }
  0x4c   : > { %586 = vst.msk [vmem:[#allocation2 + $0x99] sm:$0xff] %vm560_vm0, %v504_v36 }
  0x4d   : > { %918 = vperm.xlu2 %6027, %v668_v33   ;;  %v677_v33 = vld [vmem:[%s13086_s3 + $0x118] sm:$0xff]  ;;  %587 = vst.msk [vmem:[#allocation2 + $0xa1] sm:$0xff] %vm560_vm0, %v505_v37 }
  0x4e   : > { %913 = vperm.xlu1 %6026, %v667_v34   ;;  %908 = vperm.xlu0 %6025, %v666_v35   ;;  %v676_v34 = vld [vmem:[%s13086_s3 + $0x110] sm:$0xff]  ;;  %v675_v35 = vld [vmem:[%s13086_s3 + $0x108] sm:$0xff] }
  0x55   : > { %933 = vperm.xlu2 %6027, %v671_v59   ;;  %v276_v59 = vld [vmem:[%s7449_s30 + $0x60] sm:$0xff] }
  0x56   : > { %928 = vperm.xlu1 %6026, %v670_v60   ;;  %923 = vperm.xlu0 %6025, %v669_v61   ;;  %v1730_v60 = vld [vmem:[#allocation2 + $0x58] sm:$0xff]  ;;  %v352_v61 = vmul.f32 %v7460_v31, %v276_v59 }
  0x58   : > { %v428_v2 = vadd.f32 %v7465_v32, %v352_v61 }
  0x5a   : > { %v500_v6 = vmax.f32 %v428_v2, 0.0  ;;  %v1726_v2 = vld [vmem:[#allocation2 + $0x38] sm:$0xff] }
  0x5c   : > { %582 = vst.msk [vmem:[#allocation2 + $0x79] sm:$0xff] %vm560_vm0, %v500_v6 }
  0x5d   : > { %948 = vperm.xlu2 %6027, %v674_v21   ;;  %v513_v21 = vmax.f32 %v441_v17, 0.0  ;;  %v374_v17 = vmul.f32 %v7460_v31, %v298_v14  ;;  %v698_v14 = vld [vmem:[%s13086_s3 + $0x1c0] sm:$0xff] }
  0x5e   : > { %943 = vperm.xlu1 %6026, %v673_v24   ;;  %938 = vperm.xlu0 %6025, %v672_v25   ;;  %v686_v24 = vld [vmem:[%s13086_s3 + $0x160] sm:$0xff]  ;;  %v685_v25 = vld [vmem:[%s13086_s3 + $0x158] sm:$0xff] }
  0x5f   : > { %595 = vst.msk [vmem:[#allocation2 + $0xe1] sm:$0xff] %vm560_vm0, %v513_v21 }
  0x65   : > { %963 = vperm.xlu2 %6027, %v677_v33   ;;  %v369_v33 = vmul.f32 %v7460_v31, %v293_v28  ;;  %v440_v28 = vadd.f32 %v7465_v32, %v364_v22  ;;  %v304_v22 = vld [vmem:[%s7449_s30 + $0x140] sm:$0xff] }
  0x66   : > { %958 = vperm.xlu1 %6026, %v676_v34   ;;  %953 = vperm.xlu0 %6025, %v675_v35   ;;  %v358_v34 = vmul.f32 %v7460_v31, %v282_v30  ;;  %v444_v35 = vadd.f32 %v7465_v32, %v368_v29 }
  0x67   : > { %v7573_v47 = vpop.permute.xlu2 %808  ;;  %v445_v37 = vadd.f32 %v7465_v32, %v369_v33 }
  0x68   : > { %13627 = vst [vmem:[#allocation3_spill] sm:$0xff] %v7573_v47  ;;  %v7595_v62 = vmul.f32 %v1729_v54, %v7573_v47  ;;  %v434_v38 = vadd.f32 %v7465_v32, %v358_v34  ;;  %v516_v41 = vmax.f32 %v444_v35, 0.0  ;;  %v1727_v54 = vld [vmem:[#allocation2 + $0x40] sm:$0xff] }
  0x69   : > { %v517_v43 = vmax.f32 %v445_v37, 0.0  ;;  %v695_v37 = vld [vmem:[%s13086_s3 + $0x1a8] sm:$0xff]  ;;  %v7176_v47 = vld [vmem:[%s13086_s3 + $0x1e0] sm:$0xff] }
  0x6a   : > { %13628 = vst [vmem:[#allocation4_spill] sm:$0xff] %v7595_v62  ;;  %v506_v44 = vmax.f32 %v434_v38, 0.0  ;;  %v694_v38 = vld [vmem:[%s13086_s3 + $0x1a0] sm:$0xff]  ;;  %v322_v62 = vld [vmem:[%s7449_s30 + $0x1d0] sm:$0xff] }
  0x6b   : > { %598 = vst.msk [vmem:[#allocation2 + $0xf9] sm:$0xff] %vm560_vm0, %v516_v41 }
  0x6c   : > { %599 = vst.msk [vmem:[#allocation2 + $0x101] sm:$0xff] %vm560_vm0, %v517_v43  ;;  %v693_v43 = vld [vmem:[%s13086_s3 + $0x198] sm:$0xff] }
  0x6d   : > { %978 = vperm.xlu2 %6027, %v680_v51   ;;  %v285_v51 = vld [vmem:[%s7449_s30 + $0xa8] sm:$0xff]  ;;  %588 = vst.msk [vmem:[#allocation2 + $0xa9] sm:$0xff] %vm560_vm0, %v506_v44 }
  0x6e   : > { %973 = vperm.xlu1 %6026, %v679_v52   ;;  %968 = vperm.xlu0 %6025, %v678_v53   ;;  %v372_v52 = vmul.f32 %v7460_v31, %v296_v49  ;;  %v361_v53 = vmul.f32 %v7460_v31, %v285_v51  ;;  %v301_v44 = vld [vmem:[%s7449_s30 + $0x128] sm:$0xff]  ;;  %v291_v49 = vld [vmem:[%s7449_s30 + $0xd8] sm:$0xff] }
  0x6f   : > { %v7599_v1 = vpop.permute.xlu2 %813  ;;  %v367_v51 = vmul.f32 %v7460_v31, %v291_v49 }
  0x70   : > { %13629 = vst [vmem:[#allocation5_spill] sm:$0xff] %v7599_v1  ;;  %v7603_v3 = vmul.f32 %v1730_v60, %v7599_v1  ;;  %v448_v59 = vadd.f32 %v7465_v32, %v372_v52  ;;  %v437_v60 = vadd.f32 %v7465_v32, %v361_v53  ;;  %v1736_v52 = vld [vmem:[#allocation2 + $0x88] sm:$0xff]  ;;  %v1735_v53 = vld [vmem:[#allocation2 + $0x80] sm:$0xff] }
  0x71   : > { %v7175_v1 = vld [vmem:[%s13086_s3 + $0x1e8] sm:$0xff] }
  0x72   : > { %13630 = vst [vmem:[#allocation6_spill] sm:$0xff] %v7603_v3  ;;  %v520_v11 = vmax.f32 %v448_v59, 0.0  ;;  %v509_v12 = vmax.f32 %v437_v60, 0.0  ;;  %v1734_v59 = vld [vmem:[#allocation2 + $0x78] sm:$0xff]  ;;  %v443_v60 = vadd.f32 %v7465_v32, %v367_v51 }
  0x73   : > { %v323_v3 = vld [vmem:[%s7449_s30 + $0x1d8] sm:$0xff] }
  0x74   : > { %602 = vst.msk [vmem:[#allocation2 + $0x119] sm:$0xff] %vm560_vm0, %v520_v11 }
  0x75   : > { %993 = vperm.xlu2 %6027, %v683_v7   ;;  %591 = vst.msk [vmem:[#allocation2 + $0xc1] sm:$0xff] %vm560_vm0, %v509_v12 }
  0x76   : > { %988 = vperm.xlu1 %6026, %v682_v9   ;;  %983 = vperm.xlu0 %6025, %v681_v10   ;;  %v692_v9 = vld [vmem:[%s13086_s3 + $0x190] sm:$0xff]  ;;  %v691_v10 = vld [vmem:[%s13086_s3 + $0x188] sm:$0xff] }
  0x77   : > { %v7626_v18 = vpop.permute.xlu2 %828 }
  0x78   : > { %13631 = vst [vmem:[#allocation7_spill] sm:$0xff] %v7626_v18  ;;  %v7769_v12 = vmul.f32 %v1733_v56, %v7626_v18 }
  0x7a   : > { %13652 = vst [vmem:[#allocation28_spill] sm:$0xff] %v7769_v12 }
  0x7d   : > { %1008 = vperm.xlu2 %6027, %v686_v24   ;;  %v450_v24 = vadd.f32 %v7465_v32, %v374_v17 }
  0x7e   : > { %1003 = vperm.xlu1 %6026, %v685_v25   ;;  %998 = vperm.xlu0 %6025, %v684_v26   ;;  %v451_v25 = vadd.f32 %v7465_v32, %v375_v19  ;;  %v515_v19 = vmax.f32 %v443_v60, 0.0  ;;  %v307_v60 = vld [vmem:[%s7449_s30 + $0x158] sm:$0xff] }
  0x7f   : > { %v7649_v36 = vpop.permute.xlu2 %843  ;;  %v522_v33 = vmax.f32 %v450_v24, 0.0  ;;  %v303_v24 = vld [vmem:[%s7449_s30 + $0x138] sm:$0xff] }
  0x80   : > { %13632 = vst [vmem:[#allocation8_spill] sm:$0xff] %v7649_v36  ;;  %v7653_v39 = vpop.permute.xlu1 %798  ;;  %v7655_v40 = vpop.permute.xlu0 %788  ;;  %v523_v41 = vmax.f32 %v451_v25, 0.0  ;;  %v380_v25 = vmul.f32 %v7460_v31, %v304_v22  ;;  %v1742_v22 = vld [vmem:[#allocation2 + $0xb8] sm:$0xff] }
  0x81   : > { %13633 = vst [vmem:[#allocation9_spill] sm:$0xff] %v7653_v39  ;;  %v7685_v4 = vmul.f32 %v1727_v54, %v7653_v39  ;;  %v7691_v6 = vmul.f32 %v1725_v57, %v7655_v40  ;;  %v8760_v39 = vld [vmem:[#allocation2 + $0xb2] sm:$0xff] }
  0x82   : > { %13634 = vst [vmem:[#allocation10_spill] sm:$0xff] %v7655_v40 }
  0x83   : > { %13638 = vst [vmem:[#allocation14_spill] sm:$0xff] %v7685_v4  ;;  %v7318_v4 = vmov 2  }
  0x84   : > { %13640 = vst [vmem:[#allocation16_spill] sm:$0xff] %v7691_v6 }
  0x85   : > { %1023 = vperm.xlu2 %6027, %v689_v42   ;;  %604 = vst.msk [vmem:[#allocation2 + $0x129] sm:$0xff] %vm560_vm0, %v522_v33  ;;  %v512_v42 = vmax.f32 %v440_v28, 0.0  ;;  %v294_v28 = vld [vmem:[%s7449_s30 + $0xf0] sm:$0xff] }
  0x86   : > { %1018 = vperm.xlu1 %6026, %v688_v45   ;;  %1013 = vperm.xlu0 %6025, %v687_v46   ;;  %v302_v45 = vld [vmem:[%s7449_s30 + $0x130] sm:$0xff]  ;;  %605 = vst.msk [vmem:[#allocation2 + $0x131] sm:$0xff] %vm560_vm0, %v523_v41  ;;  %v377_v46 = vmul.f32 %v7460_v31, %v301_v44  ;;  %v456_v41 = vadd.f32 %v7465_v32, %v380_v25 }
  0x87   : > { %v7676_v58 = vpop.permute.xlu2 %858  ;;  %v378_v48 = vmul.f32 %v7460_v31, %v302_v45  ;;  %594 = vst.msk [vmem:[#allocation2 + $0xd9] sm:$0xff] %vm560_vm0, %v512_v42  ;;  %v1737_v44 = vld [vmem:[#allocation2 + $0x90] sm:$0xff] }
  0x88   : > { %13635 = vst [vmem:[#allocation11_spill] sm:$0xff] %v7676_v58  ;;  %v7680_v61 = vpop.permute.xlu1 %803  ;;  %v7682_v63 = vpop.permute.xlu0 %793  ;;  %v453_v54 = vadd.f32 %v7465_v32, %v377_v46  ;;  %v528_v49 = vmax.f32 %v456_v41, 0.0  ;;  %v1745_v33 = vld [vmem:[#allocation2 + $0xd0] sm:$0xff] }
  0x89   : > { %13636 = vst [vmem:[#allocation12_spill] sm:$0xff] %v7680_v61  ;;  %v7688_v5 = vmul.f32 %v1728_v55, %v7680_v61  ;;  %v7694_v7 = vmul.f32 %v1726_v2, %v7682_v63  ;;  %v454_v55 = vadd.f32 %v7465_v32, %v378_v48 }
  0x8a   : > { %13637 = vst [vmem:[#allocation13_spill] sm:$0xff] %v7682_v63  ;;  %v8804_v63 = vld [vmem:[#allocation2 + $0xc2] sm:$0xff] }
  0x8b   : > { %13639 = vst [vmem:[#allocation15_spill] sm:$0xff] %v7688_v5  ;;  %v526_v17 = vmax.f32 %v454_v55, 0.0 }
  0x8c   : > { %13641 = vst [vmem:[#allocation17_spill] sm:$0xff] %v7694_v7 }
  0x8d   : > { %1038 = vperm.xlu2 %6027, %v692_v9   ;;  %v525_v9 = vmax.f32 %v453_v54, 0.0  ;;  %608 = vst.msk [vmem:[#allocation2 + $0x149] sm:$0xff] %vm560_vm0, %v526_v17  ;;  %v700_v54 = vld [vmem:[%s13086_s3 + $0x1d0] sm:$0xff]  ;;  %v297_v17 = vld [vmem:[%s7449_s30 + $0x108] sm:$0xff] }
  0x8e   : > { %1033 = vperm.xlu1 %6026, %v691_v10   ;;  %1028 = vperm.xlu0 %6025, %v690_v13   ;;  %v7763_v10 = vmul.f32 %v1736_v52, %v7649_v36  ;;  %597 = vst.msk [vmem:[#allocation2 + $0xf1] sm:$0xff] %vm560_vm0, %v515_v19 }
  0x8f   : > { %v7720_v26 = vpop.permute.xlu2 %873  ;;  %607 = vst.msk [vmem:[#allocation2 + $0x141] sm:$0xff] %vm560_vm0, %v525_v9  ;;  %v308_v9 = vld [vmem:[%s7449_s30 + $0x160] sm:$0xff] }
  0x90   : > { %13642 = vst [vmem:[#allocation18_spill] sm:$0xff] %v7720_v26  ;;  %v7723_v29 = vpop.permute.xlu1 %823  ;;  %v7725_v30 = vpop.permute.xlu0 %818 }
  0x91   : > { %13643 = vst [vmem:[#allocation19_spill] sm:$0xff] %v7723_v29  ;;  %v7728_v34 = vmul.f32 %v1732_v23, %v7723_v29  ;;  %v7731_v35 = vmul.f32 %v1731_v27, %v7725_v30  ;;  %v305_v23 = vld [vmem:[%s7449_s30 + $0x148] sm:$0xff]  ;;  %v7177_v29 = vld [vmem:[%s13086_s3 + $0x1f0] sm:$0xff] }
  0x92   : > { %13644 = vst [vmem:[#allocation20_spill] sm:$0xff] %v7725_v30  ;;  %v381_v27 = vmul.f32 %v7460_v31, %v305_v23  ;;  %v1741_v23 = vld [vmem:[#allocation2 + $0xb0] sm:$0xff] }
  0x93   : > { %13645 = vst [vmem:[#allocation21_spill] sm:$0xff] %v7728_v34 }
  0x94   : > { %13646 = vst [vmem:[#allocation22_spill] sm:$0xff] %v7731_v35  ;;  %v457_v42 = vadd.f32 %v7465_v32, %v381_v27 }
  0x95   : > { %1053 = vperm.xlu2 %6027, %v695_v37   ;;  %13650 = vst [vmem:[#allocation26_spill] sm:$0xff] %v7763_v10  ;;  %v370_v37 = vmul.f32 %v7460_v31, %v294_v28  ;;  %v1739_v28 = vld [vmem:[#allocation2 + $0xa0] sm:$0xff]  ;;  %v1754_v10 = vld [vmem:[#allocation2 + $0x118] sm:$0xff] }
  0x96   : > { %1048 = vperm.xlu1 %6026, %v694_v38   ;;  %1043 = vperm.xlu0 %6025, %v693_v43   ;;  %v1738_v38 = vld [vmem:[#allocation2 + $0x98] sm:$0xff]  ;;  %v529_v55 = vmax.f32 %v457_v42, 0.0  ;;  %610 = vst.msk [vmem:[#allocation2 + $0x159] sm:$0xff] %vm560_vm0, %v528_v49  ;;  %v7841_v49 = vmul.f32 %v1742_v22, %v7720_v26 }
  0x97   : > { %v7755_v57 = vpop.permute.xlu2 %888  ;;  %v446_v45 = vadd.f32 %v7465_v32, %v370_v37 }
  0x98   : > { %13647 = vst [vmem:[#allocation23_spill] sm:$0xff] %v7755_v57  ;;  %v7758_v0 = vpop.permute.xlu1 %838  ;;  %v7760_v2 = vpop.permute.xlu0 %833 }
  0x99   : > { %13648 = vst [vmem:[#allocation24_spill] sm:$0xff] %v7758_v0  ;;  %v7766_v11 = vmul.f32 %v1735_v53, %v7758_v0  ;;  %v7772_v13 = vmul.f32 %v1734_v59, %v7760_v2  ;;  %v701_v53 = vld [vmem:[%s13086_s3 + $0x1d8] sm:$0xff]  ;;  %v518_v56 = vmax.f32 %v446_v45, 0.0  ;;  %v699_v59 = vld [vmem:[%s13086_s3 + $0x1c8] sm:$0xff] }
  0x9a   : > { %13649 = vst [vmem:[#allocation25_spill] sm:$0xff] %v7760_v2 }
  0x9b   : > { %13651 = vst [vmem:[#allocation27_spill] sm:$0xff] %v7766_v11  ;;  %v309_v11 = vld [vmem:[%s7449_s30 + $0x168] sm:$0xff] }
  0x9c   : > { %13653 = vst [vmem:[#allocation29_spill] sm:$0xff] %v7772_v13 }
  0x9d   : > { %1068 = vperm.xlu2 %6027, %v698_v14   ;;  %611 = vst.msk [vmem:[#allocation2 + $0x161] sm:$0xff] %vm560_vm0, %v529_v55  ;;  %v383_v14 = vmul.f32 %v7460_v31, %v307_v60 }
  0x9e   : > { %1063 = vperm.xlu1 %6026, %v697_v15   ;;  %1058 = vperm.xlu0 %6025, %v696_v20   ;;  %v384_v15 = vmul.f32 %v7460_v31, %v308_v9  ;;  %600 = vst.msk [vmem:[#allocation2 + $0x109] sm:$0xff] %vm560_vm0, %v518_v56  ;;  %v373_v20 = vmul.f32 %v7460_v31, %v297_v17  ;;  %v704_v56 = vld [vmem:[%s13086_s3 + $0x1f0] sm:$0xff]  ;;  %v702_v9 = vld [vmem:[%s13086_s3 + $0x1e0] sm:$0xff]  ;;  %v311_v17 = vld [vmem:[%s7449_s30 + $0x178] sm:$0xff] }
  0x9f   : > { %v7798_v43 = vpop.permute.xlu2 %903  ;;  %v459_v25 = vadd.f32 %v7465_v32, %v383_v14  ;;  %13662 = vst [vmem:[#allocation38_spill] sm:$0xff] %v7841_v49 }
  0xa0   : > { %13654 = vst [vmem:[#allocation30_spill] sm:$0xff] %v7798_v43  ;;  %v7801_v46 = vpop.permute.xlu1 %853  ;;  %v7803_v48 = vpop.permute.xlu0 %848  ;;  %v460_v27 = vadd.f32 %v7465_v32, %v384_v15  ;;  %v449_v41 = vadd.f32 %v7465_v32, %v373_v20  ;;  %v310_v15 = vld [vmem:[%s7449_s30 + $0x170] sm:$0xff] }
  0xa1   : > { %13655 = vst [vmem:[#allocation31_spill] sm:$0xff] %v7801_v46  ;;  %v7806_v51 = vmul.f32 %v1738_v38, %v7801_v46  ;;  %v7809_v52 = vmul.f32 %v1737_v44, %v7803_v48  ;;  %v1740_v38 = vld [vmem:[#allocation2 + $0xa8] sm:$0xff]  ;;  %v531_v45 = vmax.f32 %v459_v25, 0.0  ;;  %v386_v22 = vmul.f32 %v7460_v31, %v310_v15  ;;  %v300_v25 = vld [vmem:[%s7449_s30 + $0x120] sm:$0xff] }
  0xa2   : > { %13656 = vst [vmem:[#allocation32_spill] sm:$0xff] %v7803_v48  ;;  %v532_v60 = vmax.f32 %v460_v27, 0.0  ;;  %v521_v14 = vmax.f32 %v449_v41, 0.0  ;;  %v1743_v15 = vld [vmem:[#allocation2 + $0xc0] sm:$0xff]  ;;  %v7173_v48 = vld [vmem:[%s13086_s3 + $0x1c8] sm:$0xff] }
  0xa3   : > { %13657 = vst [vmem:[#allocation33_spill] sm:$0xff] %v7806_v51  ;;  %v462_v41 = vadd.f32 %v7465_v32, %v386_v22  ;;  %v7892_v22 = vld [vmem:[%s13086_s3 + $0x208] sm:$0xff] }
  0xa4   : > { %13658 = vst [vmem:[#allocation34_spill] sm:$0xff] %v7809_v52 }
  0xa5   : > { %1083 = vperm.xlu2 %6027, %v701_v53   ;;  %613 = vst.msk [vmem:[#allocation2 + $0x171] sm:$0xff] %vm560_vm0, %v531_v45 }
  0xa6   : > { %1078 = vperm.xlu1 %6026, %v700_v54   ;;  %1073 = vperm.xlu0 %6025, %v699_v59   ;;  %v7847_v54 = vmul.f32 %v1739_v28, %v7676_v58  ;;  %v703_v59 = vld [vmem:[%s13086_s3 + $0x1e8] sm:$0xff]  ;;  %614 = vst.msk [vmem:[#allocation2 + $0x179] sm:$0xff] %vm560_vm0, %v532_v60  ;;  %v376_v28 = vmul.f32 %v7460_v31, %v300_v25  ;;  %v8703_v58 = vld [vmem:[#allocation2 + $0x92] sm:$0xff] }
  0xa7   : > { %v7833_v37 = vpop.permute.xlu2 %918  ;;  %603 = vst.msk [vmem:[#allocation2 + $0x121] sm:$0xff] %vm560_vm0, %v521_v14  ;;  %v534_v14 = vmax.f32 %v462_v41, 0.0  ;;  %v313_v41 = vld [vmem:[%s7449_s30 + $0x188] sm:$0xff] }
  0xa8   : > { %13659 = vst [vmem:[#allocation35_spill] sm:$0xff] %v7833_v37  ;;  %v7836_v42 = vpop.permute.xlu1 %868  ;;  %v7838_v44 = vpop.permute.xlu0 %863  ;;  %v389_v27 = vmul.f32 %v7460_v31, %v313_v41 }
  0xa9   : > { %13660 = vst [vmem:[#allocation36_spill] sm:$0xff] %v7836_v42  ;;  %v7844_v53 = vmul.f32 %v1741_v23, %v7836_v42  ;;  %v7850_v55 = vmul.f32 %v1740_v38, %v7838_v44  ;;  %v387_v23 = vmul.f32 %v7460_v31, %v311_v17  ;;  %v1744_v38 = vld [vmem:[#allocation2 + $0xc8] sm:$0xff]  ;;  %v452_v17 = vadd.f32 %v7465_v32, %v376_v28 }
  0xaa   : > { %13661 = vst [vmem:[#allocation37_spill] sm:$0xff] %v7838_v44  ;;  %v465_v41 = vadd.f32 %v7465_v32, %v389_v27  ;;  %v7172_v44 = vld [vmem:[%s13086_s3 + $0x1d0] sm:$0xff] }
  0xab   : > { %13663 = vst [vmem:[#allocation39_spill] sm:$0xff] %v7844_v53  ;;  %v463_v45 = vadd.f32 %v7465_v32, %v387_v23  ;;  %v7897_v23 = vld [vmem:[%s13086_s3 + $0x200] sm:$0xff]  ;;  %v524_v28 = vmax.f32 %v452_v17, 0.0  ;;  %v379_v17 = vmul.f32 %v7460_v31, %v303_v24  ;;  %v1750_v53 = vld [vmem:[#allocation2 + $0xf8] sm:$0xff] }
  0xac   : > { %13664 = vst [vmem:[#allocation40_spill] sm:$0xff] %v7847_v54  ;;  %v537_v16 = vmax.f32 %v465_v41, 0.0 }
  0xad   : > { %13665 = vst [vmem:[#allocation41_spill] sm:$0xff] %v7850_v55  ;;  %1098 = vperm.xlu2 %6027, %v704_v56   ;;  %v535_v25 = vmax.f32 %v463_v45, 0.0  ;;  %v1746_v45 = vld [vmem:[#allocation2 + $0xd8] sm:$0xff]  ;;  %v320_v55 = vld [vmem:[%s7449_s30 + $0x1c0] sm:$0xff] }
  0xae   : > { %1093 = vperm.xlu1 %6026, %v703_v59   ;;  %1088 = vperm.xlu0 %6025, %v702_v9   ;;  %616 = vst.msk [vmem:[#allocation2 + $0x189] sm:$0xff] %vm560_vm0, %v534_v14  ;;  %v1748_v14 = vld [vmem:[#allocation2 + $0xe8] sm:$0xff]  ;;  %v396_v51 = vmul.f32 %v7460_v31, %v320_v55 }
  0xaf   : > { %v7876_v60 = vpop.permute.xlu2 %933  ;;  %617 = vst.msk [vmem:[#allocation2 + $0x191] sm:$0xff] %vm560_vm0, %v535_v25  ;;  %v1747_v25 = vld [vmem:[#allocation2 + $0xe0] sm:$0xff]  ;;  %v7928_v21 = vmul.f32 %v1748_v14, %v7798_v43  ;;  %v7947_v14 = vld [vmem:[%s13086_s3 + $0x218] sm:$0xff] }
  0xb0   : > { %13666 = vst [vmem:[#allocation42_spill] sm:$0xff] %v7876_v60  ;;  %v7879_v20 = vpop.permute.xlu1 %883  ;;  %v7881_v56 = vpop.permute.xlu0 %878  ;;  %v8027_v35 = vmul.f32 %v1754_v10, %v7876_v60  ;;  %v398_v10 = vmul.f32 %v7460_v31, %v322_v62  ;;  %v7113_v62 = vld [vmem:[%s13086_s3 + $0x10] sm:$0xff] }
  0xb1   : > { %13667 = vst [vmem:[#allocation43_spill] sm:$0xff] %v7879_v20  ;;  %v7884_v59 = vmul.f32 %v1744_v38, %v7879_v20  ;;  %v7887_v9 = vmul.f32 %v1743_v15, %v7881_v56  ;;  %v7903_v38 = vld [vmem:[%s13086_s3 + $0x1f8] sm:$0xff]  ;;  %v314_v15 = vld [vmem:[%s7449_s30 + $0x190] sm:$0xff] }
  0xb2   : > { %13668 = vst [vmem:[#allocation44_spill] sm:$0xff] %v7881_v56  ;;  %v390_v19 = vmul.f32 %v7460_v31, %v314_v15  ;;  %v7169_v56 = vld [vmem:[%s13086_s3 + $0x1b8] sm:$0xff]  ;;  %v7170_v20 = vld [vmem:[%s13086_s3 + $0x1b0] sm:$0xff] }
  0xb3   : > { %13669 = vst [vmem:[#allocation45_spill] sm:$0xff] %v7884_v59  ;;  %v317_v59 = vld [vmem:[%s7449_s30 + $0x1a8] sm:$0xff] }
  0xb4   : > { %13670 = vst [vmem:[#allocation46_spill] sm:$0xff] %v7887_v9  ;;  %v466_v15 = vadd.f32 %v7465_v32, %v390_v19  ;;  %v7934_v19 = vmul.f32 %v1745_v33, %v7755_v57  ;;  %v7953_v33 = vld [vmem:[%s13086_s3 + $0x210] sm:$0xff]  ;;  %v393_v54 = vmul.f32 %v7460_v31, %v317_v59  ;;  %v7171_v57 = vld [vmem:[%s13086_s3 + $0x1c0] sm:$0xff] }
  0xb5   : > { %1113 = vperm.xlu2 %6027, %v7892_v22   ;;  %606 = vst.msk [vmem:[#allocation2 + $0x139] sm:$0xff] %vm560_vm0, %v524_v28  ;;  %v455_v28 = vadd.f32 %v7465_v32, %v379_v17  ;;  %v7942_v17 = vld [vmem:[%s13086_s3 + $0x220] sm:$0xff] }
  0xb6   : > { %1108 = vperm.xlu1 %6026, %v7897_v23   ;;  %1103 = vperm.xlu0 %6025, %v7903_v38   ;;  %13674 = vst [vmem:[#allocation50_spill] sm:$0xff] %v7928_v21  ;;  %v538_v41 = vmax.f32 %v466_v15, 0.0  ;;  %v306_v15 = vld [vmem:[%s7449_s30 + $0x150] sm:$0xff]  ;;  %v469_v59 = vadd.f32 %v7465_v32, %v393_v54  ;;  %v7988_v54 = vld [vmem:[%s13086_s3 + $0x238] sm:$0xff] }
  0xb7   : > { %v7920_v50 = vpop.permute.xlu2 %948  ;;  %13676 = vst [vmem:[#allocation52_spill] sm:$0xff] %v7934_v19 }
  0xb8   : > { %13671 = vst [vmem:[#allocation47_spill] sm:$0xff] %v7920_v50  ;;  %v7923_v8 = vpop.permute.xlu1 %898  ;;  %v7925_v24 = vpop.permute.xlu0 %893 }
  0xb9   : > { %13672 = vst [vmem:[#allocation48_spill] sm:$0xff] %v7923_v8  ;;  %v7931_v27 = vmul.f32 %v1747_v25, %v7923_v8  ;;  %v7937_v9 = vmul.f32 %v1746_v45, %v7925_v24  ;;  %v527_v25 = vmax.f32 %v455_v28, 0.0  ;;  %v316_v45 = vld [vmem:[%s7449_s30 + $0x1a0] sm:$0xff]  ;;  %v382_v28 = vmul.f32 %v7460_v31, %v306_v15 }
  0xba   : > { %13673 = vst [vmem:[#allocation49_spill] sm:$0xff] %v7925_v24  ;;  %v392_v49 = vmul.f32 %v7460_v31, %v316_v45  ;;  %v8655_v24 = vld [vmem:[#allocation2 + $0x82] sm:$0xff] }
  0xbb   : > { %13675 = vst [vmem:[#allocation51_spill] sm:$0xff] %v7931_v27  ;;  %v458_v27 = vadd.f32 %v7465_v32, %v382_v28  ;;  %v7993_v28 = vld [vmem:[%s13086_s3 + $0x230] sm:$0xff] }
  0xbc   : > { %13677 = vst [vmem:[#allocation53_spill] sm:$0xff] %v7937_v9  ;;  %v541_v9 = vmax.f32 %v469_v59, 0.0 }
  0xbd   : > { %619 = vst.msk [vmem:[#allocation2 + $0x1a1] sm:$0xff] %vm560_vm0, %v537_v16  ;;  %1128 = vperm.xlu2 %6027, %v7942_v17   ;;  %v1749_v16 = vld [vmem:[#allocation2 + $0xf0] sm:$0xff] }
  0xbe   : > { %620 = vst.msk [vmem:[#allocation2 + $0x1a9] sm:$0xff] %vm560_vm0, %v538_v41  ;;  %1123 = vperm.xlu1 %6026, %v7947_v14   ;;  %1118 = vperm.xlu0 %6025, %v7953_v33   ;;  %v468_v41 = vadd.f32 %v7465_v32, %v392_v49 }
  0xbf   : > { %609 = vst.msk [vmem:[#allocation2 + $0x151] sm:$0xff] %vm560_vm0, %v527_v25  ;;  %v7972_v45 = vpop.permute.xlu2 %963 }
  0xc0   : > { %13678 = vst [vmem:[#allocation54_spill] sm:$0xff] %v7972_v45  ;;  %v7975_v21 = vpop.permute.xlu1 %913  ;;  %v7977_v25 = vpop.permute.xlu0 %908  ;;  %v540_v15 = vmax.f32 %v468_v41, 0.0  ;;  %v530_v41 = vmax.f32 %v458_v27, 0.0  ;;  %v385_v27 = vmul.f32 %v7460_v31, %v309_v11 }
  0xc1   : > { %13679 = vst [vmem:[#allocation55_spill] sm:$0xff] %v7975_v21  ;;  %v7980_v19 = vmul.f32 %v1750_v53, %v7975_v21  ;;  %v7983_v49 = vmul.f32 %v1749_v16, %v7977_v25  ;;  %v7999_v53 = vld [vmem:[%s13086_s3 + $0x228] sm:$0xff]  ;;  %v319_v16 = vld [vmem:[%s7449_s30 + $0x1b8] sm:$0xff] }
  0xc2   : > { %13680 = vst [vmem:[#allocation56_spill] sm:$0xff] %v7977_v25  ;;  %v395_v52 = vmul.f32 %v7460_v31, %v319_v16  ;;  %v472_v16 = vadd.f32 %v7465_v32, %v396_v51 }
  0xc3   : > { %13681 = vst [vmem:[#allocation57_spill] sm:$0xff] %v7980_v19 }
  0xc4   : > { %13682 = vst [vmem:[#allocation58_spill] sm:$0xff] %v7983_v49  ;;  %v471_v55 = vadd.f32 %v7465_v32, %v395_v52  ;;  %v1752_v49 = vld [vmem:[#allocation2 + $0x108] sm:$0xff]  ;;  %v544_v34 = vmax.f32 %v472_v16, 0.0 }
  0xc5   : > { %622 = vst.msk [vmem:[#allocation2 + $0x1b9] sm:$0xff] %vm560_vm0, %v540_v15  ;;  %1143 = vperm.xlu2 %6027, %v7988_v54   ;;  %v1751_v15 = vld [vmem:[#allocation2 + $0x100] sm:$0xff]  ;;  %v1756_v16 = vld [vmem:[#allocation2 + $0x128] sm:$0xff] }
  0xc6   : > { %623 = vst.msk [vmem:[#allocation2 + $0x1c1] sm:$0xff] %vm560_vm0, %v541_v9  ;;  %1138 = vperm.xlu1 %6026, %v7993_v28   ;;  %1133 = vperm.xlu0 %6025, %v7999_v53   ;;  %v1753_v9 = vld [vmem:[#allocation2 + $0x110] sm:$0xff]  ;;  %v543_v12 = vmax.f32 %v471_v55, 0.0  ;;  %v8024_v13 = vmul.f32 %v1751_v15, %v7833_v37  ;;  %v399_v15 = vmul.f32 %v7460_v31, %v323_v3  ;;  %v7114_v3 = vld [vmem:[%s13086_s3 + $0x8] sm:$0xff] }
  0xc7   : > { %612 = vst.msk [vmem:[#allocation2 + $0x169] sm:$0xff] %vm560_vm0, %v530_v41  ;;  %v8016_v59 = vpop.permute.xlu2 %978  ;;  %v461_v41 = vadd.f32 %v7465_v32, %v385_v27  ;;  %v8585_v37 = vld [vmem:[#allocation2 + $0x6a] sm:$0xff] }
  0xc8   : > { %13683 = vst [vmem:[#allocation59_spill] sm:$0xff] %v8016_v59  ;;  %v8019_v19 = vpop.permute.xlu1 %928  ;;  %v8021_v11 = vpop.permute.xlu0 %923 }
  0xc9   : > { %13684 = vst [vmem:[#allocation60_spill] sm:$0xff] %v8019_v19  ;;  %v8030_v52 = vmul.f32 %v1753_v9, %v8019_v19  ;;  %v8033_v51 = vmul.f32 %v1752_v49, %v8021_v11  ;;  %v533_v27 = vmax.f32 %v461_v41, 0.0  ;;  %v312_v9 = vld [vmem:[%s7449_s30 + $0x180] sm:$0xff]  ;;  %v474_v41 = vadd.f32 %v7465_v32, %v398_v10  ;;  %v7167_v19 = vld [vmem:[%s13086_s3 + $0x198] sm:$0xff] }
  0xca   : > { %13685 = vst [vmem:[#allocation61_spill] sm:$0xff] %v8021_v11  ;;  %v7115_v10 = vld [vmem:[%s13086_s3] sm:$0xff] }
  0xcb   : > { %13686 = vst [vmem:[#allocation62_spill] sm:$0xff] %v8024_v13  ;;  %v546_v55 = vmax.f32 %v474_v41, 0.0  ;;  %v8080_v41 = vld [vmem:[%s13084_s1] ss:$0 sm:$0xff]  ;;  %v315_v13 = vld [vmem:[%s7449_s30 + $0x198] sm:$0xff] }
  0xcc   : > { %13687 = vst [vmem:[#allocation63_spill] sm:$0xff] %v8027_v35  ;;  %v326_v35 = vld [vmem:[%s7449_s30 + $0x1f0] sm:$0xff] }
  0xcd   : > { %13688 = vst [vmem:[#allocation64_spill] sm:$0xff] %v8030_v52  ;;  %6030 = vset.pattern.permute.xlu2 %v7318_v4 }
  0xce   : > { %13689 = vst [vmem:[#allocation65_spill] sm:$0xff] %v8033_v51  ;;  %6029 = vset.pattern.permute.xlu1 %v7318_v4  ;;  %6028 = vset.pattern.permute.xlu0 %v7318_v4  ;;  %v1755_v4 = vld [vmem:[#allocation2 + $0x120] sm:$0xff] }
  0xcf   : > { %625 = vst.msk [vmem:[#allocation2 + $0x1d1] sm:$0xff] %vm560_vm0, %v543_v12  ;;  %v388_v12 = vmul.f32 %v7460_v31, %v312_v9  ;;  %1371 = vperm.xlu2 %6030, %v7113_v62   ;;  %1367 = vperm.xlu1 %6029, %v7114_v3  }
  0xd0   : > { %626 = vst.msk [vmem:[#allocation2 + $0x1d9] sm:$0xff] %vm560_vm0, %v544_v34  ;;  %v475_v34 = vadd.f32 %v7465_v32, %v399_v15  ;;  %1363 = vperm.xlu0 %6028, %v7115_v10   ;;  %v8062_v15 = vpop.permute.xlu1 %943  ;;  %v8064_v62 = vpop.permute.xlu0 %938 }
  0xd1   : > { %615 = vst.msk [vmem:[#allocation2 + $0x181] sm:$0xff] %vm560_vm0, %v533_v27  ;;  %v8056_v27 = vpop.permute.xlu2 %993  ;;  %v464_v9 = vadd.f32 %v7465_v32, %v388_v12  ;;  %v8067_v49 = vmul.f32 %v1756_v16, %v8062_v15  ;;  %v8070_v3 = vmul.f32 %v1755_v4, %v8064_v62  ;;  %v325_v12 = vld [vmem:[%s7449_s30 + $0x1e8] sm:$0xff]  ;;  %v402_v16 = vmul.f32 %v8080_v41, %v326_v35  ;;  %v1757_v35 = vld [vmem:[#allocation2 + $0x130] sm:$0xff] }
  0xd2   : > { %13690 = vst [vmem:[#allocation66_spill] sm:$0xff] %v8056_v27  ;;  %v547_v52 = vmax.f32 %v475_v34, 0.0  ;;  %v401_v10 = vmul.f32 %v7460_v31, %v325_v12  ;;  %v1760_v4 = vld [vmem:[#allocation2 + $0x148] sm:$0xff]  ;;  %v8091_v31 = vld [vmem:[%s13085_s2] ss:$0 sm:$0xff]  ;;  %v8118_v6 = vmul.f32 %v1757_v35, %v7920_v50  ;;  %v318_v35 = vld [vmem:[%s7449_s30 + $0x1b0] sm:$0xff] }
  0xd3   : > { %13691 = vst [vmem:[#allocation67_spill] sm:$0xff] %v8062_v15  ;;  %v536_v32 = vmax.f32 %v464_v9, 0.0  ;;  %v1759_v9 = vld [vmem:[#allocation2 + $0x140] sm:$0xff]  ;;  %v478_v12 = vadd.f32 %v8091_v31, %v402_v16  ;;  %v7120_v16 = vld [vmem:[%s13086_s3 + $0x28] sm:$0xff] }
  0xd4   : > { %13692 = vst [vmem:[#allocation68_spill] sm:$0xff] %v8064_v62  ;;  %v7118_v34 = vld [vmem:[%s13086_s3 + $0x20] sm:$0xff]  ;;  %v329_v15 = vld [vmem:[%s7449_s30 + $0x208] sm:$0xff] }
  0xd5   : > { %13693 = vst [vmem:[#allocation69_spill] sm:$0xff] %v8067_v49  ;;  %v550_v7 = vmax.f32 %v478_v12, 0.0  ;;  %v328_v62 = vld [vmem:[%s7449_s30 + $0x200] sm:$0xff]  ;;  %v1762_v12 = vld [vmem:[#allocation2 + $0x158] sm:$0xff]  ;;  %v321_v50 = vld [vmem:[%s7449_s30 + $0x1c8] sm:$0xff] }
  0xd6   : > { %13694 = vst [vmem:[#allocation70_spill] sm:$0xff] %v8070_v3  ;;  %v1758_v3 = vld [vmem:[#allocation2 + $0x138] sm:$0xff] }
  0xd7   : > { %628 = vst.msk [vmem:[#allocation2 + $0x1e9] sm:$0xff] %vm560_vm0, %v546_v55  ;;  %v391_v55 = vmul.f32 %v8080_v41, %v315_v13  ;;  %1379 = vperm.xlu2 %6030, %v7118_v34   ;;  %v7119_v13 = vld [vmem:[%s13086_s3 + $0x18] sm:$0xff] }
  0xd8   : > { %629 = vst.msk [vmem:[#allocation2 + $0x1f1] sm:$0xff] %vm560_vm0, %v547_v52  ;;  %v477_v52 = vadd.f32 %v8091_v31, %v401_v10  ;;  %1375 = vperm.xlu1 %6029, %v7119_v13   ;;  %1383 = vperm.xlu0 %6028, %v7120_v16   ;;  %v8107_v49 = vpop.permute.xlu1 %958  ;;  %v8109_v34 = vpop.permute.xlu0 %953  ;;  %v8112_v13 = vmul.f32 %v1760_v4, %v7972_v45 }
  0xd9   : > { %618 = vst.msk [vmem:[#allocation2 + $0x199] sm:$0xff] %vm560_vm0, %v536_v32  ;;  %v8101_v32 = vpop.permute.xlu2 %1008  ;;  %v467_v10 = vadd.f32 %v8091_v31, %v391_v55  ;;  %v8115_v5 = vmul.f32 %v1759_v9, %v8107_v49  ;;  %v8121_v55 = vmul.f32 %v1758_v3, %v8109_v34  ;;  %v404_v4 = vmul.f32 %v8080_v41, %v328_v62 }
  0xda   : > { %13695 = vst [vmem:[#allocation71_spill] sm:$0xff] %v8101_v32  ;;  %v549_v51 = vmax.f32 %v477_v52, 0.0  ;;  %v405_v9 = vmul.f32 %v8080_v41, %v329_v15  ;;  %v7122_v15 = vld [vmem:[%s13086_s3 + $0x30] sm:$0xff] }
  0xdb   : > { %13696 = vst [vmem:[#allocation72_spill] sm:$0xff] %v8107_v49  ;;  %v539_v16 = vmax.f32 %v467_v10, 0.0  ;;  %v480_v10 = vadd.f32 %v8091_v31, %v404_v4  ;;  %v7123_v4 = vld [vmem:[%s13086_s3 + $0x40] sm:$0xff]  ;;  %v334_v49 = vld [vmem:[%s7449_s30 + $0x230] sm:$0xff] }
  0xdc   : > { %13697 = vst [vmem:[#allocation73_spill] sm:$0xff] %v8109_v34  ;;  %v481_v45 = vadd.f32 %v8091_v31, %v405_v9  ;;  %v335_v34 = vld [vmem:[%s7449_s30 + $0x238] sm:$0xff] }
  0xdd   : > { %13698 = vst [vmem:[#allocation74_spill] sm:$0xff] %v8112_v13  ;;  %v552_v52 = vmax.f32 %v480_v10, 0.0  ;;  %v331_v13 = vld [vmem:[%s7449_s30 + $0x218] sm:$0xff]  ;;  %v397_v10 = vmul.f32 %v8080_v41, %v321_v50  ;;  %v1764_v50 = vld [vmem:[#allocation2 + $0x168] sm:$0xff] }
  0xde   : > { %13699 = vst [vmem:[#allocation75_spill] sm:$0xff] %v8115_v5  ;;  %v553_v5 = vmax.f32 %v481_v45, 0.0  ;;  %v1766_v45 = vld [vmem:[#allocation2 + $0x178] sm:$0xff] }
  0xdf   : > { %13700 = vst [vmem:[#allocation76_spill] sm:$0xff] %v8118_v6  ;;  %v332_v6 = vld [vmem:[%s7449_s30 + $0x220] sm:$0xff] }
  0xe0   : > { %13701 = vst [vmem:[#allocation77_spill] sm:$0xff] %v8121_v55  ;;  %1387 = vperm.xlu1 %6029, %v7122_v15   ;;  %1395 = vperm.xlu0 %6028, %v7123_v4   ;;  %v8150_v9 = vpop.permute.xlu1 %973  ;;  %v407_v4 = vmul.f32 %v8080_v41, %v331_v13  ;;  %v408_v55 = vmul.f32 %v8080_v41, %v332_v6  ;;  %v7125_v6 = vld [vmem:[%s13086_s3 + $0x48] sm:$0xff] }
  0xe1   : > { %631 = vst.msk [vmem:[#allocation2 + $0x201] sm:$0xff] %vm560_vm0, %v549_v51  ;;  %v394_v51 = vmul.f32 %v8080_v41, %v318_v35  ;;  %v8144_v62 = vpop.permute.xlu2 %1023  ;;  %v8155_v3 = vmul.f32 %v1762_v12, %v8150_v9 }
  0xe2   : > { %632 = vst.msk [vmem:[#allocation2 + $0x209] sm:$0xff] %vm560_vm0, %v550_v7  ;;  %v7121_v7 = vld [vmem:[%s13086_s3 + $0x38] sm:$0xff] }
  0xe3   : > { %621 = vst.msk [vmem:[#allocation2 + $0x1b1] sm:$0xff] %vm560_vm0, %v539_v16  ;;  %1391 = vperm.xlu2 %6030, %v7121_v7   ;;  %v1761_v16 = vld [vmem:[#allocation2 + $0x150] sm:$0xff]  ;;  %v470_v35 = vadd.f32 %v8091_v31, %v394_v51  ;;  %v8152_v7 = vpop.permute.xlu0 %968 }
  0xe4   : > { %13702 = vst [vmem:[#allocation78_spill] sm:$0xff] %v8144_v62  ;;  %v8158_v15 = vmul.f32 %v1761_v16, %v8152_v7  ;;  %v1765_v16 = vld [vmem:[#allocation2 + $0x170] sm:$0xff] }
  0xe5   : > { %13703 = vst [vmem:[#allocation79_spill] sm:$0xff] %v8150_v9  ;;  %v542_v51 = vmax.f32 %v470_v35, 0.0  ;;  %v484_v35 = vadd.f32 %v8091_v31, %v408_v55  ;;  %v7126_v55 = vld [vmem:[%s13086_s3 + $0x58] sm:$0xff] }
  0xe6   : > { %13704 = vst [vmem:[#allocation80_spill] sm:$0xff] %v8152_v7  ;;  %v1763_v7 = vld [vmem:[#allocation2 + $0x160] sm:$0xff] }
  0xe7   : > { %13705 = vst [vmem:[#allocation81_spill] sm:$0xff] %v8155_v3  ;;  %v8196_v3 = vmul.f32 %v1763_v7, %v8016_v59  ;;  %v556_v9 = vmax.f32 %v484_v35, 0.0  ;;  %v324_v7 = vld [vmem:[%s7449_s30 + $0x1e0] sm:$0xff]  ;;  %v1768_v35 = vld [vmem:[#allocation2 + $0x188] sm:$0xff]  ;;  %v1945_v59 = vld [vmem:[#allocation2 + $0x52] sm:$0xff] }
  0xe8   : > { %13706 = vst [vmem:[#allocation82_spill] sm:$0xff] %v8158_v15  ;;  %1399 = vperm.xlu1 %6029, %v7125_v6   ;;  %1407 = vperm.xlu0 %6028, %v7126_v55   ;;  %v8190_v6 = vmul.f32 %v1766_v45, %v8056_v27  ;;  %v410_v45 = vmul.f32 %v8080_v41, %v334_v49  ;;  %v7128_v49 = vld [vmem:[%s13086_s3 + $0x60] sm:$0xff] }
  0xe9   : > { %634 = vst.msk [vmem:[#allocation2 + $0x219] sm:$0xff] %vm560_vm0, %v552_v52  ;;  %v483_v52 = vadd.f32 %v8091_v31, %v407_v4  ;;  %v8179_v13 = vpop.permute.xlu2 %1038  ;;  %v8185_v4 = vpop.permute.xlu1 %988 }
  0xea   : > { %635 = vst.msk [vmem:[#allocation2 + $0x221] sm:$0xff] %vm560_vm0, %v553_v5  ;;  %v7124_v5 = vld [vmem:[%s13086_s3 + $0x50] sm:$0xff]  ;;  %v8193_v15 = vmul.f32 %v1765_v16, %v8185_v4  ;;  %v411_v16 = vmul.f32 %v8080_v41, %v335_v34 }
  0xeb   : > { %624 = vst.msk [vmem:[#allocation2 + $0x1c9] sm:$0xff] %vm560_vm0, %v542_v51  ;;  %1403 = vperm.xlu2 %6030, %v7124_v5   ;;  %v473_v51 = vadd.f32 %v8091_v31, %v397_v10  ;;  %v8187_v5 = vpop.permute.xlu0 %983  ;;  %v555_v12 = vmax.f32 %v483_v52, 0.0 }
  0xec   : > { %13707 = vst [vmem:[#allocation83_spill] sm:$0xff] %v8179_v13  ;;  %v8199_v10 = vmul.f32 %v1764_v50, %v8187_v5  ;;  %v487_v27 = vadd.f32 %v8091_v31, %v411_v16 }
  0xed   : > { %13708 = vst [vmem:[#allocation84_spill] sm:$0xff] %v8185_v4  ;;  %v545_v55 = vmax.f32 %v473_v51, 0.0  ;;  %v486_v51 = vadd.f32 %v8091_v31, %v410_v45  ;;  %v7129_v45 = vld [vmem:[%s13086_s3 + $0x70] sm:$0xff] }
  0xee   : > { %13709 = vst [vmem:[#allocation85_spill] sm:$0xff] %v8187_v5  ;;  %v7165_v4 = vld [vmem:[%s13086_s3 + $0x190] sm:$0xff]  ;;  %v7168_v5 = vld [vmem:[%s13086_s3 + $0x1a8] sm:$0xff] }
  0xef   : > { %13710 = vst [vmem:[#allocation86_spill] sm:$0xff] %v8190_v6  ;;  %v327_v6 = vld [vmem:[%s7449_s30 + $0x1f8] sm:$0xff] }
  0xf0   : > { %13711 = vst [vmem:[#allocation87_spill] sm:$0xff] %v8193_v15  ;;  %1411 = vperm.xlu1 %6029, %v7128_v49   ;;  %1419 = vperm.xlu0 %6028, %v7129_v45   ;;  %v559_v15 = vmax.f32 %v487_v27, 0.0  ;;  %v403_v45 = vmul.f32 %v8080_v41, %v327_v6  ;;  %v7130_v27 = vld [vmem:[%s13086_s3 + $0x80] sm:$0xff] }
  0xf1   : > { %13712 = vst [vmem:[#allocation88_spill] sm:$0xff] %v8196_v3  ;;  %v8222_v34 = vpop.permute.xlu2 %1053  ;;  %v8228_v16 = vpop.permute.xlu1 %1003 }
  0xf2   : > { %13713 = vst [vmem:[#allocation89_spill] sm:$0xff] %v8199_v10  ;;  %v8233_v50 = vmul.f32 %v1768_v35, %v8228_v16  ;;  %v1771_v35 = vld [vmem:[#allocation2 + $0x1a0] sm:$0xff]  ;;  %v479_v10 = vadd.f32 %v8091_v31, %v403_v45 }
  0xf3   : > { %637 = vst.msk [vmem:[#allocation2 + $0x231] sm:$0xff] %vm560_vm0, %v555_v12  ;;  %v400_v12 = vmul.f32 %v8080_v41, %v324_v7  ;;  %v8230_v52 = vpop.permute.xlu0 %998 }
  0xf4   : > { %638 = vst.msk [vmem:[#allocation2 + $0x239] sm:$0xff] %vm560_vm0, %v556_v9  ;;  %v7127_v9 = vld [vmem:[%s13086_s3 + $0x68] sm:$0xff]  ;;  %v551_v3 = vmax.f32 %v479_v10, 0.0 }
  0xf5   : > { %627 = vst.msk [vmem:[#allocation2 + $0x1e1] sm:$0xff] %vm560_vm0, %v545_v55  ;;  %1415 = vperm.xlu2 %6030, %v7127_v9   ;;  %v1767_v55 = vld [vmem:[#allocation2 + $0x180] sm:$0xff]  ;;  %v476_v7 = vadd.f32 %v8091_v31, %v400_v12  ;;  %v558_v9 = vmax.f32 %v486_v51, 0.0  ;;  %v1772_v51 = vld [vmem:[#allocation2 + $0x1a8] sm:$0xff] }
  0xf6   : > { %13714 = vst [vmem:[#allocation90_spill] sm:$0xff] %v8222_v34  ;;  %v8236_v49 = vmul.f32 %v1767_v55, %v8230_v52  ;;  %v1769_v55 = vld [vmem:[#allocation2 + $0x190] sm:$0xff] }
  0xf7   : > { %13715 = vst [vmem:[#allocation91_spill] sm:$0xff] %v8228_v16  ;;  %v548_v12 = vmax.f32 %v476_v7, 0.0  ;;  %v1770_v7 = vld [vmem:[#allocation2 + $0x198] sm:$0xff]  ;;  %v7164_v16 = vld [vmem:[%s13086_s3 + $0x180] sm:$0xff] }
  0xf8   : > { %13716 = vst [vmem:[#allocation92_spill] sm:$0xff] %v8230_v52  ;;  %v7135_v52 = vld [vmem:[%s13086_s3 + $0xa0] sm:$0xff] }
  0xf9   : > { %13717 = vst [vmem:[#allocation93_spill] sm:$0xff] %v8233_v50  ;;  %v8252_v6 = vpop.permute.xlu2 %1068 }
  0xfa   : > { %13718 = vst [vmem:[#allocation94_spill] sm:$0xff] %v8236_v49 }
  0xfb   : > { %640 = vst.msk [vmem:[#allocation2 + $0x249] sm:$0xff] %vm560_vm0, %v558_v9  ;;  %v7132_v9 = vld [vmem:[%s13086_s3 + $0x88] sm:$0xff]  ;;  %v8259_v45 = vpop.permute.xlu0 %1013 }
  0xfc   : > { %641 = vst.msk [vmem:[#allocation2 + $0x251] sm:$0xff] %vm560_vm0, %v559_v15  ;;  %v7131_v15 = vld [vmem:[%s13086_s3 + $0x78] sm:$0xff]  ;;  %1431 = vperm.xlu0 %6028, %v7132_v9   ;;  %v8271_v50 = vmul.f32 %v1770_v7, %v8259_v45  ;;  %v330_v9 = vld [vmem:[%s7449_s30 + $0x210] sm:$0xff] }
  0xfd   : > { %630 = vst.msk [vmem:[#allocation2 + $0x1f9] sm:$0xff] %vm560_vm0, %v548_v12  ;;  %1427 = vperm.xlu2 %6030, %v7130_v27   ;;  %1423 = vperm.xlu1 %6029, %v7131_v15   ;;  %v8257_v12 = vpop.permute.xlu1 %1018  ;;  %v8262_v27 = vmul.f32 %v1772_v51, %v8144_v62  ;;  %v8268_v15 = vmul.f32 %v1769_v55, %v8101_v32  ;;  %v1774_v62 = vld [vmem:[#allocation2 + $0x1b8] sm:$0xff]  ;;  %v1777_v32 = vld [vmem:[#allocation2 + $0x1d0] sm:$0xff] }
  0xfe   : > { %13719 = vst [vmem:[#allocation95_spill] sm:$0xff] %v8252_v6  ;;  %v8265_v49 = vmul.f32 %v1771_v35, %v8257_v12  ;;  %v406_v10 = vmul.f32 %v8080_v41, %v330_v9  ;;  %v7133_v55 = vld [vmem:[%s13086_s3 + $0x98] sm:$0xff]  ;;  %v1773_v9 = vld [vmem:[#allocation2 + $0x1b0] sm:$0xff] }
  0xff   : > { %13720 = vst [vmem:[#allocation96_spill] sm:$0xff] %v8257_v12 }
 0x100   : > { %13721 = vst [vmem:[#allocation97_spill] sm:$0xff] %v8259_v45  ;;  %v482_v35 = vadd.f32 %v8091_v31, %v406_v10  ;;  %v1775_v45 = vld [vmem:[#allocation2 + $0x1c0] sm:$0xff] }
 0x101   : > { %13722 = vst [vmem:[#allocation98_spill] sm:$0xff] %v8262_v27  ;;  %v8287_v7 = vpop.permute.xlu2 %1083 }
 0x102   : > { %13723 = vst [vmem:[#allocation99_spill] sm:$0xff] %v8265_v49  ;;  %v554_v49 = vmax.f32 %v482_v35, 0.0 }
 0x103   : > { %13724 = vst [vmem:[#allocation100_spill] sm:$0xff] %v8268_v15  ;;  %v8294_v10 = vpop.permute.xlu0 %1028 }
 0x104   : > { %13725 = vst [vmem:[#allocation101_spill] sm:$0xff] %v8271_v50  ;;  %1443 = vperm.xlu0 %6028, %v7135_v52   ;;  %v8300_v27 = vmul.f32 %v1773_v9, %v8294_v10  ;;  %v1778_v52 = vld [vmem:[#allocation2 + $0x1d8] sm:$0xff] }
 0x105   : > { %633 = vst.msk [vmem:[#allocation2 + $0x211] sm:$0xff] %vm560_vm0, %v551_v3  ;;  %1439 = vperm.xlu2 %6030, %v7133_v55   ;;  %v7134_v3 = vld [vmem:[%s13086_s3 + $0x90] sm:$0xff]  ;;  %v8292_v51 = vpop.permute.xlu1 %1033  ;;  %v7138_v9 = vld [vmem:[%s13086_s3 + $0xb8] sm:$0xff] }
 0x106   : > { %1435 = vperm.xlu1 %6029, %v7134_v3   ;;  %13726 = vst [vmem:[#allocation102_spill] sm:$0xff] %v8287_v7  ;;  %v8297_v55 = vmul.f32 %v1774_v62, %v8292_v51  ;;  %v333_v3 = vld [vmem:[%s7449_s30 + $0x228] sm:$0xff]  ;;  %v7136_v62 = vld [vmem:[%s13086_s3 + $0xb0] sm:$0xff]  ;;  %s7319_s30 = smov 32  }
 0x107   : > { %13727 = vst [vmem:[#allocation103_spill] sm:$0xff] %v8292_v51  ;;  %v409_v15 = vmul.f32 %v8080_v41, %v333_v3  ;;  %v1776_v41 = vld [vmem:[#allocation2 + $0x1c8] sm:$0xff] }
 0x108   : > { %13728 = vst [vmem:[#allocation104_spill] sm:$0xff] %v8294_v10  ;;  %v1944_v10 = vld [vmem:[#allocation2 + $0x4a] sm:$0xff] }
 0x109   : > { %13729 = vst [vmem:[#allocation105_spill] sm:$0xff] %v8297_v55  ;;  %v485_v12 = vadd.f32 %v8091_v31, %v409_v15  ;;  %v8314_v35 = vpop.permute.xlu2 %1098  ;;  %v1780_v55 = vld [vmem:[#allocation2 + $0x1e8] sm:$0xff] }
 0x10a   : > { %13730 = vst [vmem:[#allocation106_spill] sm:$0xff] %v8300_v27  ;;  %v7163_v51 = vld [vmem:[%s13086_s3 + $0x188] sm:$0xff] }
 0x10b   : > { %636 = vst.msk [vmem:[#allocation2 + $0x229] sm:$0xff] %vm560_vm0, %v554_v49  ;;  %v7137_v49 = vld [vmem:[%s13086_s3 + $0xa8] sm:$0xff]  ;;  %v8321_v15 = vpop.permute.xlu0 %1043  ;;  %v557_v3 = vmax.f32 %v485_v12, 0.0 }
 0x10c   : > { %13731 = vst [vmem:[#allocation107_spill] sm:$0xff] %v8314_v35  ;;  %1455 = vperm.xlu0 %6028, %v7138_v9   ;;  %v8333_v27 = vmul.f32 %v1776_v41, %v8321_v15  ;;  %v1779_v41 = vld [vmem:[#allocation2 + $0x1e0] sm:$0xff] }
 0x10d   : > { %1451 = vperm.xlu2 %6030, %v7136_v62   ;;  %v8319_v31 = vpop.permute.xlu1 %1048  ;;  %13733 = vst [vmem:[#allocation109_spill] sm:$0xff] %v8321_v15  ;;  %v8324_v62 = vmul.f32 %v1778_v52, %v8222_v34  ;;  %v7143_v34 = vld [vmem:[%s13086_s3 + $0xd8] sm:$0xff] }
 0x10e   : > { %1447 = vperm.xlu1 %6029, %v7137_v49   ;;  %13732 = vst [vmem:[#allocation108_spill] sm:$0xff] %v8319_v31  ;;  %v8327_v50 = vmul.f32 %v1777_v32, %v8319_v31  ;;  %v8330_v49 = vmul.f32 %v1775_v45, %v8179_v13  ;;  %v7139_v32 = vld [vmem:[%s13086_s3 + $0xc8] sm:$0xff]  ;;  %v7140_v45 = vld [vmem:[%s13086_s3 + $0xc0] sm:$0xff]  ;;  %v7160_v13 = vld [vmem:[%s13086_s3 + $0x170] sm:$0xff] }
 0x10f   : > { %13734 = vst [vmem:[#allocation110_spill] sm:$0xff] %v8324_v62  ;;  %v1784_v62 = vld [vmem:[#allocation2 + $0x208] sm:$0xff] }
 0x110   : > { %13735 = vst [vmem:[#allocation111_spill] sm:$0xff] %v8327_v50  ;;  %v8523_v31 = vld [vmem:[#allocation2 + $0x2a] sm:$0xff] }
 0x111   : > { %13736 = vst [vmem:[#allocation112_spill] sm:$0xff] %v8330_v49  ;;  %v8346_v52 = vpop.permute.xlu2 %1113  ;;  %v1783_v49 = vld [vmem:[#allocation2 + $0x200] sm:$0xff] }
 0x112   : > { %13737 = vst [vmem:[#allocation113_spill] sm:$0xff] %v8333_v27  ;;  %v1781_v27 = vld [vmem:[#allocation2 + $0x1f0] sm:$0xff] }
 0x113   : > { %639 = vst.msk [vmem:[#allocation2 + $0x241] sm:$0xff] %vm560_vm0, %v557_v3  ;;  %v7141_v3 = vld [vmem:[%s13086_s3 + $0xd0] sm:$0xff]  ;;  %v8353_v12 = vpop.permute.xlu0 %1058 }
 0x114   : > { %13738 = vst [vmem:[#allocation114_spill] sm:$0xff] %v8346_v52  ;;  %1467 = vperm.xlu0 %6028, %v7141_v3   ;;  %v7142_v3 = vld [vmem:[%s13086_s3 + $0xe0] sm:$0xff] }
 0x115   : > { %1463 = vperm.xlu2 %6030, %v7139_v32   ;;  %v8351_v9 = vpop.permute.xlu1 %1063  ;;  %13740 = vst [vmem:[#allocation116_spill] sm:$0xff] %v8353_v12  ;;  %v8359_v32 = vmul.f32 %v1779_v41, %v8353_v12  ;;  %v1782_v41 = vld [vmem:[#allocation2 + $0x1f8] sm:$0xff]  ;;  %v8379_v12 = vmul.f32 %v1784_v62, %v8287_v7 }
 0x116   : > { %1459 = vperm.xlu1 %6029, %v7140_v45   ;;  %13739 = vst [vmem:[#allocation115_spill] sm:$0xff] %v8351_v9  ;;  %v8356_v50 = vmul.f32 %v1780_v55, %v8351_v9  ;;  %v7144_v45 = vld [vmem:[%s13086_s3 + $0xe8] sm:$0xff]  ;;  %v1786_v7 = vld [vmem:[#allocation2 + $0x218] sm:$0xff]  ;;  %v7147_v9 = vld [vmem:[%s13086_s3 + $0x100] sm:$0xff] }
 0x117   : > { %13742 = vst [vmem:[#allocation118_spill] sm:$0xff] %v8359_v32 }
 0x118   : > { %13741 = vst [vmem:[#allocation117_spill] sm:$0xff] %v8356_v50 }
 0x119   : > { %v8369_v55 = vpop.permute.xlu2 %1128  ;;  %13746 = vst [vmem:[#allocation122_spill] sm:$0xff] %v8379_v12 }
 0x11a   : > { %13743 = vst [vmem:[#allocation119_spill] sm:$0xff] %v8369_v55 }
 0x11b   : > { %v8376_v50 = vpop.permute.xlu0 %1073 }
 0x11c   : > { %1479 = vperm.xlu0 %6028, %v7144_v45   ;;  %13745 = vst [vmem:[#allocation121_spill] sm:$0xff] %v8376_v50  ;;  %v8388_v55 = vmul.f32 %v1782_v41, %v8376_v50  ;;  %v5991_v45 = vld [vmem:[%s13087_s4 + $0x88] sm:$0xff] }
 0x11d   : > { %1475 = vperm.xlu2 %6030, %v7142_v3   ;;  %v8374_v32 = vpop.permute.xlu1 %1078  ;;  %5141 = vmatpush.bf16.msra.mxu2 %v5991_v45 }
 0x11e   : > { %1471 = vperm.xlu1 %6029, %v7143_v34   ;;  %13744 = vst [vmem:[#allocation120_spill] sm:$0xff] %v8374_v32  ;;  %v8382_v3 = vmul.f32 %v1783_v49, %v8374_v32  ;;  %v8385_v34 = vmul.f32 %v1781_v27, %v8252_v6  ;;  %v7145_v27 = vld [vmem:[%s13086_s3 + $0xf8] sm:$0xff]  ;;  %v7146_v49 = vld [vmem:[%s13086_s3 + $0xf0] sm:$0xff]  ;;  %v1792_v6 = vld [vmem:[#allocation2 + $0x248] sm:$0xff] }
 0x11f   : > { %13749 = vst [vmem:[#allocation125_spill] sm:$0xff] %v8388_v55  ;;  %v1785_v32 = vld [vmem:[#allocation2 + $0x210] sm:$0xff]  ;;  %v1787_v55 = vld [vmem:[#allocation2 + $0x220] sm:$0xff] }
 0x120   : > { %13747 = vst [vmem:[#allocation123_spill] sm:$0xff] %v8382_v3 }
 0x121   : > { %13748 = vst [vmem:[#allocation124_spill] sm:$0xff] %v8385_v34  ;;  %v8403_v41 = vpop.permute.xlu2 %1143  ;;  %v1790_v34 = vld [vmem:[#allocation2 + $0x238] sm:$0xff] }
 0x122   : > { %13750 = vst [vmem:[#allocation126_spill] sm:$0xff] %v8403_v41  ;;  %v7148_v41 = vld [vmem:[%s13086_s3 + $0x110] sm:$0xff] }
 0x123   : > { %v8410_v62 = vpop.permute.xlu0 %1088 }
 0x124   : > { %1491 = vperm.xlu0 %6028, %v7147_v9   ;;  %13752 = vst [vmem:[#allocation128_spill] sm:$0xff] %v8410_v62  ;;  %v1789_v9 = vld [vmem:[#allocation2 + $0x230] sm:$0xff] }
 0x125   : > { %1487 = vperm.xlu2 %6030, %v7145_v27   ;;  %v8408_v45 = vpop.permute.xlu1 %1093  ;;  %v8416_v27 = vmul.f32 %v1785_v32, %v8410_v62  ;;  %v1788_v32 = vld [vmem:[#allocation2 + $0x228] sm:$0xff]  ;;  %v7150_v62 = vld [vmem:[%s13086_s3 + $0x118] sm:$0xff] }
 0x126   : > { %1483 = vperm.xlu1 %6029, %v7146_v49   ;;  %13751 = vst [vmem:[#allocation127_spill] sm:$0xff] %v8408_v45  ;;  %v8413_v3 = vmul.f32 %v1786_v7, %v8408_v45  ;;  %v5990_v49 = vld [vmem:[%s13087_s4 + $0x80] sm:$0xff]  ;;  %v7149_v7 = vld [vmem:[%s13086_s3 + $0x108] sm:$0xff] }
 0x127   : > { %13754 = vst [vmem:[#allocation130_spill] sm:$0xff] %v8416_v27  ;;  %5142 = vmatpush.bf16.msra.mxu2 %v5990_v49  ;;  %v8437_v27 = vmul.f32 %v1790_v34, %v8346_v52  ;;  %v7151_v34 = vld [vmem:[%s13086_s3 + $0x128] sm:$0xff] }
 0x128   : > { %13753 = vst [vmem:[#allocation129_spill] sm:$0xff] %v8413_v3 }
 0x129   : > { %13757 = vst [vmem:[#allocation133_spill] sm:$0xff] %v8437_v27  ;;  %v8442_v3 = vpop.permute.xlu2 %1371 }
 0x12b   : > { %v8434_v12 = vpop.permute.xlu0 %1103 }
 0x12c   : > { %1503 = vperm.xlu0 %6028, %v7150_v62   ;;  %13756 = vst [vmem:[#allocation132_spill] sm:$0xff] %v8434_v12  ;;  %v8448_v45 = vmul.f32 %v1788_v32, %v8434_v12  ;;  %v7153_v32 = vld [vmem:[%s13086_s3 + $0x130] sm:$0xff] }
 0x12d   : > { %1499 = vperm.xlu2 %6030, %v7148_v41   ;;  %v8432_v49 = vpop.permute.xlu1 %1108 }
 0x12e   : > { %1495 = vperm.xlu1 %6029, %v7149_v7   ;;  %13755 = vst [vmem:[#allocation131_spill] sm:$0xff] %v8432_v49  ;;  %v8440_v41 = vmul.f32 %v1789_v9, %v8432_v49  ;;  %v8445_v7 = vmul.f32 %v1787_v55, %v8314_v35  ;;  %v7152_v55 = vld [vmem:[%s13086_s3 + $0x120] sm:$0xff] }
 0x12f   : > { %13760 = vst [vmem:[#allocation136_spill] sm:$0xff] %v8448_v45  ;;  %v1791_v9 = vld [vmem:[#allocation2 + $0x240] sm:$0xff] }
 0x130   : > { %13758 = vst [vmem:[#allocation134_spill] sm:$0xff] %v8440_v41 }
 0x131   : > { %13759 = vst [vmem:[#allocation135_spill] sm:$0xff] %v8445_v7  ;;  %v8470_v27 = vpop.permute.xlu2 %1379  ;;  %v7154_v7 = vld [vmem:[%s13086_s3 + $0x140] sm:$0xff] }
 0x132   : > { %v2167_v26 = vmul.f32 %v1945_v59, %v8470_v27 }
 0x133   : > { %v8465_v50 = vpop.permute.xlu0 %1118 }
 0x134   : > { %1515 = vperm.xlu0 %6028, %v7153_v32   ;;  %13762 = vst [vmem:[#allocation138_spill] sm:$0xff] %v8465_v50  ;;  %v7155_v32 = vld [vmem:[%s13086_s3 + $0x138] sm:$0xff] }
 0x135   : > { %1511 = vperm.xlu2 %6030, %v7151_v34   ;;  %v8463_v62 = vpop.permute.xlu1 %1123  ;;  %v8473_v34 = vmul.f32 %v1791_v9, %v8465_v50 }
 0x136   : > { %1507 = vperm.xlu1 %6029, %v7152_v55   ;;  %13761 = vst [vmem:[#allocation137_spill] sm:$0xff] %v8463_v62  ;;  %v8468_v41 = vmul.f32 %v1792_v6, %v8463_v62  ;;  %v7156_v6 = vld [vmem:[%s13086_s3 + $0x148] sm:$0xff]  ;;  %v1941_v62 = vld [vmem:[#allocation2 + $0x32] sm:$0xff] }
 0x137   : > { %13764 = vst [vmem:[#allocation140_spill] sm:$0xff] %v8473_v34  ;;  %v1294_v34 = vld [vmem:[#allocation2 + $0x22] sm:$0xff] }
 0x138   : > { %13763 = vst [vmem:[#allocation139_spill] sm:$0xff] %v8468_v41  ;;  %v1942_v41 = vld [vmem:[#allocation2 + $0x3a] sm:$0xff] }
 0x13b   : > { %v8488_v45 = vpop.permute.xlu0 %1133 }
 0x13c   : > { %1527 = vperm.xlu0 %6028, %v7156_v6   ;;  %13766 = vst [vmem:[#allocation142_spill] sm:$0xff] %v8488_v45  ;;  %v7159_v6 = vld [vmem:[%s13086_s3 + $0x160] sm:$0xff] }
 0x13d   : > { %1523 = vperm.xlu2 %6030, %v7154_v7   ;;  %v8486_v9 = vpop.permute.xlu1 %1138  ;;  %v8490_v55 = vpop.permute.xlu2 %1391  ;;  %v7157_v7 = vld [vmem:[%s13086_s3 + $0x158] sm:$0xff] }
 0x13e   : > { %1519 = vperm.xlu1 %6029, %v7155_v32   ;;  %13765 = vst [vmem:[#allocation141_spill] sm:$0xff] %v8486_v9  ;;  %v7158_v32 = vld [vmem:[%s13086_s3 + $0x150] sm:$0xff]  ;;  %v1938_v45 = vld [vmem:[#allocation2 + $0x1a] sm:$0xff] }
 0x143   : > { %v8505_v12 = vpop.permute.xlu0 %1363 }
 0x144   : > { %1539 = vperm.xlu0 %6028, %v7159_v6   ;;  %v8512_v49 = vmul.f32 %v1938_v45, %v8505_v12  ;;  %v2163_v52 = vmul.f32 %v1941_v62, %v8505_v12  ;;  %v7162_v45 = vld [vmem:[%s13086_s3 + $0x178] sm:$0xff]  ;;  %v1943_v6 = vld [vmem:[#allocation2 + $0x42] sm:$0xff] }
 0x145   : > { %1535 = vperm.xlu2 %6030, %v7157_v7   ;;  %v8501_v9 = vpop.permute.xlu2 %1403  ;;  %v8503_v50 = vpop.permute.xlu1 %1367 }
 0x146   : > { %1531 = vperm.xlu1 %6029, %v7158_v32   ;;  %v8508_v7 = vmul.f32 %v8503_v50, %v1294_v34  ;;  %v2164_v32 = vmul.f32 %v1942_v41, %v8503_v50  ;;  %13768 = vst [vmem:[#allocation144_spill] sm:$0xff] %v8512_v49  ;;  %v7161_v34 = vld [vmem:[%s13086_s3 + $0x168] sm:$0xff]  ;;  %v8537_v49 = vmul.f32 %v8523_v31, %v8442_v3 }
 0x148   : > { %13767 = vst [vmem:[#allocation143_spill] sm:$0xff] %v8508_v7  ;;  %v4399_v35 = vpack.c.bf16 %v2164_v32, %v2163_v52 }
 0x149   : > { %13769 = vst [vmem:[#allocation145_spill] sm:$0xff] %v8537_v49 }
 0x14a   : > { %5936 = vmatmul.msk.bf16.vlgmr.msra.gmra.mxu2 %vm560_vm0, %v4399_v35 }
 0x14c   : > { %1551 = vperm.xlu0 %6028, %v7162_v45  }
 0x14d   : > { %1547 = vperm.xlu2 %6030, %v7160_v13   ;;  %v8531_v32 = vpop.permute.xlu1 %1375  ;;  %v8533_v13 = vpop.permute.xlu0 %1383 }
 0x14e   : > { %1543 = vperm.xlu1 %6029, %v7161_v34   ;;  %v8540_v34 = vmul.f32 %v1942_v41, %v8470_v27  ;;  %v8543_v35 = vmul.f32 %v1941_v62, %v8531_v32  ;;  %v8546_v7 = vmul.f32 %v1943_v6, %v8533_v13 }
 0x14f   : > { %v8529_v52 = vpop.permute.xlu2 %1415 }
 0x150   : > { %13770 = vst [vmem:[#allocation146_spill] sm:$0xff] %v8540_v34  ;;  %v8566_v34 = vmul.f32 %v1942_v41, %v8490_v55  ;;  %v8602_v41 = vmul.f32 %v1945_v59, %v8501_v9 }
 0x151   : > { %13771 = vst [vmem:[#allocation147_spill] sm:$0xff] %v8543_v35 }
 0x152   : > { %13772 = vst [vmem:[#allocation148_spill] sm:$0xff] %v8546_v7 }
 0x153   : > { %13775 = vst [vmem:[#allocation151_spill] sm:$0xff] %v8602_v41 }
 0x154   : > { %1563 = vperm.xlu0 %6028, %v7165_v4   ;;  %v2165_v4 = vmul.f32 %v1943_v6, %v8442_v3 }
 0x155   : > { %1559 = vperm.xlu2 %6030, %v7163_v51   ;;  %v8563_v15 = vpop.permute.xlu1 %1387  ;;  %v2166_v51 = vmul.f32 %v1944_v10, %v8531_v32  ;;  %v8572_v49 = vpop.permute.xlu0 %1395 }
 0x156   : > { %1555 = vperm.xlu1 %6029, %v7164_v16   ;;  %v8570_v7 = vmul.f32 %v1941_v62, %v8563_v15  ;;  %v8575_v16 = vmul.f32 %v1945_v59, %v8490_v55  ;;  %v8578_v35 = vmul.f32 %v1944_v10, %v8563_v15  ;;  %v7166_v62 = vld [vmem:[%s13086_s3 + $0x1a0] sm:$0xff]  ;;  %v7174_v59 = vld [vmem:[%s13086_s3 + $0x1d8] sm:$0xff] }
 0x157   : > { %v8561_v45 = vpop.permute.xlu2 %1427  ;;  %v4402_v60 = vpack.c.bf16 %v2166_v51, %v2165_v4 }
 0x158   : > { %13773 = vst [vmem:[#allocation149_spill] sm:$0xff] %v8575_v16  ;;  %v8613_v16 = vld [vmem:[#allocation2 + $0x72] sm:$0xff] }
 0x159   : > { %13774 = vst [vmem:[#allocation150_spill] sm:$0xff] %v8578_v35  ;;  %v1946_v35 = vld [vmem:[#allocation2 + $0x5a] sm:$0xff] }
 0x15a   : > { %5937 = vmatmul.msk.bf16.gmra.mxu2 %vm560_vm0, %v4402_v60  ;;  %v8611_v60 = vmul.f32 %v1943_v6, %v8572_v49  ;;  %v8621_v25 = vmul.f32 %v1946_v35, %v8572_v49 }
 0x15c   : > { %1575 = vperm.xlu0 %6028, %v7168_v5   ;;  %13777 = vst [vmem:[#allocation153_spill] sm:$0xff] %v8621_v25 }
 0x15d   : > { %1571 = vperm.xlu2 %6030, %v7166_v62   ;;  %v8599_v4 = vpop.permute.xlu1 %1399  ;;  %v8606_v62 = vmul.f32 %v8585_v37, %v8501_v9  ;;  %v8618_v11 = vpop.permute.xlu0 %1407 }
 0x15e   : > { %1567 = vperm.xlu1 %6029, %v7167_v19   ;;  %v8608_v19 = vld [vmem:[#allocation2 + $0x62] sm:$0xff]  ;;  %v8616_v5 = vmul.f32 %v1944_v10, %v8599_v4  ;;  %v8628_v43 = vmul.f32 %v1946_v35, %v8618_v11  ;;  %v8632_v6 = vmul.f32 %v8613_v16, %v8618_v11 }
 0x15f   : > { %v8597_v51 = vpop.permute.xlu2 %1439  ;;  %13776 = vst [vmem:[#allocation152_spill] sm:$0xff] %v8606_v62  ;;  %v8625_v21 = vmul.f32 %v8608_v19, %v8599_v4  ;;  %v8659_v62 = vmul.f32 %v8585_v37, %v8529_v52 }
 0x160   : > { %13779 = vst [vmem:[#allocation155_spill] sm:$0xff] %v8632_v6  ;;  %v8662_v6 = vld [vmem:[#allocation2 + $0x7a] sm:$0xff] }
 0x161   : > { %13778 = vst [vmem:[#allocation154_spill] sm:$0xff] %v8625_v21 }
 0x162   : > { %13780 = vst [vmem:[#allocation156_spill] sm:$0xff] %v8659_v62 }
 0x164   : > { %1587 = vperm.xlu0 %6028, %v7171_v57   ;;  %v8672_v57 = vmul.f32 %v8655_v24, %v8529_v52 }
 0x165   : > { %1583 = vperm.xlu2 %6030, %v7169_v56   ;;  %v8653_v8 = vpop.permute.xlu1 %1411  ;;  %v2168_v56 = vmul.f32 %v1946_v35, %v8533_v13  ;;  %v8668_v25 = vpop.permute.xlu0 %1419 }
 0x166   : > { %1579 = vperm.xlu1 %6029, %v7170_v20   ;;  %v8666_v20 = vmul.f32 %v8608_v19, %v8653_v8  ;;  %13782 = vst [vmem:[#allocation158_spill] sm:$0xff] %v8672_v57  ;;  %v8676_v21 = vmul.f32 %v8662_v6, %v8653_v8  ;;  %v8717_v57 = vld [vmem:[#allocation2 + $0x9a] sm:$0xff] }
 0x167   : > { %v8651_v10 = vpop.permute.xlu2 %1451  ;;  %v4405_v42 = vpack.c.bf16 %v2168_v56, %v2167_v26  ;;  %v8699_v56 = vmul.f32 %v8655_v24, %v8561_v45  ;;  %v8737_v2 = vmul.f32 %v8717_v57, %v8561_v45 }
 0x168   : > { %13781 = vst [vmem:[#allocation157_spill] sm:$0xff] %v8666_v20  ;;  %v1218_v20 = vld [vmem:[#allocation2 + $0x1] sm:$0xff] }
 0x169   : > { %13783 = vst [vmem:[#allocation159_spill] sm:$0xff] %v8676_v21 }
 0x16a   : > { %5938 = vmatmul.msk.bf16.gmra.mxu2 %vm560_vm0, %v4405_v42  ;;  %13784 = vst [vmem:[#allocation160_spill] sm:$0xff] %v8699_v56  ;;  %v8709_v42 = vld [vmem:[#allocation2 + $0xa2] sm:$0xff] }
 0x16b   : > { %13791 = vst [vmem:[#allocation167_spill] sm:$0xff] %v8737_v2  ;;  %v2169_v2 = vmul.f32 %v8608_v19, %v8563_v15  ;;  %v2170_v15 = vmul.f32 %v8585_v37, %v8490_v55  ;;  %v8800_v37 = vmul.f32 %v8760_v39, %v8651_v10  ;;  %v8802_v55 = vld [vmem:[#allocation2 + $0xba] sm:$0xff] }
 0x16c   : > { %1599 = vperm.xlu0 %6028, %v7174_v59  }
 0x16d   : > { %1595 = vperm.xlu2 %6030, %v7172_v44   ;;  %v8701_v44 = vld [vmem:[#allocation2 + $0x8a] sm:$0xff]  ;;  %v4408_v61 = vpack.c.bf16 %v2170_v15, %v2169_v2  ;;  %13798 = vst [vmem:[#allocation174_spill] sm:$0xff] %v8800_v37  ;;  %v8859_v37 = vld [vmem:[#allocation2 + $0xda] sm:$0xff] }
 0x16e   : > { %1591 = vperm.xlu1 %6029, %v7173_v48   ;;  %v8707_v48 = vmul.f32 %v8613_v16, %v8668_v25  ;;  %v8715_v21 = vpop.permute.xlu0 %1431  ;;  %v8721_v46 = vmul.f32 %v8701_v44, %v8668_v25 }
 0x16f   : > { %v8693_v35 = vpop.permute.xlu2 %1463  ;;  %v8695_v26 = vpop.permute.xlu1 %1423  ;;  %v8729_v18 = vmul.f32 %v8701_v44, %v8715_v21  ;;  %v8733_v0 = vmul.f32 %v8709_v42, %v8715_v21 }
 0x170   : > { %13785 = vst [vmem:[#allocation161_spill] sm:$0xff] %v8707_v48  ;;  %v8713_v59 = vmul.f32 %v8662_v6, %v8695_v26  ;;  %v8725_v36 = vmul.f32 %v8703_v58, %v8695_v26  ;;  %v8857_v48 = vld [vmem:[#allocation2 + $0xe2] sm:$0xff] }
 0x171   : > { %13787 = vst [vmem:[#allocation163_spill] sm:$0xff] %v8721_v46  ;;  %v8778_v46 = vmul.f32 %v8760_v39, %v8597_v51 }
 0x172   : > { %13786 = vst [vmem:[#allocation162_spill] sm:$0xff] %v8713_v59 }
 0x173   : > { %13788 = vst [vmem:[#allocation164_spill] sm:$0xff] %v8725_v36 }
 0x174   : > { %13789 = vst [vmem:[#allocation165_spill] sm:$0xff] %v8729_v18  ;;  %1611 = vperm.xlu0 %6028, %v7177_v29  }
 0x175   : > { %13790 = vst [vmem:[#allocation166_spill] sm:$0xff] %v8733_v0  ;;  %1607 = vperm.xlu2 %6030, %v7175_v1   ;;  %v8766_v1 = vmul.f32 %v8717_v57, %v8597_v51  ;;  %v8768_v0 = vld [vmem:[#allocation2 + $0xaa] sm:$0xff] }
 0x176   : > { %1603 = vperm.xlu1 %6029, %v7176_v47   ;;  %v8774_v29 = vpop.permute.xlu0 %1443  ;;  %13795 = vst [vmem:[#allocation171_spill] sm:$0xff] %v8778_v46 }
 0x177   : > { %v8756_v30 = vpop.permute.xlu2 %1475  ;;  %13793 = vst [vmem:[#allocation169_spill] sm:$0xff] %v8766_v1  ;;  %v8808_v2 = vmul.f32 %v8709_v42, %v8774_v29  ;;  %v8822_v15 = vmul.f32 %v8802_v55, %v8774_v29  ;;  %v2172_v1 = vmul.f32 %v8662_v6, %v8599_v4  ;;  %v8883_v4 = vld [vmem:[#allocation2 + $0xea] sm:$0xff] }
 0x178   : > { %13792 = vst [vmem:[#allocation168_spill] sm:$0xff] %v8756_v30  ;;  %v8758_v40 = vpop.permute.xlu1 %1435 }
 0x179   : > { %v8772_v47 = vmul.f32 %v8703_v58, %v8758_v40  ;;  %v8782_v36 = vmul.f32 %v8768_v0, %v8758_v40  ;;  %13799 = vst [vmem:[#allocation175_spill] sm:$0xff] %v8808_v2 }
 0x17a   : > { %5939 = vmatmul.msk.bf16.gmra.mxu2 %vm560_vm0, %v4408_v61  ;;  %13801 = vst [vmem:[#allocation177_spill] sm:$0xff] %v8822_v15  ;;  %v1221_v15 = vld [vmem:[#allocation2 + $0x19] sm:$0xff] }
 0x17b   : > { %13794 = vst [vmem:[#allocation170_spill] sm:$0xff] %v8772_v47 }
 0x17c   : > { %13796 = vst [vmem:[#allocation172_spill] sm:$0xff] %v8782_v36  ;;  %1623 = vperm.xlu0 %6028, %v7892_v22  }
 0x17d   : > { %1619 = vperm.xlu2 %6030, %v7897_v23   ;;  %v8810_v23 = vld [vmem:[#allocation2 + $0xd2] sm:$0xff] }
 0x17e   : > { %1615 = vperm.xlu1 %6029, %v7903_v38   ;;  %v8816_v22 = vpop.permute.xlu0 %1455  ;;  %v8818_v38 = vld [vmem:[#allocation2 + $0xca] sm:$0xff] }
 0x17f   : > { %v8794_v56 = vpop.permute.xlu2 %1487  ;;  %v8830_v36 = vmul.f32 %v8802_v55, %v8816_v22  ;;  %v8834_v46 = vmul.f32 %v8810_v23, %v8816_v22  ;;  %v8838_v47 = vmul.f32 %v8818_v38, %v8651_v10 }
 0x180   : > { %13797 = vst [vmem:[#allocation173_spill] sm:$0xff] %v8794_v56  ;;  %v8796_v18 = vpop.permute.xlu1 %1447 }
 0x181   : > { %v8814_v61 = vmul.f32 %v8768_v0, %v8796_v18  ;;  %v8826_v19 = vmul.f32 %v8804_v63, %v8796_v18  ;;  %13803 = vst [vmem:[#allocation179_spill] sm:$0xff] %v8830_v36 }
 0x182   : > { %13804 = vst [vmem:[#allocation180_spill] sm:$0xff] %v8834_v46  ;;  %v1220_v46 = vld [vmem:[#allocation2 + $0x11] sm:$0xff] }
 0x183   : > { %13800 = vst [vmem:[#allocation176_spill] sm:$0xff] %v8814_v61  ;;  %v6036_v2 = vpack.i.bf16 %v1221_v15, %v1220_v46  ;;  %v1225_v46 = vld [vmem:[#allocation2 + $0x39] sm:$0xff]  ;;  %v1226_v15 = vld [vmem:[#allocation2 + $0x41] sm:$0xff] }
 0x184   : > { %13802 = vst [vmem:[#allocation178_spill] sm:$0xff] %v8826_v19  ;;  %1635 = vperm.xlu0 %6028, %v7942_v17  }
 0x185   : > { %13805 = vst [vmem:[#allocation181_spill] sm:$0xff] %v8838_v47  ;;  %1631 = vperm.xlu2 %6030, %v7947_v14   ;;  %v8865_v14 = vmul.f32 %v8857_v48, %v8693_v35  ;;  %v1219_v47 = vld [vmem:[#allocation2 + $0x9] sm:$0xff] }
 0x186   : > { %1627 = vperm.xlu1 %6029, %v7953_v33   ;;  %v8861_v59 = vpop.permute.xlu0 %1467  ;;  %v2171_v33 = vmul.f32 %v8613_v16, %v8572_v49  ;;  %v1222_v49 = vld [vmem:[#allocation2 + $0x21] sm:$0xff]  ;;  %v1223_v16 = vld [vmem:[#allocation2 + $0x29] sm:$0xff] }
 0x187   : > { %v8851_v62 = vpop.permute.xlu2 %1499  ;;  %13807 = vst [vmem:[#allocation183_spill] sm:$0xff] %v8861_v59 }
 0x188   : > { %13806 = vst [vmem:[#allocation182_spill] sm:$0xff] %v8851_v62  ;;  %v8853_v41 = vpop.permute.xlu1 %1459  ;;  %v4411_v6 = vpack.c.bf16 %v2172_v1, %v2171_v33  ;;  %v8885_v1 = vld [vmem:[#allocation2 + $0xf2] sm:$0xff]  ;;  %v6031_v33 = vpack.i.bf16 %v1219_v47, %v1218_v20  ;;  %v6041_v20 = vpack.i.bf16 %v1223_v16, %v1222_v49 }
 0x189   : > { %13808 = vst [vmem:[#allocation184_spill] sm:$0xff] %v8865_v14  ;;  %v8869_v17 = vmul.f32 %v8859_v37, %v8853_v41  ;;  %v1228_v16 = vld [vmem:[#allocation2 + $0x51] sm:$0xff]  ;;  %v1229_v47 = vld [vmem:[#allocation2 + $0x59] sm:$0xff] }
 0x18a   : > { %5940 = vmatmul.msk.bf16.gmra.mxu2 %vm560_vm0, %v4411_v6  ;;  %v8891_v6 = vld [vmem:[#allocation2 + $0xfa] sm:$0xff] }
 0x18b   : > { %13809 = vst [vmem:[#allocation185_spill] sm:$0xff] %v8869_v17  ;;  %v8907_v61 = vmul.f32 %v8891_v6, %v8756_v30 }
 0x18c   : > { %1647 = vperm.xlu0 %6028, %v7988_v54   ;;  %13814 = vst [vmem:[#allocation190_spill] sm:$0xff] %v8891_v6  ;;  %v8895_v54 = vmul.f32 %v8883_v4, %v8861_v59  ;;  %v2174_v59 = vmul.f32 %v8701_v44, %v8618_v11  ;;  %v6056_v11 = vpack.i.bf16 %v1229_v47, %v1228_v16  ;;  %v1235_v47 = vld [vmem:[#allocation2 + $0x89] sm:$0xff] }
 0x18d   : > { %1643 = vperm.xlu2 %6030, %v7993_v28   ;;  %v8887_v28 = vld [vmem:[#allocation2 + $0x102] sm:$0xff]  ;;  %13818 = vst [vmem:[#allocation194_spill] sm:$0xff] %v8907_v61  ;;  %v8922_v61 = vld [vmem:[#allocation2 + $0x112] sm:$0xff] }
 0x18e   : > { %1639 = vperm.xlu1 %6029, %v7999_v53   ;;  %13812 = vst [vmem:[#allocation188_spill] sm:$0xff] %v8887_v28  ;;  %v8889_v53 = vpop.permute.xlu0 %1479 }
 0x18f   : > { %v8879_v19 = vpop.permute.xlu2 %1511  ;;  %13813 = vst [vmem:[#allocation189_spill] sm:$0xff] %v8889_v53  ;;  %v8903_v14 = vmul.f32 %v8887_v28, %v8889_v53  ;;  %v1227_v28 = vld [vmem:[#allocation2 + $0x49] sm:$0xff]  ;;  %v2173_v53 = vmul.f32 %v8655_v24, %v8501_v9  ;;  %v1234_v9 = vld [vmem:[#allocation2 + $0x81] sm:$0xff] }
 0x190   : > { %13810 = vst [vmem:[#allocation186_spill] sm:$0xff] %v8879_v19  ;;  %v8881_v36 = vpop.permute.xlu1 %1471 }
 0x191   : > { %13811 = vst [vmem:[#allocation187_spill] sm:$0xff] %v8881_v36  ;;  %v8899_v17 = vmul.f32 %v8885_v1, %v8881_v36  ;;  %v1224_v36 = vld [vmem:[#allocation2 + $0x31] sm:$0xff]  ;;  %v4414_v6 = vpack.c.bf16 %v2174_v59, %v2173_v53  ;;  %v8950_v59 = vld [vmem:[#allocation2 + $0x122] sm:$0xff] }
 0x192   : > { %13815 = vst [vmem:[#allocation191_spill] sm:$0xff] %v8895_v54  ;;  %v6046_v54 = vpack.i.bf16 %v1225_v46, %v1224_v36  ;;  %v1232_v36 = vld [vmem:[#allocation2 + $0x71] sm:$0xff] }
 0x193   : > { %13816 = vst [vmem:[#allocation192_spill] sm:$0xff] %v8899_v17  ;;  %v6051_v17 = vpack.i.bf16 %v1227_v28, %v1226_v15  ;;  %v1233_v28 = vld [vmem:[#allocation2 + $0x79] sm:$0xff] }
 0x194   : > { %13817 = vst [vmem:[#allocation193_spill] sm:$0xff] %v8903_v14  ;;  %6042 = vrot.lane.b32.xlu0 %v6041_v20, %s7319_s30  ;;  %v8930_v20 = vmul.f32 %v8922_v61, %v8794_v56  ;;  %v1231_v56 = vld [vmem:[#allocation2 + $0x69] sm:$0xff]  ;;  %v8948_v15 = vld [vmem:[#allocation2 + $0x11a] sm:$0xff]  ;;  %v8952_v53 = vld [vmem:[#allocation2 + $0x132] sm:$0xff] }
 0x195   : > { %6037 = vrot.lane.b32.xlu2 %v6036_v2, %s7319_s30  ;;  %13820 = vst [vmem:[#allocation196_spill] sm:$0xff] %v8922_v61  ;;  %v1230_v61 = vld [vmem:[#allocation2 + $0x61] sm:$0xff] }
 0x196   : > { %6032 = vrot.lane.b32.xlu1 %v6031_v33, %s7319_s30  ;;  %v8924_v33 = vld [vmem:[#allocation2 + $0x10a] sm:$0xff]  ;;  %v8926_v2 = vpop.permute.xlu0 %1491  ;;  %13823 = vst [vmem:[#allocation199_spill] sm:$0xff] %v8930_v20 }
 0x197   : > { %v8916_v30 = vpop.permute.xlu2 %1523  ;;  %13821 = vst [vmem:[#allocation197_spill] sm:$0xff] %v8924_v33  ;;  %v8960_v16 = vmul.f32 %v8948_v15, %v8926_v2 }
 0x198   : > { %13819 = vst [vmem:[#allocation195_spill] sm:$0xff] %v8916_v30  ;;  %v8918_v49 = vpop.permute.xlu1 %1483 }
 0x199   : > { %13822 = vst [vmem:[#allocation198_spill] sm:$0xff] %v8926_v2  ;;  %v8934_v14 = vmul.f32 %v8924_v33, %v8918_v49  ;;  %v1236_v33 = vld [vmem:[#allocation2 + $0x91] sm:$0xff]  ;;  %v8991_v2 = vld [vmem:[#allocation2 + $0x142] sm:$0xff] }
 0x19a   : > { %5941 = vmatmul.msk.bf16.gmra.mxu2 %vm560_vm0, %v4414_v6  ;;  %13827 = vst [vmem:[#allocation203_spill] sm:$0xff] %v8948_v15  ;;  %v8956_v6 = vld [vmem:[#allocation2 + $0x12a] sm:$0xff] }
 0x19b   : > { %13824 = vst [vmem:[#allocation200_spill] sm:$0xff] %v8934_v14  ;;  %v6066_v14 = vpack.i.bf16 %v1233_v28, %v1232_v36  ;;  %v8972_v20 = vmul.f32 %v8956_v6, %v8851_v62  ;;  %v1239_v15 = vld [vmem:[#allocation2 + $0xa9] sm:$0xff]  ;;  %v8980_v36 = vld [vmem:[#allocation2 + $0x15a] sm:$0xff]  ;;  %v8983_v28 = vld [vmem:[#allocation2 + $0x152] sm:$0xff] }
 0x19c   : > { %6057 = vrot.lane.b32.xlu0 %v6056_v11, %s7319_s30  ;;  %13828 = vst [vmem:[#allocation204_spill] sm:$0xff] %v8950_v59 }
 0x19d   : > { %6052 = vrot.lane.b32.xlu2 %v6051_v17, %s7319_s30  ;;  %13829 = vst [vmem:[#allocation205_spill] sm:$0xff] %v8952_v53 }
 0x19e   : > { %6047 = vrot.lane.b32.xlu1 %v6046_v54, %s7319_s30  ;;  %v8954_v17 = vpop.permute.xlu0 %1503  ;;  %v6061_v54 = vpack.i.bf16 %v1231_v56, %v1230_v61  ;;  %13831 = vst [vmem:[#allocation207_spill] sm:$0xff] %v8956_v6  ;;  %v6071_v56 = vpack.i.bf16 %v1235_v47, %v1234_v9  ;;  %v1240_v61 = vld [vmem:[#allocation2 + $0xb1] sm:$0xff]  ;;  %v9003_v6 = vmul.f32 %v8980_v36, %v8879_v19 }
 0x19f   : > { %v8944_v46 = vpop.permute.xlu2 %1535  ;;  %13830 = vst [vmem:[#allocation206_spill] sm:$0xff] %v8954_v17  ;;  %v8968_v44 = vmul.f32 %v8952_v53, %v8954_v17  ;;  %v1238_v53 = vld [vmem:[#allocation2 + $0xa1] sm:$0xff]  ;;  %v1245_v17 = vld [vmem:[#allocation2 + $0xd9] sm:$0xff] }
 0x1a0   : > { %13825 = vst [vmem:[#allocation201_spill] sm:$0xff] %v8944_v46  ;;  %v8946_v24 = vpop.permute.xlu1 %1495 }
 0x1a1   : > { %13826 = vst [vmem:[#allocation202_spill] sm:$0xff] %v8946_v24  ;;  %v8964_v11 = vmul.f32 %v8950_v59, %v8946_v24  ;;  %v1237_v59 = vld [vmem:[#allocation2 + $0x99] sm:$0xff]  ;;  %v9023_v24 = vld [vmem:[#allocation2 + $0x14a] sm:$0xff] }
 0x1a2   : > { %13832 = vst [vmem:[#allocation208_spill] sm:$0xff] %v8960_v16  ;;  %v1241_v16 = vld [vmem:[#allocation2 + $0xb9] sm:$0xff] }
 0x1a3   : > { %13833 = vst [vmem:[#allocation209_spill] sm:$0xff] %v8964_v11  ;;  %v6081_v11 = vpack.i.bf16 %v1239_v15, %v1238_v53 }
 0x1a4   : > { %13834 = vst [vmem:[#allocation210_spill] sm:$0xff] %v8968_v44  ;;  %6072 = vrot.lane.b32.xlu0 %v6071_v56, %s7319_s30  ;;  %v6076_v44 = vpack.i.bf16 %v1237_v59, %v1236_v33  ;;  %v8999_v56 = vmul.f32 %v8991_v2, %v8879_v19  ;;  %v6086_v33 = vpack.i.bf16 %v1241_v16, %v1240_v61  ;;  %v9019_v19 = vld [vmem:[#allocation2 + $0x172] sm:$0xff] }
 0x1a5   : > { %13835 = vst [vmem:[#allocation211_spill] sm:$0xff] %v8972_v20  ;;  %6067 = vrot.lane.b32.xlu2 %v6066_v14, %s7319_s30  ;;  %v8993_v14 = vld [vmem:[#allocation2 + $0x13a] sm:$0xff] }
 0x1a6   : > { %6062 = vrot.lane.b32.xlu1 %v6061_v54, %s7319_s30  ;;  %13836 = vst [vmem:[#allocation212_spill] sm:$0xff] %v8980_v36  ;;  %v2175_v54 = vmul.f32 %v8703_v58, %v8653_v8  ;;  %v8995_v20 = vpop.permute.xlu0 %1515  ;;  %v2176_v58 = vmul.f32 %v8717_v57, %v8529_v52  ;;  %v9025_v52 = vld [vmem:[#allocation2 + $0x162] sm:$0xff]  ;;  %v9029_v57 = vld [vmem:[#allocation2 + $0x16a] sm:$0xff] }
 0x1a7   : > { %13837 = vst [vmem:[#allocation213_spill] sm:$0xff] %v8983_v28  ;;  %v8985_v9 = vpop.permute.xlu2 %1547 }
 0x1a8   : > { %13838 = vst [vmem:[#allocation214_spill] sm:$0xff] %v8985_v9  ;;  %v8987_v47 = vpop.permute.xlu1 %1507  ;;  %v4417_v53 = vpack.c.bf16 %v2176_v58, %v2175_v54  ;;  %v1247_v54 = vld [vmem:[#allocation2 + $0xe9] sm:$0xff]  ;;  %v9039_v58 = vmul.f32 %v9023_v24, %v8995_v20 }
 0x1a9   : > { %13839 = vst [vmem:[#allocation215_spill] sm:$0xff] %v8987_v47  ;;  %v9007_v62 = vmul.f32 %v8993_v14, %v8987_v47  ;;  %v9011_v8 = vmul.f32 %v8983_v28, %v8987_v47  ;;  %v1244_v47 = vld [vmem:[#allocation2 + $0xd1] sm:$0xff] }
 0x1aa   : > { %13840 = vst [vmem:[#allocation216_spill] sm:$0xff] %v8991_v2  ;;  %v1242_v2 = vld [vmem:[#allocation2 + $0xc1] sm:$0xff]  ;;  %5942 = vmatmul.msk.bf16.gmra.mxu2 %vm560_vm0, %v4417_v53  ;;  %v6096_v53 = vpack.i.bf16 %v1245_v17, %v1244_v47  ;;  %v9065_v17 = vmul.f32 %v9019_v19, %v8916_v30 }
 0x1ab   : > { %13841 = vst [vmem:[#allocation217_spill] sm:$0xff] %v8993_v14  ;;  %v1243_v14 = vld [vmem:[#allocation2 + $0xc9] sm:$0xff] }
 0x1ac   : > { %13842 = vst [vmem:[#allocation218_spill] sm:$0xff] %v8995_v20  ;;  %6087 = vrot.lane.b32.xlu0 %v6086_v33, %s7319_s30  ;;  %v6091_v15 = vpack.i.bf16 %v1243_v14, %v1242_v2  ;;  %v9045_v33 = vmul.f32 %v9025_v52, %v8995_v20  ;;  %v9061_v2 = vmul.f32 %v8980_v36, %v8916_v30  ;;  %v1249_v30 = vld [vmem:[#allocation2 + $0xf9] sm:$0xff]  ;;  %v1252_v36 = vld [vmem:[#allocation2 + $0x111] sm:$0xff] }
 0x1ad   : > { %13843 = vst [vmem:[#allocation219_spill] sm:$0xff] %v8999_v56  ;;  %6082 = vrot.lane.b32.xlu2 %v6081_v11, %s7319_s30  ;;  %v1246_v11 = vld [vmem:[#allocation2 + $0xe1] sm:$0xff] }
 0x1ae   : > { %13844 = vst [vmem:[#allocation220_spill] sm:$0xff] %v9003_v6  ;;  %6077 = vrot.lane.b32.xlu1 %v6076_v44, %s7319_s30  ;;  %v9035_v44 = vld [vmem:[#allocation2 + $0x17a] sm:$0xff]  ;;  %v9041_v59 = vpop.permute.xlu0 %1527  ;;  %v6101_v14 = vpack.i.bf16 %v1247_v54, %v1246_v11  ;;  %v1251_v11 = vld [vmem:[#allocation2 + $0x109] sm:$0xff] }
 0x1af   : > { %13845 = vst [vmem:[#allocation221_spill] sm:$0xff] %v9007_v62  ;;  %v9031_v16 = vpop.permute.xlu2 %1559  ;;  %v9069_v47 = vmul.f32 %v9035_v44, %v9041_v59  ;;  %v9081_v54 = vld [vmem:[#allocation2 + $0x18a] sm:$0xff]  ;;  %v9084_v6 = vld [vmem:[#allocation2 + $0x182] sm:$0xff] }
 0x1b0   : > { %13846 = vst [vmem:[#allocation222_spill] sm:$0xff] %v9011_v8  ;;  %v9033_v61 = vpop.permute.xlu1 %1519  ;;  %v9057_v8 = vmul.f32 %v9025_v52, %v9041_v59 }
 0x1b1   : > { %13847 = vst [vmem:[#allocation223_spill] sm:$0xff] %v9019_v19  ;;  %v9049_v62 = vmul.f32 %v8983_v28, %v9033_v61  ;;  %v9053_v56 = vmul.f32 %v9029_v57, %v9033_v61  ;;  %v1248_v28 = vld [vmem:[#allocation2 + $0xf1] sm:$0xff] }
 0x1b2   : > { %13848 = vst [vmem:[#allocation224_spill] sm:$0xff] %v9023_v24  ;;  %v1250_v24 = vld [vmem:[#allocation2 + $0x101] sm:$0xff] }
 0x1b3   : > { %13849 = vst [vmem:[#allocation225_spill] sm:$0xff] %v9025_v52 }
 0x1b4   : > { %13850 = vst [vmem:[#allocation226_spill] sm:$0xff] %v9029_v57  ;;  %6102 = vrot.lane.b32.xlu0 %v6101_v14, %s7319_s30  ;;  %v9100_v14 = vmul.f32 %v9081_v54, %v8944_v46 }
 0x1b5   : > { %13851 = vst [vmem:[#allocation227_spill] sm:$0xff] %v9031_v16  ;;  %6097 = vrot.lane.b32.xlu2 %v6096_v53, %s7319_s30  ;;  %v6106_v53 = vpack.i.bf16 %v1249_v30, %v1248_v28  ;;  %v2177_v30 = vmul.f32 %v8709_v42, %v8668_v25  ;;  %v9124_v25 = vld [vmem:[#allocation2 + $0x19a] sm:$0xff] }
 0x1b6   : > { %13852 = vst [vmem:[#allocation228_spill] sm:$0xff] %v9039_v58  ;;  %6092 = vrot.lane.b32.xlu1 %v6091_v15, %s7319_s30  ;;  %v2178_v15 = vmul.f32 %v8768_v0, %v8695_v26  ;;  %v9092_v20 = vpop.permute.xlu0 %1539 }
 0x1b7   : > { %13853 = vst [vmem:[#allocation229_spill] sm:$0xff] %v9045_v33  ;;  %v9086_v52 = vpop.permute.xlu2 %1571  ;;  %v1255_v33 = vld [vmem:[#allocation2 + $0x129] sm:$0xff] }
 0x1b8   : > { %13854 = vst [vmem:[#allocation230_spill] sm:$0xff] %v9049_v62  ;;  %v9088_v58 = vpop.permute.xlu1 %1531  ;;  %v1253_v62 = vld [vmem:[#allocation2 + $0x119] sm:$0xff]  ;;  %v4420_v28 = vpack.c.bf16 %v2178_v15, %v2177_v30  ;;  %v1259_v15 = vld [vmem:[#allocation2 + $0x149] sm:$0xff]  ;;  %v9138_v30 = vmul.f32 %v9035_v44, %v9092_v20 }
 0x1b9   : > { %13855 = vst [vmem:[#allocation231_spill] sm:$0xff] %v9053_v56  ;;  %v6116_v0 = vpack.i.bf16 %v1253_v62, %v1252_v36  ;;  %v1256_v56 = vld [vmem:[#allocation2 + $0x131] sm:$0xff] }
 0x1ba   : > { %13856 = vst [vmem:[#allocation232_spill] sm:$0xff] %v9057_v8  ;;  %v9096_v8 = vmul.f32 %v9019_v19, %v8944_v46  ;;  %v1257_v19 = vld [vmem:[#allocation2 + $0x139] sm:$0xff]  ;;  %v9118_v46 = vld [vmem:[#allocation2 + $0x1a2] sm:$0xff]  ;;  %5943 = vmatmul.msk.bf16.gmra.mxu2 %vm560_vm0, %v4420_v28  ;;  %v9130_v36 = vld [vmem:[#allocation2 + $0x1aa] sm:$0xff] }
 0x1bb   : > { %13857 = vst [vmem:[#allocation233_spill] sm:$0xff] %v9061_v2  ;;  %v6111_v2 = vpack.i.bf16 %v1251_v11, %v1250_v24  ;;  %v1254_v11 = vld [vmem:[#allocation2 + $0x121] sm:$0xff]  ;;  %v6126_v24 = vpack.i.bf16 %v1257_v19, %v1256_v56 }
 0x1bc   : > { %13858 = vst [vmem:[#allocation234_spill] sm:$0xff] %v9065_v17  ;;  %v9104_v17 = vmul.f32 %v9029_v57, %v9088_v58  ;;  %v9120_v57 = vld [vmem:[#allocation2 + $0x192] sm:$0xff]  ;;  %6117 = vrot.lane.b32.xlu0 %v6116_v0, %s7319_s30  ;;  %v6121_v0 = vpack.i.bf16 %v1255_v33, %v1254_v11  ;;  %v9160_v33 = vmul.f32 %v9118_v46, %v8985_v9 }
 0x1bd   : > { %13859 = vst [vmem:[#allocation235_spill] sm:$0xff] %v9069_v47  ;;  %v9108_v47 = vmul.f32 %v9084_v6, %v9088_v58  ;;  %6112 = vrot.lane.b32.xlu2 %v6111_v2, %s7319_s30  ;;  %v1258_v2 = vld [vmem:[#allocation2 + $0x141] sm:$0xff]  ;;  %v9144_v26 = vmul.f32 %v9120_v57, %v9092_v20  ;;  %v9179_v11 = vld [vmem:[#allocation2 + $0x1b2] sm:$0xff] }
 0x1be   : > { %13860 = vst [vmem:[#allocation236_spill] sm:$0xff] %v9081_v54  ;;  %6107 = vrot.lane.b32.xlu1 %v6106_v53, %s7319_s30  ;;  %v9134_v53 = vmul.f32 %v9081_v54, %v8985_v9  ;;  %v9140_v28 = vpop.permute.xlu0 %1551  ;;  %v6131_v56 = vpack.i.bf16 %v1259_v15, %v1258_v2  ;;  %v1261_v9 = vld [vmem:[#allocation2 + $0x159] sm:$0xff]  ;;  %v1263_v2 = vld [vmem:[#allocation2 + $0x169] sm:$0xff] }
 0x1bf   : > { %13861 = vst [vmem:[#allocation237_spill] sm:$0xff] %v9084_v6  ;;  %v9126_v62 = vpop.permute.xlu2 %1583  ;;  %v9164_v19 = vmul.f32 %v9130_v36, %v9140_v28  ;;  %v9176_v15 = vld [vmem:[#allocation2 + $0x1ba] sm:$0xff] }
 0x1c0   : > { %13862 = vst [vmem:[#allocation238_spill] sm:$0xff] %v9086_v52  ;;  %v9128_v42 = vpop.permute.xlu1 %1543 }
 0x1c1   : > { %13863 = vst [vmem:[#allocation239_spill] sm:$0xff] %v9092_v20  ;;  %v1262_v20 = vld [vmem:[#allocation2 + $0x161] sm:$0xff] }
 0x1c2   : > { %13864 = vst [vmem:[#allocation240_spill] sm:$0xff] %v9096_v8  ;;  %v9152_v8 = vmul.f32 %v9124_v25, %v9128_v42 }
 0x1c3   : > { %13865 = vst [vmem:[#allocation241_spill] sm:$0xff] %v9100_v14 }
 0x1c4   : > { %13866 = vst [vmem:[#allocation242_spill] sm:$0xff] %v9104_v17  ;;  %v9148_v17 = vmul.f32 %v9084_v6, %v9128_v42  ;;  %6132 = vrot.lane.b32.xlu0 %v6131_v56, %s7319_s30  ;;  %v9195_v56 = vmul.f32 %v9176_v15, %v9031_v16 }
 0x1c5   : > { %13867 = vst [vmem:[#allocation243_spill] sm:$0xff] %v9108_v47  ;;  %v9156_v47 = vmul.f32 %v9120_v57, %v9140_v28  ;;  %6127 = vrot.lane.b32.xlu2 %v6126_v24, %s7319_s30 }
 0x1c6   : > { %13868 = vst [vmem:[#allocation244_spill] sm:$0xff] %v9118_v46  ;;  %6122 = vrot.lane.b32.xlu1 %v6121_v0, %s7319_s30  ;;  %v2180_v0 = vmul.f32 %v8802_v55, %v8715_v21  ;;  %v9187_v6 = vpop.permute.xlu0 %1563  ;;  %v2179_v21 = vmul.f32 %v8760_v39, %v8561_v45  ;;  %v9219_v39 = vld [vmem:[#allocation2 + $0x1ca] sm:$0xff] }
 0x1c7   : > { %13869 = vst [vmem:[#allocation245_spill] sm:$0xff] %v9120_v57  ;;  %v1260_v57 = vld [vmem:[#allocation2 + $0x151] sm:$0xff]  ;;  %v9181_v14 = vpop.permute.xlu2 %1595 }
 0x1c8   : > { %13870 = vst [vmem:[#allocation246_spill] sm:$0xff] %v9124_v25  ;;  %v9183_v54 = vpop.permute.xlu1 %1555  ;;  %v6136_v24 = vpack.i.bf16 %v1261_v9, %v1260_v57  ;;  %v4423_v57 = vpack.c.bf16 %v2180_v0, %v2179_v21  ;;  %v1271_v0 = vld [vmem:[#allocation2 + $0x1a9] sm:$0xff]  ;;  %v9233_v21 = vmul.f32 %v9130_v36, %v9187_v6 }
 0x1c9   : > { %13871 = vst [vmem:[#allocation247_spill] sm:$0xff] %v9126_v62 }
 0x1ca   : > { %13872 = vst [vmem:[#allocation248_spill] sm:$0xff] %v9134_v53  ;;  %v1264_v53 = vld [vmem:[#allocation2 + $0x171] sm:$0xff]  ;;  %5944 = vmatmul.msk.bf16.gmra.mxu2 %vm560_vm0, %v4423_v57 }
 0x1cb   : > { %13873 = vst [vmem:[#allocation249_spill] sm:$0xff] %v9138_v30  ;;  %v6141_v30 = vpack.i.bf16 %v1263_v2, %v1262_v20  ;;  %v1266_v2 = vld [vmem:[#allocation2 + $0x181] sm:$0xff] }
 0x1cc   : > { %13874 = vst [vmem:[#allocation250_spill] sm:$0xff] %v9144_v26  ;;  %v1267_v26 = vld [vmem:[#allocation2 + $0x189] sm:$0xff] }
 0x1cd   : > { %13875 = vst [vmem:[#allocation251_spill] sm:$0xff] %v9148_v17  ;;  %v9191_v17 = vmul.f32 %v9118_v46, %v9031_v16  ;;  %6142 = vrot.lane.b32.xlu2 %v6141_v30, %s7319_s30  ;;  %v1269_v46 = vld [vmem:[#allocation2 + $0x199] sm:$0xff]  ;;  %v1270_v30 = vld [vmem:[#allocation2 + $0x1a1] sm:$0xff] }
 0x1ce   : > { %13876 = vst [vmem:[#allocation252_spill] sm:$0xff] %v9152_v8  ;;  %6137 = vrot.lane.b32.xlu1 %v6136_v24, %s7319_s30  ;;  %v1268_v8 = vld [vmem:[#allocation2 + $0x191] sm:$0xff]  ;;  %v9229_v24 = vmul.f32 %v9176_v15, %v9086_v52  ;;  %v9235_v57 = vpop.permute.xlu0 %1575 }
 0x1cf   : > { %13877 = vst [vmem:[#allocation253_spill] sm:$0xff] %v9156_v47  ;;  %v1265_v47 = vld [vmem:[#allocation2 + $0x179] sm:$0xff]  ;;  %v9221_v45 = vpop.permute.xlu2 %1607  ;;  %v6156_v9 = vpack.i.bf16 %v1269_v46, %v1268_v8 }
 0x1d0   : > { %13878 = vst [vmem:[#allocation254_spill] sm:$0xff] %v9160_v33  ;;  %v9199_v33 = vmul.f32 %v9124_v25, %v9183_v54  ;;  %v6146_v55 = vpack.i.bf16 %v1265_v47, %v1264_v53  ;;  %v9213_v16 = vld [vmem:[#allocation2 + $0x1d2] sm:$0xff]  ;;  %v9215_v25 = vld [vmem:[#allocation2 + $0x1c2] sm:$0xff]  ;;  %v9223_v47 = vpop.permute.xlu1 %1567  ;;  %v9225_v53 = vld [vmem:[#allocation2 + $0x1da] sm:$0xff] }
 0x1d1   : > { %13879 = vst [vmem:[#allocation255_spill] sm:$0xff] %v9164_v19  ;;  %v9203_v19 = vmul.f32 %v9179_v11, %v9183_v54  ;;  %v9239_v20 = vmul.f32 %v9215_v25, %v9187_v6  ;;  %v9257_v46 = vmul.f32 %v9213_v16, %v9086_v52  ;;  %v9261_v8 = vmul.f32 %v9225_v53, %v9235_v57  ;;  %v1273_v52 = vld [vmem:[#allocation2 + $0x1b9] sm:$0xff] }
 0x1d2   : > { %13880 = vst [vmem:[#allocation256_spill] sm:$0xff] %v9176_v15  ;;  %6147 = vrot.lane.b32.xlu0 %v6146_v55, %s7319_s30  ;;  %v6151_v55 = vpack.i.bf16 %v1267_v26, %v1266_v2  ;;  %v6161_v26 = vpack.i.bf16 %v1271_v0, %v1270_v30  ;;  %v1275_v30 = vld [vmem:[#allocation2 + $0x1c9] sm:$0xff] }
 0x1d3   : > { %13881 = vst [vmem:[#allocation257_spill] sm:$0xff] %v9179_v11  ;;  %v9273_v0 = vld [vmem:[#allocation2 + $0x1ea] sm:$0xff]  ;;  %v9276_v2 = vld [vmem:[#allocation2 + $0x1e2] sm:$0xff] }
 0x1d4   : > { %13882 = vst [vmem:[#allocation258_spill] sm:$0xff] %v9181_v14 }
 0x1d5   : > { %13883 = vst [vmem:[#allocation259_spill] sm:$0xff] %v9187_v6  ;;  %6157 = vrot.lane.b32.xlu2 %v6156_v9, %s7319_s30  ;;  %v1274_v6 = vld [vmem:[#allocation2 + $0x1c1] sm:$0xff] }
 0x1d6   : > { %13884 = vst [vmem:[#allocation260_spill] sm:$0xff] %v9191_v17  ;;  %v9247_v17 = vmul.f32 %v9219_v39, %v9223_v47  ;;  %6152 = vrot.lane.b32.xlu1 %v6151_v55, %s7319_s30  ;;  %v2181_v55 = vmul.f32 %v8804_v63, %v8758_v40 }
 0x1d7   : > { %13885 = vst [vmem:[#allocation261_spill] sm:$0xff] %v9195_v56  ;;  %v9253_v56 = vpop.f32.mrf.mxu2  ;;  %v9278_v15 = vpop.permute.xlu2 %1619 }
 0x1d8   : > { %13886 = vst [vmem:[#allocation262_spill] sm:$0xff] %v9199_v33  ;;  %v9243_v33 = vmul.f32 %v9179_v11, %v9223_v47  ;;  %v1272_v11 = vld [vmem:[#allocation2 + $0x1b1] sm:$0xff] }
 0x1d9   : > { %13887 = vst [vmem:[#allocation263_spill] sm:$0xff] %v9203_v19  ;;  %v9251_v19 = vmul.f32 %v9215_v25, %v9235_v57  ;;  %v6166_v9 = vpack.i.bf16 %v1273_v52, %v1272_v11 }
 0x1da   : > { %13888 = vst [vmem:[#allocation264_spill] sm:$0xff] %v9213_v16  ;;  %6162 = vrot.lane.b32.xlu0 %v6161_v26, %s7319_s30  ;;  %v9292_v26 = vmul.f32 %v9273_v0, %v9126_v62 }
 0x1db   : > { %13889 = vst [vmem:[#allocation265_spill] sm:$0xff] %v9215_v25  ;;  %v9280_v25 = vpop.permute.xlu1 %1579 }
 0x1dc   : > { %13890 = vst [vmem:[#allocation266_spill] sm:$0xff] %v9219_v39 }
 0x1dd   : > { %13891 = vst [vmem:[#allocation267_spill] sm:$0xff] %v9221_v45 }
 0x1de   : > { %13892 = vst [vmem:[#allocation268_spill] sm:$0xff] %v9225_v53  ;;  %6167 = vrot.lane.b32.xlu1 %v6166_v9, %s7319_s30  ;;  %v1283_v9 = vld [vmem:[#allocation2 + $0x209] sm:$0xff] }
 0x1df   : > { %13893 = vst [vmem:[#allocation269_spill] sm:$0xff] %v9229_v24  ;;  %v1276_v24 = vld [vmem:[#allocation2 + $0x1d1] sm:$0xff]  ;;  %v9302_v40 = vpop.f32.mrf.mxu2 }
 0x1e0   : > { %13894 = vst [vmem:[#allocation270_spill] sm:$0xff] %v9233_v21  ;;  %v6171_v21 = vpack.i.bf16 %v1275_v30, %v1274_v6  ;;  %v2182_v6 = vmul.f32 %v8818_v38, %v8597_v51  ;;  %v9318_v51 = vld [vmem:[#allocation2 + $0x1fa] sm:$0xff] }
 0x1e1   : > { %13895 = vst [vmem:[#allocation271_spill] sm:$0xff] %v9239_v20 }
 0x1e2   : > { %13896 = vst [vmem:[#allocation272_spill] sm:$0xff] %v9243_v33  ;;  %v9288_v33 = vmul.f32 %v9213_v16, %v9126_v62  ;;  %v4426_v20 = vpack.c.bf16 %v2182_v6, %v2181_v55  ;;  %6172 = vrot.lane.b32.xlu2 %v6171_v21, %s7319_s30  ;;  %v1279_v16 = vld [vmem:[#allocation2 + $0x1e9] sm:$0xff]  ;;  %v1280_v62 = vld [vmem:[#allocation2 + $0x1f1] sm:$0xff]  ;;  %v1282_v21 = vld [vmem:[#allocation2 + $0x201] sm:$0xff]  ;;  %v9328_v6 = vmul.f32 %v9273_v0, %v9181_v14 }
 0x1e3   : > { %13897 = vst [vmem:[#allocation273_spill] sm:$0xff] %v9247_v17  ;;  %v1278_v17 = vld [vmem:[#allocation2 + $0x1e1] sm:$0xff]  ;;  %v9324_v55 = vld [vmem:[#allocation2 + $0x20a] sm:$0xff] }
 0x1e4   : > { %13898 = vst [vmem:[#allocation274_spill] sm:$0xff] %v9251_v19  ;;  %v1277_v19 = vld [vmem:[#allocation2 + $0x1d9] sm:$0xff]  ;;  %5945 = vmatmul.msk.bf16.gmra.mxu2 %vm560_vm0, %v4426_v20 }
 0x1e5   : > { %13899 = vst [vmem:[#allocation275_spill] sm:$0xff] %v9253_v56  ;;  %v9284_v56 = vpop.permute.xlu0 %1587  ;;  %v6176_v52 = vpack.i.bf16 %v1277_v19, %v1276_v24  ;;  %v9320_v19 = vpop.permute.xlu2 %1631 }
 0x1e6   : > { %13900 = vst [vmem:[#allocation276_spill] sm:$0xff] %v9257_v46  ;;  %v9296_v46 = vmul.f32 %v9219_v39, %v9280_v25  ;;  %v1281_v39 = vld [vmem:[#allocation2 + $0x1f9] sm:$0xff]  ;;  %v9322_v24 = vpop.permute.xlu1 %1591  ;;  %v9332_v30 = vmul.f32 %v9225_v53, %v9284_v56  ;;  %v1286_v53 = vld [vmem:[#allocation2 + $0x221] sm:$0xff] }
 0x1e7   : > { %13901 = vst [vmem:[#allocation277_spill] sm:$0xff] %v9261_v8  ;;  %v9300_v8 = vmul.f32 %v9276_v2, %v9280_v25  ;;  %6177 = vrot.lane.b32.xlu0 %v6176_v52, %s7319_s30  ;;  %v6181_v52 = vpack.i.bf16 %v1279_v16, %v1278_v17  ;;  %v6186_v11 = vpack.i.bf16 %v1281_v39, %v1280_v62  ;;  %v9375_v39 = vld [vmem:[#allocation2 + $0x212] sm:$0xff] }
 0x1e8   : > { %13902 = vst [vmem:[#allocation278_spill] sm:$0xff] %v9273_v0  ;;  %v9352_v0 = vpop.f32.mrf.mxu2  ;;  %v6191_v62 = vpack.i.bf16 %v1283_v9, %v1282_v21  ;;  %v1287_v21 = vld [vmem:[#allocation2 + $0x229] sm:$0xff]  ;;  %v9372_v9 = vld [vmem:[#allocation2 + $0x21a] sm:$0xff] }
 0x1e9   : > { %13903 = vst [vmem:[#allocation279_spill] sm:$0xff] %v9276_v2  ;;  %6182 = vrot.lane.b32.xlu1 %v6181_v52, %s7319_s30  ;;  %v2184_v52 = vmul.f32 %v8859_v37, %v8796_v18 }
 0x1ea   : > { %13904 = vst [vmem:[#allocation280_spill] sm:$0xff] %v9280_v25  ;;  %v9314_v25 = vld [vmem:[#allocation2 + $0x1f2] sm:$0xff]  ;;  %6187 = vrot.lane.b32.xlu2 %v6186_v11, %s7319_s30 }
 0x1eb   : > { %13905 = vst [vmem:[#allocation281_spill] sm:$0xff] %v9284_v56 }
 0x1ec   : > { %13906 = vst [vmem:[#allocation282_spill] sm:$0xff] %v9288_v33  ;;  %v9342_v33 = vmul.f32 %v9276_v2, %v9322_v24 }
 0x1ed   : > { %13907 = vst [vmem:[#allocation283_spill] sm:$0xff] %v9292_v26  ;;  %v9334_v20 = vpop.permute.xlu0 %1599  ;;  %v9377_v2 = vpop.permute.xlu2 %1643 }
 0x1ee   : > { %13908 = vst [vmem:[#allocation284_spill] sm:$0xff] %v9296_v46  ;;  %v9338_v46 = vmul.f32 %v9314_v25, %v9284_v56  ;;  %v9350_v26 = vmul.f32 %v9314_v25, %v9334_v20  ;;  %v9360_v17 = vmul.f32 %v9324_v55, %v9334_v20  ;;  %v1284_v56 = vld [vmem:[#allocation2 + $0x211] sm:$0xff] }
 0x1ef   : > { %13909 = vst [vmem:[#allocation285_spill] sm:$0xff] %v9300_v8  ;;  %v9346_v8 = vmul.f32 %v9318_v51, %v9322_v24  ;;  %6192 = vrot.lane.b32.xlu0 %v6191_v62, %s7319_s30  ;;  %v9391_v62 = vmul.f32 %v9372_v9, %v9221_v45 }
 0x1f0   : > { %13910 = vst [vmem:[#allocation286_spill] sm:$0xff] %v9302_v40  ;;  %v9312_v40 = vld [vmem:[#allocation2 + $0x202] sm:$0xff]  ;;  %v9401_v18 = vpop.f32.mrf.mxu2 }
 0x1f1   : > { %13911 = vst [vmem:[#allocation287_spill] sm:$0xff] %v9312_v40  ;;  %v9356_v16 = vmul.f32 %v9312_v40, %v9181_v14  ;;  %v1285_v14 = vld [vmem:[#allocation2 + $0x219] sm:$0xff] }
 0x1f2   : > { %13912 = vst [vmem:[#allocation288_spill] sm:$0xff] %v9314_v25  ;;  %v9379_v25 = vpop.permute.xlu1 %1603  ;;  %v6196_v11 = vpack.i.bf16 %v1285_v14, %v1284_v56  ;;  %v2183_v14 = vmul.f32 %v8810_v23, %v8774_v29 }
 0x1f3   : > { %13913 = vst [vmem:[#allocation289_spill] sm:$0xff] %v9328_v6  ;;  %v1288_v6 = vld [vmem:[#allocation2 + $0x231] sm:$0xff] }
 0x1f4   : > { %13914 = vst [vmem:[#allocation290_spill] sm:$0xff] %v9332_v30  ;;  %v9395_v30 = vmul.f32 %v9318_v51, %v9379_v25  ;;  %6197 = vrot.lane.b32.xlu1 %v6196_v11, %s7319_s30 }
 0x1f5   : > { %13915 = vst [vmem:[#allocation291_spill] sm:$0xff] %v9338_v46  ;;  %v7178_v46 = vld [vmem:[#allocation2 + $0x1a] sm:$0xff] }
 0x1f6   : > { %13916 = vst [vmem:[#allocation292_spill] sm:$0xff] %v9342_v33  ;;  %v9399_v33 = vmul.f32 %v9375_v39, %v9379_v25  ;;  %v1653_v11 = vmul.f32 %v7178_v46, %v8531_v32  ;;  %v9451_v32 = vmul.f32 %v9372_v9, %v9278_v15 }
 0x1f7   : > { %13917 = vst [vmem:[#allocation293_spill] sm:$0xff] %v9346_v8  ;;  %v1291_v8 = vld [vmem:[#allocation2 + $0xa] sm:$0xff] }
 0x1f8   : > { %13918 = vst [vmem:[#allocation294_spill] sm:$0xff] %v9350_v26  ;;  %v9387_v26 = vmul.f32 %v9312_v40, %v9221_v45  ;;  %v4429_v40 = vpack.c.bf16 %v2184_v52, %v2183_v14  ;;  %v9409_v45 = vld [vmem:[#allocation2 + $0x222] sm:$0xff]  ;;  %v1651_v52 = vmul.f32 %v8503_v50, %v1291_v8 }
 0x1f9   : > { %13919 = vst [vmem:[#allocation295_spill] sm:$0xff] %v9352_v0  ;;  %v1289_v0 = vld [vmem:[#allocation2 + $0x239] sm:$0xff] }
 0x1fa   : > { %13920 = vst [vmem:[#allocation296_spill] sm:$0xff] %v9356_v16  ;;  %v9383_v16 = vpop.permute.xlu0 %1611  ;;  %v6206_v56 = vpack.i.bf16 %v1289_v0, %v1288_v6  ;;  %v9416_v0 = vld [vmem:[#allocation2 + $0x232] sm:$0xff]  ;;  %5946 = vmatmul.msk.bf16.gmra.mxu2 %vm560_vm0, %v4429_v40  ;;  %v9420_v6 = vld [vmem:[#allocation2 + $0x23a] sm:$0xff] }
 0x1fb   : > { %13921 = vst [vmem:[#allocation297_spill] sm:$0xff] %v9360_v17  ;;  %v6201_v17 = vpack.i.bf16 %v1287_v21, %v1286_v53  ;;  %v1292_v53 = vld [vmem:[#allocation2 + $0x12] sm:$0xff]  ;;  %v9427_v21 = vpop.permute.xlu1 %1615  ;;  %v9433_v40 = vmul.f32 %v9324_v55, %v9383_v16 }
 0x1fc   : > { %13922 = vst [vmem:[#allocation298_spill] sm:$0xff] %v9372_v9  ;;  %v1652_v29 = vmul.f32 %v8442_v3, %v1292_v53  ;;  %6207 = vrot.lane.b32.xlu0 %v6206_v56, %s7319_s30  ;;  %v9429_v3 = vpop.permute.xlu2 %6037  ;;  %v9437_v56 = vmul.f32 %v9409_v45, %v9383_v16  ;;  %v9441_v50 = vmul.f32 %v9375_v39, %v9427_v21  ;;  %v7179_v53 = vld [vmem:[#allocation2 + $0x22] sm:$0xff] }
 0x1fd   : > { %13923 = vst [vmem:[#allocation299_spill] sm:$0xff] %v9375_v39  ;;  %6202 = vrot.lane.b32.xlu2 %v6201_v17, %s7319_s30  ;;  %v1655_v17 = vmul.f32 %v8523_v31, %v8533_v13  ;;  %v9455_v13 = vmul.f32 %v9416_v0, %v9278_v15  ;;  %v2008_v39 = vld [vmem:[#allocation2 + $0x24a] sm:$0xff] }
 0x1fe   : > { %13924 = vst [vmem:[#allocation300_spill] sm:$0xff] %v9377_v2  ;;  %v1290_v2 = vld [vmem:[#allocation2 + $0x2] sm:$0xff] }
 0x1ff   : > { %13925 = vst [vmem:[#allocation301_spill] sm:$0xff] %v9387_v26  ;;  %v1650_v14 = vmul.f32 %v8505_v12, %v1290_v2  ;;  %v9465_v2 = vpop.f32.mrf.mxu2 }
 0x200   : > { %13926 = vst [vmem:[#allocation302_spill] sm:$0xff] %v9391_v62 }
 0x201   : > { %13927 = vst [vmem:[#allocation303_spill] sm:$0xff] %v9395_v30  ;;  %v6211_v26 = vpack.i.bf16 %v1651_v52, %v1650_v14  ;;  %v2186_v52 = vmul.f32 %v8883_v4, %v8816_v22  ;;  %v13949_v30 = vpack.i.bf16 %v8566_v34, %v8570_v7  ;;  %v13957_v34 = vld [vmem:[#allocation156_spill] sm:$0xff] }
 0x202   : > { %13928 = vst [vmem:[#allocation304_spill] sm:$0xff] %v9399_v33  ;;  %v9447_v31 = vpop.permute.xlu0 %1623  ;;  %v1654_v33 = vmul.f32 %v7179_v53, %v8470_v27  ;;  %v2007_v27 = vld [vmem:[#allocation2 + $0x242] sm:$0xff] }
 0x203   : > { %13929 = vst [vmem:[#allocation305_spill] sm:$0xff] %v9401_v18  ;;  %v9413_v18 = vld [vmem:[#allocation2 + $0x22a] sm:$0xff]  ;;  %v9459_v46 = vmul.f32 %v9409_v45, %v9447_v31  ;;  %v9463_v8 = vmul.f32 %v9420_v6, %v9447_v31  ;;  %6212 = vrot.lane.b32.xlu1 %v6211_v26, %s7320_s17 }
 0x204   : > { %13930 = vst [vmem:[#allocation306_spill] sm:$0xff] %v9409_v45  ;;  %v9445_v12 = vmul.f32 %v9413_v18, %v9427_v21  ;;  %v9483_v14 = vpop.permute.xlu2 %6052 }
 0x205   : > { %13931 = vst [vmem:[#allocation307_spill] sm:$0xff] %v9420_v6  ;;  %v6221_v6 = vpack.i.bf16 %v1655_v17, %v1654_v33  ;;  %v9490_v33 = vmul.f32 %v2008_v39, %v9320_v19 }
 0x206   : > { %13932 = vst [vmem:[#allocation308_spill] sm:$0xff] %v9429_v3  ;;  %v6216_v3 = vpack.i.bf16 %v1653_v11, %v1652_v29  ;;  %v9481_v29 = vpop.permute.xlu1 %1627  ;;  %v9487_v11 = vmul.f32 %v9416_v0, %v9320_v19 }
 0x207   : > { %13933 = vst [vmem:[#allocation309_spill] sm:$0xff] %v9433_v40  ;;  %6222 = vrot.lane.b32.xlu0 %v6221_v6, %s7320_s17  ;;  %v9494_v26 = vmul.f32 %v9413_v18, %v9481_v29  ;;  %v9497_v6 = vmul.f32 %v2007_v27, %v9481_v29  ;;  %v9501_v22 = vpop.f32.mrf.mxu2  ;;  %v13950_v27 = vpack.i.bf16 %v8616_v5, %v8611_v60  ;;  %v13960_v5 = vld [vmem:[#allocation162_spill] sm:$0xff] }
 0x208   : > { %13934 = vst [vmem:[#allocation310_spill] sm:$0xff] %v9437_v56  ;;  %6217 = vrot.lane.b32.xlu2 %v6216_v3, %s7320_s17  ;;  %v2185_v3 = vmul.f32 %v8857_v48, %v8651_v10  ;;  %v13951_v10 = vld [vmem:[#allocation151_spill] sm:$0xff]  ;;  %v13978_v56 = vld [vmem:[#allocation174_spill] sm:$0xff] }
 0x209   : > { %13935 = vst [vmem:[#allocation311_spill] sm:$0xff] %v9441_v50  ;;  %v13952_v53 = vpack.i.bf16 %v8628_v43, %v13951_v10  ;;  %v13963_v43 = vld [vmem:[#allocation165_spill] sm:$0xff]  ;;  %v14002_v50 = vld [vmem:[#allocation204_spill] sm:$0xff] }
 0x20a   : > { %13936 = vst [vmem:[#allocation312_spill] sm:$0xff] %v9445_v12  ;;  %v9499_v17 = vpop.permute.xlu0 %1635  ;;  %v4432_v9 = vpack.c.bf16 %v2186_v52, %v2185_v3 }
 0x20b   : > { %13937 = vst [vmem:[#allocation313_spill] sm:$0xff] %v9451_v32  ;;  %6227 = vrot.lane.b32.xlu1 %v13949_v30, %s7320_s17  ;;  %v13958_v30 = vld [vmem:[#allocation157_spill] sm:$0xff] }
 0x20c   : > { %13938 = vst [vmem:[#allocation314_spill] sm:$0xff] %v9455_v13  ;;  %5947 = vmatmul.msk.bf16.gmra.mxu2 %vm560_vm0, %v4432_v9  ;;  %v9524_v52 = vpop.permute.xlu2 %6067  ;;  %v13959_v60 = vpack.i.bf16 %v13957_v34, %v13958_v30  ;;  %v13961_v9 = vld [vmem:[#allocation161_spill] sm:$0xff]  ;;  %v13969_v34 = vld [vmem:[#allocation190_spill] sm:$0xff] }
 0x20d   : > { %13939 = vst [vmem:[#allocation315_spill] sm:$0xff] %v9459_v46  ;;  %v2188_v30 = vmul.f32 %v13969_v34, %v8693_v35 }
 0x20e   : > { %13940 = vst [vmem:[#allocation316_spill] sm:$0xff] %v9463_v8  ;;  %v9522_v45 = vpop.permute.xlu1 %1639  ;;  %v13977_v8 = vld [vmem:[#allocation179_spill] sm:$0xff] }
 0x20f   : > { %13941 = vst [vmem:[#allocation317_spill] sm:$0xff] %v9465_v2  ;;  %6237 = vrot.lane.b32.xlu0 %v13952_v53, %s7320_s17  ;;  %v9528_v7 = vpop.f32.mrf.mxu2  ;;  %v13964_v53 = vld [vmem:[#allocation160_spill] sm:$0xff]  ;;  %v13979_v12 = vpack.i.bf16 %v13977_v8, %v13978_v56  ;;  %v13985_v56 = vld [vmem:[#allocation183_spill] sm:$0xff] }
 0x210   : > { %13942 = vst [vmem:[#allocation318_spill] sm:$0xff] %v9483_v14  ;;  %6232 = vrot.lane.b32.xlu2 %v13950_v27, %s7320_s17  ;;  %v13962_v27 = vpack.i.bf16 %v13960_v5, %v13961_v9  ;;  %v13965_v10 = vpack.i.bf16 %v13963_v43, %v13964_v53  ;;  %v13971_v9 = vld [vmem:[#allocation169_spill] sm:$0xff]  ;;  %v13974_v53 = vld [vmem:[#allocation176_spill] sm:$0xff] }
 0x211   : > { %13943 = vst [vmem:[#allocation319_spill] sm:$0xff] %v9487_v11  ;;  %v13986_v8 = vld [vmem:[#allocation168_spill] sm:$0xff]  ;;  %v9938_v14 = vld [vmem:[#allocation2 + $0xe8] sm:$0xff] }
 0x212   : > { %13944 = vst [vmem:[#allocation320_spill] sm:$0xff] %v9490_v33  ;;  %v9526_v3 = vpop.permute.xlu0 %1647  ;;  %v13999_v2 = vld [vmem:[#allocation196_spill] sm:$0xff] }
 0x213   : > { %13945 = vst [vmem:[#allocation321_spill] sm:$0xff] %v9494_v26  ;;  %6242 = vrot.lane.b32.xlu1 %v13959_v60, %s7320_s17 }
 0x214   : > { %13946 = vst [vmem:[#allocation322_spill] sm:$0xff] %v9497_v6  ;;  %v9544_v62 = vpop.permute.xlu2 %6082  ;;  %v2187_v6 = vmul.f32 %v8885_v1, %v8853_v41 }
 0x215   : > { %13947 = vst [vmem:[#allocation323_spill] sm:$0xff] %v9499_v17 }
 0x216   : > { %13948 = vst [vmem:[#allocation324_spill] sm:$0xff] %v9501_v22  ;;  %v9542_v39 = vpop.permute.xlu1 %6032  ;;  %v4435_v5 = vpack.c.bf16 %v2188_v30, %v2187_v6  ;;  %v1674_v6 = vmul.f32 %v8804_v63, %v8853_v41  ;;  %v13980_v30 = vld [vmem:[#allocation187_spill] sm:$0xff]  ;;  %v1678_v63 = vmul.f32 %v8857_v48, %v13986_v8 }
 0x217   : > { %13953 = vst [vmem:[#allocation151_spill] sm:$0xff] %v9522_v45  ;;  %6252 = vrot.lane.b32.xlu0 %v13965_v10, %s7320_s17  ;;  %v9552_v60 = vpop.f32.mrf.mxu2  ;;  %v13975_v10 = vld [vmem:[#allocation175_spill] sm:$0xff] }
 0x218   : > { %13954 = vst [vmem:[#allocation325_spill] sm:$0xff] %v9524_v52  ;;  %6247 = vrot.lane.b32.xlu2 %v13962_v27, %s7320_s17  ;;  %v13972_v27 = vld [vmem:[#allocation170_spill] sm:$0xff]  ;;  %v13976_v13 = vpack.i.bf16 %v13974_v53, %v13975_v10  ;;  %v14117_v52 = vld [vmem:[#allocation55_spill] sm:$0xff] }
 0x219   : > { %13955 = vst [vmem:[#allocation326_spill] sm:$0xff] %v9526_v3  ;;  %v13973_v43 = vpack.i.bf16 %v13971_v9, %v13972_v27 }
 0x21a   : > { %13956 = vst [vmem:[#allocation327_spill] sm:$0xff] %v9528_v7  ;;  %v9548_v33 = vpop.permute.xlu0 %6042 }
 0x21b   : > { %13966 = vst [vmem:[#allocation156_spill] sm:$0xff] %v9542_v39  ;;  %6257 = vrot.lane.b32.xlu1 %v13973_v43, %s7320_s17  ;;  %v13983_v43 = vld [vmem:[#allocation189_spill] sm:$0xff]  ;;  %v9916_v39 = vld [vmem:[#allocation2 + $0xe0] sm:$0xff] }
 0x21c   : > { %13967 = vst [vmem:[#allocation157_spill] sm:$0xff] %v9544_v62  ;;  %5948 = vmatmul.msk.bf16.gmra.mxu2 %vm560_vm0, %v4435_v5  ;;  %v9573_v27 = vpop.permute.xlu2 %6097  ;;  %v1675_v5 = vmul.f32 %v8818_v38, %v8693_v35  ;;  %v1680_v35 = vmul.f32 %v8885_v1, %v8918_v49  ;;  %v13988_v38 = vld [vmem:[#allocation202_spill] sm:$0xff]  ;;  %v13997_v1 = vld [vmem:[#allocation188_spill] sm:$0xff] }
 0x21d   : > { %13968 = vst [vmem:[#allocation162_spill] sm:$0xff] %v9548_v33  ;;  %v2189_v11 = vmul.f32 %v13997_v1, %v13985_v56 }
 0x21e   : > { %13970 = vst [vmem:[#allocation161_spill] sm:$0xff] %v9552_v60  ;;  %v1677_v60 = vmul.f32 %v8859_v37, %v13980_v30  ;;  %v9571_v9 = vpop.permute.xlu1 %6047  ;;  %v6271_v41 = vpack.i.bf16 %v1675_v5, %v1674_v6  ;;  %v13992_v6 = vld [vmem:[#allocation206_spill] sm:$0xff] }
 0x21f   : > { %6267 = vrot.lane.b32.xlu0 %v13979_v12, %s7320_s17  ;;  %13981 = vst [vmem:[#allocation165_spill] sm:$0xff] %v9571_v9  ;;  %v1676_v12 = vmul.f32 %v8810_v23, %v13985_v56  ;;  %v9585_v10 = vpop.f32.mrf.mxu2 }
 0x220   : > { %6262 = vrot.lane.b32.xlu2 %v13976_v13, %s7320_s17  ;;  %13982 = vst [vmem:[#allocation160_spill] sm:$0xff] %v9573_v27  ;;  %v1679_v13 = vmul.f32 %v8883_v4, %v13983_v43  ;;  %v13989_v4 = vld [vmem:[#allocation197_spill] sm:$0xff] }
 0x221   : > { %v6276_v37 = vpack.i.bf16 %v1677_v60, %v1676_v12  ;;  %13987 = vst [vmem:[#allocation169_spill] sm:$0xff] %v9585_v10  ;;  %v1683_v23 = vmul.f32 %v13989_v4, %v13988_v38  ;;  %v2190_v60 = vmul.f32 %v13989_v4, %v13980_v30  ;;  %v13998_v10 = vld [vmem:[#allocation182_spill] sm:$0xff] }
 0x222   : > { %v9577_v53 = vpop.permute.xlu0 %6057  ;;  %v6281_v7 = vpack.i.bf16 %v1679_v13, %v1678_v63  ;;  %v13993_v13 = vld [vmem:[#allocation203_spill] sm:$0xff]  ;;  %v13995_v63 = vld [vmem:[#allocation173_spill] sm:$0xff]  ;;  %v1684_v26 = vmul.f32 %v13999_v2, %v13998_v10 }
 0x223   : > { %13984 = vst [vmem:[#allocation190_spill] sm:$0xff] %v9577_v53  ;;  %6272 = vrot.lane.b32.xlu1 %v6271_v41, %s7320_s17  ;;  %v1685_v5 = vmul.f32 %v13993_v13, %v13992_v6  ;;  %v13996_v41 = vld [vmem:[#allocation198_spill] sm:$0xff]  ;;  %v4438_v30 = vpack.c.bf16 %v2190_v60, %v2189_v11  ;;  %v14009_v60 = vld [vmem:[#allocation207_spill] sm:$0xff] }
 0x224   : > { %v9596_v48 = vpop.permute.xlu2 %6112  ;;  %v14111_v53 = vld [vmem:[#allocation30_spill] sm:$0xff] }
 0x225   : > { %13991 = vst [vmem:[#allocation176_spill] sm:$0xff] %v9596_v48  ;;  %v6296_v4 = vpack.i.bf16 %v1685_v5, %v1684_v26 }
 0x226   : > { %v9594_v22 = vpop.permute.xlu1 %6062 }
 0x227   : > { %6282 = vrot.lane.b32.xlu0 %v6281_v7, %s7320_s17  ;;  %13990 = vst [vmem:[#allocation170_spill] sm:$0xff] %v9594_v22  ;;  %v1681_v7 = vmul.f32 %v13969_v34, %v13995_v63  ;;  %v9614_v40 = vpop.f32.mrf.mxu2  ;;  %v14001_v34 = vld [vmem:[#allocation215_spill] sm:$0xff]  ;;  %v14003_v22 = vld [vmem:[#allocation217_spill] sm:$0xff] }
 0x228   : > { %6277 = vrot.lane.b32.xlu2 %v6276_v37, %s7320_s17  ;;  %v1682_v37 = vmul.f32 %v13997_v1, %v13996_v41  ;;  %14000 = vst [vmem:[#allocation179_spill] sm:$0xff] %v9614_v40  ;;  %v1689_v56 = vmul.f32 %v14003_v22, %v9033_v61  ;;  %v14011_v1 = vld [vmem:[#allocation205_spill] sm:$0xff] }
 0x229   : > { %v6286_v32 = vpack.i.bf16 %v1681_v7, %v1680_v35  ;;  %v14010_v7 = vld [vmem:[#allocation218_spill] sm:$0xff] }
 0x22a   : > { %v9602_v12 = vpop.permute.xlu0 %6072  ;;  %v6291_v46 = vpack.i.bf16 %v1683_v23, %v1682_v37  ;;  %v14008_v23 = vld [vmem:[#allocation186_spill] sm:$0xff]  ;;  %v1688_v37 = vmul.f32 %v14011_v1, %v14010_v7 }
 0x22b   : > { %13994 = vst [vmem:[#allocation175_spill] sm:$0xff] %v9602_v12  ;;  %6287 = vrot.lane.b32.xlu1 %v6286_v32, %s7320_s17  ;;  %v1686_v12 = vmul.f32 %v14002_v50, %v14001_v34  ;;  %v14006_v32 = vld [vmem:[#allocation224_spill] sm:$0xff]  ;;  %v1687_v5 = vmul.f32 %v14009_v60, %v14008_v23  ;;  %v14015_v23 = vld [vmem:[#allocation226_spill] sm:$0xff] }
 0x22c   : > { %5949 = vmatmul.msk.bf16.gmra.mxu2 %vm560_vm0, %v4438_v30  ;;  %v9624_v11 = vpop.permute.xlu2 %6127  ;;  %v1691_v26 = vmul.f32 %v14006_v32, %v9041_v59  ;;  %v14012_v30 = vld [vmem:[#allocation195_spill] sm:$0xff]  ;;  %v6306_v61 = vpack.i.bf16 %v1689_v56, %v1688_v37  ;;  %v14014_v59 = vld [vmem:[#allocation213_spill] sm:$0xff] }
 0x22d   : > { %14005 = vst [vmem:[#allocation187_spill] sm:$0xff] %v9624_v11  ;;  %v6301_v40 = vpack.i.bf16 %v1687_v5, %v1686_v12  ;;  %v2192_v12 = vmul.f32 %v13993_v13, %v13983_v43  ;;  %v14021_v5 = vld [vmem:[#allocation212_spill] sm:$0xff]  ;;  %v14022_v37 = vld [vmem:[#allocation239_spill] sm:$0xff] }
 0x22e   : > { %v9622_v35 = vpop.permute.xlu1 %6077 }
 0x22f   : > { %6297 = vrot.lane.b32.xlu0 %v6296_v4, %s7320_s17  ;;  %14004 = vst [vmem:[#allocation174_spill] sm:$0xff] %v9622_v35  ;;  %v14013_v4 = vld [vmem:[#allocation216_spill] sm:$0xff]  ;;  %v1695_v35 = vmul.f32 %v14015_v23, %v9128_v42  ;;  %v9651_v56 = vpop.f32.mrf.mxu2 }
 0x230   : > { %6292 = vrot.lane.b32.xlu2 %v6291_v46, %s7320_s17  ;;  %v1690_v34 = vmul.f32 %v14013_v4, %v14012_v30  ;;  %14018 = vst [vmem:[#allocation202_spill] sm:$0xff] %v9651_v56  ;;  %v14023_v30 = vld [vmem:[#allocation225_spill] sm:$0xff] }
 0x231   : > { %v1694_v42 = vmul.f32 %v14023_v30, %v14022_v37  ;;  %v14033_v37 = vld [vmem:[#allocation259_spill] sm:$0xff]  ;;  %v14034_v30 = vld [vmem:[#allocation245_spill] sm:$0xff] }
 0x232   : > { %v9628_v46 = vpop.permute.xlu0 %6087  ;;  %v6311_v48 = vpack.i.bf16 %v1691_v26, %v1690_v34  ;;  %v2191_v34 = vmul.f32 %v13999_v2, %v13986_v8  ;;  %v14027_v2 = vld [vmem:[#allocation246_spill] sm:$0xff] }
 0x233   : > { %14007 = vst [vmem:[#allocation189_spill] sm:$0xff] %v9628_v46  ;;  %6302 = vrot.lane.b32.xlu1 %v6301_v40, %s7320_s17  ;;  %v1692_v46 = vmul.f32 %v14014_v59, %v9088_v58  ;;  %v1697_v40 = vmul.f32 %v9035_v44, %v9140_v28  ;;  %v14025_v59 = vld [vmem:[#allocation223_spill] sm:$0xff]  ;;  %v6321_v13 = vpack.i.bf16 %v1695_v35, %v1694_v42  ;;  %v14026_v28 = vld [vmem:[#allocation237_spill] sm:$0xff] }
 0x234   : > { %v9645_v7 = vpop.permute.xlu2 %6142  ;;  %v1701_v8 = vmul.f32 %v14027_v2, %v9223_v47  ;;  %v1703_v35 = vmul.f32 %v9130_v36, %v9235_v57  ;;  %v1700_v42 = vmul.f32 %v14034_v30, %v14033_v37  ;;  %v14038_v36 = vld [vmem:[#allocation280_spill] sm:$0xff]  ;;  %v14039_v57 = vld [vmem:[#allocation257_spill] sm:$0xff] }
 0x235   : > { %14017 = vst [vmem:[#allocation168_spill] sm:$0xff] %v9645_v7  ;;  %v4441_v7 = vpack.c.bf16 %v2192_v12, %v2191_v34  ;;  %v14035_v34 = vld [vmem:[#allocation238_spill] sm:$0xff]  ;;  %v14046_v37 = vld [vmem:[#allocation256_spill] sm:$0xff] }
 0x236   : > { %v9643_v11 = vpop.permute.xlu1 %6092 }
 0x237   : > { %6312 = vrot.lane.b32.xlu0 %v6311_v48, %s7320_s17  ;;  %14016 = vst [vmem:[#allocation183_spill] sm:$0xff] %v9643_v11  ;;  %v14020_v48 = vld [vmem:[#allocation201_spill] sm:$0xff]  ;;  %v9903_v11 = vld [vmem:[#allocation2 + $0xd0] sm:$0xff] }
 0x238   : > { %6307 = vrot.lane.b32.xlu2 %v6306_v61, %s7320_s17  ;;  %v1693_v58 = vmul.f32 %v14021_v5, %v14020_v48  ;;  %v14024_v61 = vld [vmem:[#allocation214_spill] sm:$0xff]  ;;  %v1698_v48 = vmul.f32 %v14026_v28, %v9183_v54  ;;  %v14036_v54 = vld [vmem:[#allocation244_spill] sm:$0xff]  ;;  %v1817_v27 = vmul.f32 %v9903_v11, %v14111_v53 }
 0x239   : > { %v1696_v23 = vmul.f32 %v14025_v59, %v14024_v61  ;;  %v1702_v61 = vmul.f32 %v14036_v54, %v14035_v34  ;;  %v9685_v59 = vpop.f32.mrf.mxu2  ;;  %v14048_v34 = vld [vmem:[#allocation265_spill] sm:$0xff] }
 0x23a   : > { %v9653_v26 = vpop.permute.xlu0 %6102  ;;  %v6316_v43 = vpack.i.bf16 %v1693_v58, %v1692_v46  ;;  %v14032_v58 = vld [vmem:[#allocation236_spill] sm:$0xff]  ;;  %14037 = vst [vmem:[#allocation198_spill] sm:$0xff] %v9685_v59  ;;  %v14086_v59 = vld [vmem:[#allocation7_spill] sm:$0xff] }
 0x23b   : > { %14019 = vst [vmem:[#allocation197_spill] sm:$0xff] %v9653_v26  ;;  %v6326_v44 = vpack.i.bf16 %v1697_v40, %v1696_v23  ;;  %v14031_v40 = vld [vmem:[#allocation227_spill] sm:$0xff]  ;;  %v6336_v23 = vpack.i.bf16 %v1701_v8, %v1700_v42  ;;  %v14043_v8 = vld [vmem:[#allocation268_spill] sm:$0xff]  ;;  %v14047_v42 = vld [vmem:[#allocation281_spill] sm:$0xff] }
 0x23c   : > { %6317 = vrot.lane.b32.xlu1 %v6316_v43, %s7320_s17  ;;  %5950 = vmatmul.msk.bf16.gmra.mxu2 %vm560_vm0, %v4441_v7  ;;  %v9673_v46 = vpop.permute.xlu2 %6157  ;;  %v1699_v7 = vmul.f32 %v14032_v58, %v14031_v40  ;;  %v6341_v43 = vpack.i.bf16 %v1703_v35, %v1702_v61  ;;  %v1709_v35 = vmul.f32 %v14043_v8, %v9334_v20  ;;  %v14049_v61 = vld [vmem:[#allocation258_spill] sm:$0xff]  ;;  %v14056_v8 = vld [vmem:[#allocation267_spill] sm:$0xff] }
 0x23d   : > { %14029 = vst [vmem:[#allocation203_spill] sm:$0xff] %v9673_v46  ;;  %v1706_v54 = vmul.f32 %v14048_v34, %v14047_v42  ;;  %v14102_v46 = vld [vmem:[#allocation44_spill] sm:$0xff]  ;;  %v14110_v26 = vld [vmem:[#allocation23_spill] sm:$0xff] }
 0x23e   : > { %v9671_v5 = vpop.permute.xlu1 %6107  ;;  %v6331_v47 = vpack.i.bf16 %v1699_v7, %v1698_v48  ;;  %v2193_v48 = vmul.f32 %v14002_v50, %v8918_v49  ;;  %v14045_v7 = vld [vmem:[#allocation247_spill] sm:$0xff] }
 0x23f   : > { %6327 = vrot.lane.b32.xlu0 %v6326_v44, %s7320_s17  ;;  %14028 = vst [vmem:[#allocation206_spill] sm:$0xff] %v9671_v5  ;;  %v14040_v44 = vld [vmem:[#allocation266_spill] sm:$0xff]  ;;  %v1705_v30 = vmul.f32 %v14046_v37, %v14045_v7  ;;  %v14058_v37 = vld [vmem:[#allocation288_spill] sm:$0xff]  ;;  %v9899_v5 = vld [vmem:[#allocation2 + $0xb8] sm:$0xff] }
 0x240   : > { %6322 = vrot.lane.b32.xlu2 %v6321_v13, %s7320_s17  ;;  %v1704_v13 = vmul.f32 %v14039_v57, %v14038_v36  ;;  %v1707_v28 = vmul.f32 %v14040_v44, %v9322_v24  ;;  %v2194_v24 = vmul.f32 %v14009_v60, %v13995_v63  ;;  %v14052_v57 = vld [vmem:[#allocation279_spill] sm:$0xff]  ;;  %v1713_v60 = vmul.f32 %v9318_v51, %v9427_v21 }
 0x241   : > { %v9712_v49 = vpop.f32.mrf.mxu2  ;;  %v1710_v63 = vmul.f32 %v14052_v57, %v9379_v25  ;;  %v14059_v25 = vld [vmem:[#allocation287_spill] sm:$0xff]  ;;  %v14068_v57 = vld [vmem:[#allocation300_spill] sm:$0xff]  ;;  %14116 = vst [vmem:[#allocation266_spill] sm:$0xff] %v9916_v39 }
 0x242   : > { %v9677_v12 = vpop.permute.xlu0 %6117  ;;  %v6351_v36 = vpack.i.bf16 %v1707_v28, %v1706_v54  ;;  %14051 = vst [vmem:[#allocation215_spill] sm:$0xff] %v9712_v49  ;;  %v4444_v50 = vpack.c.bf16 %v2194_v24, %v2193_v48  ;;  %v1715_v28 = vmul.f32 %v9324_v55, %v9447_v31  ;;  %v1714_v42 = vmul.f32 %v14059_v25, %v9278_v15  ;;  %v14061_v55 = vld [vmem:[#allocation299_spill] sm:$0xff] }
 0x243   : > { %14030 = vst [vmem:[#allocation173_spill] sm:$0xff] %v9677_v12  ;;  %v1716_v31 = vmul.f32 %v14061_v55, %v9481_v29  ;;  %v14067_v29 = vld [vmem:[#allocation306_spill] sm:$0xff]  ;;  %v14074_v55 = vld [vmem:[#allocation5_spill] sm:$0xff]  ;;  %v9826_v49 = vld [vmem:[#allocation2 + $0x58] sm:$0xff] }
 0x244   : > { %6332 = vrot.lane.b32.xlu1 %v6331_v47, %s7320_s17  ;;  %v9696_v40 = vpop.permute.xlu2 %6172  ;;  %v14050_v47 = vld [vmem:[#allocation264_spill] sm:$0xff]  ;;  %v6371_v21 = vpack.i.bf16 %v1715_v28, %v1714_v42  ;;  %v9783_v42 = vld [vmem:[#allocation2 + $0x38] sm:$0xff]  ;;  %v1802_v56 = vmul.f32 %v9826_v49, %v14086_v59  ;;  %v9881_v12 = vld [vmem:[#allocation2 + $0xa8] sm:$0xff] }
 0x245   : > { %14042 = vst [vmem:[#allocation182_spill] sm:$0xff] %v9696_v40 }
 0x246   : > { %v9694_v2 = vpop.permute.xlu1 %6122  ;;  %14101 = vst [vmem:[#allocation236_spill] sm:$0xff] %v9881_v12 }
 0x247   : > { %6342 = vrot.lane.b32.xlu0 %v6341_v43, %s7320_s17  ;;  %14041 = vst [vmem:[#allocation188_spill] sm:$0xff] %v9694_v2  ;;  %v6346_v43 = vpack.i.bf16 %v1705_v30, %v1704_v13  ;;  %v1712_v30 = vmul.f32 %v14058_v37, %v9383_v16  ;;  %v1719_v16 = vmul.f32 %v9413_v18, %v9522_v45 }
 0x248   : > { %6337 = vrot.lane.b32.xlu2 %v6336_v23, %s7320_s17  ;;  %v1708_v23 = vmul.f32 %v14050_v47, %v14049_v61  ;;  %v2196_v61 = vmul.f32 %v14003_v22, %v13988_v38  ;;  %v14064_v47 = vld [vmem:[#allocation307_spill] sm:$0xff]  ;;  %v2195_v18 = vmul.f32 %v14011_v1, %v13996_v41  ;;  %v9773_v41 = vld [vmem:[#allocation2 + $0x30] sm:$0xff]  ;;  %v2197_v45 = vmul.f32 %v14013_v4, %v13998_v10  ;;  %v14090_v4 = vld [vmem:[#allocation32_spill] sm:$0xff] }
 0x249   : > { %v6366_v51 = vpack.i.bf16 %v1713_v60, %v1712_v30  ;;  %v9738_v54 = vpop.f32.mrf.mxu2  ;;  %v9846_v10 = vld [vmem:[#allocation2 + $0x78] sm:$0xff] }
 0x24a   : > { %v9702_v58 = vpop.permute.xlu0 %6132  ;;  %v6356_v20 = vpack.i.bf16 %v1709_v35, %v1708_v23  ;;  %v14057_v35 = vld [vmem:[#allocation278_spill] sm:$0xff]  ;;  %14060 = vst [vmem:[#allocation186_spill] sm:$0xff] %v9738_v54  ;;  %v1721_v23 = vmul.f32 %v14064_v47, %v9526_v3  ;;  %v4447_v22 = vpack.c.bf16 %v2196_v61, %v2195_v18  ;;  %v14077_v47 = vld [vmem:[#allocation9_spill] sm:$0xff]  ;;  %v14087_v3 = vld [vmem:[#allocation8_spill] sm:$0xff] }
 0x24b   : > { %14044 = vst [vmem:[#allocation196_spill] sm:$0xff] %v9702_v58  ;;  %v1711_v7 = vmul.f32 %v14057_v35, %v14056_v8  ;;  %v9765_v8 = vld [vmem:[#allocation2 + $0x20] sm:$0xff]  ;;  %v9769_v35 = vld [vmem:[#allocation2 + $0x18] sm:$0xff] }
 0x24c   : > { %6347 = vrot.lane.b32.xlu1 %v6346_v43, %s7320_s17  ;;  %5951 = vmatmul.msk.bf16.gmra.mxu2 %vm560_vm0, %v4444_v50  ;;  %v9724_v44 = vpop.permute.xlu2 %6187 }
 0x24d   : > { %14054 = vst [vmem:[#allocation217_spill] sm:$0xff] %v9724_v44  ;;  %v6361_v34 = vpack.i.bf16 %v1711_v7, %v1710_v63  ;;  %v1720_v63 = vmul.f32 %v9416_v0, %v14068_v57  ;;  %v14069_v0 = vld [vmem:[#allocation12_spill] sm:$0xff]  ;;  %v14070_v7 = vld [vmem:[#allocation13_spill] sm:$0xff]  ;;  %v9830_v57 = vld [vmem:[#allocation2 + $0x70] sm:$0xff] }
 0x24e   : > { %v9722_v13 = vpop.permute.xlu1 %6137  ;;  %v1797_v1 = vmul.f32 %v9773_v41, %v14069_v0  ;;  %v1795_v37 = vmul.f32 %v14070_v7, %v9765_v8  ;;  %v14097_v44 = vld [vmem:[#allocation18_spill] sm:$0xff] }
 0x24f   : > { %6357 = vrot.lane.b32.xlu0 %v6356_v20, %s7320_s17  ;;  %14053 = vst [vmem:[#allocation204_spill] sm:$0xff] %v9722_v13  ;;  %v1718_v20 = vmul.f32 %v14067_v29, %v9499_v17  ;;  %v6386_v38 = vpack.i.bf16 %v1721_v23, %v1720_v63  ;;  %v9802_v63 = vld [vmem:[#allocation2 + $0x50] sm:$0xff]  ;;  %v1805_v17 = vmul.f32 %v9830_v57, %v14087_v3 }
 0x250   : > { %6352 = vrot.lane.b32.xlu2 %v6351_v36, %s7320_s17  ;;  %v14066_v36 = vld [vmem:[#allocation298_spill] sm:$0xff] }
 0x251   : > { %v1717_v50 = vmul.f32 %v14066_v36, %v9320_v19  ;;  %v6381_v28 = vpack.i.bf16 %v1719_v16, %v1718_v20  ;;  %v9767_v19 = vld [vmem:[#allocation2 + $0x28] sm:$0xff]  ;;  %v9791_v16 = vpop.f32.mrf.mxu2  ;;  %v14078_v36 = vld [vmem:[#allocation10_spill] sm:$0xff] }
 0x252   : > { %v9728_v48 = vpop.permute.xlu0 %6147  ;;  %14075 = vst [vmem:[#allocation213_spill] sm:$0xff] %v9791_v16  ;;  %v1796_v23 = vmul.f32 %v14077_v47, %v9767_v19 }
 0x253   : > { %14055 = vst [vmem:[#allocation224_spill] sm:$0xff] %v9728_v48  ;;  %v6376_v60 = vpack.i.bf16 %v1717_v50, %v1716_v31  ;;  %v1794_v50 = vmul.f32 %v9769_v35, %v14078_v36  ;;  %v9868_v48 = vld [vmem:[#allocation2 + $0xa0] sm:$0xff] }
 0x254   : > { %6362 = vrot.lane.b32.xlu1 %v6361_v34, %s7320_s17  ;;  %v14073_v34 = vld [vmem:[#allocation3_spill] sm:$0xff]  ;;  %v6396_v20 = vpack.i.bf16 %v1797_v1, %v1796_v23  ;;  %v14081_v1 = vld [vmem:[#allocation25_spill] sm:$0xff]  ;;  %v1811_v13 = vmul.f32 %v9868_v48, %v14097_v44 }
 0x255   : > { %v6391_v29 = vpack.i.bf16 %v1795_v37, %v1794_v50  ;;  %v9810_v37 = vld [vmem:[#allocation2 + $0x60] sm:$0xff]  ;;  %v9818_v50 = vld [vmem:[#allocation2 + $0x68] sm:$0xff] }
 0x256   : > { %v9745_v24 = vpop.permute.xlu1 %6152 }
 0x257   : > { %6372 = vrot.lane.b32.xlu0 %v6371_v21, %s7320_s17  ;;  %14062 = vst [vmem:[#allocation207_spill] sm:$0xff] %v9745_v24  ;;  %v9747_v15 = vpop.permute.xlu2 %6202  ;;  %v9787_v21 = vld [vmem:[#allocation2 + $0x40] sm:$0xff] }
 0x258   : > { %6367 = vrot.lane.b32.xlu2 %v6366_v51, %s7320_s17  ;;  %14063 = vst [vmem:[#allocation218_spill] sm:$0xff] %v9747_v15  ;;  %v1798_v51 = vmul.f32 %v9783_v42, %v14073_v34  ;;  %v1799_v31 = vmul.f32 %v9787_v21, %v14074_v55  ;;  %v14114_v15 = vld [vmem:[#allocation222_spill] sm:$0xff] }
 0x25a   : > { %v9753_v43 = vpop.permute.xlu0 %6162  ;;  %v6401_v18 = vpack.i.bf16 %v1799_v31, %v1798_v51  ;;  %v1803_v51 = vmul.f32 %v9810_v37, %v14081_v1 }
 0x25b   : > { %14065 = vst [vmem:[#allocation205_spill] sm:$0xff] %v9753_v43  ;;  %v14089_v43 = vld [vmem:[#allocation31_spill] sm:$0xff] }
 0x25c   : > { %6377 = vrot.lane.b32.xlu1 %v6376_v60, %s7320_s17  ;;  %5952 = vmatmul.msk.bf16.gmra.mxu2 %vm560_vm0, %v4447_v22  ;;  %v14079_v60 = vld [vmem:[#allocation19_spill] sm:$0xff]  ;;  %v9806_v22 = vld [vmem:[#allocation2 + $0x48] sm:$0xff] }
 0x25e   : > { %v9779_v30 = vpop.permute.xlu1 %6167 }
 0x25f   : > { %6387 = vrot.lane.b32.xlu0 %v6386_v38, %s7320_s17  ;;  %14071 = vst [vmem:[#allocation195_spill] sm:$0xff] %v9779_v30  ;;  %v14080_v38 = vld [vmem:[#allocation20_spill] sm:$0xff]  ;;  %v6411_v30 = vpack.i.bf16 %v1803_v51, %v1802_v56  ;;  %v1806_v56 = vmul.f32 %v9846_v10, %v14090_v4 }
 0x260   : > { %6382 = vrot.lane.b32.xlu2 %v6381_v28, %s7320_s17  ;;  %v1801_v28 = vmul.f32 %v9802_v63, %v14079_v60  ;;  %v1800_v16 = vmul.f32 %v9806_v22, %v14080_v38  ;;  %v14094_v51 = vld [vmem:[#allocation36_spill] sm:$0xff] }
 0x262   : > { %v9781_v25 = vpop.permute.xlu2 %6217  ;;  %v9793_v61 = vpop.permute.xlu0 %6177 }
 0x263   : > { %14072 = vst [vmem:[#allocation216_spill] sm:$0xff] %v9781_v25 }
 0x264   : > { %14076 = vst [vmem:[#allocation226_spill] sm:$0xff] %v9793_v61  ;;  %6392 = vrot.lane.b32.xlu1 %v6391_v29, %s7321_s18  ;;  %v14084_v29 = vld [vmem:[#allocation24_spill] sm:$0xff]  ;;  %v6406_v61 = vpack.i.bf16 %v1801_v28, %v1800_v16  ;;  %v9858_v28 = vld [vmem:[#allocation2 + $0x98] sm:$0xff] }
 0x266   : > { %v9814_v31 = vpop.permute.xlu1 %6182 }
 0x267   : > { %6402 = vrot.lane.b32.xlu0 %v6401_v18, %s7321_s18  ;;  %14082 = vst [vmem:[#allocation201_spill] sm:$0xff] %v9814_v31  ;;  %v2198_v18 = vmul.f32 %v14006_v32, %v13992_v6  ;;  %v9836_v31 = vpop.f32.mrf.mxu2 }
 0x268   : > { %6397 = vrot.lane.b32.xlu2 %v6396_v20, %s7321_s18  ;;  %v1804_v20 = vmul.f32 %v9818_v50, %v14084_v29  ;;  %14088 = vst [vmem:[#allocation225_spill] sm:$0xff] %v9836_v31 }
 0x269   : > { %v4450_v6 = vpack.c.bf16 %v2198_v18, %v2197_v45  ;;  %v9850_v45 = vld [vmem:[#allocation2 + $0x90] sm:$0xff] }
 0x26a   : > { %v9816_v23 = vpop.permute.xlu2 %6232  ;;  %v9824_v54 = vpop.permute.xlu0 %6192  ;;  %v6416_v32 = vpack.i.bf16 %v1805_v17, %v1804_v20  ;;  %v14091_v17 = vld [vmem:[#allocation37_spill] sm:$0xff]  ;;  %v1810_v20 = vmul.f32 %v9858_v28, %v14094_v51 }
 0x26b   : > { %14083 = vst [vmem:[#allocation212_spill] sm:$0xff] %v9816_v23  ;;  %v1809_v16 = vmul.f32 %v9850_v45, %v14091_v17  ;;  %v1814_v23 = vmul.f32 %v9899_v5, %v14110_v26 }
 0x26c   : > { %14085 = vst [vmem:[#allocation239_spill] sm:$0xff] %v9824_v54  ;;  %6407 = vrot.lane.b32.xlu1 %v6406_v61, %s7321_s18  ;;  %5953 = vmatmul.msk.bf16.gmra.mxu2 %vm560_vm0, %v4450_v6  ;;  %v9842_v54 = vld [vmem:[#allocation2 + $0x80] sm:$0xff]  ;;  %v9864_v6 = vld [vmem:[#allocation2 + $0x88] sm:$0xff]  ;;  %v6431_v2 = vpack.i.bf16 %v1811_v13, %v1810_v20 }
 0x26d   : > { %v1807_v24 = vmul.f32 %v9842_v54, %v14089_v43 }
 0x26f   : > { %6417 = vrot.lane.b32.xlu0 %v6416_v32, %s7321_s18  ;;  %v14096_v32 = vld [vmem:[#allocation11_spill] sm:$0xff]  ;;  %v6421_v58 = vpack.i.bf16 %v1807_v24, %v1806_v56  ;;  %v9872_v25 = vpop.f32.mrf.mxu2  ;;  %v1812_v24 = vmul.f32 %v9881_v12, %v14102_v46  ;;  %v14104_v56 = vld [vmem:[#allocation49_spill] sm:$0xff] }
 0x270   : > { %6412 = vrot.lane.b32.xlu2 %v6411_v30, %s7321_s18  ;;  %v9854_v30 = vpop.permute.xlu1 %6197  ;;  %v1808_v31 = vmul.f32 %v9864_v6, %v14096_v32  ;;  %14098 = vst [vmem:[#allocation246_spill] sm:$0xff] %v9872_v25 }
 0x271   : > { %14092 = vst [vmem:[#allocation214_spill] sm:$0xff] %v9854_v30 }
 0x272   : > { %v9856_v61 = vpop.permute.xlu2 %6247  ;;  %v9862_v18 = vpop.permute.xlu0 %6207  ;;  %v6426_v40 = vpack.i.bf16 %v1809_v16, %v1808_v31  ;;  %v9885_v31 = vld [vmem:[#allocation2 + $0xc0] sm:$0xff] }
 0x273   : > { %14093 = vst [vmem:[#allocation223_spill] sm:$0xff] %v9856_v61  ;;  %v9877_v61 = vld [vmem:[#allocation2 + $0xb0] sm:$0xff]  ;;  %v1815_v13 = vmul.f32 %v9885_v31, %v14104_v56  ;;  %v14108_v16 = vld [vmem:[#allocation48_spill] sm:$0xff] }
 0x274   : > { %14095 = vst [vmem:[#allocation237_spill] sm:$0xff] %v9862_v18  ;;  %6422 = vrot.lane.b32.xlu1 %v6421_v58, %s7321_s18  ;;  %v14100_v18 = vld [vmem:[#allocation43_spill] sm:$0xff]  ;;  %v9957_v56 = vld [vmem:[#allocation2 + $0x120] sm:$0xff] }
 0x275   : > { %14099 = vst [vmem:[#allocation227_spill] sm:$0xff] %v9877_v61  ;;  %v1813_v30 = vmul.f32 %v9877_v61, %v14100_v18  ;;  %v6441_v9 = vpack.i.bf16 %v1815_v13, %v1814_v23  ;;  %v9920_v23 = vld [vmem:[#allocation2 + $0xd8] sm:$0xff]  ;;  %v14121_v13 = vld [vmem:[#allocation61_spill] sm:$0xff] }
 0x276   : > { %14103 = vst [vmem:[#allocation259_spill] sm:$0xff] %v9885_v31  ;;  %v9942_v31 = vld [vmem:[#allocation2 + $0x100] sm:$0xff] }
 0x277   : > { %6432 = vrot.lane.b32.xlu0 %v6431_v2, %s7321_s18  ;;  %v9893_v2 = vld [vmem:[#allocation2 + $0xc8] sm:$0xff]  ;;  %v9909_v33 = vpop.f32.mrf.mxu2  ;;  %14118 = vst [vmem:[#allocation268_spill] sm:$0xff] %v9920_v23 }
 0x278   : > { %6427 = vrot.lane.b32.xlu2 %v6426_v40, %s7321_s18  ;;  %v9889_v58 = vpop.permute.xlu1 %6212  ;;  %14107 = vst [vmem:[#allocation244_spill] sm:$0xff] %v9893_v2  ;;  %v1816_v20 = vmul.f32 %v9893_v2, %v14108_v16  ;;  %v9953_v2 = vld [vmem:[#allocation2 + $0x108] sm:$0xff] }
 0x279   : > { %14105 = vst [vmem:[#allocation245_spill] sm:$0xff] %v9889_v58  ;;  %v6436_v58 = vpack.i.bf16 %v1813_v30, %v1812_v24  ;;  %v1819_v30 = vmul.f32 %v9916_v39, %v14117_v52  ;;  %v14127_v39 = vld [vmem:[#allocation35_spill] sm:$0xff]  ;;  %v14133_v52 = vld [vmem:[#allocation68_spill] sm:$0xff] }
 0x27a   : > { %v9891_v40 = vpop.permute.xlu2 %6262  ;;  %v9897_v25 = vpop.permute.xlu0 %6222  ;;  %14112 = vst [vmem:[#allocation257_spill] sm:$0xff] %v9909_v33  ;;  %v1824_v12 = vmul.f32 %v9953_v2, %v14133_v52 }
 0x27b   : > { %14106 = vst [vmem:[#allocation238_spill] sm:$0xff] %v9891_v40  ;;  %v6446_v40 = vpack.i.bf16 %v1817_v27, %v1816_v20  ;;  %v14119_v27 = vld [vmem:[#allocation56_spill] sm:$0xff] }
 0x27c   : > { %14109 = vst [vmem:[#allocation280_spill] sm:$0xff] %v9897_v25  ;;  %6437 = vrot.lane.b32.xlu1 %v6436_v58, %s7321_s18  ;;  %v14113_v25 = vld [vmem:[#allocation220_spill] sm:$0xff]  ;;  %v1818_v24 = vmul.f32 %v9920_v23, %v14119_v27  ;;  %v1820_v23 = vmul.f32 %v9938_v14, %v14127_v39  ;;  %v14129_v27 = vld [vmem:[#allocation42_spill] sm:$0xff] }
 0x27d   : > { %v14115_v62 = vpack.c.bf16 %v14113_v25, %v14114_v15  ;;  %v9932_v25 = vld [vmem:[#allocation2 + $0xf8] sm:$0xff]  ;;  %14128 = vst [vmem:[#allocation264_spill] sm:$0xff] %v9942_v31 }
 0x27e   : > { %14124 = vst [vmem:[#allocation265_spill] sm:$0xff] %v9932_v25 }
 0x27f   : > { %5954 = vmatmul.msk.bf16.gmra.mxu2 %vm560_vm0, %v14115_v62  ;;  %6447 = vrot.lane.b32.xlu0 %v6446_v40, %s7321_s18  ;;  %v14125_v40 = vld [vmem:[#allocation60_spill] sm:$0xff]  ;;  %14132 = vst [vmem:[#allocation267_spill] sm:$0xff] %v9953_v2  ;;  %v14143_v2 = vld [vmem:[#allocation47_spill] sm:$0xff] }
 0x280   : > { %6442 = vrot.lane.b32.xlu2 %v6441_v9, %s7321_s18  ;;  %v9924_v9 = vld [vmem:[#allocation2 + $0xf0] sm:$0xff]  ;;  %v9928_v15 = vpop.permute.xlu1 %6227  ;;  %v1822_v20 = vmul.f32 %v9932_v25, %v14125_v40  ;;  %v14131_v25 = vld [vmem:[#allocation67_spill] sm:$0xff]  ;;  %14134 = vst [vmem:[#allocation278_spill] sm:$0xff] %v9957_v56 }
 0x281   : > { %14120 = vst [vmem:[#allocation247_spill] sm:$0xff] %v9924_v9  ;;  %v1821_v58 = vmul.f32 %v9924_v9, %v14121_v13  ;;  %v1823_v9 = vmul.f32 %v9942_v31, %v14129_v27  ;;  %v10026_v31 = vmul.f32 %v14074_v55, %v9767_v19  ;;  %v10068_v19 = vld [vmem:[#allocation2 + $0x170] sm:$0xff]  ;;  %v10076_v55 = vld [vmem:[#allocation2 + $0x180] sm:$0xff] }
 0x282   : > { %14122 = vst [vmem:[#allocation256_spill] sm:$0xff] %v9928_v15  ;;  %v9930_v62 = vpop.permute.xlu2 %6277  ;;  %v9936_v33 = vpop.permute.xlu0 %6237  ;;  %v6451_v15 = vpack.i.bf16 %v1819_v30, %v1818_v24  ;;  %v14135_v30 = vld [vmem:[#allocation73_spill] sm:$0xff] }
 0x283   : > { %14123 = vst [vmem:[#allocation281_spill] sm:$0xff] %v9930_v62  ;;  %v6456_v13 = vpack.i.bf16 %v1821_v58, %v1820_v23  ;;  %v6461_v62 = vpack.i.bf16 %v1823_v9, %v1822_v20  ;;  %v1827_v23 = vmul.f32 %v9957_v56, %v14135_v30  ;;  %v14139_v58 = vld [vmem:[#allocation72_spill] sm:$0xff]  ;;  %v14145_v56 = vld [vmem:[#allocation54_spill] sm:$0xff] }
 0x284   : > { %14126 = vst [vmem:[#allocation258_spill] sm:$0xff] %v9936_v33  ;;  %6452 = vrot.lane.b32.xlu1 %v6451_v15, %s7321_s18  ;;  %v9949_v33 = vld [vmem:[#allocation2 + $0x110] sm:$0xff] }
 0x285   : > { %14130 = vst [vmem:[#allocation279_spill] sm:$0xff] %v9949_v33  ;;  %v1825_v40 = vmul.f32 %v9949_v33, %v14131_v25  ;;  %v9973_v33 = vld [vmem:[#allocation2 + $0x118] sm:$0xff]  ;;  %v9977_v25 = vld [vmem:[#allocation2 + $0x130] sm:$0xff] }
 0x286   : > { %14142 = vst [vmem:[#allocation306_spill] sm:$0xff] %v9973_v33  ;;  %v1826_v52 = vmul.f32 %v9973_v33, %v14143_v2  ;;  %v14150_v33 = vld [vmem:[#allocation79_spill] sm:$0xff] }
 0x287   : > { %6462 = vrot.lane.b32.xlu0 %v6461_v62, %s7321_s18  ;;  %v9969_v62 = vpop.f32.mrf.mxu2  ;;  %14144 = vst [vmem:[#allocation12_spill] sm:$0xff] %v9977_v25 }
 0x288   : > { %6457 = vrot.lane.b32.xlu2 %v6456_v13, %s7321_s18  ;;  %v9961_v24 = vpop.permute.xlu1 %6242  ;;  %v9965_v13 = vld [vmem:[#allocation2 + $0x128] sm:$0xff]  ;;  %14140 = vst [vmem:[#allocation307_spill] sm:$0xff] %v9969_v62  ;;  %v6471_v30 = vpack.i.bf16 %v1827_v23, %v1826_v52  ;;  %v14146_v62 = vld [vmem:[#allocation231_spill] sm:$0xff]  ;;  %v14152_v52 = vld [vmem:[#allocation80_spill] sm:$0xff] }
 0x289   : > { %14136 = vst [vmem:[#allocation288_spill] sm:$0xff] %v9961_v24  ;;  %v1828_v15 = vmul.f32 %v9965_v13, %v14139_v58  ;;  %v1829_v24 = vmul.f32 %v9977_v25, %v14145_v56  ;;  %v9988_v58 = vld [vmem:[#allocation2 + $0x140] sm:$0xff]  ;;  %v9992_v25 = vld [vmem:[#allocation2 + $0x138] sm:$0xff] }
 0x28a   : > { %v9963_v9 = vpop.permute.xlu2 %6292  ;;  %14138 = vst [vmem:[#allocation299_spill] sm:$0xff] %v9965_v13  ;;  %v9971_v20 = vpop.permute.xlu0 %6252  ;;  %v14147_v13 = vld [vmem:[#allocation229_spill] sm:$0xff]  ;;  %v1831_v16 = vmul.f32 %v9988_v58, %v14150_v33  ;;  %v714_v33 = vld [vmem:[#allocation2] sm:$0xff] }
 0x28b   : > { %14137 = vst [vmem:[#allocation287_spill] sm:$0xff] %v9963_v9  ;;  %v6466_v9 = vpack.i.bf16 %v1825_v40, %v1824_v12  ;;  %v6476_v61 = vpack.i.bf16 %v1829_v24, %v1828_v15  ;;  %v1830_v12 = vmul.f32 %v9992_v25, %v14152_v52  ;;  %v9996_v40 = vld [vmem:[#allocation2 + $0x150] sm:$0xff]  ;;  %v10014_v56 = vld [vmem:[#allocation2 + $0x160] sm:$0xff] }
 0x28c   : > { %14141 = vst [vmem:[#allocation298_spill] sm:$0xff] %v9971_v20  ;;  %v14148_v20 = vpack.c.bf16 %v14146_v62, %v14147_v13  ;;  %v14158_v13 = vld [vmem:[#allocation84_spill] sm:$0xff]  ;;  %v716_v52 = vld [vmem:[#allocation2 + $0x10] sm:$0xff] }
 0x28d   : > { %6467 = vrot.lane.b32.xlu1 %v6466_v9, %s7321_s18  ;;  %14149 = vst [vmem:[#allocation13_spill] sm:$0xff] %v9988_v58  ;;  %v14161_v58 = vld [vmem:[#allocation59_spill] sm:$0xff] }
 0x28e   : > { %14151 = vst [vmem:[#allocation3_spill] sm:$0xff] %v9992_v25 }
 0x28f   : > { %5955 = vmatmul.msk.bf16.gmra.mxu2 %vm560_vm0, %v14148_v20  ;;  %6477 = vrot.lane.b32.xlu0 %v6476_v61, %s7321_s18  ;;  %14153 = vst [vmem:[#allocation5_spill] sm:$0xff] %v9996_v40  ;;  %v10004_v61 = vld [vmem:[#allocation2 + $0x158] sm:$0xff]  ;;  %v10010_v20 = vld [vmem:[#allocation2 + $0x148] sm:$0xff] }
 0x290   : > { %6472 = vrot.lane.b32.xlu2 %v6471_v30, %s7321_s18  ;;  %v14154_v30 = vld [vmem:[#allocation85_spill] sm:$0xff]  ;;  %v10000_v24 = vpop.permute.xlu1 %6257  ;;  %14157 = vst [vmem:[#allocation19_spill] sm:$0xff] %v10004_v61  ;;  %v1834_v15 = vmul.f32 %v10004_v61, %v14158_v13  ;;  %v1832_v25 = vmul.f32 %v10010_v20, %v14161_v58 }
 0x291   : > { %v1833_v23 = vmul.f32 %v9996_v40, %v14154_v30  ;;  %14155 = vst [vmem:[#allocation9_spill] sm:$0xff] %v10000_v24  ;;  %v14163_v40 = vld [vmem:[#allocation66_spill] sm:$0xff]  ;;  %v10022_v30 = vmul.f32 %v14073_v34, %v9765_v8  ;;  %v715_v61 = vld [vmem:[#allocation2 + $0x8] sm:$0xff]  ;;  %v10040_v8 = vmul.f32 %v14078_v36, %v714_v33  ;;  %v10044_v34 = vmul.f32 %v9830_v57, %v14096_v32 }
 0x292   : > { %v10002_v9 = vpop.permute.xlu2 %6307  ;;  %v10008_v62 = vpop.permute.xlu0 %6267  ;;  %14160 = vst [vmem:[#allocation25_spill] sm:$0xff] %v10010_v20  ;;  %v1835_v24 = vmul.f32 %v10014_v56, %v14163_v40  ;;  %v10030_v20 = vmul.f32 %v9787_v21, %v14086_v59  ;;  %v10037_v40 = vmul.f32 %v14077_v47, %v716_v52  ;;  %v10050_v59 = vmul.f32 %v9769_v35, %v14069_v0  ;;  %v14165_v35 = vld [vmem:[#allocation91_spill] sm:$0xff]  ;;  %v14166_v21 = vld [vmem:[#allocation92_spill] sm:$0xff]  ;;  %v10096_v32 = vld [vmem:[#allocation2 + $0x188] sm:$0xff] }
 0x293   : > { %14156 = vst [vmem:[#allocation10_spill] sm:$0xff] %v10002_v9  ;;  %v10018_v9 = vpop.f32.mrf.mxu2  ;;  %v6486_v13 = vpack.i.bf16 %v1833_v23, %v1832_v25  ;;  %v10061_v33 = vmul.f32 %v9783_v42, %v14079_v60  ;;  %v10066_v57 = vmul.f32 %v9773_v41, %v14080_v38  ;;  %v1837_v0 = vmul.f32 %v10068_v19, %v14165_v35  ;;  %v14167_v42 = vld [vmem:[#allocation97_spill] sm:$0xff] }
 0x294   : > { %14159 = vst [vmem:[#allocation20_spill] sm:$0xff] %v10008_v62  ;;  %v6481_v62 = vpack.i.bf16 %v1831_v16, %v1830_v12  ;;  %v1839_v47 = vmul.f32 %v10076_v55, %v14167_v42  ;;  %v10086_v41 = vmul.f32 %v9868_v48, %v14110_v26  ;;  %v10090_v38 = vmul.f32 %v9802_v63, %v14084_v29  ;;  %v14170_v16 = vld [vmem:[#allocation96_spill] sm:$0xff]  ;;  %v7223_v63 = vld [vmem:[#allocation2 + $0x178] sm:$0xff] }
 0x295   : > { %14162 = vst [vmem:[#allocation24_spill] sm:$0xff] %v10014_v56  ;;  %v10034_v56 = vmul.f32 %v9826_v49, %v14087_v3  ;;  %v10053_v3 = vmul.f32 %v14070_v7, %v715_v61  ;;  %v10057_v49 = vmul.f32 %v9864_v6, %v14097_v44  ;;  %v10072_v7 = vld [vmem:[#allocation2 + $0x168] sm:$0xff]  ;;  %v10094_v6 = vmul.f32 %v9806_v22, %v14081_v1  ;;  %v14173_v22 = vld [vmem:[#allocation71_spill] sm:$0xff] }
 0x296   : > { %14164 = vst [vmem:[#allocation7_spill] sm:$0xff] %v10018_v9  ;;  %v6491_v9 = vpack.i.bf16 %v1835_v24, %v1834_v15  ;;  %6482 = vrot.lane.b32.xlu1 %v6481_v62, %s7321_s18  ;;  %v1836_v44 = vmul.f32 %v10072_v7, %v14166_v21  ;;  %v1840_v25 = vmul.f32 %v10096_v32, %v14170_v16  ;;  %v14179_v24 = vld [vmem:[#allocation227_spill] sm:$0xff]  ;;  %v14182_v61 = vld [vmem:[#allocation49_spill] sm:$0xff]  ;;  %v14185_v15 = vld [vmem:[#allocation306_spill] sm:$0xff] }
 0x297   : > { %v10104_v12 = vmul.f32 %v9899_v5, %v14111_v53  ;;  %v10108_v26 = vmul.f32 %v9818_v50, %v14089_v43  ;;  %v10112_v48 = vmul.f32 %v9810_v37, %v14090_v4  ;;  %v1838_v1 = vmul.f32 %v7223_v63, %v14173_v22  ;;  %v7224_v5 = vld [vmem:[#allocation2 + $0x190] sm:$0xff] }
 0x298   : > { %6487 = vrot.lane.b32.xlu2 %v6486_v13, %s7321_s18  ;;  %6492 = vrot.lane.b32.xlu0 %v6491_v9, %s7321_s18  ;;  %v10080_v36 = vpop.permute.xlu1 %6272  ;;  %v10117_v29 = vmul.f32 %v9903_v11, %v14127_v39  ;;  %v10121_v23 = vmul.f32 %v9842_v54, %v14094_v51  ;;  %v10125_v53 = vmul.f32 %v9846_v10, %v14091_v17  ;;  %v14174_v43 = vld [vmem:[#allocation78_spill] sm:$0xff]  ;;  %v14177_v10 = vld [vmem:[#allocation264_spill] sm:$0xff] }
 0x299   : > { %14168 = vst [vmem:[#allocation8_spill] sm:$0xff] %v10080_v36  ;;  %v1841_v50 = vmul.f32 %v7224_v5, %v14174_v43  ;;  %v10130_v37 = vmul.f32 %v9938_v14, %v14129_v27  ;;  %v10134_v4 = vmul.f32 %v9858_v28, %v14100_v18  ;;  %v6496_v39 = vpack.i.bf16 %v1837_v0, %v1836_v44  ;;  %v14178_v51 = vld [vmem:[#allocation48_spill] sm:$0xff]  ;;  %v14184_v13 = vld [vmem:[#allocation54_spill] sm:$0xff]  ;;  %v14191_v44 = vld [vmem:[#allocation259_spill] sm:$0xff] }
 0x29a   : > { %v10082_v60 = vpop.permute.xlu2 %6322  ;;  %v10100_v52 = vpop.permute.xlu0 %6282  ;;  %14172 = vst [vmem:[#allocation37_spill] sm:$0xff] %v10104_v12  ;;  %v6501_v11 = vpack.i.bf16 %v1839_v47, %v1838_v1  ;;  %v10138_v54 = vmul.f32 %v9850_v45, %v14102_v46  ;;  %v10142_v17 = vmul.f32 %v14177_v10, %v14143_v2  ;;  %v10146_v9 = vmul.f32 %v14179_v24, %v14178_v51  ;;  %v14183_v28 = vld [vmem:[#allocation236_spill] sm:$0xff]  ;;  %v14187_v46 = vld [vmem:[#allocation55_spill] sm:$0xff]  ;;  %v14195_v10 = vld [vmem:[#allocation266_spill] sm:$0xff] }
 0x29b   : > { %14169 = vst [vmem:[#allocation31_spill] sm:$0xff] %v10082_v60  ;;  %v10148_v14 = vpop.f32.mrf.mxu2  ;;  %v6506_v27 = vpack.i.bf16 %v1841_v50, %v1840_v25  ;;  %v10152_v18 = vmul.f32 %v14183_v28, %v14182_v61  ;;  %v10156_v62 = vmul.f32 %v14185_v15, %v14184_v13  ;;  %v14188_v45 = vld [vmem:[#allocation244_spill] sm:$0xff]  ;;  %v14197_v24 = vld [vmem:[#allocation235_spill] sm:$0xff]  ;;  %v14198_v61 = vld [vmem:[#allocation234_spill] sm:$0xff] }
 0x29c   : > { %14171 = vst [vmem:[#allocation32_spill] sm:$0xff] %v10100_v52  ;;  %v10160_v0 = vmul.f32 %v14188_v45, %v14187_v46  ;;  %v14190_v2 = vld [vmem:[#allocation56_spill] sm:$0xff]  ;;  %v14199_v28 = vpack.c.bf16 %v14197_v24, %v14198_v61  ;;  %v14202_v46 = vld [vmem:[#allocation103_spill] sm:$0xff] }
 0x29d   : > { %14175 = vst [vmem:[#allocation36_spill] sm:$0xff] %v10130_v37  ;;  %v10166_v47 = vmul.f32 %v14191_v44, %v14190_v2  ;;  %v14193_v25 = vld [vmem:[#allocation12_spill] sm:$0xff]  ;;  %v10189_v2 = vld [vmem:[#allocation2 + $0x198] sm:$0xff] }
 0x29e   : > { %14176 = vst [vmem:[#allocation11_spill] sm:$0xff] %v10134_v4  ;;  %6497 = vrot.lane.b32.xlu1 %v6496_v39, %s7321_s18  ;;  %v10170_v1 = vmul.f32 %v14193_v25, %v14161_v58  ;;  %v14194_v50 = vld [vmem:[#allocation60_spill] sm:$0xff]  ;;  %v5981_v39 = vld [vmem:[%s13087_s4 + $0x38] sm:$0xff]  ;;  %v14235_v4 = vld [vmem:[#allocation13_spill] sm:$0xff] }
 0x29f   : > { %14180 = vst [vmem:[#allocation18_spill] sm:$0xff] %v10146_v9  ;;  %v10174_v51 = vmul.f32 %v14195_v10, %v14194_v50  ;;  %5956 = vmatmul.msk.bf16.gmra.mxu2 %vm560_vm0, %v14199_v28  ;;  %v14201_v13 = vld [vmem:[#allocation268_spill] sm:$0xff]  ;;  %v7227_v50 = vld [vmem:[#allocation2 + $0x1b0] sm:$0xff]  ;;  %v14204_v10 = vld [vmem:[#allocation109_spill] sm:$0xff]  ;;  %4757 = vmatpush.bf16.msra.mxu0 %v5981_v39 }
 0x2a0   : > { %14181 = vst [vmem:[#allocation43_spill] sm:$0xff] %v10148_v14  ;;  %6502 = vrot.lane.b32.xlu2 %v6501_v11, %s7321_s18  ;;  %6507 = vrot.lane.b32.xlu0 %v6506_v27, %s7321_s18  ;;  %v14200_v11 = vld [vmem:[#allocation61_spill] sm:$0xff]  ;;  %v7225_v58 = vld [vmem:[#allocation2 + $0x1a0] sm:$0xff]  ;;  %v1845_v24 = vmul.f32 %v7227_v50, %v14204_v10  ;;  %v10194_v27 = vpop.permute.xlu1 %6287  ;;  %v14207_v28 = vld [vmem:[#allocation66_spill] sm:$0xff] }
 0x2a1   : > { %14186 = vst [vmem:[#allocation44_spill] sm:$0xff] %v10156_v62  ;;  %v10186_v15 = vmul.f32 %v14201_v13, %v14200_v11  ;;  %v1843_v45 = vmul.f32 %v7225_v58, %v14202_v46  ;;  %v14203_v44 = vld [vmem:[#allocation104_spill] sm:$0xff]  ;;  %v14208_v14 = vld [vmem:[#allocation25_spill] sm:$0xff]  ;;  %v14210_v11 = vld [vmem:[#allocation67_spill] sm:$0xff]  ;;  %5992 = vmatpush.bf16.msra.mxu3 %v5981_v39 }
 0x2a2   : > { %14189 = vst [vmem:[#allocation23_spill] sm:$0xff] %v10160_v0  ;;  %v1842_v25 = vmul.f32 %v10189_v2, %v14203_v44  ;;  %v10196_v61 = vpop.permute.xlu2 %6337  ;;  %v10200_v52 = vmul.f32 %v14208_v14, %v14207_v28  ;;  %v14211_v13 = vld [vmem:[#allocation265_spill] sm:$0xff]  ;;  %v7228_v58 = vld [vmem:[#allocation2 + $0x1b8] sm:$0xff]  ;;  %v14213_v36 = vld [vmem:[#allocation108_spill] sm:$0xff] }
 0x2a3   : > { %14192 = vst [vmem:[#allocation30_spill] sm:$0xff] %v10166_v47  ;;  %v10204_v60 = vmul.f32 %v14211_v13, %v14210_v11  ;;  %v1846_v62 = vmul.f32 %v7228_v58, %v14213_v36  ;;  %v14215_v50 = vld [vmem:[#allocation68_spill] sm:$0xff]  ;;  %v14216_v37 = vld [vmem:[#allocation247_spill] sm:$0xff]  ;;  %v7229_v11 = vld [vmem:[#allocation2 + $0x1a8] sm:$0xff] }
 0x2a4   : > { %14196 = vst [vmem:[#allocation220_spill] sm:$0xff] %v10174_v51  ;;  %v10207_v51 = vpop.permute.xlu0 %6297  ;;  %v14220_v14 = vld [vmem:[#allocation72_spill] sm:$0xff]  ;;  %v14221_v28 = vld [vmem:[#allocation279_spill] sm:$0xff]  ;;  %v5980_v58 = vld [vmem:[%s13087_s4 + $0x30] sm:$0xff]  ;;  %v6511_v9 = vpack.i.bf16 %v1843_v45, %v1842_v25 }
 0x2a5   : > { %14205 = vst [vmem:[#allocation222_spill] sm:$0xff] %v10194_v27  ;;  %v10211_v27 = vmul.f32 %v14216_v37, %v14215_v50  ;;  %v14223_v13 = vld [vmem:[#allocation83_spill] sm:$0xff]  ;;  %v14224_v39 = vld [vmem:[#allocation73_spill] sm:$0xff]  ;;  %v10230_v37 = vmul.f32 %v7223_v63, %v14174_v43  ;;  %4758 = vmatpush.bf16.msra.mxu0 %v5980_v58  ;;  %5993 = vmatpush.bf16.msra.mxu3 %v5980_v58 }
 0x2a6   : > { %14206 = vst [vmem:[#allocation35_spill] sm:$0xff] %v10196_v61  ;;  %v14218_v61 = vld [vmem:[#allocation24_spill] sm:$0xff]  ;;  %v14225_v36 = vld [vmem:[#allocation267_spill] sm:$0xff]  ;;  %v10242_v12 = vmul.f32 %v7224_v5, %v14223_v13  ;;  %v14237_v43 = vld [vmem:[#allocation85_spill] sm:$0xff]  ;;  %6512 = vrot.lane.b32.xlu1 %v6511_v9, %s7321_s18  ;;  %v10279_v9 = vmul.f32 %v10068_v19, %v14170_v16  ;;  %v10296_v19 = vmul.f32 %v10096_v32, %v14202_v46 }
 0x2a7   : > { %14209 = vst [vmem:[#allocation42_spill] sm:$0xff] %v10200_v52  ;;  %v10215_v47 = vmul.f32 %v14218_v61, %v14173_v22  ;;  %v10219_v52 = vmul.f32 %v14221_v28, %v14220_v14  ;;  %v14227_v22 = vld [vmem:[#allocation79_spill] sm:$0xff]  ;;  %v7230_v14 = vld [vmem:[#allocation2 + $0x1c0] sm:$0xff]  ;;  %v14230_v28 = vld [vmem:[#allocation90_spill] sm:$0xff]  ;;  %v10313_v32 = vmul.f32 %v10189_v2, %v14204_v10 }
 0x2a8   : > { %14212 = vst [vmem:[#allocation47_spill] sm:$0xff] %v10204_v60  ;;  %v1844_v60 = vmul.f32 %v7229_v11, %v14223_v13  ;;  %v14228_v61 = vld [vmem:[#allocation299_spill] sm:$0xff]  ;;  %v7233_v13 = vld [vmem:[#allocation2 + $0x1c8] sm:$0xff]  ;;  %v5978_v46 = vld [vmem:[%s13087_s4 + $0x20] sm:$0xff] }
 0x2a9   : > { %14214 = vst [vmem:[#allocation231_spill] sm:$0xff] %v10207_v51  ;;  %v10227_v51 = vmul.f32 %v14225_v36, %v14224_v39  ;;  %v10234_v50 = vmul.f32 %v14228_v61, %v14227_v22  ;;  %v14234_v39 = vld [vmem:[#allocation84_spill] sm:$0xff]  ;;  %v7236_v16 = vld [vmem:[#allocation2 + $0x1e8] sm:$0xff]  ;;  %v7241_v10 = vld [vmem:[#allocation2 + $0x218] sm:$0xff] }
 0x2aa   : > { %14217 = vst [vmem:[#allocation229_spill] sm:$0xff] %v10211_v27  ;;  %v14231_v27 = vld [vmem:[#allocation80_spill] sm:$0xff]  ;;  %v6516_v36 = vpack.i.bf16 %v1845_v24, %v1844_v60  ;;  %v10246_v63 = vmul.f32 %v14235_v4, %v14234_v39  ;;  %v14242_v60 = vld [vmem:[#allocation5_spill] sm:$0xff]  ;;  %v14244_v4 = vld [vmem:[#allocation95_spill] sm:$0xff] }
 0x2ab   : > { %14219 = vst [vmem:[#allocation59_spill] sm:$0xff] %v10215_v47  ;;  %v14232_v47 = vld [vmem:[#allocation278_spill] sm:$0xff]  ;;  %v10261_v45 = vmul.f32 %v14242_v60, %v14166_v21  ;;  %v10266_v25 = vmul.f32 %v7230_v14, %v14244_v4  ;;  %v5979_v21 = vld [vmem:[%s13087_s4 + $0x28] sm:$0xff]  ;;  %v7234_v39 = vld [vmem:[#allocation2 + $0x1e0] sm:$0xff]  ;;  %v10289_v60 = vpop.permute.xlu1 %6302 }
 0x2ac   : > { %14222 = vst [vmem:[#allocation91_spill] sm:$0xff] %v10219_v52  ;;  %v1847_v52 = vmul.f32 %v7230_v14, %v14230_v28  ;;  %v10239_v0 = vmul.f32 %v14232_v47, %v14231_v27  ;;  %v14240_v47 = vld [vmem:[#allocation19_spill] sm:$0xff]  ;;  %6517 = vrot.lane.b32.xlu2 %v6516_v36, %s7321_s18  ;;  %v7232_v24 = vld [vmem:[#allocation2 + $0x1d0] sm:$0xff]  ;;  %v10283_v14 = vmul.f32 %v10072_v7, %v14167_v42  ;;  %v14256_v7 = vld [vmem:[#allocation120_spill] sm:$0xff] }
 0x2ad   : > { %14226 = vst [vmem:[#allocation92_spill] sm:$0xff] %v10230_v37  ;;  %v14238_v37 = vld [vmem:[#allocation3_spill] sm:$0xff]  ;;  %v10257_v5 = vmul.f32 %v14240_v47, %v14165_v35  ;;  %v14247_v35 = vld [vmem:[#allocation116_spill] sm:$0xff]  ;;  %v1852_v42 = vmul.f32 %v7236_v16, %v14256_v7  ;;  %4759 = vmatpush.bf16.msra.mxu0 %v5979_v21  ;;  %5994 = vmatpush.bf16.msra.mxu3 %v5979_v21  ;;  %v14261_v16 = vld [vmem:[#allocation114_spill] sm:$0xff] }
 0x2ae   : > { %14229 = vst [vmem:[#allocation97_spill] sm:$0xff] %v10234_v50  ;;  %v10250_v22 = vmul.f32 %v14238_v37, %v14237_v43  ;;  %v6521_v61 = vpack.i.bf16 %v1847_v52, %v1846_v62  ;;  %v10253_v50 = vmul.f32 %v7229_v11, %v14230_v28  ;;  %v7231_v52 = vld [vmem:[#allocation2 + $0x1d8] sm:$0xff]  ;;  %v1848_v58 = vmul.f32 %v7233_v13, %v14247_v35  ;;  %v10271_v37 = vpop.f32.mrf.mxu2  ;;  %v14250_v28 = vld [vmem:[#allocation102_spill] sm:$0xff]  ;;  %v14252_v43 = vld [vmem:[#allocation121_spill] sm:$0xff] }
 0x2af   : > { %14233 = vst [vmem:[#allocation96_spill] sm:$0xff] %v10239_v0  ;;  %v1850_v62 = vmul.f32 %v7231_v52, %v14244_v4  ;;  %v14246_v27 = vld [vmem:[#allocation115_spill] sm:$0xff]  ;;  %v10286_v36 = vmul.f32 %v7231_v52, %v14250_v28  ;;  %v1851_v47 = vmul.f32 %v7234_v39, %v14252_v43  ;;  %v7235_v4 = vld [vmem:[#allocation2 + $0x1f0] sm:$0xff]  ;;  %v10303_v52 = vmul.f32 %v10076_v55, %v14203_v44  ;;  %v7238_v21 = vld [vmem:[#allocation2 + $0x220] sm:$0xff] }
 0x2b0   : > { %14236 = vst [vmem:[#allocation71_spill] sm:$0xff] %v10246_v63  ;;  %v1849_v11 = vmul.f32 %v7232_v24, %v14246_v27  ;;  %6522 = vrot.lane.b32.xlu0 %v6521_v61, %s7321_s18  ;;  %v10291_v61 = vpop.permute.xlu2 %6352  ;;  %v1853_v24 = vmul.f32 %v7235_v4, %v14250_v28  ;;  %v14259_v39 = vld [vmem:[#allocation107_spill] sm:$0xff]  ;;  %v7237_v27 = vld [vmem:[#allocation2 + $0x208] sm:$0xff]  ;;  %v10319_v7 = vmul.f32 %v7238_v21, %v14261_v16  ;;  %v7239_v55 = vld [vmem:[#allocation2 + $0x200] sm:$0xff] }
 0x2b1   : > { %14239 = vst [vmem:[#allocation78_spill] sm:$0xff] %v10253_v50  ;;  %v10309_v28 = vmul.f32 %v7237_v27, %v14259_v39  ;;  %v14262_v44 = vld [vmem:[#allocation127_spill] sm:$0xff]  ;;  %v14263_v50 = vld [vmem:[#allocation128_spill] sm:$0xff]  ;;  %4760 = vmatpush.bf16.msra.mxu0 %v5978_v46  ;;  %5995 = vmatpush.bf16.msra.mxu3 %v5978_v46  ;;  %v14270_v63 = vld [vmem:[#allocation138_spill] sm:$0xff] }
 0x2b2   : > { %14241 = vst [vmem:[#allocation264_spill] sm:$0xff] %v10257_v5  ;;  %v7240_v35 = vld [vmem:[#allocation2 + $0x1f8] sm:$0xff]  ;;  %v6531_v5 = vpack.i.bf16 %v1851_v47, %v1850_v62  ;;  %v14272_v47 = vld [vmem:[#allocation141_spill] sm:$0xff] }
 0x2b3   : > { %14243 = vst [vmem:[#allocation48_spill] sm:$0xff] %v10261_v45  ;;  %v10325_v27 = vmul.f32 %v7240_v35, %v14263_v50  ;;  %v14266_v45 = vld [vmem:[#allocation132_spill] sm:$0xff]  ;;  %v6536_v50 = vpack.i.bf16 %v1853_v24, %v1852_v42  ;;  %v14274_v42 = vld [vmem:[#allocation243_spill] sm:$0xff] }
 0x2b4   : > { %14245 = vst [vmem:[#allocation227_spill] sm:$0xff] %v10266_v25  ;;  %6532 = vrot.lane.b32.xlu2 %v6531_v5, %s7321_s18  ;;  %v5977_v5 = vld [vmem:[%s13087_s4 + $0x18] sm:$0xff] }
 0x2b5   : > { %14248 = vst [vmem:[#allocation49_spill] sm:$0xff] %v10271_v37  ;;  %v10299_v37 = vpop.permute.xlu0 %6312  ;;  %4761 = vmatpush.bf16.msra.mxu0 %v5977_v5  ;;  %5996 = vmatpush.bf16.msra.mxu3 %v5977_v5  ;;  %v14284_v5 = vld [vmem:[#allocation156_spill] sm:$0xff] }
 0x2b6   : > { %14249 = vst [vmem:[#allocation236_spill] sm:$0xff] %v10279_v9  ;;  %v10386_v0 = vpop.f32.mrf.mxu2 }
 0x2b7   : > { %14251 = vst [vmem:[#allocation54_spill] sm:$0xff] %v10286_v36  ;;  %v10306_v36 = vmul.f32 %v7235_v4, %v14259_v39  ;;  %v10322_v4 = vmul.f32 %v7239_v55, %v14262_v44  ;;  %v6526_v39 = vpack.i.bf16 %v1849_v11, %v1848_v58  ;;  %v10338_v44 = vmul.f32 %v7233_v13, %v14252_v43  ;;  %v14268_v11 = vld [vmem:[#allocation126_spill] sm:$0xff]  ;;  %v7246_v43 = vld [vmem:[#allocation2 + $0x248] sm:$0xff] }
 0x2b8   : > { %14253 = vst [vmem:[#allocation306_spill] sm:$0xff] %v10289_v60  ;;  %v7245_v60 = vld [vmem:[#allocation2 + $0x228] sm:$0xff]  ;;  %v10352_v13 = vmul.f32 %v7240_v35, %v14266_v45  ;;  %v10355_v24 = vmul.f32 %v7246_v43, %v14272_v47  ;;  %6537 = vrot.lane.b32.xlu0 %v6536_v50, %s7321_s18  ;;  %v14276_v35 = vld [vmem:[#allocation142_spill] sm:$0xff]  ;;  %v14277_v43 = vld [vmem:[#allocation308_spill] sm:$0xff] }
 0x2b9   : > { %14254 = vst [vmem:[#allocation55_spill] sm:$0xff] %v10291_v61  ;;  %v10347_v62 = vmul.f32 %v7245_v60, %v14270_v63  ;;  %6527 = vrot.lane.b32.xlu1 %v6526_v39, %s7321_s18 }
 0x2ba   : > { %14255 = vst [vmem:[#allocation244_spill] sm:$0xff] %v10296_v19  ;;  %v14265_v19 = vld [vmem:[#allocation131_spill] sm:$0xff] }
 0x2bb   : > { %14257 = vst [vmem:[#allocation56_spill] sm:$0xff] %v10299_v37  ;;  %v10331_v9 = vmul.f32 %v7241_v10, %v14265_v19  ;;  %v7243_v37 = vld [vmem:[#allocation2 + $0x238] sm:$0xff]  ;;  %v14269_v19 = vld [vmem:[#allocation137_spill] sm:$0xff] }
 0x2bc   : > { %14258 = vst [vmem:[#allocation259_spill] sm:$0xff] %v10303_v52  ;;  %v14264_v52 = vld [vmem:[#allocation119_spill] sm:$0xff]  ;;  %v10341_v58 = vmul.f32 %v7243_v37, %v14268_v11  ;;  %v6040_v11 = vunpack.i.h.bf16 %v14277_v43 }
 0x2bd   : > { %14260 = vst [vmem:[#allocation12_spill] sm:$0xff] %v10306_v36  ;;  %v10328_v2 = vmul.f32 %v7238_v21, %v14264_v52  ;;  %v7242_v36 = vld [vmem:[#allocation2 + $0x210] sm:$0xff]  ;;  %v10335_v55 = vmul.f32 %v7243_v37, %v14264_v52  ;;  %v14273_v37 = vld [vmem:[#allocation241_spill] sm:$0xff]  ;;  %v6541_v52 = vpack.i.bf16 %v10322_v4, %v10325_v27  ;;  %v6551_v50 = vpack.i.bf16 %v10319_v7, %v10331_v9 }
 0x2be   : > { %v1857_v16 = vmul.f32 %v7242_v36, %v14266_v45  ;;  %14267 = vst [vmem:[#allocation60_spill] sm:$0xff] %v10338_v44  ;;  %v7244_v21 = vld [vmem:[#allocation2 + $0x230] sm:$0xff]  ;;  %v14275_v46 = vpack.c.bf16 %v14273_v37, %v14274_v42  ;;  %v7247_v45 = vld [vmem:[#allocation2 + $0x240] sm:$0xff]  ;;  %v10373_v37 = vpop.permute.xlu2 %6367  ;;  %v10381_v27 = vmul.f32 %v7241_v10, %v14269_v19  ;;  %v10391_v9 = vmul.f32 %v7242_v36, %v14270_v63  ;;  %v14283_v7 = vld [vmem:[#allocation325_spill] sm:$0xff] }
 0x2bf   : > { %v10344_v61 = vmul.f32 %v7244_v21, %v14269_v19  ;;  %14271 = vst [vmem:[#allocation266_spill] sm:$0xff] %v10352_v13  ;;  %v10368_v39 = vmul.f32 %v7247_v45, %v14276_v35  ;;  %v10371_v13 = vpop.permute.xlu1 %6317  ;;  %v10378_v4 = vld [vmem:[#allocation2 + $0x31] sm:$0xff]  ;;  %v6069_v19 = vunpack.i.l.bf16 %v14283_v7  ;;  %v6035_v36 = vunpack.i.h.bf16 %v14284_v5 }
 0x2c0   : > { %5957 = vmatmul.msk.bf16.gmra.mxu2 %vm560_vm0, %v14275_v46  ;;  %14278 = vst [vmem:[#allocation235_spill] sm:$0xff] %v10371_v13  ;;  %v6546_v42 = vpack.i.bf16 %v1857_v16, %v10309_v28  ;;  %v6039_v46 = vunpack.i.l.bf16 %v14277_v43  ;;  %v14280_v45 = vld [vmem:[#allocation318_spill] sm:$0xff]  ;;  %v10388_v13 = vpop.permute.xlu0 %6327  ;;  %v6070_v28 = vunpack.i.h.bf16 %v14283_v7  ;;  %v10401_v43 = vmul.f32 %v7244_v21, %v14272_v47  ;;  %v14285_v7 = vld [vmem:[#allocation157_spill] sm:$0xff]  ;;  %6552 = vrot.lane.b32.xlu0 %v6551_v50, %s7321_s18 }
 0x2c1   : > { %14279 = vst [vmem:[#allocation234_spill] sm:$0xff] %v10373_v37  ;;  %v6055_v44 = vunpack.i.h.bf16 %v14280_v45  ;;  %v6054_v25 = vunpack.i.l.bf16 %v14280_v45  ;;  %v6556_v16 = vpack.i.bf16 %v10344_v61, %v10347_v62  ;;  %v5976_v10 = vld [vmem:[%s13087_s4 + $0x10] sm:$0xff]  ;;  %v1215_v45 = vmul.f32 %v7245_v60, %v14276_v35  ;;  %6542 = vrot.lane.b32.xlu1 %v6541_v52, %s7321_s18  ;;  %v5975_v52 = vld [vmem:[%s13087_s4 + $0x8] sm:$0xff] }
 0x2c2   : > { %14281 = vst [vmem:[#allocation61_spill] sm:$0xff] %v10386_v0  ;;  %v6034_v0 = vunpack.i.l.bf16 %v14284_v5  ;;  %v6084_v37 = vunpack.i.l.bf16 %v14285_v7  ;;  %v6561_v61 = vpack.i.bf16 %v10368_v39, %v10335_v55  ;;  %v10413_v62 = vsel %vm560_vm0, %v10050_v59, %v6040_v11  ;;  %4762 = vmatpush.bf16.msra.mxu0 %v5976_v10  ;;  %5997 = vmatpush.bf16.msra.mxu3 %v5976_v10  ;;  %v14287_v63 = vld [vmem:[#allocation218_spill] sm:$0xff]  ;;  %v14289_v11 = vld [vmem:[#allocation165_spill] sm:$0xff]  ;;  %v14291_v10 = vld [vmem:[#allocation160_spill] sm:$0xff] }
 0x2c3   : > { %14282 = vst [vmem:[#allocation268_spill] sm:$0xff] %v10388_v13  ;;  %v10417_v60 = vsel %vm560_vm0, %v10037_v40, %v6039_v46  ;;  %v10421_v21 = vsel %vm560_vm0, %v10030_v20, %v6054_v25  ;;  %v10425_v5 = vsel %vm560_vm0, %v10094_v6, %v6055_v44  ;;  %v6205_v55 = vunpack.i.h.bf16 %v14287_v63  ;;  %6547 = vrot.lane.b32.xlu2 %v6546_v42, %s7321_s18  ;;  %v14288_v59 = vld [vmem:[#allocation162_spill] sm:$0xff] }
 0x2c4   : > { %14286 = vst [vmem:[#allocation103_spill] sm:$0xff] %v10413_v62  ;;  %v6204_v39 = vunpack.i.l.bf16 %v14287_v63  ;;  %v10433_v40 = vsel %vm560_vm0, %v10044_v34, %v6069_v19  ;;  %v10437_v20 = vsel %vm560_vm0, %v10125_v53, %v6070_v28  ;;  %v6045_v25 = vunpack.i.h.bf16 %v14288_v59 }
 0x2c5   : > { %v6044_v6 = vunpack.i.l.bf16 %v14288_v59  ;;  %v6085_v44 = vunpack.i.h.bf16 %v14285_v7  ;;  %v10448_v34 = vsel %vm560_vm0, %v10040_v8, %v6034_v0  ;;  %v6050_v42 = vunpack.i.h.bf16 %v14289_v11 }
 0x2c6   : > { %v6049_v53 = vunpack.i.l.bf16 %v14289_v11  ;;  %v6383_v28 = vpop.permute.xlu2 %6382  ;;  %v10456_v19 = vsel %vm560_vm0, %v10053_v3, %v6035_v36  ;;  %v10460_v50 = vsel %vm560_vm0, %v10086_v41, %v6084_v37  ;;  %v6100_v63 = vunpack.i.h.bf16 %v14291_v10  ;;  %4763 = vmatpush.bf16.msra.mxu0 %v5975_v52  ;;  %5998 = vmatpush.bf16.msra.mxu3 %v5975_v52  ;;  %v14293_v11 = vld [vmem:[#allocation190_spill] sm:$0xff]  ;;  %v5974_v3 = vld [vmem:[%s13087_s4] sm:$0xff] }
 0x2c7   : > { %v10452_v46 = vpop.permute.xlu1 %6332  ;;  %v6099_v8 = vunpack.i.l.bf16 %v14291_v10  ;;  %v6385_v7 = vunpack.i.h.bf16 %v6383_v28  ;;  %v6384_v59 = vunpack.i.l.bf16 %v6383_v28  ;;  %v6059_v47 = vunpack.i.l.bf16 %v14293_v11  ;;  %v14294_v10 = vld [vmem:[#allocation176_spill] sm:$0xff] }
 0x2c8   : > { %14290 = vst [vmem:[#allocation104_spill] sm:$0xff] %v10452_v46  ;;  %v10464_v0 = vpop.permute.xlu0 %6342  ;;  %v4031_v41 = vsel %vm560_vm0, %v10328_v2, %v6204_v39  ;;  %v4032_v37 = vsel %vm560_vm0, %v1215_v45, %v6205_v55  ;;  %v6060_v36 = vunpack.i.h.bf16 %v14293_v11  ;;  %v6115_v35 = vunpack.i.h.bf16 %v14294_v10  ;;  %v14298_v46 = vld [vmem:[#allocation170_spill] sm:$0xff]  ;;  %v1871_v11 = vld [vmem:[#allocation2 + $0x41] sm:$0xff] }
 0x2c9   : > { %14292 = vst [vmem:[#allocation109_spill] sm:$0xff] %v10464_v0  ;;  %v10475_v0 = vpop.f32.mrf.mxu2  ;;  %v10478_v52 = vsel %vm4035_vm2, %v4031_v41, %v6384_v59  ;;  %v10481_v28 = vsel %vm4035_vm2, %v4032_v37, %v6385_v7  ;;  %v6064_v13 = vunpack.i.l.bf16 %v14298_v46  ;;  %v6114_v62 = vunpack.i.l.bf16 %v14294_v10  ;;  %6557 = vrot.lane.b32.xlu1 %v6556_v16, %s7321_s18  ;;  %v14300_v16 = vld [vmem:[#allocation187_spill] sm:$0xff] }
 0x2ca   : > { %14295 = vst [vmem:[#allocation66_spill] sm:$0xff] %v10475_v0  ;;  %v10487_v2 = vsel %vm560_vm0, %v10022_v30, %v6044_v6  ;;  %v10491_v45 = vsel %vm560_vm0, %v10152_v18, %v6085_v44  ;;  %v10495_v55 = vsel %vm560_vm0, %v10186_v15, %v6100_v63  ;;  %v10499_v39 = vsel %vm560_vm0, %v10117_v29, %v6099_v8  ;;  %v14299_v30 = vld [vmem:[#allocation175_spill] sm:$0xff]  ;;  %v14301_v44 = vld [vmem:[#allocation252_spill] sm:$0xff] }
 0x2cb   : > { %14296 = vst [vmem:[#allocation25_spill] sm:$0xff] %v10478_v52  ;;  %v6065_v7 = vunpack.i.h.bf16 %v14298_v46  ;;  %4764 = vmatpush.bf16.msra.mxu0 %v5974_v3  ;;  %v10504_v59 = vsel %vm560_vm0, %v10026_v31, %v6045_v25  ;;  %5999 = vmatpush.bf16.msra.mxu3 %v5974_v3  ;;  %v6074_v6 = vunpack.i.l.bf16 %v14299_v30  ;;  %v10511_v18 = vsel %vm560_vm0, %v10066_v57, %v6049_v53  ;;  %v14302_v46 = vld [vmem:[#allocation250_spill] sm:$0xff]  ;;  %v1870_v8 = vld [vmem:[#allocation2 + $0x39] sm:$0xff] }
 0x2cc   : > { %14297 = vst [vmem:[#allocation67_spill] sm:$0xff] %v10481_v28  ;;  %6562 = vrot.lane.b32.xlu2 %v6561_v61, %s7321_s18  ;;  %v10515_v29 = vsel %vm560_vm0, %v10061_v33, %v6050_v42  ;;  %v10519_v15 = vsel %vm560_vm0, %v10090_v38, %v6059_v47  ;;  %v6075_v31 = vunpack.i.h.bf16 %v14299_v30  ;;  %v10524_v25 = vsel %vm560_vm0, %v10227_v51, %v6115_v35  ;;  %v14305_v47 = vld [vmem:[#allocation174_spill] sm:$0xff]  ;;  %v14309_v37 = vld [vmem:[#allocation183_spill] sm:$0xff]  ;;  %v14310_v30 = vld [vmem:[#allocation168_spill] sm:$0xff] }
 0x2cd   : > { %v6130_v61 = vunpack.i.h.bf16 %v14300_v16  ;;  %v14303_v57 = vpack.c.bf16 %v14301_v44, %v14302_v46  ;;  %v14304_v33 = vpack.i.bf16 %v10378_v4, %v10355_v24  ;;  %v10537_v38 = vsel %vm560_vm0, %v10034_v56, %v6060_v36  ;;  %v14307_v4 = vld [vmem:[#allocation189_spill] sm:$0xff] }
 0x2ce   : > { %v10541_v51 = vsel %vm560_vm0, %v10142_v17, %v6114_v62  ;;  %v6079_v35 = vunpack.i.l.bf16 %v14305_v47  ;;  %v6129_v42 = vunpack.i.l.bf16 %v14300_v16  ;;  %v10547_v63 = vpop.permute.xlu2 %6397  ;;  %v10551_v24 = vsel %vm560_vm0, %v10112_v48, %v6064_v13 }
 0x2cf   : > { %6567 = vrot.lane.b32.xlu0 %v14304_v33, %s7321_s18  ;;  %v10545_v53 = vpop.permute.xlu1 %6347  ;;  %v6080_v56 = vunpack.i.h.bf16 %v14305_v47  ;;  %v6090_v3 = vunpack.i.h.bf16 %v14307_v4  ;;  %v6089_v17 = vunpack.i.l.bf16 %v14307_v4  ;;  %v10560_v41 = vsel %vm560_vm0, %v10108_v26, %v6065_v7  ;;  %v14317_v4 = vld [vmem:[#allocation23_spill] sm:$0xff] }
 0x2d0   : > { %5958 = vmatmul.msk.bf16.gmra.mxu2 %vm560_vm0, %v14303_v57  ;;  %14306 = vst [vmem:[#allocation265_spill] sm:$0xff] %v10545_v53  ;;  %v10556_v62 = vpop.permute.xlu0 %6357  ;;  %v6095_v36 = vunpack.i.h.bf16 %v14309_v37  ;;  %v6094_v10 = vunpack.i.l.bf16 %v14309_v37  ;;  %v6145_v16 = vunpack.i.h.bf16 %v14310_v30  ;;  %v10567_v48 = vsel %vm560_vm0, %v10121_v23, %v6074_v6  ;;  %v14311_v57 = vld [vmem:[#allocation212_spill] sm:$0xff] }
 0x2d1   : > { %14308 = vst [vmem:[#allocation68_spill] sm:$0xff] %v10556_v62  ;;  %v10571_v13 = vsel %vm560_vm0, %v10250_v22, %v6130_v61  ;;  %v6144_v44 = vunpack.i.l.bf16 %v14310_v30  ;;  %v6581_v46 = vpack.i.bf16 %v1871_v11, %v1870_v8  ;;  %v10576_v26 = vsel %vm560_vm0, %v10057_v49, %v6075_v31  ;;  %v14312_v22 = vld [vmem:[#allocation197_spill] sm:$0xff]  ;;  %v10589_v47 = vpop.f32.mrf.mxu2  ;;  %v14314_v8 = vld [vmem:[#allocation11_spill] sm:$0xff]  ;;  %v14315_v31 = vld [vmem:[#allocation18_spill] sm:$0xff] }
 0x2d2   : > { %v10580_v7 = vsel %vm560_vm0, %v10170_v1, %v6129_v42  ;;  %v6235_v33 = vunpack.i.h.bf16 %v14311_v57  ;;  %v6234_v23 = vunpack.i.l.bf16 %v14311_v57  ;;  %v10586_v6 = vsel %vm560_vm0, %v10138_v54, %v6079_v35  ;;  %14313 = vst [vmem:[#allocation247_spill] sm:$0xff] %v10589_v47  ;;  %v14316_v42 = vld [vmem:[#allocation37_spill] sm:$0xff]  ;;  %v14319_v35 = vld [vmem:[#allocation30_spill] sm:$0xff]  ;;  %v14323_v57 = vld [vmem:[#allocation144_spill] sm:$0xff] }
 0x2d3   : > { %v6105_v61 = vunpack.i.h.bf16 %v14312_v22  ;;  %v10593_v49 = vsel %vm560_vm0, %v14314_v8, %v6080_v56  ;;  %v10597_v1 = vsel %vm560_vm0, %v14315_v31, %v6089_v17  ;;  %v10601_v11 = vsel %vm560_vm0, %v14316_v42, %v6090_v3  ;;  %v14322_v17 = vld [vmem:[#allocation143_spill] sm:$0xff]  ;;  %v14325_v3 = vld [vmem:[#allocation17_spill] sm:$0xff]  ;;  %v14326_v31 = vld [vmem:[#allocation16_spill] sm:$0xff] }
 0x2d4   : > { %v10605_v54 = vsel %vm560_vm0, %v14317_v4, %v6095_v36  ;;  %v10609_v37 = vsel %vm560_vm0, %v14319_v35, %v6094_v10  ;;  %v6104_v30 = vunpack.i.l.bf16 %v14312_v22  ;;  %v10614_v56 = vsel %vm560_vm0, %v10283_v14, %v6145_v16  ;;  %v14328_v42 = vld [vmem:[#allocation59_spill] sm:$0xff]  ;;  %v14330_v4 = vld [vmem:[#allocation206_spill] sm:$0xff]  ;;  %v14332_v47 = vld [vmem:[#allocation173_spill] sm:$0xff] }
 0x2d5   : > { %14318 = vst [vmem:[#allocation24_spill] sm:$0xff] %v10605_v54  ;;  %v14324_v8 = vpack.i.bf16 %v14322_v17, %v14323_v57  ;;  %v14327_v36 = vpack.i.bf16 %v14325_v3, %v14326_v31  ;;  %v10626_v10 = vsel %vm560_vm0, %v14328_v42, %v6144_v44  ;;  %v6110_v22 = vunpack.i.h.bf16 %v14330_v4  ;;  %v14331_v14 = vld [vmem:[#allocation203_spill] sm:$0xff]  ;;  %v1872_v31 = vld [vmem:[#allocation2 + $0x49] sm:$0xff] }
 0x2d6   : > { %14320 = vst [vmem:[#allocation72_spill] sm:$0xff] %v10609_v37  ;;  %v6109_v35 = vunpack.i.l.bf16 %v14330_v4  ;;  %v6160_v16 = vunpack.i.h.bf16 %v14331_v14  ;;  %v6120_v17 = vunpack.i.h.bf16 %v14332_v47  ;;  %v6159_v57 = vunpack.i.l.bf16 %v14331_v14  ;;  %v6413_v3 = vpop.permute.xlu2 %6412  ;;  %v14334_v4 = vld [vmem:[#allocation214_spill] sm:$0xff]  ;;  %v14336_v14 = vld [vmem:[#allocation237_spill] sm:$0xff]  ;;  %v14340_v37 = vld [vmem:[#allocation47_spill] sm:$0xff] }
 0x2d7   : > { %14321 = vst [vmem:[#allocation279_spill] sm:$0xff] %v10614_v56  ;;  %6572 = vrot.lane.b32.xlu1 %v14324_v8, %s7319_s30  ;;  %6577 = vrot.lane.b32.xlu2 %v14327_v36, %s7320_s17  ;;  %v10634_v8 = vpop.permute.xlu1 %6362  ;;  %v1873_v36 = vld [vmem:[#allocation2 + $0x51] sm:$0xff]  ;;  %v4044_v44 = vsel %vm4035_vm2, %v10421_v21, %v6234_v23  ;;  %v4045_v42 = vsel %vm4035_vm2, %v10425_v5, %v6235_v33  ;;  %v6200_v0 = vunpack.i.h.bf16 %v14334_v4  ;;  %v6199_v62 = vunpack.i.l.bf16 %v14334_v4  ;;  %v14338_v4 = vld [vmem:[#allocation36_spill] sm:$0xff] }
 0x2d8   : > { %14329 = vst [vmem:[#allocation83_spill] sm:$0xff] %v10626_v10  ;;  %6582 = vrot.lane.b32.xlu0 %v6581_v46, %s7321_s18  ;;  %v10642_v46 = vpop.permute.xlu0 %6372  ;;  %v6415_v53 = vunpack.i.h.bf16 %v6413_v3  ;;  %v6414_v28 = vunpack.i.l.bf16 %v6413_v3  ;;  %v6210_v52 = vunpack.i.h.bf16 %v14336_v14  ;;  %v6209_v21 = vunpack.i.l.bf16 %v14336_v14  ;;  %v14339_v3 = vld [vmem:[#allocation220_spill] sm:$0xff]  ;;  %v14347_v14 = vld [vmem:[#allocation14_spill] sm:$0xff] }
 0x2d9   : > { %14333 = vst [vmem:[#allocation73_spill] sm:$0xff] %v10634_v8  ;;  %v14337_v8 = vld [vmem:[#allocation223_spill] sm:$0xff]  ;;  %v6596_v23 = vpack.i.bf16 %v1873_v36, %v1872_v31  ;;  %v10660_v54 = vsel %vm560_vm0, %v14339_v3, %v6104_v30  ;;  %v10682_v30 = vsel %vm560_vm0, %v10242_v12, %v6159_v57  ;;  %v4029_v12 = vsel %vm560_vm0, %v10391_v9, %v6199_v62  ;;  %v10699_v57 = vpop.f32.mrf.mxu2  ;;  %v14353_v62 = vld [vmem:[#allocation245_spill] sm:$0xff] }
 0x2da   : > { %14335 = vst [vmem:[#allocation267_spill] sm:$0xff] %v10642_v46  ;;  %v6250_v56 = vunpack.i.h.bf16 %v14337_v8  ;;  %v6249_v10 = vunpack.i.l.bf16 %v14337_v8  ;;  %v10649_v5 = vsel %vm4108_vm3, %v4044_v44, %v6414_v28  ;;  %v10652_v33 = vsel %vm4108_vm3, %v4045_v42, %v6415_v53  ;;  %v14341_v28 = vld [vmem:[#allocation229_spill] sm:$0xff]  ;;  %v14342_v53 = vld [vmem:[#allocation44_spill] sm:$0xff]  ;;  %v14350_v3 = vld [vmem:[#allocation255_spill] sm:$0xff] }
 0x2db   : > { %v10656_v46 = vsel %vm560_vm0, %v14338_v4, %v6105_v61  ;;  %v10664_v8 = vsel %vm560_vm0, %v14340_v37, %v6110_v22  ;;  %v10670_v36 = vsel %vm560_vm0, %v14341_v28, %v6109_v35  ;;  %v10674_v44 = vsel %vm560_vm0, %v14342_v53, %v6120_v17  ;;  %v14343_v37 = vld [vmem:[#allocation147_spill] sm:$0xff]  ;;  %v14344_v22 = vld [vmem:[#allocation145_spill] sm:$0xff]  ;;  %14349 = vst [vmem:[#allocation79_spill] sm:$0xff] %v10699_v57  ;;  %v14351_v28 = vld [vmem:[#allocation254_spill] sm:$0xff] }
 0x2dc   : > { %v10678_v61 = vsel %vm560_vm0, %v10313_v32, %v6160_v16  ;;  %v14345_v42 = vpack.i.bf16 %v14343_v37, %v14344_v22  ;;  %v14346_v35 = vld [vmem:[#allocation15_spill] sm:$0xff]  ;;  %v4050_v17 = vsel %vm4035_vm2, %v10433_v40, %v6249_v10  ;;  %v4051_v32 = vsel %vm4035_vm2, %v10437_v20, %v6250_v56  ;;  %v14354_v10 = vld [vmem:[#allocation238_spill] sm:$0xff] }
 0x2dd   : > { %v14348_v4 = vpack.i.bf16 %v14346_v35, %v14347_v14  ;;  %v6119_v16 = vunpack.i.l.bf16 %v14332_v47  ;;  %v14352_v53 = vpack.c.bf16 %v14350_v3, %v14351_v28  ;;  %v4030_v40 = vsel %vm560_vm0, %v10381_v27, %v6200_v0  ;;  %v1875_v14 = vld [vmem:[#allocation2 + $0x61] sm:$0xff] }
 0x2de   : > { %v4033_v20 = vsel %vm560_vm0, %v10401_v43, %v6209_v21  ;;  %v4034_v9 = vsel %vm560_vm0, %v10341_v58, %v6210_v52  ;;  %v6215_v47 = vunpack.i.h.bf16 %v14353_v62  ;;  %v6214_v56 = vunpack.i.l.bf16 %v14353_v62  ;;  %v6428_v35 = vpop.permute.xlu2 %6427  ;;  %v14355_v21 = vld [vmem:[#allocation280_spill] sm:$0xff] }
 0x2df   : > { %6587 = vrot.lane.b32.xlu1 %v14345_v42, %s7319_s30  ;;  %6592 = vrot.lane.b32.xlu2 %v14348_v4, %s7320_s17  ;;  %v6265_v37 = vunpack.i.h.bf16 %v14354_v10  ;;  %v6264_v22 = vunpack.i.l.bf16 %v14354_v10  ;;  %v6378_v42 = vpop.permute.xlu1 %6377  ;;  %v6430_v3 = vunpack.i.h.bf16 %v6428_v35  ;;  %v6429_v43 = vunpack.i.l.bf16 %v6428_v35 }
 0x2e0   : > { %5959 = vmatmul.msk.bf16.gmra.mxu2 %vm560_vm0, %v14352_v53  ;;  %6597 = vrot.lane.b32.xlu0 %v6596_v23, %s7321_s18  ;;  %v1874_v23 = vld [vmem:[#allocation2 + $0x59] sm:$0xff]  ;;  %v6380_v4 = vunpack.i.h.bf16 %v6378_v42  ;;  %v6379_v27 = vunpack.i.l.bf16 %v6378_v42  ;;  %v6388_v0 = vpop.permute.xlu0 %6387  ;;  %v6225_v28 = vunpack.i.h.bf16 %v14355_v21  ;;  %v6224_v58 = vunpack.i.l.bf16 %v14355_v21 }
 0x2e1   : > { %v6390_v52 = vunpack.i.h.bf16 %v6388_v0  ;;  %v6389_v53 = vunpack.i.l.bf16 %v6388_v0  ;;  %v6611_v62 = vpack.i.bf16 %v1875_v14, %v1874_v23  ;;  %v10719_v31 = vsel %vm4108_vm3, %v4050_v17, %v6429_v43  ;;  %v14361_v17 = vld [vmem:[#allocation91_spill] sm:$0xff]  ;;  %v10772_v0 = vpop.f32.mrf.mxu2 }
 0x2e2   : > { %14356 = vst [vmem:[#allocation299_spill] sm:$0xff] %v10719_v31  ;;  %v10722_v10 = vsel %vm4108_vm3, %v4051_v32, %v6430_v3  ;;  %v10725_v57 = vsel %vm4035_vm2, %v4029_v12, %v6379_v27  ;;  %v10730_v35 = vsel %vm4035_vm2, %v4030_v40, %v6380_v4  ;;  %v10740_v14 = vsel %vm560_vm0, %v14361_v17, %v6119_v16  ;;  %v14362_v32 = vld [vmem:[#allocation188_spill] sm:$0xff]  ;;  %v14365_v4 = vld [vmem:[#allocation146_spill] sm:$0xff] }
 0x2e3   : > { %14357 = vst [vmem:[#allocation90_spill] sm:$0xff] %v10722_v10  ;;  %v10733_v21 = vsel %vm4035_vm2, %v4033_v20, %v6389_v53  ;;  %v10736_v23 = vsel %vm4035_vm2, %v4034_v9, %v6390_v52  ;;  %v14363_v27 = vld [vmem:[#allocation216_spill] sm:$0xff]  ;;  %v14367_v9 = vld [vmem:[#allocation6_spill] sm:$0xff]  ;;  %v4036_v16 = vsel %vm4035_vm2, %v10448_v34, %v6214_v56  ;;  %v4037_v17 = vsel %vm4035_vm2, %v10456_v19, %v6215_v47 }
 0x2e4   : > { %14358 = vst [vmem:[#allocation80_spill] sm:$0xff] %v10730_v35  ;;  %v6220_v3 = vunpack.i.h.bf16 %v14363_v27  ;;  %v6219_v43 = vunpack.i.l.bf16 %v14363_v27  ;;  %v14364_v40 = vld [vmem:[#allocation148_spill] sm:$0xff]  ;;  %v4056_v42 = vsel %vm4035_vm2, %v10460_v50, %v6264_v22  ;;  %v4057_v34 = vsel %vm4035_vm2, %v10491_v45, %v6265_v37  ;;  %v14371_v47 = vld [vmem:[#allocation258_spill] sm:$0xff]  ;;  %v14372_v50 = vld [vmem:[#allocation281_spill] sm:$0xff] }
 0x2e5   : > { %14359 = vst [vmem:[#allocation278_spill] sm:$0xff] %v10733_v21  ;;  %v14366_v20 = vpack.i.bf16 %v14364_v40, %v14365_v4  ;;  %v14368_v52 = vld [vmem:[#allocation4_spill] sm:$0xff]  ;;  %v1876_v40 = vld [vmem:[#allocation2 + $0x69] sm:$0xff]  ;;  %v1877_v4 = vld [vmem:[#allocation2 + $0x71] sm:$0xff]  ;;  %v6240_v56 = vunpack.i.h.bf16 %v14371_v47  ;;  %v6280_v22 = vunpack.i.h.bf16 %v14372_v50 }
 0x2e6   : > { %14360 = vst [vmem:[#allocation84_spill] sm:$0xff] %v10736_v23  ;;  %v14369_v53 = vpack.i.bf16 %v14367_v9, %v14368_v52  ;;  %v14370_v27 = vld [vmem:[#allocation256_spill] sm:$0xff]  ;;  %v4041_v9 = vsel %vm4035_vm2, %v10504_v59, %v6225_v28  ;;  %v6279_v52 = vunpack.i.l.bf16 %v14372_v50  ;;  %v6239_v28 = vunpack.i.l.bf16 %v14371_v47 }
 0x2e7   : > { %6602 = vrot.lane.b32.xlu1 %v14366_v20, %s7319_s30  ;;  %v6230_v12 = vunpack.i.h.bf16 %v14370_v27  ;;  %v4040_v20 = vsel %vm4035_vm2, %v10487_v2, %v6224_v58  ;;  %v6229_v19 = vunpack.i.l.bf16 %v14370_v27  ;;  %14373 = vst [vmem:[#allocation13_spill] sm:$0xff] %v10772_v0  ;;  %v6626_v27 = vpack.i.bf16 %v1877_v4, %v1876_v40  ;;  %v14376_v4 = vld [vmem:[#allocation149_spill] sm:$0xff] }
 0x2e8   : > { %6607 = vrot.lane.b32.xlu2 %v14369_v53, %s7320_s17  ;;  %6612 = vrot.lane.b32.xlu0 %v6611_v62, %s7321_s18  ;;  %v6393_v62 = vpop.permute.xlu1 %6392  ;;  %v6443_v53 = vpop.permute.xlu2 %6442 }
 0x2e9   : > { %v6403_v23 = vpop.permute.xlu0 %6402  ;;  %v6395_v2 = vunpack.i.h.bf16 %v6393_v62  ;;  %v6394_v58 = vunpack.i.l.bf16 %v6393_v62  ;;  %v6445_v31 = vunpack.i.h.bf16 %v6443_v53  ;;  %v6444_v59 = vunpack.i.l.bf16 %v6443_v53 }
 0x2ea   : > { %v6405_v45 = vunpack.i.h.bf16 %v6403_v23  ;;  %v6404_v37 = vunpack.i.l.bf16 %v6403_v23 }
 0x2eb   : > { %v4109_v10 = vsel %vm4108_vm3, %v4036_v16, %v6394_v58  ;;  %v4110_v21 = vsel %vm4108_vm3, %v4037_v17, %v6395_v2  ;;  %v10778_v50 = vsel %vm4108_vm3, %v4056_v42, %v6444_v59  ;;  %v10781_v35 = vsel %vm4108_vm3, %v4057_v34, %v6445_v31  ;;  %v14374_v17 = vld [vmem:[#allocation103_spill] sm:$0xff]  ;;  %v14379_v34 = vld [vmem:[#allocation288_spill] sm:$0xff] }
 0x2ec   : > { %v4397_v0 = vpack.c.bf16 %v4110_v21, %v4109_v10  ;;  %v10784_v62 = vsel %vm4108_vm3, %v4040_v20, %v6404_v37  ;;  %v10787_v53 = vsel %vm4108_vm3, %v4041_v9, %v6405_v45  ;;  %v4038_v16 = vsel %vm4035_vm2, %v10417_v60, %v6219_v43  ;;  %v14375_v21 = vld [vmem:[#allocation182_spill] sm:$0xff]  ;;  %v14381_v2 = vld [vmem:[#allocation263_spill] sm:$0xff]  ;;  %v14385_v45 = vld [vmem:[#allocation21_spill] sm:$0xff] }
 0x2ed   : > { %v4039_v42 = vsel %vm4035_vm2, %v14374_v17, %v6220_v3  ;;  %v4042_v10 = vsel %vm4035_vm2, %v10511_v18, %v6229_v19  ;;  %v14377_v20 = vld [vmem:[#allocation150_spill] sm:$0xff]  ;;  %v4043_v60 = vsel %vm4035_vm2, %v10515_v29, %v6230_v12  ;;  %v4062_v3 = vsel %vm4035_vm2, %v10499_v39, %v6279_v52  ;;  %v14380_v19 = vld [vmem:[#allocation261_spill] sm:$0xff] }
 0x2ee   : > { %v14378_v9 = vpack.i.bf16 %v14376_v4, %v14377_v20  ;;  %4765 = vmatmul.bf16.vlgmr.msra.gmra.mxu0 %v4397_v0  ;;  %v4063_v43 = vsel %vm4035_vm2, %v10495_v55, %v6280_v22  ;;  %v6245_v47 = vunpack.i.h.bf16 %v14379_v34  ;;  %v6244_v18 = vunpack.i.l.bf16 %v14379_v34  ;;  %v14383_v0 = vld [vmem:[#allocation298_spill] sm:$0xff]  ;;  %v14384_v22 = vld [vmem:[#allocation287_spill] sm:$0xff] }
 0x2ef   : > { %v14382_v58 = vpack.c.bf16 %v14380_v19, %v14381_v2  ;;  %v4046_v29 = vsel %vm4035_vm2, %v10519_v15, %v6239_v28  ;;  %v4047_v39 = vsel %vm4035_vm2, %v10537_v38, %v6240_v56  ;;  %v6255_v12 = vunpack.i.h.bf16 %v14383_v0  ;;  %v14386_v37 = vld [vmem:[#allocation22_spill] sm:$0xff]  ;;  %v1878_v20 = vld [vmem:[#allocation2 + $0x79] sm:$0xff]  ;;  %v1879_v15 = vld [vmem:[#allocation2 + $0x81] sm:$0xff] }
 0x2f0   : > { %6617 = vrot.lane.b32.xlu1 %v14378_v9, %s7319_s30  ;;  %6627 = vrot.lane.b32.xlu0 %v6626_v27, %s7321_s18  ;;  %v6254_v55 = vunpack.i.l.bf16 %v14383_v0  ;;  %v6295_v52 = vunpack.i.h.bf16 %v14384_v22  ;;  %v6294_v59 = vunpack.i.l.bf16 %v14384_v22  ;;  %v14387_v17 = vpack.i.bf16 %v14385_v45, %v14386_v37  ;;  %v6408_v27 = vpop.permute.xlu1 %6407  ;;  %v6458_v4 = vpop.permute.xlu2 %6457 }
 0x2f1   : > { %5960 = vmatmul.msk.bf16.gmra.mxu2 %vm560_vm0, %v14382_v58  ;;  %v6418_v28 = vpop.permute.xlu0 %6417  ;;  %v6410_v9 = vunpack.i.h.bf16 %v6408_v27  ;;  %v6409_v38 = vunpack.i.l.bf16 %v6408_v27  ;;  %v6460_v56 = vunpack.i.h.bf16 %v6458_v4  ;;  %v6459_v34 = vunpack.i.l.bf16 %v6458_v4  ;;  %v10831_v22 = vpop.f32.mrf.mxu2 }
 0x2f2   : > { %6622 = vrot.lane.b32.xlu2 %v14387_v17, %s7320_s17  ;;  %v6400_v19 = vunpack.i.h.bf16 %v10547_v63  ;;  %v6399_v2 = vunpack.i.l.bf16 %v10547_v63  ;;  %v6420_v58 = vunpack.i.h.bf16 %v6418_v28  ;;  %v6419_v0 = vunpack.i.l.bf16 %v6418_v28  ;;  %14388 = vst [vmem:[#allocation85_spill] sm:$0xff] %v10831_v22  ;;  %v14391_v28 = vld [vmem:[#allocation153_spill] sm:$0xff] }
 0x2f3   : > { %v6641_v23 = vpack.i.bf16 %v1879_v15, %v1878_v20  ;;  %v10834_v45 = vsel %vm4108_vm3, %v4042_v10, %v6409_v38  ;;  %v10837_v37 = vsel %vm4108_vm3, %v4043_v60, %v6410_v9  ;;  %v10840_v17 = vsel %vm4108_vm3, %v4062_v3, %v6459_v34  ;;  %v1881_v34 = vld [vmem:[#allocation2 + $0x91] sm:$0xff] }
 0x2f4   : > { %14389 = vst [vmem:[#allocation3_spill] sm:$0xff] %v10840_v17  ;;  %v10845_v4 = vsel %vm4108_vm3, %v4046_v29, %v6419_v0  ;;  %v10848_v63 = vsel %vm4108_vm3, %v4047_v39, %v6420_v58  ;;  %v10851_v20 = vsel %vm4108_vm3, %v4063_v43, %v6460_v56  ;;  %v4048_v60 = vsel %vm4035_vm2, %v10551_v24, %v6244_v18  ;;  %v14390_v29 = vld [vmem:[#allocation154_spill] sm:$0xff]  ;;  %v14397_v0 = vld [vmem:[#allocation28_spill] sm:$0xff] }
 0x2f5   : > { %v4049_v3 = vsel %vm4035_vm2, %v10560_v41, %v6245_v47  ;;  %v14392_v39 = vpack.i.bf16 %v14390_v29, %v14391_v28  ;;  %v4052_v43 = vsel %vm4035_vm2, %v10567_v48, %v6254_v55  ;;  %v4053_v9 = vsel %vm4035_vm2, %v10576_v26, %v6255_v12  ;;  %v14393_v47 = vld [vmem:[#allocation9_spill] sm:$0xff]  ;;  %v14394_v55 = vld [vmem:[#allocation20_spill] sm:$0xff] }
 0x2f6   : > { %v4068_v24 = vsel %vm4035_vm2, %v10541_v51, %v6294_v59  ;;  %v4069_v41 = vsel %vm4035_vm2, %v10524_v25, %v6295_v52  ;;  %v6260_v18 = vunpack.i.h.bf16 %v14393_v47  ;;  %v6259_v38 = vunpack.i.l.bf16 %v14393_v47  ;;  %v1880_v56 = vld [vmem:[#allocation2 + $0x89] sm:$0xff] }
 0x2f7   : > { %v4111_v58 = vsel %vm4108_vm3, %v4038_v16, %v6399_v2  ;;  %v4112_v48 = vsel %vm4108_vm3, %v4039_v42, %v6400_v19  ;;  %v6270_v26 = vunpack.i.h.bf16 %v14394_v55  ;;  %v6269_v12 = vunpack.i.l.bf16 %v14394_v55  ;;  %v14395_v51 = vld [vmem:[#allocation10_spill] sm:$0xff]  ;;  %v14396_v52 = vld [vmem:[#allocation29_spill] sm:$0xff] }
 0x2f8   : > { %6632 = vrot.lane.b32.xlu1 %v14392_v39, %s7319_s30  ;;  %6642 = vrot.lane.b32.xlu0 %v6641_v23, %s7321_s18  ;;  %v6310_v59 = vunpack.i.h.bf16 %v14395_v51  ;;  %v6309_v25 = vunpack.i.l.bf16 %v14395_v51  ;;  %v14398_v29 = vpack.i.bf16 %v14396_v52, %v14397_v0  ;;  %v6423_v23 = vpop.permute.xlu1 %6422  ;;  %v6473_v28 = vpop.permute.xlu2 %6472  ;;  %v6656_v10 = vpack.i.bf16 %v1881_v34, %v1880_v56  ;;  %v14402_v34 = vld [vmem:[#allocation97_spill] sm:$0xff] }
 0x2f9   : > { %v6433_v39 = vpop.permute.xlu0 %6432  ;;  %v6425_v47 = vunpack.i.h.bf16 %v6423_v23  ;;  %v6424_v16 = vunpack.i.l.bf16 %v6423_v23  ;;  %v6475_v2 = vunpack.i.h.bf16 %v6473_v28  ;;  %v6474_v42 = vunpack.i.l.bf16 %v6473_v28  ;;  %v14406_v28 = vld [vmem:[#allocation196_spill] sm:$0xff] }
 0x2fa   : > { %6637 = vrot.lane.b32.xlu2 %v14398_v29, %s7320_s17  ;;  %v6435_v19 = vunpack.i.h.bf16 %v6433_v39  ;;  %v6434_v15 = vunpack.i.l.bf16 %v6433_v39  ;;  %v4400_v55 = vpack.c.bf16 %v4112_v48, %v4111_v58  ;;  %v14404_v58 = vld [vmem:[#allocation96_spill] sm:$0xff]  ;;  %v6135_v39 = vunpack.i.h.bf16 %v14406_v28 }
 0x2fb   : > { %v10887_v27 = vsel %vm4108_vm3, %v4048_v60, %v6424_v16  ;;  %v10890_v51 = vsel %vm4108_vm3, %v4049_v3, %v6425_v47  ;;  %v10893_v52 = vsel %vm4108_vm3, %v4068_v24, %v6474_v42  ;;  %v10896_v0 = vsel %vm4108_vm3, %v4069_v41, %v6475_v2  ;;  %v14407_v47 = vld [vmem:[#allocation155_spill] sm:$0xff]  ;;  %v14408_v16 = vld [vmem:[#allocation152_spill] sm:$0xff] }
 0x2fc   : > { %14399 = vst [vmem:[#allocation19_spill] sm:$0xff] %v10893_v52  ;;  %v10901_v23 = vsel %vm4108_vm3, %v4052_v43, %v6434_v15  ;;  %v10904_v56 = vsel %vm4108_vm3, %v4053_v9, %v6435_v19  ;;  %v14401_v3 = vunpack.i.h.bf16 %v14362_v32  ;;  %v14403_v41 = vunpack.i.l.bf16 %v14362_v32  ;;  %v10921_v43 = vpop.f32.mrf.mxu2  ;;  %v14418_v9 = vld [vmem:[#allocation32_spill] sm:$0xff] }
 0x2fd   : > { %14400 = vst [vmem:[#allocation5_spill] sm:$0xff] %v10896_v0  ;;  %v6174_v15 = vunpack.i.l.bf16 %v14375_v21  ;;  %v14409_v2 = vpack.i.bf16 %v14407_v47, %v14408_v16  ;;  %v4054_v32 = vsel %vm4035_vm2, %v10586_v6, %v6259_v38  ;;  %v4055_v42 = vsel %vm4035_vm2, %v10593_v49, %v6260_v18  ;;  %v14413_v18 = vld [vmem:[#allocation8_spill] sm:$0xff] }
 0x2fe   : > { %v10912_v24 = vsel %vm560_vm0, %v14402_v34, %v14401_v3  ;;  %v10918_v48 = vsel %vm560_vm0, %v14404_v58, %v14403_v41  ;;  %14405 = vst [vmem:[#allocation95_spill] sm:$0xff] %v10921_v43  ;;  %4770 = vmatmul.bf16.gmra.mxu0 %v4400_v55  ;;  %v4074_v19 = vsel %vm4035_vm2, %v10580_v7, %v6309_v25  ;;  %v14410_v34 = vld [vmem:[#allocation273_spill] sm:$0xff]  ;;  %v14411_v41 = vld [vmem:[#allocation271_spill] sm:$0xff]  ;;  %v6275_v7 = vunpack.i.h.bf16 %v14413_v18 }
 0x2ff   : > { %v14412_v58 = vpack.c.bf16 %v14410_v34, %v14411_v41  ;;  %v4058_v55 = vsel %vm4035_vm2, %v10597_v1, %v6269_v12  ;;  %v4059_v6 = vsel %vm4035_vm2, %v10601_v11, %v6270_v26  ;;  %v4075_v49 = vsel %vm4035_vm2, %v10571_v13, %v6310_v59  ;;  %v14414_v25 = vld [vmem:[#allocation31_spill] sm:$0xff]  ;;  %v1883_v11 = vld [vmem:[#allocation2 + $0xa1] sm:$0xff] }
 0x300   : > { %6647 = vrot.lane.b32.xlu1 %v14409_v2, %s7319_s30  ;;  %6657 = vrot.lane.b32.xlu0 %v6656_v10, %s7321_s18  ;;  %v6274_v38 = vunpack.i.l.bf16 %v14413_v18  ;;  %v6325_v47 = vunpack.i.h.bf16 %v14414_v25  ;;  %v6324_v16 = vunpack.i.l.bf16 %v14414_v25  ;;  %v14415_v2 = vld [vmem:[#allocation26_spill] sm:$0xff]  ;;  %v14416_v10 = vld [vmem:[#allocation27_spill] sm:$0xff]  ;;  %v6438_v1 = vpop.permute.xlu1 %6437  ;;  %v6488_v12 = vpop.permute.xlu2 %6487  ;;  %v6285_v18 = vunpack.i.h.bf16 %v14418_v9 }
 0x301   : > { %5961 = vmatmul.msk.bf16.gmra.mxu2 %vm560_vm0, %v14412_v58  ;;  %v14417_v34 = vpack.i.bf16 %v14415_v2, %v14416_v10  ;;  %v1882_v41 = vld [vmem:[#allocation2 + $0x99] sm:$0xff]  ;;  %v6448_v26 = vpop.permute.xlu0 %6447  ;;  %v6440_v58 = vunpack.i.h.bf16 %v6438_v1  ;;  %v6439_v13 = vunpack.i.l.bf16 %v6438_v1  ;;  %v6490_v59 = vunpack.i.h.bf16 %v6488_v12 }
 0x302   : > { %v6489_v60 = vunpack.i.l.bf16 %v6488_v12  ;;  %v6284_v29 = vunpack.i.l.bf16 %v14418_v9  ;;  %v6450_v31 = vunpack.i.h.bf16 %v6448_v26  ;;  %v6449_v25 = vunpack.i.l.bf16 %v6448_v26 }
 0x303   : > { %6652 = vrot.lane.b32.xlu2 %v14417_v34, %s7320_s17  ;;  %v6671_v3 = vpack.i.bf16 %v1883_v11, %v1882_v41  ;;  %v10959_v40 = vsel %vm4108_vm3, %v4054_v32, %v6439_v13  ;;  %v10962_v2 = vsel %vm4108_vm3, %v4055_v42, %v6440_v58  ;;  %v10976_v12 = vsel %vm4108_vm3, %v4075_v49, %v6490_v59  ;;  %v14421_v32 = vld [vmem:[#allocation227_spill] sm:$0xff]  ;;  %v14425_v11 = vld [vmem:[#allocation158_spill] sm:$0xff]  ;;  %v14429_v13 = vld [vmem:[#allocation24_spill] sm:$0xff] }
 0x304   : > { %v10965_v10 = vsel %vm4108_vm3, %v4074_v19, %v6489_v60  ;;  %v10970_v1 = vsel %vm4108_vm3, %v4058_v55, %v6449_v25  ;;  %v10973_v9 = vsel %vm4108_vm3, %v4059_v6, %v6450_v31  ;;  %14420 = vst [vmem:[#allocation121_spill] sm:$0xff] %v10976_v12  ;;  %v10980_v41 = vsel %vm560_vm0, %v14421_v32, %v6174_v15  ;;  %v14423_v60 = vld [vmem:[#allocation60_spill] sm:$0xff]  ;;  %v14424_v6 = vld [vmem:[#allocation42_spill] sm:$0xff]  ;;  %v14426_v15 = vld [vmem:[#allocation159_spill] sm:$0xff]  ;;  %v11007_v31 = vpop.f32.mrf.mxu2 }
 0x305   : > { %14419 = vst [vmem:[#allocation102_spill] sm:$0xff] %v10965_v10  ;;  %v14422_v42 = vunpack.i.h.bf16 %v14375_v21  ;;  %v10994_v49 = vsel %vm560_vm0, %v14424_v6, %v6135_v39  ;;  %v14427_v26 = vpack.i.bf16 %v14425_v11, %v14426_v15  ;;  %v14428_v21 = vld [vmem:[#allocation72_spill] sm:$0xff]  ;;  %v4061_v59 = vsel %vm4035_vm2, %v14429_v13, %v6275_v7  ;;  %v14430_v25 = vld [vmem:[#allocation83_spill] sm:$0xff]  ;;  %v11010_v39 = vld [vmem:[#allocation2 + $0xa9] sm:$0xff] }
 0x306   : > { %v4060_v58 = vsel %vm4035_vm2, %v14428_v21, %v6274_v38  ;;  %v4080_v32 = vsel %vm4035_vm2, %v14430_v25, %v6324_v16  ;;  %14432 = vst [vmem:[#allocation107_spill] sm:$0xff] %v11007_v31  ;;  %v11012_v6 = vld [vmem:[#allocation2 + $0xb1] sm:$0xff]  ;;  %v4064_v11 = vsel %vm4035_vm2, %v10660_v54, %v6284_v29  ;;  %v4065_v38 = vsel %vm4035_vm2, %v10656_v46, %v6285_v18  ;;  %v14436_v55 = vld [vmem:[#allocation33_spill] sm:$0xff] }
 0x307   : > { %v10986_v19 = vsel %vm560_vm0, %v14423_v60, %v14422_v42  ;;  %v14431_v42 = vld [vmem:[#allocation222_spill] sm:$0xff]  ;;  %v14433_v7 = vld [vmem:[#allocation279_spill] sm:$0xff]  ;;  %v6686_v12 = vpack.i.bf16 %v11012_v6, %v11010_v39 }
 0x308   : > { %6662 = vrot.lane.b32.xlu1 %v14427_v26, %s7319_s30  ;;  %v6290_v60 = vunpack.i.h.bf16 %v14431_v42  ;;  %6672 = vrot.lane.b32.xlu0 %v6671_v3, %s7321_s18  ;;  %v4081_v15 = vsel %vm4035_vm2, %v14433_v7, %v6325_v47  ;;  %v6289_v16 = vunpack.i.l.bf16 %v14431_v42  ;;  %v14434_v26 = vld [vmem:[#allocation231_spill] sm:$0xff]  ;;  %v14437_v34 = vld [vmem:[#allocation34_spill] sm:$0xff]  ;;  %v6453_v54 = vpop.permute.xlu1 %6452  ;;  %v6503_v29 = vpop.permute.xlu2 %6502 }
 0x309   : > { %v6300_v21 = vunpack.i.h.bf16 %v14434_v26  ;;  %v14435_v13 = vld [vmem:[#allocation35_spill] sm:$0xff]  ;;  %v14438_v31 = vpack.i.bf16 %v14436_v55, %v14437_v34  ;;  %v6463_v43 = vpop.permute.xlu0 %6462  ;;  %v6455_v46 = vunpack.i.h.bf16 %v6453_v54  ;;  %v6454_v18 = vunpack.i.l.bf16 %v6453_v54 }
 0x30a   : > { %v6340_v25 = vunpack.i.h.bf16 %v14435_v13  ;;  %v6339_v3 = vunpack.i.l.bf16 %v14435_v13  ;;  %v6505_v22 = vunpack.i.h.bf16 %v6503_v29  ;;  %v6504_v47 = vunpack.i.l.bf16 %v6503_v29  ;;  %v14444_v29 = vld [vmem:[#allocation71_spill] sm:$0xff] }
 0x30b   : > { %6667 = vrot.lane.b32.xlu2 %v14438_v31, %s7320_s17  ;;  %v6299_v42 = vunpack.i.l.bf16 %v14434_v26  ;;  %v6465_v7 = vunpack.i.h.bf16 %v6463_v43  ;;  %v6464_v10 = vunpack.i.l.bf16 %v6463_v43  ;;  %v11032_v13 = vsel %vm4108_vm3, %v4060_v58, %v6454_v18  ;;  %v14452_v18 = vld [vmem:[#allocation277_spill] sm:$0xff] }
 0x30c   : > { %v11035_v34 = vsel %vm4108_vm3, %v4061_v59, %v6455_v46  ;;  %v11038_v55 = vsel %vm4108_vm3, %v4080_v32, %v6504_v47  ;;  %v11041_v31 = vsel %vm4108_vm3, %v4081_v15, %v6505_v22  ;;  %v14443_v59 = vunpack.i.l.bf16 %v14406_v28  ;;  %v14445_v22 = vld [vmem:[#allocation204_spill] sm:$0xff] }
 0x30d   : > { %14439 = vst [vmem:[#allocation132_spill] sm:$0xff] %v11038_v55  ;;  %v11046_v43 = vsel %vm4108_vm3, %v4064_v11, %v6464_v10  ;;  %v11049_v54 = vsel %vm4108_vm3, %v4065_v38, %v6465_v7  ;;  %v6140_v15 = vunpack.i.h.bf16 %v14445_v22  ;;  %v14446_v11 = vld [vmem:[#allocation217_spill] sm:$0xff]  ;;  %v14447_v47 = vld [vmem:[#allocation164_spill] sm:$0xff]  ;;  %v14448_v7 = vld [vmem:[#allocation163_spill] sm:$0xff]  ;;  %v14450_v28 = vpack.c.bf16 %v10787_v53, %v10784_v62 }
 0x30e   : > { %14440 = vst [vmem:[#allocation137_spill] sm:$0xff] %v11041_v31  ;;  %v11057_v32 = vsel %vm560_vm0, %v14444_v29, %v14443_v59  ;;  %v14449_v58 = vpack.i.bf16 %v14447_v47, %v14448_v7  ;;  %v4066_v59 = vsel %vm4035_vm2, %v10670_v36, %v6289_v16  ;;  %v4067_v29 = vsel %vm4035_vm2, %v10664_v8, %v6290_v60  ;;  %v14451_v10 = vld [vmem:[#allocation224_spill] sm:$0xff]  ;;  %v14455_v53 = vld [vmem:[#allocation306_spill] sm:$0xff]  ;;  %v14456_v16 = vld [vmem:[#allocation55_spill] sm:$0xff] }
 0x30f   : > { %14441 = vst [vmem:[#allocation138_spill] sm:$0xff] %v11046_v43  ;;  %4775 = vmatmul.bf16.gmra.mxu0 %v14450_v28  ;;  %v14453_v46 = vld [vmem:[#allocation276_spill] sm:$0xff]  ;;  %v4071_v62 = vsel %vm4035_vm2, %v10674_v44, %v6300_v21  ;;  %v4086_v36 = vsel %vm4035_vm2, %v10682_v30, %v6339_v3  ;;  %v6305_v8 = vunpack.i.h.bf16 %v14455_v53  ;;  %v6304_v60 = vunpack.i.l.bf16 %v14455_v53  ;;  %v11101_v30 = vpop.f32.mrf.mxu2 }
 0x310   : > { %14442 = vst [vmem:[#allocation241_spill] sm:$0xff] %v11049_v54  ;;  %6677 = vrot.lane.b32.xlu1 %v14449_v58, %s7319_s30  ;;  %v14454_v38 = vpack.c.bf16 %v14452_v18, %v14453_v46  ;;  %6687 = vrot.lane.b32.xlu0 %v6686_v12, %s7321_s18  ;;  %v4070_v58 = vsel %vm4035_vm2, %v10740_v14, %v6299_v42  ;;  %v6355_v47 = vunpack.i.h.bf16 %v14456_v16  ;;  %v14457_v46 = vld [vmem:[#allocation41_spill] sm:$0xff]  ;;  %v14458_v18 = vld [vmem:[#allocation40_spill] sm:$0xff]  ;;  %v6468_v12 = vpop.permute.xlu1 %6467  ;;  %v6518_v7 = vpop.permute.xlu2 %6517  ;;  %v6354_v55 = vunpack.i.l.bf16 %v14456_v16 }
 0x311   : > { %v11095_v14 = vld [vmem:[#allocation2 + $0xb9] sm:$0xff]  ;;  %v11097_v42 = vld [vmem:[#allocation2 + $0xc1] sm:$0xff]  ;;  %v4087_v44 = vsel %vm4035_vm2, %v10678_v61, %v6340_v25  ;;  %14460 = vst [vmem:[#allocation243_spill] sm:$0xff] %v11101_v30  ;;  %v6478_v21 = vpop.permute.xlu0 %6477  ;;  %v6470_v3 = vunpack.i.h.bf16 %v6468_v12  ;;  %v6469_v28 = vunpack.i.l.bf16 %v6468_v12  ;;  %v6520_v53 = vunpack.i.h.bf16 %v6518_v7  ;;  %v5988_v25 = vld [vmem:[%s13087_s4 + $0x70] sm:$0xff] }
 0x312   : > { %5962 = vmatmul.msk.bf16.gmra.mxu2 %vm560_vm0, %v14454_v38  ;;  %v14459_v38 = vpack.i.bf16 %v14457_v46, %v14458_v18  ;;  %v6519_v26 = vunpack.i.l.bf16 %v6518_v7  ;;  %v5989_v46 = vld [vmem:[%s13087_s4 + $0x78] sm:$0xff]  ;;  %v14461_v18 = vld [vmem:[#allocation56_spill] sm:$0xff]  ;;  %v6480_v31 = vunpack.i.h.bf16 %v6478_v21  ;;  %v6479_v52 = vunpack.i.l.bf16 %v6478_v21 }
 0x313   : > { %v6314_v0 = vunpack.i.l.bf16 %v14461_v18  ;;  %v6701_v61 = vpack.i.bf16 %v11097_v42, %v11095_v14  ;;  %4946 = vmatpush.bf16.msra.mxu1 %v5989_v46  ;;  %6000 = vmatpush.bf16.msrb.mxu3 %v5989_v46  ;;  %v11115_v12 = vsel %vm4108_vm3, %v4066_v59, %v6469_v28  ;;  %v11118_v7 = vsel %vm4108_vm3, %v4067_v29, %v6470_v3  ;;  %v14467_v43 = vld [vmem:[#allocation264_spill] sm:$0xff]  ;;  %v11155_v28 = vld [vmem:[#allocation2 + $0xc9] sm:$0xff] }
 0x314   : > { %6682 = vrot.lane.b32.xlu2 %v14459_v38, %s7320_s17  ;;  %v6315_v38 = vunpack.i.h.bf16 %v14461_v18  ;;  %14462 = vst [vmem:[#allocation308_spill] sm:$0xff] %v11115_v12  ;;  %v11123_v21 = vsel %vm4108_vm3, %v4070_v58, %v6479_v52  ;;  %v11126_v18 = vsel %vm4108_vm3, %v4071_v62, %v6480_v31  ;;  %v11129_v30 = vsel %vm4108_vm3, %v4086_v36, %v6519_v26  ;;  %v14469_v52 = vld [vmem:[#allocation166_spill] sm:$0xff]  ;;  %v14470_v58 = vld [vmem:[#allocation167_spill] sm:$0xff] }
 0x315   : > { %14463 = vst [vmem:[#allocation318_spill] sm:$0xff] %v11118_v7  ;;  %v11133_v46 = vsel %vm560_vm0, %v14467_v43, %v6140_v15  ;;  %v6149_v59 = vunpack.i.l.bf16 %v14451_v10  ;;  %v11139_v3 = vsel %vm4108_vm3, %v4087_v44, %v6520_v53  ;;  %v14471_v31 = vpack.i.bf16 %v14469_v52, %v14470_v58  ;;  %v14472_v36 = vld [vmem:[#allocation235_spill] sm:$0xff]  ;;  %v14474_v52 = vld [vmem:[#allocation234_spill] sm:$0xff] }
 0x316   : > { %14464 = vst [vmem:[#allocation325_spill] sm:$0xff] %v11123_v21  ;;  %v4092_v26 = vsel %vm4035_vm2, %v10980_v41, %v6354_v55  ;;  %v4093_v43 = vsel %vm4035_vm2, %v10986_v19, %v6355_v47  ;;  %v4072_v15 = vsel %vm4035_vm2, %v10918_v48, %v6304_v60  ;;  %v6320_v44 = vunpack.i.h.bf16 %v14472_v36  ;;  %v11157_v53 = vld [vmem:[#allocation2 + $0xd1] sm:$0xff]  ;;  %v14473_v60 = vld [vmem:[#allocation268_spill] sm:$0xff] }
 0x317   : > { %14465 = vst [vmem:[#allocation156_spill] sm:$0xff] %v11126_v18  ;;  %4947 = vmatpush.bf16.msra.mxu1 %v5988_v25  ;;  %v4073_v41 = vsel %vm4035_vm2, %v10912_v24, %v6305_v8  ;;  %v4076_v19 = vsel %vm4035_vm2, %v11057_v32, %v6314_v0  ;;  %v4077_v48 = vsel %vm4035_vm2, %v10994_v49, %v6315_v38  ;;  %v6319_v55 = vunpack.i.l.bf16 %v14472_v36  ;;  %v14476_v62 = vld [vmem:[#allocation39_spill] sm:$0xff]  ;;  %v5987_v36 = vld [vmem:[%s13087_s4 + $0x68] sm:$0xff]  ;;  %v14518_v21 = vld [vmem:[#allocation78_spill] sm:$0xff] }
 0x318   : > { %14466 = vst [vmem:[#allocation157_spill] sm:$0xff] %v11129_v30  ;;  %6692 = vrot.lane.b32.xlu1 %v14471_v31, %s7319_s30  ;;  %6702 = vrot.lane.b32.xlu0 %v6701_v61, %s7321_s18  ;;  %v6330_v47 = vunpack.i.h.bf16 %v14473_v60  ;;  %v6370_v61 = vunpack.i.h.bf16 %v14474_v52  ;;  %v6369_v58 = vunpack.i.l.bf16 %v14474_v52  ;;  %v14475_v31 = vld [vmem:[#allocation38_spill] sm:$0xff]  ;;  %v6483_v24 = vpop.permute.xlu1 %6482  ;;  %v6533_v8 = vpop.permute.xlu2 %6532  ;;  %v6329_v30 = vunpack.i.l.bf16 %v14473_v60  ;;  %v5986_v60 = vld [vmem:[%s13087_s4 + $0x60] sm:$0xff] }
 0x319   : > { %14468 = vst [vmem:[#allocation218_spill] sm:$0xff] %v11139_v3  ;;  %v14477_v29 = vpack.i.bf16 %v14475_v31, %v14476_v62  ;;  %6001 = vmatpush.bf16.msrb.mxu3 %v5988_v25  ;;  %v6493_v0 = vpop.permute.xlu0 %6492  ;;  %v6485_v32 = vunpack.i.h.bf16 %v6483_v24  ;;  %v6484_v16 = vunpack.i.l.bf16 %v6483_v24  ;;  %v6535_v49 = vunpack.i.h.bf16 %v6533_v8 }
 0x31a   : > { %v6534_v38 = vunpack.i.l.bf16 %v6533_v8  ;;  %v6495_v52 = vunpack.i.h.bf16 %v6493_v0  ;;  %v6494_v3 = vunpack.i.l.bf16 %v6493_v0  ;;  %v6716_v62 = vpack.i.bf16 %v11157_v53, %v11155_v28 }
 0x31b   : > { %4948 = vmatpush.bf16.msra.mxu1 %v5987_v36  ;;  %v11185_v31 = vsel %vm4108_vm3, %v4093_v43, %v6535_v49  ;;  %v11188_v24 = vsel %vm4108_vm3, %v4072_v15, %v6484_v16  ;;  %v11191_v8 = vsel %vm4108_vm3, %v4073_v41, %v6485_v32  ;;  %v14483_v15 = vunpack.i.l.bf16 %v14445_v22  ;;  %v14484_v41 = vld [vmem:[#allocation48_spill] sm:$0xff] }
 0x31c   : > { %6697 = vrot.lane.b32.xlu2 %v14477_v29, %s7320_s17  ;;  %v11179_v29 = vpop.f32.mrf.mxu2  ;;  %v11182_v25 = vsel %vm4108_vm3, %v4092_v26, %v6534_v38  ;;  %14479 = vst [vmem:[#allocation165_spill] sm:$0xff] %v11188_v24  ;;  %v11201_v43 = vsel %vm4108_vm3, %v4076_v19, %v6494_v3  ;;  %v11204_v16 = vsel %vm4108_vm3, %v4077_v48, %v6495_v52  ;;  %v14485_v49 = vunpack.i.l.bf16 %v14446_v11  ;;  %v14486_v38 = vld [vmem:[#allocation12_spill] sm:$0xff]  ;;  %v14498_v3 = vld [vmem:[#allocation283_spill] sm:$0xff] }
 0x31d   : > { %14478 = vst [vmem:[#allocation162_spill] sm:$0xff] %v11179_v29  ;;  %6002 = vmatpush.bf16.msrb.mxu3 %v5987_v36  ;;  %v4005_v32 = vsel %vm560_vm0, %v14484_v41, %v14483_v15  ;;  %v14487_v36 = vunpack.i.h.bf16 %v14446_v11  ;;  %v14488_v29 = vld [vmem:[#allocation266_spill] sm:$0xff]  ;;  %v14489_v19 = vunpack.i.h.bf16 %v14451_v10  ;;  %v14490_v48 = vld [vmem:[#allocation92_spill] sm:$0xff]  ;;  %v14492_v41 = vld [vmem:[#allocation207_spill] sm:$0xff] }
 0x31e   : > { %14480 = vst [vmem:[#allocation160_spill] sm:$0xff] %v11191_v8  ;;  %v4025_v0 = vsel %vm560_vm0, %v14486_v38, %v14485_v49  ;;  %v14491_v52 = vld [vmem:[#allocation236_spill] sm:$0xff]  ;;  %v6155_v24 = vunpack.i.h.bf16 %v14492_v41  ;;  %v6154_v49 = vunpack.i.l.bf16 %v14492_v41  ;;  %v14493_v11 = vld [vmem:[#allocation171_spill] sm:$0xff]  ;;  %v14497_v10 = vld [vmem:[#allocation205_spill] sm:$0xff]  ;;  %v4078_v41 = vsel %vm4035_vm2, %v4005_v32, %v6319_v55 }
 0x31f   : > { %14481 = vst [vmem:[#allocation190_spill] sm:$0xff] %v11201_v43  ;;  %v4026_v26 = vsel %vm560_vm0, %v14488_v29, %v14487_v36  ;;  %v4010_v22 = vsel %vm560_vm0, %v14490_v48, %v14489_v19  ;;  %v4009_v15 = vsel %vm560_vm0, %v14491_v52, %v6149_v59  ;;  %v14494_v38 = vld [vmem:[#allocation172_spill] sm:$0xff]  ;;  %v14496_v29 = vpack.c.bf16 %v10837_v37, %v10834_v45  ;;  %v14499_v19 = vld [vmem:[#allocation285_spill] sm:$0xff]  ;;  %v14502_v37 = vld [vmem:[#allocation46_spill] sm:$0xff] }
 0x320   : > { %14482 = vst [vmem:[#allocation176_spill] sm:$0xff] %v11204_v16  ;;  %v14495_v8 = vpack.i.bf16 %v14493_v11, %v14494_v38  ;;  %v6165_v36 = vunpack.i.h.bf16 %v14497_v10  ;;  %v14500_v48 = vpack.c.bf16 %v14498_v3, %v14499_v19  ;;  %6717 = vrot.lane.b32.xlu0 %v6716_v62, %s7321_s18  ;;  %v4098_v59 = vsel %vm4035_vm2, %v4025_v0, %v6369_v58  ;;  %v14501_v45 = vld [vmem:[#allocation45_spill] sm:$0xff]  ;;  %v6498_v38 = vpop.permute.xlu1 %6497  ;;  %v11249_v3 = vld [vmem:[#allocation2 + $0xd9] sm:$0xff]  ;;  %v14515_v16 = vld [vmem:[#allocation178_spill] sm:$0xff] }
 0x321   : > { %4780 = vmatmul.bf16.gmra.mxu0 %v14496_v29  ;;  %v4099_v52 = vsel %vm4035_vm2, %v4026_v26, %v6370_v61  ;;  %v14503_v11 = vpack.i.bf16 %v14501_v45, %v14502_v37  ;;  %v6548_v29 = vpop.permute.xlu2 %6547  ;;  %v11251_v19 = vld [vmem:[#allocation2 + $0xe1] sm:$0xff]  ;;  %4949 = vmatpush.bf16.msra.mxu1 %v5986_v60  ;;  %v4079_v58 = vsel %vm4035_vm2, %v11133_v46, %v6320_v44  ;;  %v6508_v62 = vpop.permute.xlu0 %6507  ;;  %v6500_v0 = vunpack.i.h.bf16 %v6498_v38 }
 0x322   : > { %6707 = vrot.lane.b32.xlu1 %v14495_v8, %s7319_s30  ;;  %5963 = vmatmul.msk.bf16.gmra.mxu2 %vm560_vm0, %v14500_v48  ;;  %v6164_v8 = vunpack.i.l.bf16 %v14497_v10  ;;  %v4082_v61 = vsel %vm4035_vm2, %v4009_v15, %v6329_v30  ;;  %v4083_v55 = vsel %vm4035_vm2, %v4010_v22, %v6330_v47  ;;  %v6499_v26 = vunpack.i.l.bf16 %v6498_v38  ;;  %v5985_v48 = vld [vmem:[%s13087_s4 + $0x58] sm:$0xff]  ;;  %v14504_v45 = vld [vmem:[#allocation104_spill] sm:$0xff]  ;;  %v11273_v15 = vld [vmem:[#allocation2 + $0x250] sm:$0xff] }
 0x323   : > { %v6550_v32 = vunpack.i.h.bf16 %v6548_v29  ;;  %v6549_v10 = vunpack.i.l.bf16 %v6548_v29  ;;  %6003 = vmatpush.bf16.msrb.mxu3 %v5986_v60  ;;  %v6335_v37 = vunpack.i.h.bf16 %v14504_v45  ;;  %v6510_v43 = vunpack.i.h.bf16 %v6508_v62  ;;  %v5984_v60 = vld [vmem:[%s13087_s4 + $0x50] sm:$0xff] }
 0x324   : > { %6712 = vrot.lane.b32.xlu2 %v14503_v11, %s7320_s17  ;;  %v6334_v11 = vunpack.i.l.bf16 %v14504_v45  ;;  %v6509_v46 = vunpack.i.l.bf16 %v6508_v62  ;;  %v6731_v30 = vpack.i.bf16 %v11251_v19, %v11249_v3  ;;  %v11271_v22 = vsel %vm4108_vm3, %v4078_v41, %v6499_v26  ;;  %v7248_v41 = vld [vmem:[#allocation2 + $0x1a0] sm:$0xff]  ;;  %v11292_v45 = vpop.f32.mrf.mxu2 }
 0x325   : > { %v11265_v44 = vsel %vm4108_vm3, %v4098_v59, %v6549_v10  ;;  %v11268_v47 = vsel %vm4108_vm3, %v4099_v52, %v6550_v32  ;;  %14505 = vst [vmem:[#allocation170_spill] sm:$0xff] %v11271_v22  ;;  %4950 = vmatpush.bf16.msra.mxu1 %v5985_v48  ;;  %v11281_v29 = vsel %vm4108_vm3, %v4079_v58, %v6500_v0  ;;  %v14509_v62 = vld [vmem:[#allocation108_spill] sm:$0xff]  ;;  %v14510_v32 = vld [vmem:[#allocation126_spill] sm:$0xff] }
 0x326   : > { %14506 = vst [vmem:[#allocation175_spill] sm:$0xff] %v11281_v29  ;;  %v11284_v59 = vsel %vm4108_vm3, %v4082_v61, %v6509_v46  ;;  %v11287_v52 = vsel %vm4108_vm3, %v4083_v55, %v6510_v43  ;;  %v1198_v26 = vmul.f32 %v7248_v41, %v14509_v62  ;;  %v1865_v10 = vmul.f32 %v11273_v15, %v14510_v32  ;;  %v14512_v61 = vld [vmem:[#allocation244_spill] sm:$0xff]  ;;  %v14513_v43 = vld [vmem:[#allocation259_spill] sm:$0xff]  ;;  %v14514_v46 = vld [vmem:[#allocation109_spill] sm:$0xff] }
 0x327   : > { %14507 = vst [vmem:[#allocation187_spill] sm:$0xff] %v11284_v59  ;;  %6004 = vmatpush.bf16.msrb.mxu3 %v5985_v48  ;;  %v4012_v0 = vsel %vm560_vm0, %v14512_v61, %v6155_v24  ;;  %v4011_v55 = vsel %vm560_vm0, %v14513_v43, %v6154_v49  ;;  %v6345_v41 = vunpack.i.h.bf16 %v14514_v46  ;;  %v6344_v62 = vunpack.i.l.bf16 %v14514_v46  ;;  %v14519_v59 = vld [vmem:[#allocation195_spill] sm:$0xff]  ;;  %v14520_v49 = vld [vmem:[#allocation226_spill] sm:$0xff]  ;;  %v14521_v46 = vld [vmem:[#allocation53_spill] sm:$0xff] }
 0x328   : > { %14508 = vst [vmem:[#allocation252_spill] sm:$0xff] %v11287_v52  ;;  %v4016_v38 = vsel %vm560_vm0, %v14518_v21, %v6165_v36  ;;  %v4015_v58 = vsel %vm560_vm0, %v1198_v26, %v6164_v8  ;;  %v6170_v52 = vunpack.i.h.bf16 %v14519_v59  ;;  %v6169_v24 = vunpack.i.l.bf16 %v14519_v59  ;;  %6732 = vrot.lane.b32.xlu0 %v6731_v30, %s7321_s18  ;;  %v14522_v22 = vld [vmem:[#allocation52_spill] sm:$0xff] }
 0x329   : > { %14511 = vst [vmem:[#allocation250_spill] sm:$0xff] %v11292_v45  ;;  %v14516_v45 = vld [vmem:[#allocation177_spill] sm:$0xff]  ;;  %v6180_v61 = vunpack.i.h.bf16 %v14520_v49  ;;  %v6179_v43 = vunpack.i.l.bf16 %v14520_v49  ;;  %4951 = vmatpush.bf16.msra.mxu1 %v5984_v60  ;;  %v4084_v21 = vsel %vm4035_vm2, %v4011_v55, %v6334_v11  ;;  %v4085_v36 = vsel %vm4035_vm2, %v4012_v0, %v6335_v37  ;;  %v6523_v8 = vpop.permute.xlu0 %6522  ;;  %v14525_v0 = vld [vmem:[#allocation67_spill] sm:$0xff] }
 0x32a   : > { %v14517_v48 = vpack.i.bf16 %v14515_v16, %v14516_v45  ;;  %v14523_v16 = vpack.i.bf16 %v14521_v46, %v14522_v22  ;;  %v6513_v45 = vpop.permute.xlu1 %6512  ;;  %v5983_v49 = vld [vmem:[%s13087_s4 + $0x48] sm:$0xff]  ;;  %v6525_v18 = vunpack.i.h.bf16 %v6523_v8  ;;  %v6524_v22 = vunpack.i.l.bf16 %v6523_v8 }
 0x32b   : > { %v6515_v59 = vunpack.i.h.bf16 %v6513_v45  ;;  %v6514_v26 = vunpack.i.l.bf16 %v6513_v45  ;;  %6005 = vmatpush.bf16.msrb.mxu3 %v5984_v60  ;;  %v11325_v46 = vld [vmem:[#allocation2 + $0xe9] sm:$0xff]  ;;  %v4089_v11 = vsel %vm4035_vm2, %v4016_v38, %v6345_v41  ;;  %v14532_v38 = vld [vmem:[#allocation115_spill] sm:$0xff] }
 0x32c   : > { %6722 = vrot.lane.b32.xlu1 %v14517_v48, %s7319_s30  ;;  %6727 = vrot.lane.b32.xlu2 %v14523_v16, %s7320_s17  ;;  %v6563_v48 = vpop.permute.xlu2 %6562  ;;  %v4088_v16 = vsel %vm4035_vm2, %v4015_v58, %v6344_v62  ;;  %v14524_v55 = vld [vmem:[#allocation25_spill] sm:$0xff]  ;;  %v5982_v58 = vld [vmem:[%s13087_s4 + $0x40] sm:$0xff]  ;;  %v11354_v62 = vsel %vm4108_vm3, %v4089_v11, %v6525_v18 }
 0x32d   : > { %v6565_v30 = vunpack.i.h.bf16 %v6563_v48  ;;  %v6564_v29 = vunpack.i.l.bf16 %v6563_v48  ;;  %v11338_v48 = vsel %vm4108_vm3, %v4084_v21, %v6514_v26  ;;  %v11341_v60 = vsel %vm4108_vm3, %v4085_v36, %v6515_v59  ;;  %4952 = vmatpush.bf16.msra.mxu1 %v5983_v49  ;;  %14529 = vst [vmem:[#allocation168_spill] sm:$0xff] %v11354_v62  ;;  %v7249_v21 = vld [vmem:[#allocation2 + $0x1b0] sm:$0xff]  ;;  %v14530_v36 = vld [vmem:[#allocation116_spill] sm:$0xff]  ;;  %v14531_v59 = vld [vmem:[#allocation265_spill] sm:$0xff] }
 0x32e   : > { %14526 = vst [vmem:[#allocation174_spill] sm:$0xff] %v11338_v48  ;;  %v11351_v41 = vsel %vm4108_vm3, %v4088_v16, %v6524_v22  ;;  %v1200_v8 = vmul.f32 %v7249_v21, %v14530_v36  ;;  %v6349_v26 = vunpack.i.l.bf16 %v14531_v59  ;;  %v7251_v48 = vld [vmem:[#allocation2 + $0x1d0] sm:$0xff]  ;;  %v14533_v22 = vld [vmem:[#allocation120_spill] sm:$0xff]  ;;  %v6350_v18 = vunpack.i.h.bf16 %v14531_v59  ;;  %v14536_v36 = vld [vmem:[#allocation181_spill] sm:$0xff] }
 0x32f   : > { %v11331_v37 = vsel %vm4108_vm3, %v14524_v55, %v6564_v29  ;;  %v11335_v45 = vsel %vm4108_vm3, %v14525_v0, %v6565_v30  ;;  %14527 = vst [vmem:[#allocation189_spill] sm:$0xff] %v11341_v60  ;;  %v6746_v30 = vpack.i.bf16 %v1865_v10, %v11325_v46  ;;  %6006 = vmatpush.bf16.msrb.mxu3 %v5983_v49  ;;  %v7250_v0 = vld [vmem:[#allocation2 + $0x1b8] sm:$0xff]  ;;  %v14534_v11 = vld [vmem:[#allocation68_spill] sm:$0xff]  ;;  %v11373_v55 = vpop.f32.mrf.mxu2 }
 0x330   : > { %14528 = vst [vmem:[#allocation183_spill] sm:$0xff] %v11351_v41  ;;  %v1201_v29 = vmul.f32 %v7250_v0, %v14532_v38  ;;  %v1204_v16 = vmul.f32 %v7251_v48, %v14533_v22  ;;  %v6359_v60 = vunpack.i.l.bf16 %v14534_v11  ;;  %v14535_v21 = vld [vmem:[#allocation180_spill] sm:$0xff]  ;;  %v14538_v10 = vpack.c.bf16 %v10652_v33, %v10649_v5  ;;  %v14540_v38 = vld [vmem:[#allocation293_spill] sm:$0xff]  ;;  %v14541_v0 = vld [vmem:[#allocation291_spill] sm:$0xff] }
 0x331   : > { %v14537_v12 = vpack.i.bf16 %v14535_v21, %v14536_v36  ;;  %v6360_v49 = vunpack.i.h.bf16 %v14534_v11  ;;  %14539 = vst [vmem:[#allocation212_spill] sm:$0xff] %v11373_v55  ;;  %v14542_v48 = vpack.c.bf16 %v14540_v38, %v14541_v0  ;;  %6747 = vrot.lane.b32.xlu0 %v6746_v30, %s7321_s18  ;;  %v4017_v59 = vsel %vm560_vm0, %v1200_v8, %v6169_v24  ;;  %v14543_v22 = vld [vmem:[#allocation50_spill] sm:$0xff]  ;;  %v11389_v36 = vld [vmem:[#allocation2 + $0xf9] sm:$0xff]  ;;  %v14548_v8 = vld [vmem:[#allocation201_spill] sm:$0xff] }
 0x332   : > { %4785 = vmatmul.bf16.gmra.mxu0 %v14538_v10  ;;  %v6528_v5 = vpop.permute.xlu1 %6527  ;;  %v11387_v11 = vld [vmem:[#allocation2 + $0xf1] sm:$0xff]  ;;  %14546 = vst [vmem:[#allocation197_spill] sm:$0xff] %v11389_v36  ;;  %v4018_v10 = vsel %vm560_vm0, %v1201_v29, %v6170_v52  ;;  %4953 = vmatpush.bf16.msra.mxu1 %v5982_v58  ;;  %v4021_v38 = vsel %vm560_vm0, %v1204_v16, %v6179_v43  ;;  %v6185_v0 = vunpack.i.h.bf16 %v14548_v8 }
 0x333   : > { %5964 = vmatmul.msk.bf16.gmra.mxu2 %vm560_vm0, %v14542_v48  ;;  %v14547_v30 = vld [vmem:[#allocation54_spill] sm:$0xff]  ;;  %v6538_v48 = vpop.permute.xlu0 %6537  ;;  %6007 = vmatpush.bf16.msrb.mxu3 %v5982_v58  ;;  %v4091_v62 = vsel %vm4035_vm2, %v4018_v10, %v6350_v18  ;;  %v4094_v52 = vsel %vm4035_vm2, %v4021_v38, %v6359_v60  ;;  %v6761_v43 = vpack.i.bf16 %v11389_v36, %v11387_v11  ;;  %v14549_v18 = vld [vmem:[#allocation239_spill] sm:$0xff]  ;;  %v7252_v38 = vld [vmem:[#allocation2 + $0x1e8] sm:$0xff] }
 0x334   : > { %6737 = vrot.lane.b32.xlu1 %v14537_v12, %s7319_s30  ;;  %v14544_v12 = vld [vmem:[#allocation51_spill] sm:$0xff]  ;;  %v11385_v33 = vpop.permute.xlu2 %6577  ;;  %v4022_v24 = vsel %vm560_vm0, %v14547_v30, %v6180_v61  ;;  %v6540_v55 = vunpack.i.h.bf16 %v6538_v48  ;;  %v6539_v41 = vunpack.i.l.bf16 %v6538_v48  ;;  %v6195_v60 = vunpack.i.h.bf16 %v14549_v18 }
 0x335   : > { %v14545_v21 = vpack.i.bf16 %v14543_v22, %v14544_v12  ;;  %v6530_v22 = vunpack.i.h.bf16 %v6528_v5  ;;  %v6529_v12 = vunpack.i.l.bf16 %v6528_v5  ;;  %v4095_v16 = vsel %vm4035_vm2, %v4022_v24, %v6360_v49  ;;  %v7253_v49 = vld [vmem:[#allocation2 + $0x1e0] sm:$0xff]  ;;  %v14557_v10 = vld [vmem:[#allocation131_spill] sm:$0xff] }
 0x336   : > { %v6184_v5 = vunpack.i.l.bf16 %v14548_v8  ;;  %v11406_v58 = vsel %vm4108_vm3, %v4094_v52, %v6539_v41  ;;  %v14551_v24 = vld [vmem:[#allocation128_spill] sm:$0xff] }
 0x337   : > { %6742 = vrot.lane.b32.xlu2 %v14545_v21, %s7320_s17  ;;  %v4090_v21 = vsel %vm4035_vm2, %v4017_v59, %v6349_v26  ;;  %v4164_v61 = vsel %vm4108_vm3, %v4091_v62, %v6530_v22  ;;  %v11409_v26 = vsel %vm4108_vm3, %v4095_v16, %v6540_v55  ;;  %v6194_v59 = vunpack.i.l.bf16 %v14549_v18  ;;  %v14550_v62 = vld [vmem:[#allocation127_spill] sm:$0xff]  ;;  %v14552_v22 = vld [vmem:[#allocation73_spill] sm:$0xff]  ;;  %v14553_v55 = vld [vmem:[#allocation184_spill] sm:$0xff] }
 0x338   : > { %v4163_v29 = vsel %vm4108_vm3, %v4090_v21, %v6529_v12  ;;  %v1207_v48 = vmul.f32 %v7252_v38, %v14550_v62  ;;  %v1206_v8 = vmul.f32 %v7253_v49, %v14551_v24  ;;  %v6365_v12 = vunpack.i.h.bf16 %v14552_v22  ;;  %v14554_v21 = vld [vmem:[#allocation185_spill] sm:$0xff]  ;;  %v7255_v18 = vld [vmem:[#allocation2 + $0x200] sm:$0xff]  ;;  %v14558_v38 = vld [vmem:[#allocation267_spill] sm:$0xff] }
 0x339   : > { %v4478_v30 = vpack.c.bf16 %v4164_v61, %v4163_v29  ;;  %v6364_v41 = vunpack.i.l.bf16 %v14552_v22  ;;  %v14555_v52 = vpack.i.bf16 %v14553_v55, %v14554_v21  ;;  %v7254_v29 = vld [vmem:[#allocation2 + $0x208] sm:$0xff]  ;;  %v14556_v61 = vld [vmem:[#allocation114_spill] sm:$0xff]  ;;  %v1210_v7 = vmul.f32 %v7255_v18, %v14557_v10  ;;  %6762 = vrot.lane.b32.xlu0 %v6761_v43, %s7321_s18 }
 0x33a   : > { %v1211_v16 = vmul.f32 %v7254_v29, %v14556_v61  ;;  %v6375_v62 = vunpack.i.h.bf16 %v14558_v38  ;;  %v6374_v49 = vunpack.i.l.bf16 %v14558_v38  ;;  %v7256_v24 = vld [vmem:[%s13087_s4 + $0x88] sm:$0xff]  ;;  %v6543_v21 = vpop.permute.xlu1 %6542  ;;  %v4023_v10 = vsel %vm560_vm0, %v1206_v8, %v6184_v5  ;;  %v14580_v8 = vld [vmem:[#allocation194_spill] sm:$0xff] }
 0x33b   : > { %4900 = vmatmul.bf16.vlgmr.msra.gmra.mxu3 %v4478_v30  ;;  %v14559_v22 = vld [vmem:[#allocation57_spill] sm:$0xff]  ;;  %v14560_v30 = vld [vmem:[#allocation58_spill] sm:$0xff]  ;;  %v4024_v29 = vsel %vm560_vm0, %v1207_v48, %v6185_v0  ;;  %v6553_v61 = vpop.permute.xlu0 %6552  ;;  %v6545_v18 = vunpack.i.h.bf16 %v6543_v21  ;;  %v6544_v43 = vunpack.i.l.bf16 %v6543_v21  ;;  %v4027_v38 = vsel %vm560_vm0, %v1210_v7, %v6194_v59  ;;  %v7257_v7 = vld [vmem:[%s13087_s4 + $0x80] sm:$0xff] }
 0x33c   : > { %6752 = vrot.lane.b32.xlu1 %v14555_v52, %s7319_s30  ;;  %6008 = vmatpush.bf16.msra.mxu3 %v7256_v24  ;;  %v14561_v55 = vpack.i.bf16 %v14559_v22, %v14560_v30  ;;  %v11435_v52 = vpop.permute.xlu2 %6592  ;;  %v4028_v54 = vsel %vm560_vm0, %v1211_v16, %v6195_v60  ;;  %v6555_v24 = vunpack.i.h.bf16 %v6553_v61  ;;  %v6554_v36 = vunpack.i.l.bf16 %v6553_v61  ;;  %v14570_v21 = vld [vmem:[#allocation284_spill] sm:$0xff] }
 0x33d   : > { %v4096_v17 = vsel %vm4035_vm2, %v4023_v10, %v6364_v41  ;;  %v4097_v22 = vsel %vm4035_vm2, %v4024_v29, %v6365_v12  ;;  %v4100_v0 = vsel %vm4035_vm2, %v4027_v38, %v6374_v49  ;;  %v4101_v48 = vsel %vm4035_vm2, %v4028_v54, %v6375_v62  ;;  %v14562_v12 = vld [vmem:[#allocation192_spill] sm:$0xff]  ;;  %v14563_v54 = vld [vmem:[#allocation191_spill] sm:$0xff]  ;;  %v14566_v62 = vld [vmem:[#allocation65_spill] sm:$0xff] }
 0x33e   : > { %v11444_v30 = vsel %vm4108_vm3, %v4096_v17, %v6544_v43  ;;  %v11447_v5 = vsel %vm4108_vm3, %v4097_v22, %v6545_v18  ;;  %v11457_v59 = vsel %vm4108_vm3, %v4100_v0, %v6554_v36  ;;  %v11460_v17 = vsel %vm4108_vm3, %v4101_v48, %v6555_v24  ;;  %v14567_v49 = vld [vmem:[#allocation62_spill] sm:$0xff]  ;;  %v11481_v18 = vld [vmem:[#allocation2 + $0x1e1] sm:$0xff] }
 0x33f   : > { %6757 = vrot.lane.b32.xlu2 %v14561_v55, %s7320_s17  ;;  %v14564_v41 = vpack.i.bf16 %v14562_v12, %v14563_v54  ;;  %v14565_v16 = vpack.c.bf16 %v10848_v63, %v10845_v4  ;;  %v14568_v36 = vpack.i.bf16 %v14566_v62, %v14567_v49  ;;  %v14569_v55 = vld [vmem:[#allocation282_spill] sm:$0xff]  ;;  %v11483_v63 = vld [vmem:[#allocation2 + $0x101] sm:$0xff] }
 0x340   : > { %6009 = vmatpush.bf16.msra.mxu3 %v7257_v7  ;;  %v14571_v10 = vpack.i.bf16 %v14569_v55, %v14570_v21  ;;  %v1924_v43 = vld [vmem:[#allocation2 + $0x1e9] sm:$0xff]  ;;  %v14573_v12 = vld [vmem:[#allocation80_spill] sm:$0xff] }
 0x341   : > { %6777 = vrot.lane.b32.xlu0 %v14568_v36, %s7320_s17  ;;  %v11485_v22 = vld [vmem:[#allocation2 + $0x109] sm:$0xff]  ;;  %v6791_v48 = vpack.i.bf16 %v1924_v43, %v11481_v18 }
 0x342   : > { %4790 = vmatmul.bf16.gmra.mxu0 %v14565_v16  ;;  %v6558_v29 = vpop.permute.xlu1 %6557  ;;  %14572 = vst [vmem:[#allocation11_spill] sm:$0xff] %v11485_v22  ;;  %v14574_v62 = vld [vmem:[#allocation278_spill] sm:$0xff]  ;;  %v14575_v36 = vld [vmem:[#allocation117_spill] sm:$0xff] }
 0x343   : > { %v6568_v38 = vpop.permute.xlu0 %6567  ;;  %v6560_v24 = vunpack.i.h.bf16 %v6558_v29  ;;  %v6559_v4 = vunpack.i.l.bf16 %v6558_v29  ;;  %v14576_v55 = vld [vmem:[#allocation118_spill] sm:$0xff]  ;;  %v1867_v29 = vld [vmem:[#allocation2 + $0x21] sm:$0xff] }
 0x344   : > { %6767 = vrot.lane.b32.xlu1 %v14564_v41, %s7319_s30  ;;  %v11479_v61 = vpop.permute.xlu2 %6607  ;;  %v6569_v0 = vunpack.i.l.bf16 %v6568_v38  ;;  %v6786_v41 = vpack.i.bf16 %v11485_v22, %v11483_v63  ;;  %v14577_v21 = vpack.i.bf16 %v14575_v36, %v14576_v55  ;;  %v14579_v16 = vld [vmem:[#allocation193_spill] sm:$0xff] }
 0x345   : > { %v11490_v7 = vsel %vm4108_vm3, %v10725_v57, %v6559_v4  ;;  %v11494_v54 = vsel %vm4108_vm3, %v14573_v12, %v6560_v24  ;;  %v14578_v57 = vpack.c.bf16 %v11185_v31, %v11182_v25  ;;  %v6580_v12 = vunpack.i.h.bf16 %v11385_v33 }
 0x346   : > { %v11502_v49 = vsel %vm4108_vm3, %v14574_v62, %v6569_v0  ;;  %v6579_v62 = vunpack.i.l.bf16 %v11385_v33  ;;  %v14581_v33 = vpack.i.bf16 %v14579_v16, %v14580_v8  ;;  %v1926_v8 = vld [vmem:[#allocation2 + $0x1f9] sm:$0xff] }
 0x347   : > { %6772 = vrot.lane.b32.xlu2 %v14571_v10, %s7319_s30  ;;  %v1866_v10 = vld [vmem:[#allocation2 + $0x19] sm:$0xff] }
 0x349   : > { %6792 = vrot.lane.b32.xlu0 %v6791_v48, %s7321_s18 }
 0x34a   : > { %v6573_v43 = vpop.permute.xlu1 %6572 }
 0x34b   : > { %4905 = vmatmul.bf16.gmra.mxu3 %v14578_v57  ;;  %v6583_v24 = vpop.permute.xlu0 %6582  ;;  %v6575_v4 = vunpack.i.h.bf16 %v6573_v43  ;;  %v6574_v0 = vunpack.i.l.bf16 %v6573_v43 }
 0x34c   : > { %6782 = vrot.lane.b32.xlu1 %v14577_v21, %s7320_s17  ;;  %v6584_v36 = vunpack.i.l.bf16 %v6583_v24  ;;  %v11515_v55 = vpop.permute.xlu2 %6622  ;;  %v6570_v21 = vunpack.i.h.bf16 %v6568_v38  ;;  %v14582_v38 = vpack.c.bf16 %v10890_v51, %v10887_v27 }
 0x34d   : > { %v4182_v25 = vsel %vm560_vm0, %v1867_v29, %v6575_v4  ;;  %v4181_v31 = vsel %vm560_vm0, %v1866_v10, %v6574_v0  ;;  %v14583_v10 = vld [vmem:[#allocation63_spill] sm:$0xff]  ;;  %v14584_v4 = vld [vmem:[#allocation64_spill] sm:$0xff] }
 0x34e   : > { %v4253_v48 = vsel %vm4035_vm2, %v4181_v31, %v6579_v62  ;;  %v14585_v0 = vpack.i.bf16 %v14583_v10, %v14584_v4  ;;  %v14587_v62 = vld [vmem:[#allocation290_spill] sm:$0xff]  ;;  %v6595_v4 = vunpack.i.h.bf16 %v11435_v52 }
 0x34f   : > { %6787 = vrot.lane.b32.xlu2 %v6786_v41, %s7321_s18  ;;  %v4254_v41 = vsel %vm4035_vm2, %v4182_v25, %v6580_v12  ;;  %v4325_v57 = vsel %vm4108_vm3, %v4253_v48, %v6570_v21  ;;  %v14586_v12 = vld [vmem:[#allocation292_spill] sm:$0xff]  ;;  %v11538_v25 = vld [vmem:[#allocation2 + $0x1f1] sm:$0xff] }
 0x350   : > { %v4326_v43 = vsel %vm4108_vm3, %v4254_v41, %v6584_v36  ;;  %v14588_v21 = vpack.i.bf16 %v14586_v12, %v14587_v62  ;;  %14589 = vst [vmem:[#allocation18_spill] sm:$0xff] %v11538_v25  ;;  %v11542_v31 = vld [vmem:[#allocation2 + $0x111] sm:$0xff]  ;;  %v11544_v48 = vld [vmem:[#allocation2 + $0x119] sm:$0xff]  ;;  %v1868_v41 = vld [vmem:[#allocation2 + $0x29] sm:$0xff] }
 0x351   : > { %v4398_v29 = vpack.c.bf16 %v4326_v43, %v4325_v57  ;;  %6807 = vrot.lane.b32.xlu0 %v14585_v0, %s7320_s17  ;;  %14590 = vst [vmem:[#allocation37_spill] sm:$0xff] %v11542_v31  ;;  %v6821_v43 = vpack.i.bf16 %v1926_v8, %v11538_v25  ;;  %v6594_v0 = vunpack.i.l.bf16 %v11435_v52  ;;  %v14592_v12 = vld [vmem:[#allocation125_spill] sm:$0xff]  ;;  %v14593_v62 = vld [vmem:[#allocation124_spill] sm:$0xff] }
 0x352   : > { %4795 = vmatmul.bf16.gmra.mxu0 %v14582_v38  ;;  %v6588_v36 = vpop.permute.xlu1 %6587  ;;  %14591 = vst [vmem:[#allocation23_spill] sm:$0xff] %v11544_v48  ;;  %v7258_v38 = vld [vmem:[#allocation2 + $0x31] sm:$0xff] }
 0x353   : > { %4954 = vmatmul.bf16.vlgmr.msra.gmra.mxu1 %v4398_v29  ;;  %v11540_v16 = vpop.permute.xlu0 %6597  ;;  %v6590_v27 = vunpack.i.h.bf16 %v6588_v36  ;;  %v6589_v51 = vunpack.i.l.bf16 %v6588_v36  ;;  %v14595_v36 = vpack.c.bf16 %v11409_v26, %v11406_v58  ;;  %v14596_v26 = vld [vmem:[#allocation199_spill] sm:$0xff] }
 0x354   : > { %6797 = vrot.lane.b32.xlu1 %v14581_v33, %s7319_s30  ;;  %v11546_v57 = vpop.permute.xlu2 %6637  ;;  %v6816_v33 = vpack.i.bf16 %v11544_v48, %v11542_v31  ;;  %v6599_v8 = vunpack.i.l.bf16 %v11540_v16  ;;  %v14611_v48 = vld [vmem:[#allocation123_spill] sm:$0xff] }
 0x355   : > { %v4184_v29 = vsel %vm560_vm0, %v7258_v38, %v6590_v27  ;;  %v4183_v10 = vsel %vm560_vm0, %v1868_v41, %v6589_v51  ;;  %v6585_v41 = vunpack.i.h.bf16 %v6583_v24  ;;  %v14602_v24 = vld [vmem:[#allocation69_spill] sm:$0xff] }
 0x356   : > { %v4255_v51 = vsel %vm4035_vm2, %v4183_v10, %v6594_v0  ;;  %v4256_v52 = vsel %vm4035_vm2, %v4184_v29, %v6595_v4  ;;  %v14603_v29 = vld [vmem:[#allocation70_spill] sm:$0xff] }
 0x357   : > { %6802 = vrot.lane.b32.xlu2 %v14588_v21, %s7319_s30  ;;  %v14594_v21 = vpack.i.bf16 %v14592_v12, %v14593_v62  ;;  %v4327_v62 = vsel %vm4108_vm3, %v4255_v51, %v6585_v41  ;;  %v4328_v58 = vsel %vm4108_vm3, %v4256_v52, %v6599_v8  ;;  %v14604_v4 = vpack.i.bf16 %v14602_v24, %v14603_v29  ;;  %v14605_v0 = vld [vmem:[#allocation294_spill] sm:$0xff]  ;;  %v14606_v51 = vld [vmem:[#allocation289_spill] sm:$0xff] }
 0x358   : > { %v4401_v10 = vpack.c.bf16 %v4328_v58, %v4327_v62  ;;  %v14607_v41 = vpack.i.bf16 %v14605_v0, %v14606_v51  ;;  %v11588_v52 = vld [vmem:[#allocation2 + $0x201] sm:$0xff]  ;;  %v1900_v62 = vld [vmem:[#allocation2 + $0x129] sm:$0xff]  ;;  %v6610_v51 = vunpack.i.h.bf16 %v11479_v61 }
 0x359   : > { %6822 = vrot.lane.b32.xlu0 %v6821_v43, %s7321_s18  ;;  %14608 = vst [vmem:[#allocation30_spill] sm:$0xff] %v11588_v52  ;;  %v7259_v29 = vld [vmem:[#allocation2 + $0x41] sm:$0xff] }
 0x35a   : > { %v6603_v27 = vpop.permute.xlu1 %6602 }
 0x35b   : > { %4910 = vmatmul.bf16.gmra.mxu3 %v14595_v36  ;;  %v11567_v38 = vpop.permute.xlu0 %6612  ;;  %v14600_v36 = vld [vmem:[#allocation299_spill] sm:$0xff] }
 0x35c   : > { %6812 = vrot.lane.b32.xlu1 %v14594_v21, %s7320_s17  ;;  %v14597_v21 = vld [vmem:[#allocation200_spill] sm:$0xff] }
 0x35d   : > { %v11569_v12 = vpop.permute.xlu2 %6652  ;;  %v14598_v43 = vpack.i.bf16 %v14596_v26, %v14597_v21  ;;  %v1928_v26 = vld [vmem:[#allocation2 + $0x209] sm:$0xff]  ;;  %v6605_v21 = vunpack.i.h.bf16 %v6603_v27 }
 0x35f   : > { %6817 = vrot.lane.b32.xlu2 %v6816_v33, %s7321_s18  ;;  %v14599_v33 = vld [vmem:[#allocation90_spill] sm:$0xff] }
 0x360   : > { %v14601_v60 = vpack.c.bf16 %v14599_v33, %v14600_v36  ;;  %v6851_v36 = vpack.i.bf16 %v1928_v26, %v11588_v52  ;;  %v14613_v26 = vpack.c.bf16 %v11447_v5, %v11444_v30  ;;  %v14627_v52 = vld [vmem:[#allocation129_spill] sm:$0xff] }
 0x361   : > { %6837 = vrot.lane.b32.xlu0 %v14604_v4, %s7320_s17  ;;  %v4186_v4 = vsel %vm560_vm0, %v7259_v29, %v6605_v21  ;;  %v6614_v21 = vunpack.i.l.bf16 %v11567_v38 }
 0x362   : > { %4800 = vmatmul.bf16.gmra.mxu0 %v14601_v60  ;;  %v6618_v8 = vpop.permute.xlu1 %6617  ;;  %v11592_v60 = vld [vmem:[#allocation2 + $0x121] sm:$0xff]  ;;  %v4258_v29 = vsel %vm4035_vm2, %v4186_v4, %v6610_v51 }
 0x363   : > { %4959 = vmatmul.bf16.gmra.mxu1 %v4401_v10  ;;  %v11590_v33 = vpop.permute.xlu0 %6627  ;;  %14609 = vst [vmem:[#allocation143_spill] sm:$0xff] %v11592_v60  ;;  %v6846_v24 = vpack.i.bf16 %v1900_v62, %v11592_v60  ;;  %v7260_v10 = vld [vmem:[#allocation2 + $0x39] sm:$0xff]  ;;  %v6600_v62 = vunpack.i.h.bf16 %v11540_v16  ;;  %v4330_v16 = vsel %vm4108_vm3, %v4258_v29, %v6614_v21  ;;  %v14619_v51 = vld [vmem:[#allocation77_spill] sm:$0xff]  ;;  %v1929_v29 = vld [vmem:[#allocation2 + $0x211] sm:$0xff] }
 0x364   : > { %6827 = vrot.lane.b32.xlu1 %v14598_v43, %s7319_s30  ;;  %v6604_v43 = vunpack.i.l.bf16 %v6603_v27  ;;  %v6609_v27 = vunpack.i.l.bf16 %v11479_v61  ;;  %v14628_v60 = vld [vmem:[#allocation130_spill] sm:$0xff] }
 0x365   : > { %v11594_v58 = vpop.permute.xlu2 %6667  ;;  %v14629_v22 = vpack.i.bf16 %v14627_v52, %v14628_v60  ;;  %v11678_v60 = vpop.f32.mrf.mxu2 }
 0x366   : > { %v4185_v0 = vsel %vm560_vm0, %v7260_v10, %v6604_v43  ;;  %v14616_v10 = vld [vmem:[#allocation208_spill] sm:$0xff]  ;;  %14632 = vst [vmem:[#allocation206_spill] sm:$0xff] %v11678_v60  ;;  %v6639_v60 = vunpack.i.l.bf16 %v11546_v57 }
 0x367   : > { %6832 = vrot.lane.b32.xlu2 %v14607_v41, %s7319_s30  ;;  %v14610_v41 = vld [vmem:[#allocation122_spill] sm:$0xff]  ;;  %v4257_v61 = vsel %vm4035_vm2, %v4185_v0, %v6609_v27  ;;  %v14618_v0 = vpack.c.bf16 %v10904_v56, %v10901_v23  ;;  %v14620_v27 = vld [vmem:[#allocation76_spill] sm:$0xff] }
 0x368   : > { %v14612_v25 = vpack.i.bf16 %v14610_v41, %v14611_v48  ;;  %v4329_v5 = vsel %vm4108_vm3, %v4257_v61, %v6600_v62  ;;  %v14621_v41 = vpack.i.bf16 %v14619_v51, %v14620_v27  ;;  %v14623_v62 = vld [vmem:[#allocation303_spill] sm:$0xff] }
 0x369   : > { %6852 = vrot.lane.b32.xlu0 %v6851_v36, %s7321_s18  ;;  %v14615_v36 = vld [vmem:[#allocation209_spill] sm:$0xff]  ;;  %v4404_v4 = vpack.c.bf16 %v4330_v16, %v4329_v5  ;;  %v11644_v56 = vld [vmem:[#allocation2 + $0x131] sm:$0xff]  ;;  %v1902_v5 = vld [vmem:[#allocation2 + $0x139] sm:$0xff] }
 0x36a   : > { %v11613_v43 = vpop.permute.xlu1 %6632  ;;  %14625 = vst [vmem:[#allocation17_spill] sm:$0xff] %v11644_v56  ;;  %v6876_v27 = vpack.i.bf16 %v1902_v5, %v11644_v56  ;;  %v14645_v56 = vld [vmem:[#allocation136_spill] sm:$0xff] }
 0x36b   : > { %4915 = vmatmul.bf16.gmra.mxu3 %v14613_v26  ;;  %v11617_v48 = vpop.permute.xlu0 %6642  ;;  %v11621_v30 = vpop.f32.mrf.mxu0  ;;  %v14622_v26 = vld [vmem:[#allocation301_spill] sm:$0xff] }
 0x36c   : > { %6842 = vrot.lane.b32.xlu1 %v14612_v25, %s7320_s17  ;;  %14614 = vst [vmem:[#allocation144_spill] sm:$0xff] %v11621_v30  ;;  %v14624_v61 = vpack.i.bf16 %v14622_v26, %v14623_v62 }
 0x36e   : > { %v11619_v25 = vpop.permute.xlu2 %6682 }
 0x36f   : > { %6847 = vrot.lane.b32.xlu2 %v6846_v24, %s7321_s18  ;;  %v14617_v24 = vpack.i.bf16 %v14615_v36, %v14616_v10  ;;  %v1930_v36 = vld [vmem:[#allocation2 + $0x219] sm:$0xff]  ;;  %v6620_v10 = vunpack.i.h.bf16 %v6618_v8 }
 0x370   : > { %v6881_v51 = vpack.i.bf16 %v1930_v36, %v1929_v29  ;;  %v14630_v29 = vpack.c.bf16 %v11268_v47, %v11265_v44  ;;  %v6615_v36 = vunpack.i.h.bf16 %v11567_v38 }
 0x371   : > { %6867 = vrot.lane.b32.xlu0 %v14621_v41, %s7320_s17  ;;  %v7261_v41 = vld [vmem:[#allocation2 + $0x51] sm:$0xff] }
 0x372   : > { %4805 = vmatmul.bf16.gmra.mxu0 %v14618_v0  ;;  %v11640_v21 = vpop.permute.xlu1 %6647  ;;  %v4188_v26 = vsel %vm560_vm0, %v7261_v41, %v6620_v10  ;;  %v6629_v10 = vunpack.i.l.bf16 %v11590_v33 }
 0x373   : > { %4964 = vmatmul.bf16.gmra.mxu1 %v4404_v4  ;;  %v11642_v23 = vpop.permute.xlu0 %6657  ;;  %v11648_v0 = vpop.f32.mrf.mxu0  ;;  %v7262_v4 = vld [vmem:[#allocation2 + $0x49] sm:$0xff] }
 0x374   : > { %6857 = vrot.lane.b32.xlu1 %v14617_v24, %s7319_s30  ;;  %v6619_v24 = vunpack.i.l.bf16 %v6618_v8  ;;  %14626 = vst [vmem:[#allocation16_spill] sm:$0xff] %v11648_v0  ;;  %v6625_v8 = vunpack.i.h.bf16 %v11515_v55 }
 0x376   : > { %v11646_v16 = vpop.permute.xlu2 %6697  ;;  %v4187_v62 = vsel %vm560_vm0, %v7262_v4, %v6619_v24  ;;  %v4260_v5 = vsel %vm4035_vm2, %v4188_v26, %v6625_v8  ;;  %v14636_v26 = vpack.c.bf16 %v10962_v2, %v10959_v40  ;;  %v14638_v8 = vld [vmem:[#allocation75_spill] sm:$0xff]  ;;  %v6634_v40 = vunpack.i.l.bf16 %v11613_v43 }
 0x377   : > { %6862 = vrot.lane.b32.xlu2 %v14624_v61, %s7319_s30  ;;  %v6624_v61 = vunpack.i.l.bf16 %v11515_v55  ;;  %v4332_v38 = vsel %vm4108_vm3, %v4260_v5, %v6629_v10  ;;  %v1931_v5 = vld [vmem:[#allocation2 + $0x221] sm:$0xff] }
 0x379   : > { %6882 = vrot.lane.b32.xlu0 %v6881_v51, %s7321_s18  ;;  %v4259_v55 = vsel %vm4035_vm2, %v4187_v62, %v6624_v61  ;;  %v14633_v51 = vld [vmem:[#allocation210_spill] sm:$0xff] }
 0x37a   : > { %v11666_v24 = vpop.permute.xlu1 %6662  ;;  %v4331_v47 = vsel %vm4108_vm3, %v4259_v55, %v6615_v36  ;;  %v14637_v62 = vld [vmem:[#allocation74_spill] sm:$0xff]  ;;  %v14641_v36 = vld [vmem:[#allocation309_spill] sm:$0xff] }
 0x37b   : > { %4920 = vmatmul.bf16.gmra.mxu3 %v14630_v29  ;;  %v11670_v52 = vpop.permute.xlu0 %6672  ;;  %v11674_v44 = vpop.f32.mrf.mxu0  ;;  %v4407_v4 = vpack.c.bf16 %v4332_v38, %v4331_v47  ;;  %v14639_v61 = vpack.i.bf16 %v14637_v62, %v14638_v8  ;;  %v14640_v29 = vld [vmem:[#allocation311_spill] sm:$0xff]  ;;  %v1903_v47 = vld [vmem:[#allocation2 + $0x141] sm:$0xff]  ;;  %v1904_v38 = vld [vmem:[#allocation2 + $0x149] sm:$0xff] }
 0x37c   : > { %6872 = vrot.lane.b32.xlu1 %v14629_v22, %s7320_s17  ;;  %14631 = vst [vmem:[#allocation59_spill] sm:$0xff] %v11674_v44  ;;  %v14642_v10 = vpack.i.bf16 %v14640_v29, %v14641_v36  ;;  %v6906_v8 = vpack.i.bf16 %v1904_v38, %v1903_v47  ;;  %v14646_v44 = vld [vmem:[#allocation135_spill] sm:$0xff]  ;;  %v14651_v38 = vld [vmem:[#allocation221_spill] sm:$0xff] }
 0x37d   : > { %v14647_v0 = vpack.i.bf16 %v14645_v56, %v14646_v44  ;;  %v14650_v44 = vld [vmem:[#allocation219_spill] sm:$0xff] }
 0x37e   : > { %v11672_v22 = vpop.permute.xlu2 %6712 }
 0x37f   : > { %6877 = vrot.lane.b32.xlu2 %v6876_v27, %s7321_s18  ;;  %v14634_v27 = vld [vmem:[#allocation211_spill] sm:$0xff] }
 0x380   : > { %v14635_v41 = vpack.i.bf16 %v14633_v51, %v14634_v27  ;;  %v1932_v51 = vld [vmem:[#allocation2 + $0x229] sm:$0xff]  ;;  %v6635_v27 = vunpack.i.h.bf16 %v11613_v43  ;;  %v6640_v43 = vunpack.i.h.bf16 %v11546_v57 }
 0x381   : > { %6897 = vrot.lane.b32.xlu0 %v14639_v61, %s7320_s17  ;;  %v6911_v62 = vpack.i.bf16 %v1932_v51, %v1931_v5  ;;  %v7263_v61 = vld [vmem:[#allocation2 + $0x61] sm:$0xff]  ;;  %v14648_v5 = vpack.c.bf16 %v11460_v17, %v11457_v59  ;;  %v6630_v51 = vunpack.i.h.bf16 %v11590_v33 }
 0x382   : > { %4810 = vmatmul.bf16.gmra.mxu0 %v14636_v26  ;;  %v11695_v55 = vpop.permute.xlu1 %6677  ;;  %v4190_v29 = vsel %vm560_vm0, %v7263_v61, %v6635_v27  ;;  %v6644_v27 = vunpack.i.l.bf16 %v11617_v48  ;;  %v14654_v61 = vld [vmem:[#allocation81_spill] sm:$0xff] }
 0x383   : > { %4969 = vmatmul.bf16.gmra.mxu1 %v4407_v4  ;;  %v11699_v2 = vpop.permute.xlu0 %6687  ;;  %v11703_v26 = vpop.f32.mrf.mxu0  ;;  %v7264_v4 = vld [vmem:[#allocation2 + $0x59] sm:$0xff]  ;;  %v4262_v47 = vsel %vm4035_vm2, %v4190_v29, %v6640_v43  ;;  %v14655_v29 = vld [vmem:[#allocation82_spill] sm:$0xff]  ;;  %v6650_v43 = vunpack.i.h.bf16 %v11640_v21 }
 0x384   : > { %6887 = vrot.lane.b32.xlu1 %v14635_v41, %s7319_s30  ;;  %14643 = vst [vmem:[#allocation203_spill] sm:$0xff] %v11703_v26  ;;  %v4189_v36 = vsel %vm560_vm0, %v7264_v4, %v6634_v40  ;;  %v4334_v33 = vsel %vm4108_vm3, %v4262_v47, %v6644_v27  ;;  %v14656_v4 = vpack.i.bf16 %v14654_v61, %v14655_v29  ;;  %v1933_v47 = vld [vmem:[#allocation2 + $0x231] sm:$0xff]  ;;  %v6715_v61 = vunpack.i.h.bf16 %v11672_v22  ;;  %v7266_v26 = vld [vmem:[#allocation2 + $0x69] sm:$0xff] }
 0x385   : > { %v4261_v57 = vsel %vm4035_vm2, %v4189_v36, %v6639_v60  ;;  %v14653_v60 = vpack.c.bf16 %v10781_v35, %v10778_v50  ;;  %v1934_v35 = vld [vmem:[#allocation2 + $0x239] sm:$0xff]  ;;  %v6649_v50 = vunpack.i.l.bf16 %v11640_v21  ;;  %v6714_v29 = vunpack.i.l.bf16 %v11672_v22 }
 0x386   : > { %v11701_v41 = vpop.permute.xlu2 %6727  ;;  %v4333_v17 = vsel %vm4108_vm3, %v4261_v57, %v6630_v51  ;;  %v14659_v51 = vld [vmem:[#allocation313_spill] sm:$0xff] }
 0x387   : > { %6892 = vrot.lane.b32.xlu2 %v14642_v10, %s7319_s30  ;;  %v11707_v10 = vpop.f32.mrf.mxu2  ;;  %v4191_v31 = vsel %vm560_vm0, %v7266_v26, %v6649_v50 }
 0x388   : > { %14644 = vst [vmem:[#allocation173_spill] sm:$0xff] %v11707_v10 }
 0x389   : > { %6912 = vrot.lane.b32.xlu0 %v6911_v62, %s7321_s18  ;;  %v14652_v62 = vpack.i.bf16 %v14650_v44, %v14651_v38 }
 0x38a   : > { %v11722_v40 = vpop.permute.xlu1 %6692 }
 0x38b   : > { %4925 = vmatmul.bf16.gmra.mxu3 %v14648_v5  ;;  %v11726_v56 = vpop.permute.xlu0 %6702  ;;  %v14658_v5 = vld [vmem:[#allocation315_spill] sm:$0xff] }
 0x38c   : > { %6902 = vrot.lane.b32.xlu1 %v14647_v0, %s7320_s17  ;;  %v11730_v59 = vpop.f32.mrf.mxu0  ;;  %v14660_v27 = vpack.i.bf16 %v14658_v5, %v14659_v51  ;;  %v6941_v51 = vpack.i.bf16 %v1934_v35, %v1933_v47  ;;  %v6654_v47 = vunpack.i.l.bf16 %v11569_v12  ;;  %v14661_v35 = vld [vmem:[#allocation133_spill] sm:$0xff] }
 0x38d   : > { %14649 = vst [vmem:[#allocation214_spill] sm:$0xff] %v11730_v59  ;;  %v7265_v59 = vld [vmem:[#allocation2 + $0x71] sm:$0xff] }
 0x38e   : > { %v4192_v22 = vsel %vm560_vm0, %v7265_v59, %v6650_v43  ;;  %v14664_v59 = vpack.c.bf16 %v11494_v54, %v11490_v7  ;;  %v6645_v43 = vunpack.i.h.bf16 %v11617_v48  ;;  %v4263_v50 = vsel %vm4035_vm2, %v4191_v31, %v6654_v47  ;;  %v14666_v47 = vld [vmem:[#allocation228_spill] sm:$0xff] }
 0x38f   : > { %6907 = vrot.lane.b32.xlu2 %v6906_v8, %s7321_s18  ;;  %v4410_v8 = vpack.c.bf16 %v4334_v33, %v4333_v17  ;;  %v11745_v36 = vpop.f32.mrf.mxu2  ;;  %v6705_v17 = vunpack.i.h.bf16 %v11726_v56  ;;  %v6729_v48 = vunpack.i.l.bf16 %v11701_v41 }
 0x390   : > { %14657 = vst [vmem:[#allocation237_spill] sm:$0xff] %v11745_v36 }
 0x391   : > { %v11728_v0 = vpop.permute.xlu2 %6742  ;;  %6927 = vrot.lane.b32.xlu0 %v14656_v4, %s7320_s17 }
 0x392   : > { %4815 = vmatmul.bf16.gmra.mxu0 %v14653_v60  ;;  %v1906_v60 = vld [vmem:[#allocation2 + $0x159] sm:$0xff] }
 0x393   : > { %4974 = vmatmul.bf16.gmra.mxu1 %v4410_v8  ;;  %v6718_v33 = vpop.permute.xlu0 %6717 }
 0x394   : > { %6917 = vrot.lane.b32.xlu1 %v14652_v62, %s7319_s30  ;;  %v6708_v57 = vpop.permute.xlu1 %6707  ;;  %v1905_v62 = vld [vmem:[#allocation2 + $0x151] sm:$0xff]  ;;  %v6719_v4 = vunpack.i.l.bf16 %v6718_v33 }
 0x395   : > { %v6710_v44 = vunpack.i.h.bf16 %v6708_v57  ;;  %v6709_v38 = vunpack.i.l.bf16 %v6708_v57  ;;  %v6936_v36 = vpack.i.bf16 %v1906_v60, %v1905_v62  ;;  %v6720_v62 = vunpack.i.h.bf16 %v6718_v33 }
 0x396   : > { %v4335_v33 = vsel %vm4108_vm3, %v4263_v50, %v6645_v43  ;;  %v14669_v43 = vld [vmem:[#allocation89_spill] sm:$0xff]  ;;  %v14672_v50 = vld [vmem:[#allocation319_spill] sm:$0xff] }
 0x397   : > { %6922 = vrot.lane.b32.xlu2 %v14660_v27, %s7319_s30  ;;  %v4200_v8 = vsel %vm560_vm0, %v11012_v6, %v6710_v44  ;;  %v4199_v21 = vsel %vm560_vm0, %v11010_v39, %v6709_v38  ;;  %v11762_v27 = vpop.f32.mrf.mxu0  ;;  %v6655_v39 = vunpack.i.h.bf16 %v11569_v12  ;;  %v14662_v44 = vld [vmem:[#allocation134_spill] sm:$0xff] }
 0x398   : > { %v4271_v57 = vsel %vm4035_vm2, %v4199_v21, %v6714_v29  ;;  %v4272_v10 = vsel %vm4035_vm2, %v4200_v8, %v6715_v61  ;;  %v14663_v38 = vpack.i.bf16 %v14661_v35, %v14662_v44  ;;  %v11791_v61 = vpop.f32.mrf.mxu2  ;;  %v6730_v29 = vunpack.i.h.bf16 %v11701_v41 }
 0x399   : > { %v11756_v5 = vpop.permute.xlu2 %6757  ;;  %v11769_v30 = vsel %vm4108_vm3, %v4271_v57, %v6705_v17  ;;  %v11772_v6 = vsel %vm4108_vm3, %v4272_v10, %v6719_v4  ;;  %v6659_v10 = vunpack.i.l.bf16 %v11642_v23  ;;  %6942 = vrot.lane.b32.xlu0 %v6941_v51, %s7321_s18  ;;  %v4264_v17 = vsel %vm4035_vm2, %v4192_v22, %v6655_v39 }
 0x39a   : > { %v6665_v39 = vunpack.i.h.bf16 %v11666_v24  ;;  %v14668_v44 = vpack.c.bf16 %v10973_v9, %v10970_v1  ;;  %v6664_v1 = vunpack.i.l.bf16 %v11666_v24 }
 0x39b   : > { %4930 = vmatmul.bf16.gmra.mxu3 %v14664_v59  ;;  %v6733_v60 = vpop.permute.xlu0 %6732  ;;  %v4336_v21 = vsel %vm4108_vm3, %v4264_v17, %v6659_v10  ;;  %v14670_v10 = vld [vmem:[#allocation88_spill] sm:$0xff]  ;;  %v14673_v17 = vld [vmem:[#allocation321_spill] sm:$0xff] }
 0x39c   : > { %6932 = vrot.lane.b32.xlu1 %v14663_v38, %s7320_s17  ;;  %v6734_v4 = vunpack.i.l.bf16 %v6733_v60  ;;  %v4413_v38 = vpack.c.bf16 %v4336_v21, %v4335_v33  ;;  %v6735_v9 = vunpack.i.h.bf16 %v6733_v60  ;;  %v1908_v33 = vld [vmem:[#allocation2 + $0x169] sm:$0xff]  ;;  %v7267_v21 = vld [vmem:[#allocation2 + $0x81] sm:$0xff] }
 0x39e   : > { %v6723_v12 = vpop.permute.xlu1 %6722 }
 0x39f   : > { %6937 = vrot.lane.b32.xlu2 %v6936_v36, %s7321_s18  ;;  %v6725_v7 = vunpack.i.h.bf16 %v6723_v12  ;;  %v6724_v54 = vunpack.i.l.bf16 %v6723_v12  ;;  %v14671_v12 = vpack.i.bf16 %v14669_v43, %v14670_v10 }
 0x3a0   : > { %v11841_v43 = vpop.f32.mrf.mxu2 }
 0x3a1   : > { %v11795_v8 = vpop.permute.xlu2 %6772  ;;  %v4202_v36 = vsel %vm560_vm0, %v11097_v42, %v6725_v7  ;;  %v4201_v31 = vsel %vm560_vm0, %v11095_v14, %v6724_v54  ;;  %v11812_v42 = vpop.f32.mrf.mxu0  ;;  %v14665_v14 = vld [vmem:[#allocation230_spill] sm:$0xff]  ;;  %6957 = vrot.lane.b32.xlu0 %v14671_v12, %s7320_s17  ;;  %v1935_v54 = vld [vmem:[#allocation2 + $0x241] sm:$0xff]  ;;  %14675 = vst [vmem:[#allocation223_spill] sm:$0xff] %v11841_v43 }
 0x3a2   : > { %v4273_v51 = vsel %vm4035_vm2, %v4201_v31, %v6729_v48  ;;  %v4274_v57 = vsel %vm4035_vm2, %v4202_v36, %v6730_v29  ;;  %v14667_v35 = vpack.i.bf16 %v14665_v14, %v14666_v47  ;;  %4820 = vmatmul.bf16.gmra.mxu0 %v14668_v44  ;;  %v1936_v29 = vld [vmem:[#allocation2 + $0x249] sm:$0xff]  ;;  %v1907_v31 = vld [vmem:[#allocation2 + $0x161] sm:$0xff]  ;;  %v6744_v14 = vunpack.i.l.bf16 %v11728_v0 }
 0x3a3   : > { %v11806_v22 = vsel %vm4108_vm3, %v4273_v51, %v6720_v62  ;;  %v11809_v41 = vsel %vm4108_vm3, %v4274_v57, %v6734_v4  ;;  %v14674_v62 = vpack.i.bf16 %v14672_v50, %v14673_v17  ;;  %4979 = vmatmul.bf16.gmra.mxu1 %v4413_v38  ;;  %v6748_v48 = vpop.permute.xlu0 %6747  ;;  %v4194_v51 = vsel %vm560_vm0, %v7267_v21, %v6665_v39  ;;  %v14676_v12 = vld [vmem:[#allocation84_spill] sm:$0xff] }
 0x3a4   : > { %6947 = vrot.lane.b32.xlu1 %v14667_v35, %s7319_s30  ;;  %v6745_v57 = vunpack.i.h.bf16 %v11728_v0  ;;  %v6750_v47 = vunpack.i.h.bf16 %v6748_v48  ;;  %v6749_v44 = vunpack.i.l.bf16 %v6748_v48  ;;  %v6971_v38 = vpack.i.bf16 %v1936_v29, %v1935_v54  ;;  %v7268_v17 = vld [vmem:[#allocation2 + $0x79] sm:$0xff] }
 0x3a5   : > { %v6966_v10 = vpack.i.bf16 %v1908_v33, %v1907_v31  ;;  %v6670_v54 = vunpack.i.h.bf16 %v11594_v58  ;;  %v6669_v29 = vunpack.i.l.bf16 %v11594_v58  ;;  %v14677_v48 = vld [vmem:[#allocation139_spill] sm:$0xff]  ;;  %v6660_v31 = vunpack.i.h.bf16 %v11642_v23  ;;  %v14732_v43 = vld [vmem:[#allocation260_spill] sm:$0xff] }
 0x3a6   : > { %v6738_v7 = vpop.permute.xlu1 %6737  ;;  %v11845_v39 = vsel %vm4108_vm3, %v14676_v12, %v6750_v47  ;;  %v6674_v33 = vunpack.i.l.bf16 %v11670_v52  ;;  %v6760_v23 = vunpack.i.h.bf16 %v11756_v5  ;;  %v6759_v12 = vunpack.i.l.bf16 %v11756_v5 }
 0x3a7   : > { %6952 = vrot.lane.b32.xlu2 %v14674_v62, %s7319_s30  ;;  %v6740_v4 = vunpack.i.h.bf16 %v6738_v7  ;;  %v6739_v36 = vunpack.i.l.bf16 %v6738_v7  ;;  %v4193_v62 = vsel %vm560_vm0, %v7268_v17, %v6664_v1  ;;  %v14680_v1 = vpack.c.bf16 %v11335_v45, %v11331_v37  ;;  %v7269_v37 = vld [vmem:[#allocation2 + $0x242] sm:$0xff]  ;;  %v14681_v45 = vld [vmem:[#allocation151_spill] sm:$0xff] }
 0x3a8   : > { %v2079_v47 = vmul.f32 %v7269_v37, %v14681_v45 }
 0x3a9   : > { %v11835_v35 = vpop.permute.xlu2 %6787  ;;  %v4204_v24 = vsel %vm560_vm0, %v11157_v53, %v6740_v4  ;;  %v4203_v60 = vsel %vm560_vm0, %v11155_v28, %v6739_v36  ;;  %v4502_v53 = vpack.c.bf16 %v11845_v39, %v11502_v49  ;;  %v14678_v4 = vld [vmem:[#allocation140_spill] sm:$0xff]  ;;  %6972 = vrot.lane.b32.xlu0 %v6971_v38, %s7321_s18  ;;  %v11872_v21 = vpop.f32.mrf.mxu0 }
 0x3aa   : > { %v4275_v0 = vsel %vm4035_vm2, %v4203_v60, %v6744_v14  ;;  %v4276_v50 = vsel %vm4035_vm2, %v4204_v24, %v6745_v57  ;;  %v14679_v36 = vpack.i.bf16 %v14677_v48, %v14678_v4  ;;  %v4265_v57 = vsel %vm4035_vm2, %v4193_v62, %v6669_v29  ;;  %v14682_v29 = vld [vmem:[#allocation323_spill] sm:$0xff] }
 0x3ab   : > { %v11853_v28 = vsel %vm4108_vm3, %v4275_v0, %v6735_v9  ;;  %v11856_v7 = vsel %vm4108_vm3, %v4276_v50, %v6749_v44  ;;  %4935 = vmatmul.bf16.gmra.mxu3 %v14680_v1  ;;  %v4266_v14 = vsel %vm4035_vm2, %v4194_v51, %v6670_v54  ;;  %v6763_v44 = vpop.permute.xlu0 %6762  ;;  %v4337_v17 = vsel %vm4108_vm3, %v4265_v57, %v6660_v31  ;;  %v7270_v54 = vld [vmem:[#allocation2 + $0x23a] sm:$0xff]  ;;  %v14685_v31 = vld [vmem:[#allocation233_spill] sm:$0xff] }
 0x3ac   : > { %6962 = vrot.lane.b32.xlu1 %v14679_v36, %s7320_s17  ;;  %v6765_v38 = vunpack.i.h.bf16 %v6763_v44  ;;  %v6764_v0 = vunpack.i.l.bf16 %v6763_v44  ;;  %v4338_v62 = vsel %vm4108_vm3, %v4266_v14, %v6674_v33  ;;  %v2078_v48 = vmul.f32 %v7270_v54, %v14682_v29  ;;  %v2082_v36 = vld [vmem:[#allocation2 + $0x258] sm:$0xff] }
 0x3ad   : > { %v14687_v14 = vpack.c.bf16 %v11035_v34, %v11032_v13  ;;  %v4416_v37 = vpack.c.bf16 %v4338_v62, %v4337_v17  ;;  %v1937_v13 = vld [vmem:[#allocation2 + $0x251] sm:$0xff]  ;;  %v2157_v34 = vld [vmem:[#allocation2 + $0x259] sm:$0xff]  ;;  %v6789_v17 = vunpack.i.l.bf16 %v11835_v35 }
 0x3ae   : > { %v6753_v58 = vpop.permute.xlu1 %6752  ;;  %v6981_v57 = vpack.i.bf16 %v2079_v47, %v2078_v48 }
 0x3af   : > { %6967 = vrot.lane.b32.xlu2 %v6966_v10, %s7321_s18  ;;  %v6755_v24 = vunpack.i.h.bf16 %v6753_v58  ;;  %v6754_v60 = vunpack.i.l.bf16 %v6753_v58  ;;  %v11897_v58 = vpop.f32.mrf.mxu2 }
 0x3b0   : > { %14683 = vst [vmem:[#allocation36_spill] sm:$0xff] %v11897_v58  ;;  %v14731_v58 = vld [vmem:[#allocation59_spill] sm:$0xff] }
 0x3b1   : > { %v11880_v50 = vpop.permute.xlu2 %6802  ;;  %v4206_v10 = vsel %vm560_vm0, %v11251_v19, %v6755_v24  ;;  %v4205_v51 = vsel %vm560_vm0, %v11249_v3, %v6754_v60  ;;  %v14684_v3 = vld [vmem:[#allocation232_spill] sm:$0xff]  ;;  %v14688_v24 = vld [vmem:[#allocation86_spill] sm:$0xff]  ;;  %v14689_v60 = vld [vmem:[#allocation87_spill] sm:$0xff] }
 0x3b2   : > { %v4277_v4 = vsel %vm4035_vm2, %v4205_v51, %v6759_v12  ;;  %v4278_v5 = vsel %vm4035_vm2, %v4206_v10, %v6760_v23  ;;  %v14686_v33 = vpack.i.bf16 %v14684_v3, %v14685_v31  ;;  %4825 = vmatmul.bf16.gmra.mxu0 %v14687_v14  ;;  %v14690_v23 = vpack.i.bf16 %v14688_v24, %v14689_v60  ;;  %v14691_v12 = vld [vmem:[#allocation142_spill] sm:$0xff]  ;;  %v11920_v31 = vpop.f32.mrf.mxu0 }
 0x3b3   : > { %v11892_v1 = vsel %vm4108_vm3, %v4277_v4, %v6764_v0  ;;  %v11895_v19 = vsel %vm4108_vm3, %v4278_v5, %v6765_v38  ;;  %v2154_v38 = vmul.f32 %v2082_v36, %v14691_v12  ;;  %v6680_v0 = vunpack.i.h.bf16 %v11695_v55  ;;  %4984 = vmatmul.bf16.gmra.mxu1 %v4416_v37  ;;  %v6778_v62 = vpop.permute.xlu0 %6777  ;;  %v1909_v4 = vld [vmem:[#allocation2 + $0x171] sm:$0xff]  ;;  %v1910_v5 = vld [vmem:[#allocation2 + $0x179] sm:$0xff] }
 0x3b4   : > { %6977 = vrot.lane.b32.xlu1 %v14686_v33, %s7319_s30  ;;  %6987 = vrot.lane.b32.xlu0 %v14690_v23, %s7320_s17  ;;  %v6679_v10 = vunpack.i.l.bf16 %v11695_v55  ;;  %v6790_v51 = vunpack.i.h.bf16 %v11835_v35  ;;  %v14692_v36 = vld [vmem:[#allocation119_spill] sm:$0xff]  ;;  %v6780_v55 = vunpack.i.h.bf16 %v6778_v62  ;;  %v6779_v33 = vunpack.i.l.bf16 %v6778_v62 }
 0x3b5   : > { %v2153_v3 = vmul.f32 %v11273_v15, %v14692_v36  ;;  %v7001_v37 = vpack.i.bf16 %v2157_v34, %v1937_v13  ;;  %v6996_v60 = vpack.i.bf16 %v1910_v5, %v1909_v4  ;;  %v7271_v15 = vld [vmem:[#allocation2 + $0x91] sm:$0xff]  ;;  %v7272_v36 = vld [vmem:[#allocation2 + $0x89] sm:$0xff]  ;;  %v6675_v13 = vunpack.i.h.bf16 %v11670_v52 }
 0x3b6   : > { %v6768_v47 = vpop.permute.xlu1 %6767  ;;  %v4195_v62 = vsel %vm560_vm0, %v7272_v36, %v6679_v10  ;;  %v2009_v10 = vld [vmem:[#allocation2 + $0x252] sm:$0xff]  ;;  %v6689_v34 = vunpack.i.l.bf16 %v11699_v2  ;;  %v6775_v4 = vunpack.i.h.bf16 %v11795_v8  ;;  %v6774_v52 = vunpack.i.l.bf16 %v11795_v8 }
 0x3b7   : > { %6982 = vrot.lane.b32.xlu2 %v6981_v57, %s7319_s30  ;;  %v6770_v54 = vunpack.i.h.bf16 %v6768_v47  ;;  %v6769_v48 = vunpack.i.l.bf16 %v6768_v47  ;;  %v6991_v24 = vpack.i.bf16 %v2154_v38, %v2153_v3  ;;  %v4196_v47 = vsel %vm560_vm0, %v7271_v15, %v6680_v0 }
 0x3b8   : > { %v6684_v38 = vunpack.i.l.bf16 %v11619_v25  ;;  %v6695_v0 = vunpack.i.h.bf16 %v11722_v40 }
 0x3b9   : > { %v11922_v57 = vpop.permute.xlu2 %6817  ;;  %v4208_v14 = vsel %vm560_vm0, %v11387_v11, %v6770_v54  ;;  %v4207_v35 = vsel %vm560_vm0, %v11325_v46, %v6769_v48  ;;  %v6685_v46 = vunpack.i.h.bf16 %v11619_v25  ;;  %v11950_v54 = vpop.f32.mrf.mxu2  ;;  %v2083_v48 = vld [vmem:[#allocation2 + $0x260] sm:$0xff] }
 0x3ba   : > { %v4279_v23 = vsel %vm4035_vm2, %v4207_v35, %v6779_v33  ;;  %v4280_v12 = vsel %vm4035_vm2, %v4208_v14, %v6780_v55  ;;  %14694 = vst [vmem:[#allocation220_spill] sm:$0xff] %v11950_v54  ;;  %v4267_v49 = vsel %vm4035_vm2, %v4195_v62, %v6684_v38  ;;  %v7273_v55 = vld [vmem:[#allocation2 + $0x24a] sm:$0xff]  ;;  %v14695_v33 = vld [vmem:[#allocation300_spill] sm:$0xff]  ;;  %v11970_v62 = vpop.f32.mrf.mxu0 }
 0x3bb   : > { %v11933_v44 = vsel %vm4108_vm3, %v4279_v23, %v6789_v17  ;;  %v11936_v11 = vsel %vm4108_vm3, %v4280_v12, %v6790_v51  ;;  %4940 = vmatmul.bf16.gmra.mxu3 %v4502_v53  ;;  %v14693_v51 = vld [vmem:[#allocation326_spill] sm:$0xff]  ;;  %v4268_v39 = vsel %vm4035_vm2, %v4196_v47, %v6685_v46  ;;  %v2084_v53 = vld [vmem:[#allocation2 + $0x268] sm:$0xff]  ;;  %v6793_v5 = vpop.permute.xlu0 %6792  ;;  %v2080_v14 = vmul.f32 %v7273_v55, %v14695_v33 }
 0x3bc   : > { %6992 = vrot.lane.b32.xlu1 %v6991_v24, %s7320_s17  ;;  %7002 = vrot.lane.b32.xlu0 %v7001_v37, %s7321_s18  ;;  %v2081_v17 = vmul.f32 %v2009_v10, %v14693_v51  ;;  %v11960_v35 = vld [vmem:[#allocation2 + $0x1c9] sm:$0xff]  ;;  %v11962_v37 = vld [vmem:[#allocation2 + $0x1d1] sm:$0xff]  ;;  %v4339_v12 = vsel %vm4108_vm3, %v4267_v49, %v6675_v13  ;;  %v4340_v15 = vsel %vm4108_vm3, %v4268_v39, %v6689_v34  ;;  %v6794_v55 = vunpack.i.l.bf16 %v6793_v5 }
 0x3bd   : > { %v2156_v8 = vmul.f32 %v2084_v53, %v14510_v32  ;;  %v14696_v47 = vld [vmem:[#allocation141_spill] sm:$0xff]  ;;  %v4236_v38 = vsel %vm560_vm0, %v11962_v37, %v6775_v4  ;;  %v4235_v10 = vsel %vm560_vm0, %v11960_v35, %v6774_v52  ;;  %v14697_v32 = vld [vmem:[#allocation240_spill] sm:$0xff]  ;;  %v14698_v49 = vld [vmem:[#allocation242_spill] sm:$0xff]  ;;  %v6694_v4 = vunpack.i.l.bf16 %v11722_v40 }
 0x3be   : > { %v6783_v25 = vpop.permute.xlu1 %6782  ;;  %v11957_v3 = vpop.f32.mrf.mxu3  ;;  %v2155_v36 = vmul.f32 %v2083_v48, %v14696_v47  ;;  %v7011_v46 = vpack.i.bf16 %v2081_v17, %v2080_v14  ;;  %v14699_v39 = vpack.i.bf16 %v14697_v32, %v14698_v49  ;;  %v14700_v17 = vld [vmem:[#allocation3_spill] sm:$0xff]  ;;  %v4419_v48 = vpack.c.bf16 %v4340_v15, %v4339_v12  ;;  %v14702_v52 = vld [vmem:[#allocation93_spill] sm:$0xff] }
 0x3bf   : > { %6997 = vrot.lane.b32.xlu2 %v6996_v60, %s7321_s18  ;;  %v6785_v24 = vunpack.i.h.bf16 %v6783_v25  ;;  %v6784_v60 = vunpack.i.l.bf16 %v6783_v25  ;;  %v6795_v25 = vunpack.i.h.bf16 %v6793_v5  ;;  %v14701_v53 = vpack.c.bf16 %v10851_v20, %v14700_v17  ;;  %v14703_v5 = vld [vmem:[#allocation94_spill] sm:$0xff] }
 0x3c0   : > { %v14704_v14 = vpack.i.bf16 %v14702_v52, %v14703_v5  ;;  %v6819_v47 = vunpack.i.l.bf16 %v11922_v57  ;;  %v7021_v20 = vpack.i.bf16 %v2156_v8, %v2155_v36  ;;  %v2159_v12 = vld [vmem:[#allocation2 + $0x269] sm:$0xff] }
 0x3c1   : > { %v11964_v23 = vpop.permute.xlu2 %6832  ;;  %v4307_v13 = vsel %vm4035_vm2, %v4235_v10, %v6784_v60  ;;  %v4308_v34 = vsel %vm4035_vm2, %v4236_v38, %v6785_v24  ;;  %v6700_v60 = vunpack.i.h.bf16 %v11646_v16  ;;  %v6820_v24 = vunpack.i.h.bf16 %v11922_v57  ;;  %v2158_v10 = vld [vmem:[#allocation2 + $0x261] sm:$0xff]  ;;  %v1912_v17 = vld [vmem:[#allocation2 + $0x189] sm:$0xff]  ;;  %v11999_v5 = vpop.f32.mrf.mxu2 }
 0x3c2   : > { %4830 = vmatmul.bf16.gmra.mxu0 %v14701_v53  ;;  %v4379_v53 = vsel %vm4108_vm3, %v4307_v13, %v6794_v55  ;;  %v4380_v52 = vsel %vm4108_vm3, %v4308_v34, %v6795_v25  ;;  %14705 = vst [vmem:[#allocation47_spill] sm:$0xff] %v11999_v5  ;;  %v6699_v57 = vunpack.i.l.bf16 %v11646_v16  ;;  %v14706_v55 = vld [vmem:[#allocation197_spill] sm:$0xff]  ;;  %v7031_v13 = vpack.i.bf16 %v2159_v12, %v2158_v10 }
 0x3c3   : > { %4989 = vmatmul.bf16.gmra.mxu1 %v4419_v48  ;;  %v6808_v15 = vpop.permute.xlu0 %6807  ;;  %v4479_v26 = vpack.c.bf16 %v4380_v52, %v4379_v53 }
 0x3c4   : > { %7007 = vrot.lane.b32.xlu1 %v14699_v39, %s7319_s30  ;;  %7017 = vrot.lane.b32.xlu0 %v14704_v14, %s7320_s17  ;;  %v1911_v39 = vld [vmem:[#allocation2 + $0x181] sm:$0xff]  ;;  %v6810_v36 = vunpack.i.h.bf16 %v6808_v15  ;;  %v6809_v48 = vunpack.i.l.bf16 %v6808_v15  ;;  %v6690_v15 = vunpack.i.h.bf16 %v11699_v2 }
 0x3c5   : > { %v7026_v34 = vpack.i.bf16 %v1912_v17, %v1911_v39 }
 0x3c6   : > { %v6798_v38 = vpop.permute.xlu1 %6797  ;;  %v11995_v49 = vpop.f32.mrf.mxu3 }
 0x3c7   : > { %7012 = vrot.lane.b32.xlu2 %v7011_v46, %s7319_s30  ;;  %v6800_v40 = vunpack.i.h.bf16 %v6798_v38  ;;  %v6799_v32 = vunpack.i.l.bf16 %v6798_v38  ;;  %v7274_v46 = vld [vmem:[#allocation2 + $0xa1] sm:$0xff]  ;;  %v7275_v38 = vld [vmem:[#allocation2 + $0x99] sm:$0xff] }
 0x3c8   : > { %v4198_v8 = vsel %vm560_vm0, %v7274_v46, %v6695_v0  ;;  %v4197_v9 = vsel %vm560_vm0, %v7275_v38, %v6694_v4  ;;  %v6704_v46 = vunpack.i.l.bf16 %v11726_v56 }
 0x3c9   : > { %v12003_v14 = vpop.permute.xlu2 %6847  ;;  %v4210_v59 = vsel %vm560_vm0, %v11483_v63, %v6800_v40  ;;  %v4209_v25 = vsel %vm560_vm0, %v14706_v55, %v6799_v32  ;;  %v12020_v63 = vpop.f32.mrf.mxu0  ;;  %v4269_v10 = vsel %vm4035_vm2, %v4197_v9, %v6699_v57  ;;  %v4270_v12 = vsel %vm4035_vm2, %v4198_v8, %v6700_v60  ;;  %v12035_v32 = vld [vmem:[#allocation2 + $0x1d9] sm:$0xff] }
 0x3ca   : > { %v4281_v16 = vsel %vm4035_vm2, %v4209_v25, %v6809_v48  ;;  %v4282_v0 = vsel %vm4035_vm2, %v4210_v59, %v6810_v36  ;;  %v1913_v59 = vld [vmem:[#allocation2 + $0x191] sm:$0xff]  ;;  %v6804_v40 = vunpack.i.l.bf16 %v11880_v50  ;;  %v4341_v9 = vsel %vm4108_vm3, %v4269_v10, %v6690_v15  ;;  %v12039_v57 = vpop.f32.mrf.mxu2  ;;  %v14708_v25 = vld [vmem:[#allocation144_spill] sm:$0xff]  ;;  %v14712_v15 = vld [vmem:[#allocation241_spill] sm:$0xff] }
 0x3cb   : > { %v12015_v5 = vsel %vm4108_vm3, %v4281_v16, %v6819_v47  ;;  %v12018_v4 = vsel %vm4108_vm3, %v4282_v0, %v6820_v24  ;;  %5089 = vmatmul.bf16.vlgmr.msrb.gmra.mxu3 %v4479_v26  ;;  %v1914_v24 = vld [vmem:[#allocation2 + $0x199] sm:$0xff]  ;;  %v6805_v47 = vunpack.i.h.bf16 %v11880_v50  ;;  %v4342_v60 = vsel %vm4108_vm3, %v4270_v12, %v6704_v46  ;;  %14707 = vst [vmem:[#allocation229_spill] sm:$0xff] %v12039_v57  ;;  %v14710_v16 = vld [vmem:[#allocation249_spill] sm:$0xff]  ;;  %v14713_v46 = vld [vmem:[#allocation138_spill] sm:$0xff] }
 0x3cc   : > { %7022 = vrot.lane.b32.xlu1 %v7021_v20, %s7320_s17  ;;  %7032 = vrot.lane.b32.xlu0 %v7031_v13, %s7321_s18  ;;  %v6823_v20 = vpop.permute.xlu0 %6822  ;;  %v7046_v52 = vpack.i.bf16 %v1914_v24, %v1913_v59  ;;  %v4422_v8 = vpack.c.bf16 %v4342_v60, %v4341_v9  ;;  %v4237_v36 = vsel %vm560_vm0, %v12035_v32, %v6804_v40  ;;  %v6849_v59 = vunpack.i.l.bf16 %v12003_v14  ;;  %v14717_v9 = vld [vmem:[#allocation100_spill] sm:$0xff] }
 0x3cd   : > { %v4238_v50 = vsel %vm560_vm0, %v11481_v18, %v6805_v47  ;;  %v6825_v48 = vunpack.i.h.bf16 %v6823_v20  ;;  %v6824_v38 = vunpack.i.l.bf16 %v6823_v20  ;;  %v14714_v10 = vpack.c.bf16 %v14712_v15, %v14713_v46  ;;  %v14715_v47 = vld [vmem:[#allocation275_spill] sm:$0xff]  ;;  %v14716_v20 = vld [vmem:[#allocation101_spill] sm:$0xff] }
 0x3ce   : > { %v6813_v56 = vpop.permute.xlu1 %6812  ;;  %v12031_v26 = vpop.f32.mrf.mxu3  ;;  %v14718_v60 = vpack.i.bf16 %v14716_v20, %v14717_v9  ;;  %v14719_v15 = vld [vmem:[#allocation37_spill] sm:$0xff]  ;;  %v14720_v46 = vld [vmem:[#allocation11_spill] sm:$0xff] }
 0x3cf   : > { %7027 = vrot.lane.b32.xlu2 %v7026_v34, %s7321_s18  ;;  %v6815_v39 = vunpack.i.h.bf16 %v6813_v56  ;;  %v6814_v17 = vunpack.i.l.bf16 %v6813_v56  ;;  %v14709_v34 = vld [vmem:[#allocation251_spill] sm:$0xff]  ;;  %v6850_v56 = vunpack.i.h.bf16 %v12003_v14 }
 0x3d0   : > { %v4955_v55 = vpop.f32.mrf.mxu1  ;;  %v14711_v0 = vpack.i.bf16 %v14709_v34, %v14710_v16 }
 0x3d1   : > { %v12037_v53 = vpop.permute.xlu2 %6862  ;;  %v4956_v13 = vadd.f32 %v4955_v55, %v14708_v25  ;;  %v4309_v12 = vsel %vm4035_vm2, %v4237_v36, %v6814_v17  ;;  %v4310_v18 = vsel %vm4035_vm2, %v4238_v50, %v6815_v39  ;;  %v12065_v24 = vpop.f32.mrf.mxu0  ;;  %v1915_v17 = vld [vmem:[#allocation2 + $0x1a1] sm:$0xff]  ;;  %v1916_v50 = vld [vmem:[#allocation2 + $0x1a9] sm:$0xff] }
 0x3d2   : > { %4835 = vmatmul.bf16.gmra.mxu0 %v14714_v10  ;;  %v4381_v14 = vsel %vm4108_vm3, %v4309_v12, %v6824_v38  ;;  %v4382_v34 = vsel %vm4108_vm3, %v4310_v18, %v6825_v48 }
 0x3d3   : > { %v5145_v40 = vadd.f32 %v14715_v47, %v4956_v13  ;;  %4994 = vmatmul.bf16.gmra.mxu1 %v4422_v8  ;;  %v7061_v47 = vpack.i.bf16 %v1916_v50, %v1915_v17  ;;  %v4482_v20 = vpack.c.bf16 %v4382_v34, %v4381_v14  ;;  %v14726_v14 = vld [vmem:[#allocation286_spill] sm:$0xff] }
 0x3d4   : > { %7037 = vrot.lane.b32.xlu1 %v14711_v0, %s7319_s30  ;;  %7047 = vrot.lane.b32.xlu0 %v7046_v52, %s7321_s18  ;;  %v6838_v36 = vpop.permute.xlu0 %6837  ;;  %v7276_v50 = vld [vmem:[#allocation2 + $0x1e9] sm:$0xff] }
 0x3d5   : > { %5324 = vst.msk [vmem:[%s12060_s24] sm:$0xff] %vm560_vm0, %v5145_v40  ;;  %v6840_v13 = vunpack.i.h.bf16 %v6838_v36  ;;  %v6839_v16 = vunpack.i.l.bf16 %v6838_v36 }
 0x3d6   : > { %v6828_v39 = vpop.permute.xlu1 %6827  ;;  %v12072_v25 = vpop.f32.mrf.mxu3 }
 0x3d7   : > { %7042 = vrot.lane.b32.xlu2 %v14718_v60, %s7320_s17  ;;  %v6830_v52 = vunpack.i.h.bf16 %v6828_v39  ;;  %v6829_v55 = vunpack.i.l.bf16 %v6828_v39  ;;  %v12092_v60 = vpop.f32.mrf.mxu2  ;;  %v14722_v39 = vld [vmem:[#allocation16_spill] sm:$0xff] }
 0x3d8   : > { %v4957_v12 = vpop.f32.mrf.mxu1  ;;  %14721 = vst [vmem:[#allocation44_spill] sm:$0xff] %v12092_v60 }
 0x3d9   : > { %v12078_v0 = vpop.permute.xlu2 %6877  ;;  %v4212_v8 = vsel %vm560_vm0, %v14719_v15, %v6830_v52  ;;  %v4211_v10 = vsel %vm560_vm0, %v14720_v46, %v6829_v55  ;;  %v4958_v36 = vadd.f32 %v4957_v12, %v14722_v39  ;;  %v14723_v52 = vld [vmem:[#allocation253_spill] sm:$0xff]  ;;  %v14724_v55 = vld [vmem:[#allocation248_spill] sm:$0xff]  ;;  %v1917_v46 = vld [vmem:[#allocation2 + $0x1b1] sm:$0xff] }
 0x3da   : > { %v4283_v9 = vsel %vm4035_vm2, %v4211_v10, %v6839_v16  ;;  %v4284_v38 = vsel %vm4035_vm2, %v4212_v8, %v6840_v13  ;;  %v14725_v17 = vpack.i.bf16 %v14723_v52, %v14724_v55  ;;  %v14727_v13 = vld [vmem:[#allocation98_spill] sm:$0xff]  ;;  %v14728_v16 = vld [vmem:[#allocation99_spill] sm:$0xff] }
 0x3db   : > { %v12087_v48 = vsel %vm4108_vm3, %v4283_v9, %v6849_v59  ;;  %v12090_v18 = vsel %vm4108_vm3, %v4284_v38, %v6850_v56  ;;  %5094 = vmatmul.bf16.gmra.mxu3 %v4482_v20  ;;  %v6835_v59 = vunpack.i.h.bf16 %v11964_v23  ;;  %v5545_v56 = vmul.f32 %v5145_v40, %v5145_v40  ;;  %v1918_v10 = vld [vmem:[#allocation2 + $0x1b9] sm:$0xff] }
 0x3dc   : > { %7052 = vrot.lane.b32.xlu1 %v14725_v17, %s7319_s30  ;;  %7062 = vrot.lane.b32.xlu0 %v7061_v47, %s7321_s18  ;;  %v5147_v34 = vadd.f32 %v14726_v14, %v4958_v36  ;;  %v14729_v15 = vpack.i.bf16 %v14727_v13, %v14728_v16  ;;  %v6834_v20 = vunpack.i.l.bf16 %v11964_v23  ;;  %v5396_v9 = vsel %vm560_vm0, %v5145_v40, 0.0  ;;  %v6853_v38 = vpop.permute.xlu0 %6852  ;;  %v12112_v47 = vpop.f32.mrf.mxu0  ;;  %v14730_v16 = vld [vmem:[#allocation18_spill] sm:$0xff] }
 0x3dd   : > { %v7076_v13 = vpack.i.bf16 %v1918_v10, %v1917_v46  ;;  %v4240_v23 = vsel %vm560_vm0, %v14730_v16, %v6835_v59  ;;  %v5617_v40 = vsel %vm560_vm0, %v5545_v56, 0.0  ;;  %v6855_v57 = vunpack.i.h.bf16 %v6853_v38  ;;  %v14735_v10 = vld [vmem:[#allocation318_spill] sm:$0xff]  ;;  %v14736_v59 = vld [vmem:[#allocation308_spill] sm:$0xff]  ;;  %v14740_v16 = vld [vmem:[#allocation105_spill] sm:$0xff] }
 0x3de   : > { %v6843_v8 = vpop.permute.xlu1 %6842  ;;  %v12110_v12 = vpop.f32.mrf.mxu3  ;;  %5325 = vst.msk [vmem:[%s12060_s24 + $0x8] sm:$0xff] %vm560_vm0, %v5147_v34  ;;  %v5397_v39 = vsel %vm560_vm0, %v5147_v34, 0.0  ;;  %v5546_v36 = vmul.f32 %v5147_v34, %v5147_v34  ;;  %v4239_v2 = vsel %vm560_vm0, %v7276_v50, %v6834_v20  ;;  %v6854_v54 = vunpack.i.l.bf16 %v6853_v38  ;;  %v14739_v38 = vld [vmem:[#allocation295_spill] sm:$0xff] }
 0x3df   : > { %7057 = vrot.lane.b32.xlu2 %v14729_v15, %s7320_s17  ;;  %v6845_v52 = vunpack.i.h.bf16 %v6843_v8  ;;  %v6844_v55 = vunpack.i.l.bf16 %v6843_v8  ;;  %v5398_v14 = vadd.f32 %v5397_v39, %v5396_v9  ;;  %v14733_v9 = vld [vmem:[#allocation262_spill] sm:$0xff]  ;;  %v14737_v39 = vpack.c.bf16 %v14735_v10, %v14736_v59  ;;  %v12135_v50 = vpop.f32.mrf.mxu2 }
 0x3e0   : > { %v5618_v15 = vsel %vm560_vm0, %v5546_v36, 0.0  ;;  %v4960_v34 = vpop.f32.mrf.mxu1  ;;  %v14734_v46 = vpack.i.bf16 %v14732_v43, %v14733_v9  ;;  %14738 = vst [vmem:[#allocation147_spill] sm:$0xff] %v12135_v50  ;;  %v6879_v20 = vunpack.i.l.bf16 %v12078_v0 }
 0x3e1   : > { %v12117_v17 = vpop.permute.xlu2 %6892  ;;  %v5619_v60 = vadd.f32 %v5618_v15, %v5617_v40  ;;  %v4961_v8 = vadd.f32 %v4960_v34, %v14731_v58  ;;  %v4311_v56 = vsel %vm4035_vm2, %v4239_v2, %v6844_v55  ;;  %v4312_v36 = vsel %vm4035_vm2, %v4240_v23, %v6845_v52  ;;  %v14741_v40 = vld [vmem:[#allocation106_spill] sm:$0xff]  ;;  %v1919_v52 = vld [vmem:[#allocation2 + $0x1c1] sm:$0xff] }
 0x3e2   : > { %4840 = vmatmul.bf16.gmra.mxu0 %v14737_v39  ;;  %v6880_v58 = vunpack.i.h.bf16 %v12078_v0  ;;  %v14742_v15 = vpack.i.bf16 %v14740_v16, %v14741_v40  ;;  %v14743_v2 = vpack.c.bf16 %v11772_v6, %v11769_v30  ;;  %v4383_v0 = vsel %vm4108_vm3, %v4311_v56, %v6854_v54  ;;  %v14744_v6 = vld [vmem:[#allocation143_spill] sm:$0xff] }
 0x3e3   : > { %v5150_v43 = vadd.f32 %v14739_v38, %v4961_v8  ;;  %v4384_v8 = vsel %vm4108_vm3, %v4312_v36, %v6855_v57  ;;  %v14745_v40 = vld [vmem:[#allocation23_spill] sm:$0xff]  ;;  %v7091_v54 = vpack.i.bf16 %v11960_v35, %v1919_v52  ;;  %v14747_v52 = vld [vmem:[#allocation272_spill] sm:$0xff] }
 0x3e4   : > { %7067 = vrot.lane.b32.xlu1 %v14734_v46, %s7319_s30  ;;  %7077 = vrot.lane.b32.xlu0 %v7076_v13, %s7321_s18  ;;  %v6868_v55 = vpop.permute.xlu0 %6867  ;;  %v12161_v56 = vpop.f32.mrf.mxu0  ;;  %v4485_v36 = vpack.c.bf16 %v4384_v8, %v4383_v0 }
 0x3e5   : > { %4999 = vmatmul.bf16.gmra.mxu1 %v14743_v2  ;;  %5326 = vst.msk [vmem:[%s12060_s24 + $0x10] sm:$0xff] %vm560_vm0, %v5150_v43  ;;  %v5399_v46 = vsel %vm560_vm0, %v5150_v43, 0.0  ;;  %v5547_v10 = vmul.f32 %v5150_v43, %v5150_v43  ;;  %v6870_v59 = vunpack.i.h.bf16 %v6868_v55  ;;  %v6869_v39 = vunpack.i.l.bf16 %v6868_v55 }
 0x3e6   : > { %v6858_v34 = vpop.permute.xlu1 %6857  ;;  %v12147_v9 = vpop.f32.mrf.mxu3  ;;  %v5400_v30 = vadd.f32 %v5399_v46, %v5398_v14  ;;  %v14748_v46 = vld [vmem:[#allocation270_spill] sm:$0xff] }
 0x3e7   : > { %7072 = vrot.lane.b32.xlu2 %v14742_v15, %s7320_s17  ;;  %v6860_v13 = vunpack.i.h.bf16 %v6858_v34  ;;  %v6859_v23 = vunpack.i.l.bf16 %v6858_v34  ;;  %v5620_v57 = vsel %vm560_vm0, %v5547_v10, 0.0  ;;  %v14749_v10 = vpack.i.bf16 %v14747_v52, %v14748_v46  ;;  %v14755_v52 = vld [vmem:[#allocation30_spill] sm:$0xff] }
 0x3e8   : > { %v5621_v2 = vadd.f32 %v5620_v57, %v5619_v60  ;;  %v4962_v55 = vpop.f32.mrf.mxu1  ;;  %v6865_v60 = vunpack.i.h.bf16 %v12037_v53  ;;  %v12189_v57 = vpop.f32.mrf.mxu2 }
 0x3e9   : > { %v12154_v38 = vpop.permute.xlu2 %6907  ;;  %v4214_v16 = vsel %vm560_vm0, %v14744_v6, %v6860_v13  ;;  %v4213_v15 = vsel %vm560_vm0, %v14745_v40, %v6859_v23  ;;  %v14746_v23 = vld [vmem:[#allocation203_spill] sm:$0xff]  ;;  %14754 = vst [vmem:[#allocation145_spill] sm:$0xff] %v12189_v57 }
 0x3ea   : > { %v4285_v43 = vsel %vm4035_vm2, %v4213_v15, %v6869_v39  ;;  %v4286_v34 = vsel %vm4035_vm2, %v4214_v16, %v6870_v59  ;;  %v4963_v35 = vadd.f32 %v4962_v55, %v14746_v23  ;;  %v14752_v59 = vld [vmem:[#allocation112_spill] sm:$0xff]  ;;  %v6864_v16 = vunpack.i.l.bf16 %v12037_v53 }
 0x3eb   : > { %v12167_v14 = vsel %vm4108_vm3, %v4285_v43, %v6879_v20  ;;  %v12170_v13 = vsel %vm4108_vm3, %v4286_v34, %v6880_v58  ;;  %5099 = vmatmul.bf16.gmra.mxu3 %v4485_v36  ;;  %v14750_v20 = vld [vmem:[#allocation305_spill] sm:$0xff]  ;;  %v4242_v53 = vsel %vm560_vm0, %v14755_v52, %v6865_v60 }
 0x3ec   : > { %7082 = vrot.lane.b32.xlu1 %v14749_v10, %s7319_s30  ;;  %7092 = vrot.lane.b32.xlu0 %v7091_v54, %s7321_s18  ;;  %v5152_v8 = vadd.f32 %v14750_v20, %v4963_v35  ;;  %v14751_v58 = vld [vmem:[#allocation113_spill] sm:$0xff]  ;;  %v6883_v40 = vpop.permute.xlu0 %6882  ;;  %v7106_v35 = vpack.i.bf16 %v12035_v32, %v11962_v37  ;;  %v7277_v10 = vld [vmem:[#allocation2 + $0x1f9] sm:$0xff]  ;;  %v12202_v0 = vpop.f32.mrf.mxu0  ;;  %v14757_v32 = vld [vmem:[#allocation274_spill] sm:$0xff] }
 0x3ed   : > { %v14753_v39 = vpack.i.bf16 %v14751_v58, %v14752_v59  ;;  %v4241_v20 = vsel %vm560_vm0, %v7277_v10, %v6864_v16  ;;  %v6885_v59 = vunpack.i.h.bf16 %v6883_v40  ;;  %v14758_v60 = vld [vmem:[#allocation269_spill] sm:$0xff]  ;;  %v14761_v16 = vld [vmem:[#allocation19_spill] sm:$0xff] }
 0x3ee   : > { %v6873_v6 = vpop.permute.xlu1 %6872  ;;  %v12187_v15 = vpop.f32.mrf.mxu3  ;;  %5327 = vst.msk [vmem:[%s12060_s24 + $0x18] sm:$0xff] %vm560_vm0, %v5152_v8  ;;  %v5401_v54 = vsel %vm560_vm0, %v5152_v8, 0.0  ;;  %v5548_v36 = vmul.f32 %v5152_v8, %v5152_v8  ;;  %v14759_v52 = vpack.i.bf16 %v14757_v32, %v14758_v60  ;;  %v14765_v10 = vld [vmem:[#allocation111_spill] sm:$0xff] }
 0x3ef   : > { %7087 = vrot.lane.b32.xlu2 %v14753_v39, %s7320_s17  ;;  %v6875_v43 = vunpack.i.h.bf16 %v6873_v6  ;;  %v6874_v34 = vunpack.i.l.bf16 %v6873_v6  ;;  %v5402_v23 = vadd.f32 %v5401_v54, %v5400_v30  ;;  %v6884_v39 = vunpack.i.l.bf16 %v6883_v40  ;;  %v14756_v54 = vld [vmem:[#allocation214_spill] sm:$0xff] }
 0x3f0   : > { %v5622_v46 = vsel %vm560_vm0, %v5548_v36, 0.0  ;;  %v4965_v8 = vpop.f32.mrf.mxu1  ;;  %v14760_v36 = vld [vmem:[#allocation5_spill] sm:$0xff]  ;;  %v6910_v40 = vunpack.i.h.bf16 %v12154_v38 }
 0x3f1   : > { %v12194_v55 = vpop.permute.xlu2 %6922  ;;  %v5623_v58 = vadd.f32 %v5622_v46, %v5621_v2  ;;  %v4313_v6 = vsel %vm4035_vm2, %v4241_v20, %v6874_v34  ;;  %v4314_v30 = vsel %vm4035_vm2, %v4242_v53, %v6875_v43  ;;  %v4966_v37 = vadd.f32 %v4965_v8, %v14756_v54  ;;  %v14763_v46 = vld [vmem:[#allocation317_spill] sm:$0xff]  ;;  %v14764_v53 = vld [vmem:[#allocation110_spill] sm:$0xff] }
 0x3f2   : > { %v14762_v2 = vpack.c.bf16 %v14760_v36, %v14761_v16  ;;  %v6909_v34 = vunpack.i.l.bf16 %v12154_v38  ;;  %v14766_v20 = vpack.i.bf16 %v14764_v53, %v14765_v10  ;;  %v14767_v54 = vpack.c.bf16 %v11809_v41, %v11806_v22  ;;  %v14768_v41 = vld [vmem:[#allocation17_spill] sm:$0xff] }
 0x3f3   : > { %v5155_v43 = vadd.f32 %v14763_v46, %v4966_v37  ;;  %v4385_v36 = vsel %vm4108_vm3, %v4313_v6, %v6884_v39  ;;  %v4386_v38 = vsel %vm4108_vm3, %v4314_v30, %v6885_v59 }
 0x3f4   : > { %7097 = vrot.lane.b32.xlu1 %v14759_v52, %s7319_s30  ;;  %4845 = vmatmul.bf16.gmra.mxu0 %v14762_v2  ;;  %v6898_v32 = vpop.permute.xlu0 %6897  ;;  %v4488_v39 = vpack.c.bf16 %v4386_v38, %v4385_v36  ;;  %v6895_v36 = vunpack.i.h.bf16 %v12117_v17  ;;  %v12252_v38 = vpop.f32.mrf.mxu0 }
 0x3f5   : > { %7107 = vrot.lane.b32.xlu0 %v7106_v35, %s7321_s18  ;;  %5004 = vmatmul.bf16.gmra.mxu1 %v14767_v54  ;;  %5328 = vst.msk [vmem:[%s12060_s24 + $0x20] sm:$0xff] %vm560_vm0, %v5155_v43  ;;  %v5403_v37 = vsel %vm560_vm0, %v5155_v43, 0.0  ;;  %v5549_v16 = vmul.f32 %v5155_v43, %v5155_v43  ;;  %v6900_v2 = vunpack.i.h.bf16 %v6898_v32  ;;  %v6899_v46 = vunpack.i.l.bf16 %v6898_v32  ;;  %v12237_v54 = vpop.f32.mrf.mxu2  ;;  %s262_s18 = scalar_lea.vmem %s13089_s6, %s5863_s19 }
 0x3f6   : > { %v6888_v8 = vpop.permute.xlu1 %6887  ;;  %v12225_v35 = vpop.f32.mrf.mxu3  ;;  %v5404_v22 = vadd.f32 %v5403_v37, %v5402_v23  ;;  %14769 = vst [vmem:[#allocation15_spill] sm:$0xff] %v12237_v54 }
 0x3f7   : > { %7102 = vrot.lane.b32.xlu2 %v14766_v20, %s7320_s17  ;;  %v6890_v60 = vunpack.i.h.bf16 %v6888_v8  ;;  %v6889_v52 = vunpack.i.l.bf16 %v6888_v8  ;;  %v7278_v20 = vld [vmem:[#allocation2 + $0x129] sm:$0xff]  ;;  %v5624_v59 = vsel %vm560_vm0, %v5549_v16, 0.0  ;;  %v14770_v16 = vld [vmem:[#allocation324_spill] sm:$0xff] }
 0x3f8   : > { %v5625_v43 = vadd.f32 %v5624_v59, %v5623_v58  ;;  %v4967_v32 = vpop.f32.mrf.mxu1  ;;  %v7279_v59 = vld [vmem:[#allocation2 + $0x211] sm:$0xff] }
 0x3f9   : > { %v12232_v53 = vpop.permute.xlu2 %6937  ;;  %v4216_v10 = vsel %vm560_vm0, %v14768_v41, %v6890_v60  ;;  %v4215_v8 = vsel %vm560_vm0, %v7278_v20, %v6889_v52  ;;  %v4968_v52 = vadd.f32 %v4967_v32, %v11762_v27  ;;  %v7280_v32 = vld [vmem:[#allocation2 + $0x209] sm:$0xff] }
 0x3fa   : > { %v4287_v6 = vsel %vm4035_vm2, %v4215_v8, %v6899_v46  ;;  %v4288_v30 = vsel %vm4035_vm2, %v4216_v10, %v6900_v2  ;;  %v6894_v46 = vunpack.i.l.bf16 %v12117_v17 }
 0x3fb   : > { %v12243_v23 = vsel %vm4108_vm3, %v4287_v6, %v6909_v34  ;;  %v12246_v60 = vsel %vm4108_vm3, %v4288_v30, %v6910_v40  ;;  %5104 = vmatmul.bf16.gmra.mxu3 %v4488_v39  ;;  %v5157_v2 = vadd.f32 %v14770_v16, %v4968_v52  ;;  %v4244_v39 = vsel %vm560_vm0, %v7279_v59, %v6895_v36 }
 0x3fc   : > { %v6913_v34 = vpop.permute.xlu0 %6912  ;;  %v4243_v17 = vsel %vm560_vm0, %v7280_v32, %v6894_v46  ;;  %v6940_v59 = vunpack.i.h.bf16 %v12232_v53  ;;  %v14775_v46 = vld [vmem:[#allocation327_spill] sm:$0xff]  ;;  %v14776_v32 = vpack.c.bf16 %v11856_v7, %v11853_v28  ;;  %v7281_v7 = vld [vmem:[#allocation2 + $0x141] sm:$0xff] }
 0x3fd   : > { %5329 = vst.msk [vmem:[%s12060_s24 + $0x28] sm:$0xff] %vm560_vm0, %v5157_v2  ;;  %v5405_v27 = vsel %vm560_vm0, %v5157_v2, 0.0  ;;  %v5550_v40 = vmul.f32 %v5157_v2, %v5157_v2  ;;  %v6915_v16 = vunpack.i.h.bf16 %v6913_v34  ;;  %v6914_v37 = vunpack.i.l.bf16 %v6913_v34  ;;  %v12266_v57 = vpop.f32.mrf.mxu2 }
 0x3fe   : > { %v6903_v58 = vpop.permute.xlu1 %6902  ;;  %v12256_v41 = vpop.f32.mrf.mxu3  ;;  %v5406_v8 = vadd.f32 %v5405_v27, %v5404_v22  ;;  %14771 = vst [vmem:[#allocation14_spill] sm:$0xff] %v12266_v57  ;;  %v14773_v27 = vld [vmem:[#allocation325_spill] sm:$0xff] }
 0x3ff   : > { %v6905_v10 = vunpack.i.h.bf16 %v6903_v58  ;;  %v6904_v20 = vunpack.i.l.bf16 %v6903_v58  ;;  %v5626_v6 = vsel %vm560_vm0, %v5550_v40, 0.0  ;;  %v14772_v58 = vld [vmem:[#allocation156_spill] sm:$0xff] }
 0x400   : > { %v5627_v52 = vadd.f32 %v5626_v6, %v5625_v43  ;;  %v4970_v54 = vpop.f32.mrf.mxu1  ;;  %v14774_v40 = vpack.c.bf16 %v14772_v58, %v14773_v27  ;;  %v6939_v43 = vunpack.i.l.bf16 %v12232_v53  ;;  %v12284_v58 = vpop.f32.mrf.mxu0 }
 0x401   : > { %v12263_v30 = vpop.permute.xlu2 %6952  ;;  %v4315_v2 = vsel %vm4035_vm2, %v4243_v17, %v6904_v20  ;;  %v4316_v22 = vsel %vm4035_vm2, %v4244_v39, %v6905_v10  ;;  %v4971_v36 = vadd.f32 %v4970_v54, %v11812_v42 }
 0x402   : > { %v4387_v42 = vsel %vm4108_vm3, %v4315_v2, %v6914_v37  ;;  %v4388_v54 = vsel %vm4108_vm3, %v4316_v22, %v6915_v16 }
 0x403   : > { %v5160_v34 = vadd.f32 %v14775_v46, %v4971_v36  ;;  %v4491_v2 = vpack.c.bf16 %v4388_v54, %v4387_v42  ;;  %v6925_v54 = vunpack.i.h.bf16 %v12194_v55 }
 0x404   : > { %4850 = vmatmul.bf16.gmra.mxu0 %v14774_v40  ;;  %v6928_v20 = vpop.permute.xlu0 %6927 }
 0x405   : > { %5009 = vmatmul.bf16.gmra.mxu1 %v14776_v32  ;;  %5330 = vst.msk [vmem:[%s12060_s24 + $0x30] sm:$0xff] %vm560_vm0, %v5160_v34  ;;  %v5407_v53 = vsel %vm560_vm0, %v5160_v34, 0.0  ;;  %v5551_v36 = vmul.f32 %v5160_v34, %v5160_v34  ;;  %v6930_v27 = vunpack.i.h.bf16 %v6928_v20  ;;  %v6929_v40 = vunpack.i.l.bf16 %v6928_v20  ;;  %v12305_v42 = vpop.f32.mrf.mxu2 }
 0x406   : > { %v6918_v6 = vpop.permute.xlu1 %6917  ;;  %v12280_v39 = vpop.f32.mrf.mxu3  ;;  %v5408_v28 = vadd.f32 %v5407_v53, %v5406_v8  ;;  %14777 = vst [vmem:[#allocation255_spill] sm:$0xff] %v12305_v42 }
 0x407   : > { %v6920_v17 = vunpack.i.h.bf16 %v6918_v6  ;;  %v6919_v10 = vunpack.i.l.bf16 %v6918_v6  ;;  %v7282_v6 = vld [vmem:[#allocation2 + $0x139] sm:$0xff]  ;;  %v5628_v37 = vsel %vm560_vm0, %v5551_v36, 0.0 }
 0x408   : > { %v5629_v57 = vadd.f32 %v5628_v37, %v5627_v52  ;;  %v4972_v50 = vpop.f32.mrf.mxu1  ;;  %v14778_v52 = vld [vmem:[#allocation161_spill] sm:$0xff]  ;;  %v12316_v37 = vpop.f32.mrf.mxu0 }
 0x409   : > { %v4218_v46 = vsel %vm560_vm0, %v7281_v7, %v6920_v17  ;;  %v4217_v32 = vsel %vm560_vm0, %v7282_v6, %v6919_v10  ;;  %v12300_v20 = vpop.permute.xlu2 %6967  ;;  %v4973_v17 = vadd.f32 %v4972_v50, %v11872_v21  ;;  %v7283_v6 = vld [vmem:[#allocation2 + $0x221] sm:$0xff] }
 0x40a   : > { %v4289_v16 = vsel %vm4035_vm2, %v4217_v32, %v6929_v40  ;;  %v4290_v22 = vsel %vm4035_vm2, %v4218_v46, %v6930_v27  ;;  %v4246_v32 = vsel %vm560_vm0, %v7283_v6, %v6925_v54  ;;  %v14780_v54 = vld [vmem:[#allocation165_spill] sm:$0xff]  ;;  %v6969_v6 = vunpack.i.l.bf16 %v12300_v20 }
 0x40b   : > { %v12295_v34 = vsel %vm4108_vm3, %v4289_v16, %v6939_v43  ;;  %v12298_v8 = vsel %vm4108_vm3, %v4290_v22, %v6940_v59  ;;  %5109 = vmatmul.bf16.gmra.mxu3 %v4491_v2  ;;  %v5162_v53 = vadd.f32 %v14778_v52, %v4973_v17  ;;  %v6924_v43 = vunpack.i.l.bf16 %v12194_v55  ;;  %v7284_v16 = vld [vmem:[#allocation2 + $0x219] sm:$0xff] }
 0x40c   : > { %v6943_v27 = vpop.permute.xlu0 %6942 }
 0x40d   : > { %5331 = vst.msk [vmem:[%s12060_s24 + $0x38] sm:$0xff] %vm560_vm0, %v5162_v53  ;;  %v5409_v21 = vsel %vm560_vm0, %v5162_v53, 0.0  ;;  %v5552_v50 = vmul.f32 %v5162_v53, %v5162_v53  ;;  %v4245_v55 = vsel %vm560_vm0, %v7284_v16, %v6924_v43  ;;  %v6945_v17 = vunpack.i.h.bf16 %v6943_v27 }
 0x40e   : > { %v6933_v36 = vpop.permute.xlu1 %6932  ;;  %v12310_v59 = vpop.f32.mrf.mxu3  ;;  %v5410_v46 = vadd.f32 %v5409_v21, %v5408_v28  ;;  %v6944_v52 = vunpack.i.l.bf16 %v6943_v27 }
 0x40f   : > { %v6935_v40 = vunpack.i.h.bf16 %v6933_v36  ;;  %v6934_v7 = vunpack.i.l.bf16 %v6933_v36  ;;  %v5630_v2 = vsel %vm560_vm0, %v5552_v50, 0.0  ;;  %v14779_v36 = vld [vmem:[#allocation160_spill] sm:$0xff]  ;;  %v6970_v50 = vunpack.i.h.bf16 %v12300_v20 }
 0x410   : > { %v5631_v22 = vadd.f32 %v5630_v2, %v5629_v57  ;;  %v4975_v10 = vpop.f32.mrf.mxu1  ;;  %v14781_v21 = vpack.c.bf16 %v14779_v36, %v14780_v54  ;;  %v14782_v57 = vld [vmem:[#allocation169_spill] sm:$0xff]  ;;  %v12338_v36 = vpop.f32.mrf.mxu2 }
 0x411   : > { %v4317_v42 = vsel %vm4035_vm2, %v4245_v55, %v6934_v7  ;;  %v4318_v53 = vsel %vm4035_vm2, %v4246_v32, %v6935_v40  ;;  %v4976_v28 = vadd.f32 %v4975_v10, %v11920_v31  ;;  %v12328_v43 = vpop.permute.xlu2 %6982  ;;  %v14783_v7 = vpack.c.bf16 %v11895_v19, %v11892_v1  ;;  %14785 = vst [vmem:[#allocation245_spill] sm:$0xff] %v12338_v36  ;;  %v7285_v19 = vld [vmem:[#allocation2 + $0x151] sm:$0xff] }
 0x412   : > { %v4389_v16 = vsel %vm4108_vm3, %v4317_v42, %v6944_v52  ;;  %v4390_v55 = vsel %vm4108_vm3, %v4318_v53, %v6945_v17 }
 0x413   : > { %v5165_v27 = vadd.f32 %v14782_v57, %v4976_v28  ;;  %v4494_v52 = vpack.c.bf16 %v4390_v55, %v4389_v16  ;;  %v6955_v16 = vunpack.i.h.bf16 %v12263_v30  ;;  %v14786_v55 = vld [vmem:[#allocation179_spill] sm:$0xff] }
 0x414   : > { %4855 = vmatmul.bf16.gmra.mxu0 %v14781_v21  ;;  %v6958_v40 = vpop.permute.xlu0 %6957 }
 0x415   : > { %5014 = vmatmul.bf16.gmra.mxu1 %v14783_v7  ;;  %5332 = vst.msk [vmem:[%s12060_s24 + $0x40] sm:$0xff] %vm560_vm0, %v5165_v27  ;;  %v5411_v20 = vsel %vm560_vm0, %v5165_v27, 0.0  ;;  %v5553_v28 = vmul.f32 %v5165_v27, %v5165_v27  ;;  %v6960_v54 = vunpack.i.h.bf16 %v6958_v40  ;;  %v6959_v21 = vunpack.i.l.bf16 %v6958_v40  ;;  %v12354_v40 = vpop.f32.mrf.mxu0 }
 0x416   : > { %v6948_v2 = vpop.permute.xlu1 %6947  ;;  %v12334_v10 = vpop.f32.mrf.mxu3  ;;  %v5412_v1 = vadd.f32 %v5411_v20, %v5410_v46 }
 0x417   : > { %v6950_v32 = vunpack.i.h.bf16 %v6948_v2  ;;  %v6949_v31 = vunpack.i.l.bf16 %v6948_v2  ;;  %14784 = vst [vmem:[#allocation254_spill] sm:$0xff] %v12334_v10  ;;  %v7286_v2 = vld [vmem:[#allocation2 + $0x149] sm:$0xff]  ;;  %v5632_v42 = vsel %vm560_vm0, %v5553_v28, 0.0  ;;  %v6954_v28 = vunpack.i.l.bf16 %v12263_v30 }
 0x418   : > { %v5633_v36 = vadd.f32 %v5632_v42, %v5631_v22  ;;  %v4977_v10 = vpop.f32.mrf.mxu1  ;;  %v7288_v30 = vld [vmem:[#allocation2 + $0x229] sm:$0xff] }
 0x419   : > { %v4220_v57 = vsel %vm560_vm0, %v7285_v19, %v6950_v32  ;;  %v4219_v7 = vsel %vm560_vm0, %v7286_v2, %v6949_v31  ;;  %v4978_v32 = vadd.f32 %v4977_v10, %v11970_v62  ;;  %v6998_v19 = vpop.permute.xlu2 %6997  ;;  %v12367_v2 = vpop.f32.mrf.mxu2 }
 0x41a   : > { %v4291_v17 = vsel %vm4035_vm2, %v4219_v7, %v6959_v21  ;;  %v4292_v53 = vsel %vm4035_vm2, %v4220_v57, %v6960_v54  ;;  %14788 = vst [vmem:[#allocation280_spill] sm:$0xff] %v12367_v2  ;;  %v7287_v7 = vld [vmem:[#allocation2 + $0x231] sm:$0xff] }
 0x41b   : > { %v12349_v27 = vsel %vm4108_vm3, %v4291_v17, %v6969_v6  ;;  %v12352_v46 = vsel %vm4108_vm3, %v4292_v53, %v6970_v50  ;;  %5114 = vmatmul.bf16.gmra.mxu3 %v4494_v52  ;;  %v5167_v20 = vadd.f32 %v14786_v55, %v4978_v32  ;;  %v4248_v42 = vsel %vm560_vm0, %v7287_v7, %v6955_v16  ;;  %v14790_v2 = vld [vmem:[#allocation102_spill] sm:$0xff] }
 0x41c   : > { %v6973_v6 = vpop.permute.xlu0 %6972  ;;  %v4247_v17 = vsel %vm560_vm0, %v7288_v30, %v6954_v28  ;;  %v6999_v7 = vunpack.i.l.bf16 %v6998_v19  ;;  %v14792_v28 = vld [vmem:[#allocation202_spill] sm:$0xff] }
 0x41d   : > { %5333 = vst.msk [vmem:[%s12060_s24 + $0x48] sm:$0xff] %vm560_vm0, %v5167_v20  ;;  %v5413_v50 = vsel %vm560_vm0, %v5167_v20, 0.0  ;;  %v5554_v21 = vmul.f32 %v5167_v20, %v5167_v20  ;;  %v6975_v32 = vunpack.i.h.bf16 %v6973_v6  ;;  %v6974_v55 = vunpack.i.l.bf16 %v6973_v6  ;;  %v12378_v16 = vpop.f32.mrf.mxu0 }
 0x41e   : > { %v6963_v22 = vpop.permute.xlu1 %6962  ;;  %v12362_v54 = vpop.f32.mrf.mxu3  ;;  %v5414_v57 = vadd.f32 %v5413_v50, %v5412_v1  ;;  %v14789_v50 = vld [vmem:[#allocation121_spill] sm:$0xff]  ;;  %v14793_v6 = vpack.c.bf16 %v11936_v11, %v11933_v44  ;;  %v7290_v11 = vld [vmem:[#allocation2 + $0x159] sm:$0xff] }
 0x41f   : > { %14787 = vst [vmem:[#allocation238_spill] sm:$0xff] %v12362_v54  ;;  %v6965_v62 = vunpack.i.h.bf16 %v6963_v22  ;;  %v6964_v10 = vunpack.i.l.bf16 %v6963_v22  ;;  %v5634_v52 = vsel %vm560_vm0, %v5554_v21, 0.0  ;;  %v14791_v54 = vpack.c.bf16 %v14789_v50, %v14790_v2  ;;  %v7289_v50 = vld [vmem:[#allocation2 + $0x161] sm:$0xff] }
 0x420   : > { %v5635_v53 = vadd.f32 %v5634_v52, %v5633_v36  ;;  %v4980_v31 = vpop.f32.mrf.mxu1  ;;  %v7000_v21 = vunpack.i.h.bf16 %v6998_v19 }
 0x421   : > { %v4319_v20 = vsel %vm4035_vm2, %v4247_v17, %v6964_v10  ;;  %v4320_v22 = vsel %vm4035_vm2, %v4248_v42, %v6965_v62  ;;  %v4981_v1 = vadd.f32 %v4980_v31, %v12020_v63 }
 0x422   : > { %v4391_v63 = vsel %vm4108_vm3, %v4319_v20, %v6974_v55  ;;  %v4392_v31 = vsel %vm4108_vm3, %v4320_v22, %v6975_v32  ;;  %v12396_v20 = vpop.permute.xlu2 %7012 }
 0x423   : > { %v5170_v36 = vadd.f32 %v14792_v28, %v4981_v1 }
 0x424   : > { %4860 = vmatmul.bf16.gmra.mxu0 %v14791_v54 }
 0x425   : > { %5019 = vmatmul.bf16.gmra.mxu1 %v14793_v6  ;;  %5334 = vst.msk [vmem:[%s12060_s24 + $0x50] sm:$0xff] %vm560_vm0, %v5170_v36  ;;  %v5415_v54 = vsel %vm560_vm0, %v5170_v36, 0.0  ;;  %v5555_v19 = vmul.f32 %v5170_v36, %v5170_v36  ;;  %v4497_v6 = vpack.c.bf16 %v4392_v31, %v4391_v63  ;;  %v6985_v31 = vunpack.i.h.bf16 %v12328_v43 }
 0x426   : > { %v6978_v52 = vpop.permute.xlu1 %6977  ;;  %v6988_v10 = vpop.permute.xlu0 %6987  ;;  %v5416_v1 = vadd.f32 %v5415_v54, %v5414_v57  ;;  %v14795_v54 = vld [vmem:[#allocation198_spill] sm:$0xff] }
 0x427   : > { %v6980_v30 = vunpack.i.h.bf16 %v6978_v52  ;;  %v6979_v62 = vunpack.i.l.bf16 %v6978_v52  ;;  %v12384_v42 = vpop.f32.mrf.mxu3  ;;  %v6990_v2 = vunpack.i.h.bf16 %v6988_v10  ;;  %v6989_v17 = vunpack.i.l.bf16 %v6988_v10 }
 0x428   : > { %v5636_v52 = vsel %vm560_vm0, %v5555_v19, 0.0  ;;  %v4982_v36 = vpop.f32.mrf.mxu1 }
 0x429   : > { %v4222_v44 = vsel %vm560_vm0, %v7289_v50, %v6980_v30  ;;  %v4221_v28 = vsel %vm560_vm0, %v7290_v11, %v6979_v62  ;;  %v5637_v22 = vadd.f32 %v5636_v52, %v5635_v53  ;;  %v12404_v30 = vpop.f32.mrf.mxu2  ;;  %v4983_v62 = vadd.f32 %v4982_v36, %v12065_v24  ;;  %v12417_v11 = vpop.f32.mrf.mxu0  ;;  %v7291_v52 = vld [vmem:[#allocation2 + $0x241] sm:$0xff] }
 0x42a   : > { %v4293_v55 = vsel %vm4035_vm2, %v4221_v28, %v6989_v17  ;;  %v4294_v32 = vsel %vm4035_vm2, %v4222_v44, %v6990_v2  ;;  %14794 = vst [vmem:[#allocation91_spill] sm:$0xff] %v12404_v30  ;;  %v6984_v2 = vunpack.i.l.bf16 %v12328_v43 }
 0x42b   : > { %v12399_v57 = vsel %vm4108_vm3, %v4293_v55, %v6999_v7  ;;  %v12402_v10 = vsel %vm4108_vm3, %v4294_v32, %v7000_v21  ;;  %5119 = vmatmul.bf16.gmra.mxu3 %v4497_v6  ;;  %v5172_v19 = vadd.f32 %v14795_v54, %v4983_v62  ;;  %v4250_v6 = vsel %vm560_vm0, %v7291_v52, %v6985_v31  ;;  %v7292_v32 = vld [vmem:[#allocation2 + $0x239] sm:$0xff]  ;;  %v7028_v31 = vpop.permute.xlu2 %7027 }
 0x42c   : > { %v4249_v43 = vsel %vm560_vm0, %v7292_v32, %v6984_v2  ;;  %v7030_v52 = vunpack.i.h.bf16 %v7028_v31  ;;  %v7029_v2 = vunpack.i.l.bf16 %v7028_v31 }
 0x42d   : > { %5335 = vst.msk [vmem:[%s12060_s24 + $0x58] sm:$0xff] %vm560_vm0, %v5172_v19  ;;  %v5417_v21 = vsel %vm560_vm0, %v5172_v19, 0.0  ;;  %v5556_v50 = vmul.f32 %v5172_v19, %v5172_v19 }
 0x42e   : > { %v6993_v53 = vpop.permute.xlu1 %6992  ;;  %v7003_v7 = vpop.permute.xlu0 %7002  ;;  %v5418_v28 = vadd.f32 %v5417_v21, %v5416_v1  ;;  %v14797_v1 = vld [vmem:[#allocation176_spill] sm:$0xff]  ;;  %v14798_v21 = vld [vmem:[#allocation190_spill] sm:$0xff] }
 0x42f   : > { %v12412_v17 = vpop.f32.mrf.mxu3  ;;  %v6995_v24 = vunpack.i.h.bf16 %v6993_v53  ;;  %v6994_v44 = vunpack.i.l.bf16 %v6993_v53  ;;  %v5638_v55 = vsel %vm560_vm0, %v5556_v50, 0.0  ;;  %v7005_v62 = vunpack.i.h.bf16 %v7003_v7 }
 0x430   : > { %14796 = vst [vmem:[#allocation188_spill] sm:$0xff] %v12412_v17  ;;  %v5639_v36 = vadd.f32 %v5638_v55, %v5637_v22  ;;  %v7004_v54 = vunpack.i.l.bf16 %v7003_v7  ;;  %v4985_v63 = vpop.f32.mrf.mxu1  ;;  %v14799_v17 = vpack.c.bf16 %v14797_v1, %v14798_v21  ;;  %v14801_v22 = vld [vmem:[#allocation215_spill] sm:$0xff] }
 0x431   : > { %v4321_v30 = vsel %vm4035_vm2, %v4249_v43, %v6994_v44  ;;  %v4322_v19 = vsel %vm4035_vm2, %v4250_v6, %v6995_v24  ;;  %v4986_v53 = vadd.f32 %v4985_v63, %v12112_v47  ;;  %v12428_v50 = vpop.f32.mrf.mxu2  ;;  %v14802_v44 = vpack.c.bf16 %v12018_v4, %v12015_v5  ;;  %v7294_v4 = vld [vmem:[#allocation2 + $0x169] sm:$0xff] }
 0x432   : > { %14800 = vst [vmem:[#allocation216_spill] sm:$0xff] %v12428_v50  ;;  %v4393_v63 = vsel %vm4108_vm3, %v4321_v30, %v7004_v54  ;;  %v12446_v54 = vpop.f32.mrf.mxu0 }
 0x433   : > { %v5175_v55 = vadd.f32 %v14801_v22, %v4986_v53  ;;  %v7293_v22 = vld [vmem:[#allocation2 + $0x171] sm:$0xff] }
 0x434   : > { %4865 = vmatmul.bf16.gmra.mxu0 %v14799_v17  ;;  %v4394_v17 = vsel %vm4108_vm3, %v4322_v19, %v7005_v62 }
 0x435   : > { %5024 = vmatmul.bf16.gmra.mxu1 %v14802_v44  ;;  %5336 = vst.msk [vmem:[%s12060_s24 + $0x60] sm:$0xff] %vm560_vm0, %v5175_v55  ;;  %v5419_v43 = vsel %vm560_vm0, %v5175_v55, 0.0  ;;  %v5557_v1 = vmul.f32 %v5175_v55, %v5175_v55  ;;  %v4500_v50 = vpack.c.bf16 %v4394_v17, %v4393_v63  ;;  %v7015_v63 = vunpack.i.h.bf16 %v12396_v20  ;;  %v14803_v17 = vld [vmem:[#allocation186_spill] sm:$0xff] }
 0x436   : > { %v7008_v7 = vpop.permute.xlu1 %7007  ;;  %v7018_v24 = vpop.permute.xlu0 %7017  ;;  %v5420_v31 = vadd.f32 %v5419_v43, %v5418_v28 }
 0x437   : > { %v7010_v6 = vunpack.i.h.bf16 %v7008_v7  ;;  %v7009_v32 = vunpack.i.l.bf16 %v7008_v7  ;;  %v12434_v47 = vpop.f32.mrf.mxu3  ;;  %v7020_v53 = vunpack.i.h.bf16 %v7018_v24  ;;  %v7019_v21 = vunpack.i.l.bf16 %v7018_v24 }
 0x438   : > { %v5640_v44 = vsel %vm560_vm0, %v5557_v1, 0.0  ;;  %v4987_v55 = vpop.f32.mrf.mxu1 }
 0x439   : > { %v4224_v5 = vsel %vm560_vm0, %v7293_v22, %v7010_v6  ;;  %v4223_v7 = vsel %vm560_vm0, %v7294_v4, %v7009_v32  ;;  %v5641_v19 = vadd.f32 %v5640_v44, %v5639_v36  ;;  %v4988_v6 = vadd.f32 %v4987_v55, %v12161_v56  ;;  %v12465_v22 = vpop.f32.mrf.mxu2  ;;  %v7295_v4 = vld [vmem:[#allocation2 + $0x251] sm:$0xff] }
 0x43a   : > { %v4295_v30 = vsel %vm4035_vm2, %v4223_v7, %v7019_v21  ;;  %v4296_v62 = vsel %vm4035_vm2, %v4224_v5, %v7020_v53  ;;  %v7014_v36 = vunpack.i.l.bf16 %v12396_v20  ;;  %14804 = vst [vmem:[#allocation148_spill] sm:$0xff] %v12465_v22  ;;  %v4252_v7 = vsel %vm560_vm0, %v7295_v4, %v7015_v63  ;;  %v12476_v63 = vpop.f32.mrf.mxu0 }
 0x43b   : > { %v12449_v28 = vsel %vm4108_vm3, %v4295_v30, %v7029_v2  ;;  %v12452_v24 = vsel %vm4108_vm3, %v4296_v62, %v7030_v52  ;;  %5124 = vmatmul.bf16.gmra.mxu3 %v4500_v50  ;;  %v5177_v43 = vadd.f32 %v14803_v17, %v4988_v6  ;;  %v7296_v30 = vld [vmem:[#allocation2 + $0x249] sm:$0xff] }
 0x43c   : > { %v4251_v20 = vsel %vm560_vm0, %v7296_v30, %v7014_v36 }
 0x43d   : > { %5337 = vst.msk [vmem:[%s12060_s24 + $0x68] sm:$0xff] %vm560_vm0, %v5177_v43  ;;  %v5421_v52 = vsel %vm560_vm0, %v5177_v43, 0.0  ;;  %v5558_v2 = vmul.f32 %v5177_v43, %v5177_v43 }
 0x43e   : > { %v7023_v1 = vpop.permute.xlu1 %7022  ;;  %v7033_v50 = vpop.permute.xlu0 %7032  ;;  %v5422_v5 = vadd.f32 %v5421_v52, %v5420_v31  ;;  %v14805_v31 = vld [vmem:[#allocation175_spill] sm:$0xff]  ;;  %v14806_v52 = vld [vmem:[#allocation170_spill] sm:$0xff] }
 0x43f   : > { %v12460_v53 = vpop.f32.mrf.mxu3  ;;  %v7025_v21 = vunpack.i.h.bf16 %v7023_v1  ;;  %v7024_v56 = vunpack.i.l.bf16 %v7023_v1  ;;  %v5642_v44 = vsel %vm560_vm0, %v5558_v2, 0.0  ;;  %v7035_v55 = vunpack.i.h.bf16 %v7033_v50  ;;  %v14808_v2 = vld [vmem:[#allocation213_spill] sm:$0xff] }
 0x440   : > { %v5643_v62 = vadd.f32 %v5642_v44, %v5641_v19  ;;  %v7034_v6 = vunpack.i.l.bf16 %v7033_v50  ;;  %v4990_v17 = vpop.f32.mrf.mxu1  ;;  %v14807_v22 = vpack.c.bf16 %v14805_v31, %v14806_v52  ;;  %v14809_v19 = vpack.c.bf16 %v12090_v18, %v12087_v48 }
 0x441   : > { %v4323_v43 = vsel %vm4035_vm2, %v4251_v20, %v7024_v56  ;;  %v4324_v1 = vsel %vm4035_vm2, %v4252_v7, %v7025_v21  ;;  %v4991_v32 = vadd.f32 %v4990_v17, %v12202_v0  ;;  %v5279_v44 = vpop.f32.mrf.mxu2  ;;  %v14810_v20 = vld [vmem:[#allocation225_spill] sm:$0xff] }
 0x442   : > { %v4395_v56 = vsel %vm4108_vm3, %v4323_v43, %v7034_v6  ;;  %v4396_v21 = vsel %vm4108_vm3, %v4324_v1, %v7035_v55  ;;  %v12492_v17 = vpop.f32.mrf.mxu0 }
 0x443   : > { %v5180_v4 = vadd.f32 %v14808_v2, %v4991_v32  ;;  %v4503_v32 = vpack.c.bf16 %v4396_v21, %v4395_v56  ;;  %v14812_v56 = vld [vmem:[#allocation132_spill] sm:$0xff] }
 0x444   : > { %4870 = vmatmul.bf16.gmra.mxu0 %v14807_v22 }
 0x445   : > { %5029 = vmatmul.bf16.gmra.mxu1 %v14809_v19  ;;  %5338 = vst.msk [vmem:[%s12060_s24 + $0x70] sm:$0xff] %vm560_vm0, %v5180_v4  ;;  %v5423_v0 = vsel %vm560_vm0, %v5180_v4, 0.0  ;;  %v5559_v50 = vmul.f32 %v5180_v4, %v5180_v4  ;;  %v14811_v19 = vld [vmem:[#allocation137_spill] sm:$0xff] }
 0x446   : > { %v5424_v22 = vadd.f32 %v5423_v0, %v5422_v5  ;;  %v14813_v21 = vpack.c.bf16 %v14811_v19, %v14812_v56 }
 0x447   : > { %v12482_v36 = vpop.f32.mrf.mxu3  ;;  %v5644_v7 = vsel %vm560_vm0, %v5559_v50, 0.0  ;;  %v14814_v50 = vld [vmem:[#allocation246_spill] sm:$0xff] }
 0x448   : > { %v5645_v30 = vadd.f32 %v5644_v7, %v5643_v62  ;;  %v4992_v48 = vpop.f32.mrf.mxu1 }
 0x449   : > { %v4993_v18 = vadd.f32 %v4992_v48, %v12252_v38  ;;  %v5281_v0 = vpop.f32.mrf.mxu2 }
 0x44b   : > { %5129 = vmatmul.bf16.gmra.mxu3 %v4503_v32  ;;  %v5182_v6 = vadd.f32 %v14810_v20, %v4993_v18 }
 0x44d   : > { %5339 = vst.msk [vmem:[%s12060_s24 + $0x78] sm:$0xff] %vm560_vm0, %v5182_v6  ;;  %v5425_v5 = vsel %vm560_vm0, %v5182_v6, 0.0  ;;  %v5560_v43 = vmul.f32 %v5182_v6, %v5182_v6 }
 0x44e   : > { %v5426_v31 = vadd.f32 %v5425_v5, %v5424_v22  ;;  %v14815_v22 = vpack.c.bf16 %v12170_v13, %v12167_v14  ;;  %v14816_v13 = vld [vmem:[#allocation297_spill] sm:$0xff]  ;;  %v14817_v5 = vld [vmem:[#allocation296_spill] sm:$0xff] }
 0x44f   : > { %v5090_v55 = vpop.f32.mrf.mxu3  ;;  %v5646_v62 = vsel %vm560_vm0, %v5560_v43, 0.0  ;;  %v14818_v43 = vpack.c.bf16 %v14816_v13, %v14817_v5 }
 0x450   : > { %v5091_v1 = vadd.f32 %v5090_v55, %v11957_v3  ;;  %v5647_v38 = vadd.f32 %v5646_v62, %v5645_v30  ;;  %v4995_v2 = vpop.f32.mrf.mxu1  ;;  %v12516_v30 = vpop.f32.mrf.mxu0 }
 0x451   : > { %v4996_v4 = vadd.f32 %v4995_v2, %v12284_v58 }
 0x452   : > { %v12499_v52 = vadd.f32 %v5279_v44, %v5091_v1 }
 0x453   : > { %v5185_v3 = vadd.f32 %v14814_v50, %v4996_v4 }
 0x454   : > { %5378 = vst.msk [vmem:[%s12060_s24 + $0x1b0] sm:$0xff] %vm560_vm0, %v12499_v52  ;;  %4875 = vmatmul.bf16.gmra.mxu0 %v14813_v21 }
 0x455   : > { %5034 = vmatmul.bf16.gmra.mxu1 %v14815_v22  ;;  %5340 = vst.msk [vmem:[%s12060_s24 + $0x80] sm:$0xff] %vm560_vm0, %v5185_v3  ;;  %v5427_v32 = vsel %vm560_vm0, %v5185_v3, 0.0  ;;  %v5561_v44 = vmul.f32 %v5185_v3, %v5185_v3  ;;  %v14820_v22 = vld [vmem:[#allocation252_spill] sm:$0xff] }
 0x456   : > { %v5428_v48 = vadd.f32 %v5427_v32, %v5426_v31  ;;  %v5284_v31 = vpop.f32.mrf.mxu2 }
 0x457   : > { %v5092_v7 = vpop.f32.mrf.mxu3  ;;  %v5648_v18 = vsel %vm560_vm0, %v5561_v44, 0.0 }
 0x458   : > { %v5093_v58 = vadd.f32 %v5092_v7, %v11995_v49  ;;  %v5649_v6 = vadd.f32 %v5648_v18, %v5647_v38  ;;  %v4997_v55 = vpop.f32.mrf.mxu1  ;;  %v14819_v49 = vld [vmem:[#allocation257_spill] sm:$0xff]  ;;  %v12537_v21 = vpop.f32.mrf.mxu0  ;;  %v14821_v7 = vld [vmem:[#allocation187_spill] sm:$0xff] }
 0x459   : > { %v4998_v14 = vadd.f32 %v4997_v55, %v12316_v37  ;;  %v14822_v32 = vpack.c.bf16 %v14820_v22, %v14821_v7  ;;  %v14829_v22 = vld [vmem:[#allocation189_spill] sm:$0xff]  ;;  %v14830_v7 = vld [vmem:[#allocation174_spill] sm:$0xff] }
 0x45a   : > { %v12519_v20 = vadd.f32 %v5281_v0, %v5093_v58  ;;  %v14824_v58 = vpack.c.bf16 %v12246_v60, %v12243_v23  ;;  %v14825_v60 = vld [vmem:[#allocation302_spill] sm:$0xff] }
 0x45b   : > { %5965 = vmatmul.msk.bf16.vlgmr.msra.gmra.mxu3 %vm560_vm0, %v14818_v43  ;;  %v5187_v1 = vadd.f32 %v14819_v49, %v4998_v14 }
 0x45c   : > { %5379 = vst.msk [vmem:[%s12060_s24 + $0x1b8] sm:$0xff] %vm560_vm0, %v12519_v20 }
 0x45d   : > { %5341 = vst.msk [vmem:[%s12060_s24 + $0x88] sm:$0xff] %vm560_vm0, %v5187_v1  ;;  %v5429_v38 = vsel %vm560_vm0, %v5187_v1, 0.0  ;;  %v5562_v2 = vmul.f32 %v5187_v1, %v5187_v1  ;;  %v14826_v1 = vld [vmem:[#allocation304_spill] sm:$0xff] }
 0x45e   : > { %v5430_v19 = vadd.f32 %v5429_v38, %v5428_v48 }
 0x45f   : > { %v5095_v62 = vpop.f32.mrf.mxu3  ;;  %v5650_v37 = vsel %vm560_vm0, %v5562_v2, 0.0 }
 0x460   : > { %v5096_v4 = vadd.f32 %v5095_v62, %v12031_v26  ;;  %v5651_v0 = vadd.f32 %v5650_v37, %v5649_v6  ;;  %v14823_v26 = vld [vmem:[#allocation307_spill] sm:$0xff]  ;;  %v12565_v62 = vpop.f32.mrf.mxu0 }
 0x462   : > { %v12535_v56 = vadd.f32 %v5284_v31, %v5096_v4  ;;  %v5000_v50 = vpop.f32.mrf.mxu1  ;;  %v14827_v31 = vpack.c.bf16 %v14825_v60, %v14826_v1 }
 0x463   : > { %v5001_v3 = vadd.f32 %v5000_v50, %v12354_v40  ;;  %v5286_v40 = vpop.f32.mrf.mxu2 }
 0x464   : > { %5380 = vst.msk [vmem:[%s12060_s24 + $0x1c0] sm:$0xff] %vm560_vm0, %v12535_v56  ;;  %4880 = vmatmul.bf16.gmra.mxu0 %v14822_v32  ;;  %v14831_v32 = vpack.c.bf16 %v14829_v22, %v14830_v7  ;;  %v14841_v22 = vld [vmem:[#allocation61_spill] sm:$0xff] }
 0x465   : > { %v5190_v44 = vadd.f32 %v14823_v26, %v5001_v3  ;;  %5039 = vmatmul.bf16.gmra.mxu1 %v14824_v58  ;;  %v14832_v26 = vld [vmem:[#allocation43_spill] sm:$0xff]  ;;  %v14833_v58 = vpack.c.bf16 %v12298_v8, %v12295_v34  ;;  %v14837_v8 = vld [vmem:[#allocation49_spill] sm:$0xff] }
 0x467   : > { %v5097_v48 = vpop.f32.mrf.mxu3  ;;  %5342 = vst.msk [vmem:[%s12060_s24 + $0x90] sm:$0xff] %vm560_vm0, %v5190_v44  ;;  %v5431_v18 = vsel %vm560_vm0, %v5190_v44, 0.0  ;;  %v5563_v6 = vmul.f32 %v5190_v44, %v5190_v44 }
 0x468   : > { %v5098_v55 = vadd.f32 %v5097_v48, %v12072_v25  ;;  %v5432_v14 = vadd.f32 %v5431_v18, %v5430_v19  ;;  %v14828_v25 = vld [vmem:[#allocation7_spill] sm:$0xff]  ;;  %v12582_v48 = vpop.f32.mrf.mxu0 }
 0x469   : > { %v5652_v13 = vsel %vm560_vm0, %v5563_v6, 0.0 }
 0x46a   : > { %v12555_v5 = vadd.f32 %v5286_v40, %v5098_v55  ;;  %v5653_v43 = vadd.f32 %v5652_v13, %v5651_v0  ;;  %v5002_v49 = vpop.f32.mrf.mxu1 }
 0x46b   : > { %v5003_v23 = vadd.f32 %v5002_v49, %v12378_v16  ;;  %5966 = vmatmul.msk.bf16.gmra.mxu3 %vm560_vm0, %v14827_v31  ;;  %v14834_v49 = vld [vmem:[#allocation312_spill] sm:$0xff] }
 0x46c   : > { %5381 = vst.msk [vmem:[%s12060_s24 + $0x1c8] sm:$0xff] %vm560_vm0, %v12555_v5 }
 0x46d   : > { %v5192_v38 = vadd.f32 %v14828_v25, %v5003_v23  ;;  %v14835_v23 = vld [vmem:[#allocation310_spill] sm:$0xff] }
 0x46e   : > { %v14836_v34 = vpack.c.bf16 %v14834_v49, %v14835_v23 }
 0x46f   : > { %v12568_v2 = vpop.f32.mrf.mxu3  ;;  %5343 = vst.msk [vmem:[%s12060_s24 + $0x98] sm:$0xff] %vm560_vm0, %v5192_v38  ;;  %v5433_v4 = vsel %vm560_vm0, %v5192_v38, 0.0  ;;  %v5564_v19 = vmul.f32 %v5192_v38, %v5192_v38 }
 0x470   : > { %v5434_v37 = vadd.f32 %v5433_v4, %v5432_v14  ;;  %v12601_v38 = vpop.f32.mrf.mxu0 }
 0x471   : > { %v5654_v16 = vsel %vm560_vm0, %v5564_v19, 0.0 }
 0x472   : > { %v5655_v0 = vadd.f32 %v5654_v16, %v5653_v43  ;;  %v5005_v50 = vpop.f32.mrf.mxu1 }
 0x473   : > { %v5006_v3 = vadd.f32 %v5005_v50, %v12417_v11  ;;  %v14839_v50 = vld [vmem:[#allocation157_spill] sm:$0xff] }
 0x474   : > { %4885 = vmatmul.bf16.gmra.mxu0 %v14831_v32  ;;  %v14842_v32 = vpack.c.bf16 %v12352_v46, %v12349_v27  ;;  %v14846_v46 = vld [vmem:[#allocation66_spill] sm:$0xff] }
 0x475   : > { %v5195_v44 = vadd.f32 %v14832_v26, %v5006_v3  ;;  %5044 = vmatmul.bf16.gmra.mxu1 %v14833_v58 }
 0x477   : > { %v12584_v18 = vpop.f32.mrf.mxu3  ;;  %5344 = vst.msk [vmem:[%s12060_s24 + $0xa0] sm:$0xff] %vm560_vm0, %v5195_v44  ;;  %v5435_v6 = vsel %vm560_vm0, %v5195_v44, 0.0  ;;  %v5565_v11 = vmul.f32 %v5195_v44, %v5195_v44 }
 0x478   : > { %v5436_v55 = vadd.f32 %v5435_v6, %v5434_v37 }
 0x479   : > { %v5656_v40 = vsel %vm560_vm0, %v5565_v11, 0.0  ;;  %v12618_v11 = vpop.f32.mrf.mxu0 }
 0x47a   : > { %v5657_v14 = vadd.f32 %v5656_v40, %v5655_v0  ;;  %v5007_v13 = vpop.f32.mrf.mxu1  ;;  %v14838_v0 = vld [vmem:[#allocation218_spill] sm:$0xff] }
 0x47b   : > { %v5008_v43 = vadd.f32 %v5007_v13, %v12446_v54  ;;  %5967 = vmatmul.msk.bf16.gmra.mxu3 %vm560_vm0, %v14836_v34  ;;  %v14840_v3 = vpack.c.bf16 %v14838_v0, %v14839_v50  ;;  %v14843_v13 = vld [vmem:[#allocation316_spill] sm:$0xff]  ;;  %v14850_v0 = vld [vmem:[#allocation247_spill] sm:$0xff] }
 0x47d   : > { %v5197_v60 = vadd.f32 %v14837_v8, %v5008_v43  ;;  %v14844_v43 = vld [vmem:[#allocation314_spill] sm:$0xff] }
 0x47e   : > { %v14845_v27 = vpack.c.bf16 %v14843_v13, %v14844_v43 }
 0x47f   : > { %v12596_v1 = vpop.f32.mrf.mxu3  ;;  %5345 = vst.msk [vmem:[%s12060_s24 + $0xa8] sm:$0xff] %vm560_vm0, %v5197_v60  ;;  %v5437_v31 = vsel %vm560_vm0, %v5197_v60, 0.0  ;;  %v5566_v25 = vmul.f32 %v5197_v60, %v5197_v60 }
 0x480   : > { %v5438_v4 = vadd.f32 %v5437_v31, %v5436_v55 }
 0x481   : > { %v5658_v54 = vsel %vm560_vm0, %v5566_v25, 0.0 }
 0x482   : > { %v5659_v19 = vadd.f32 %v5658_v54, %v5657_v14  ;;  %v5010_v37 = vpop.f32.mrf.mxu1  ;;  %v14847_v54 = vld [vmem:[#allocation168_spill] sm:$0xff] }
 0x483   : > { %v5011_v16 = vadd.f32 %v5010_v37, %v12476_v63 }
 0x484   : > { %4890 = vmatmul.bf16.gmra.mxu0 %v14840_v3  ;;  %v14851_v3 = vpack.c.bf16 %v12402_v10, %v12399_v57  ;;  %v14855_v57 = vld [vmem:[#allocation79_spill] sm:$0xff] }
 0x485   : > { %v5200_v7 = vadd.f32 %v14841_v22, %v5011_v16  ;;  %5049 = vmatmul.bf16.gmra.mxu1 %v14842_v32  ;;  %v12636_v16 = vpop.f32.mrf.mxu0 }
 0x487   : > { %v12612_v26 = vpop.f32.mrf.mxu3  ;;  %5346 = vst.msk [vmem:[%s12060_s24 + $0xb0] sm:$0xff] %vm560_vm0, %v5200_v7  ;;  %v5439_v44 = vsel %vm560_vm0, %v5200_v7, 0.0  ;;  %v5567_v58 = vmul.f32 %v5200_v7, %v5200_v7 }
 0x488   : > { %v5440_v6 = vadd.f32 %v5439_v44, %v5438_v4 }
 0x489   : > { %v5660_v63 = vsel %vm560_vm0, %v5567_v58, 0.0 }
 0x48a   : > { %v5661_v55 = vadd.f32 %v5660_v63, %v5659_v19  ;;  %v5012_v40 = vpop.f32.mrf.mxu1  ;;  %v14848_v19 = vld [vmem:[#allocation183_spill] sm:$0xff] }
 0x48b   : > { %v5013_v14 = vadd.f32 %v5012_v40, %v12492_v17  ;;  %5968 = vmatmul.msk.bf16.gmra.mxu3 %vm560_vm0, %v14845_v27  ;;  %v14849_v37 = vpack.c.bf16 %v14847_v54, %v14848_v19  ;;  %v14853_v40 = vld [vmem:[#allocation322_spill] sm:$0xff]  ;;  %v14857_v19 = vpack.c.bf16 %v12452_v24, %v12449_v28 }
 0x48d   : > { %v5202_v49 = vadd.f32 %v14846_v46, %v5013_v14  ;;  %v12654_v13 = vpop.f32.mrf.mxu0 }
 0x48f   : > { %v12626_v23 = vpop.f32.mrf.mxu3  ;;  %5347 = vst.msk [vmem:[%s12060_s24 + $0xb8] sm:$0xff] %vm560_vm0, %v5202_v49  ;;  %v5441_v34 = vsel %vm560_vm0, %v5202_v49, 0.0  ;;  %v5568_v8 = vmul.f32 %v5202_v49, %v5202_v49 }
 0x490   : > { %v5442_v60 = vadd.f32 %v5441_v34, %v5440_v6  ;;  %v2160_v34 = vld [vmem:[#allocation2 + $0x25a] sm:$0xff] }
 0x491   : > { %v5662_v31 = vsel %vm560_vm0, %v5568_v8, 0.0 }
 0x492   : > { %v5663_v25 = vadd.f32 %v5662_v31, %v5661_v55  ;;  %v5015_v17 = vpop.f32.mrf.mxu1  ;;  %v14852_v55 = vld [vmem:[#allocation320_spill] sm:$0xff]  ;;  %v7038_v31 = vpop.permute.xlu1 %7037 }
 0x493   : > { %v5016_v4 = vadd.f32 %v5015_v17, %v12516_v30  ;;  %v14854_v14 = vpack.c.bf16 %v14852_v55, %v14853_v40  ;;  %v2232_v17 = vmul.f32 %v2160_v34, %v14681_v45  ;;  %v7299_v55 = vld [vmem:[#allocation2 + $0x179] sm:$0xff] }
 0x494   : > { %4895 = vmatmul.bf16.gmra.mxu0 %v14849_v37  ;;  %v7040_v37 = vunpack.i.h.bf16 %v7038_v31 }
 0x495   : > { %v5205_v50 = vadd.f32 %v14850_v0, %v5016_v4  ;;  %5054 = vmatmul.bf16.gmra.mxu1 %v14851_v3  ;;  %v14856_v4 = vld [vmem:[#allocation13_spill] sm:$0xff]  ;;  %v7039_v0 = vunpack.i.l.bf16 %v7038_v31  ;;  %v7297_v3 = vld [vmem:[#allocation2 + $0x252] sm:$0xff]  ;;  %v12674_v45 = vpop.f32.mrf.mxu0 }
 0x497   : > { %v12642_v22 = vpop.f32.mrf.mxu3  ;;  %5348 = vst.msk [vmem:[%s12060_s24 + $0xc0] sm:$0xff] %vm560_vm0, %v5205_v50  ;;  %v5443_v7 = vsel %vm560_vm0, %v5205_v50, 0.0  ;;  %v5569_v30 = vmul.f32 %v5205_v50, %v5205_v50 }
 0x498   : > { %v5444_v32 = vadd.f32 %v5443_v7, %v5442_v60  ;;  %v2231_v7 = vmul.f32 %v7297_v3, %v14682_v29  ;;  %v4225_v29 = vsel %vm560_vm0, %v7299_v55, %v7039_v0 }
 0x499   : > { %v5664_v44 = vsel %vm560_vm0, %v5569_v30, 0.0 }
 0x49a   : > { %v5665_v58 = vadd.f32 %v5664_v44, %v5663_v25  ;;  %v5017_v6 = vpop.f32.mrf.mxu1  ;;  %v4501_v24 = vpack.c.bf16 %v2232_v17, %v2231_v7 }
 0x49b   : > { %v5018_v63 = vadd.f32 %v5017_v6, %v12537_v21  ;;  %5969 = vmatmul.msk.bf16.gmra.mxu3 %vm560_vm0, %v14854_v14  ;;  %v7298_v6 = vld [vmem:[#allocation2 + $0x181] sm:$0xff] }
 0x49d   : > { %v5207_v10 = vadd.f32 %v14855_v57, %v5018_v63  ;;  %v4226_v63 = vsel %vm560_vm0, %v7298_v6, %v7040_v37  ;;  %v2162_v37 = vld [vmem:[#allocation2 + $0x26a] sm:$0xff]  ;;  %v12692_v0 = vpop.f32.mrf.mxu0 }
 0x49f   : > { %v12656_v43 = vpop.f32.mrf.mxu3  ;;  %5349 = vst.msk [vmem:[%s12060_s24 + $0xc8] sm:$0xff] %vm560_vm0, %v5207_v10  ;;  %v5445_v27 = vsel %vm560_vm0, %v5207_v10, 0.0  ;;  %v5570_v46 = vmul.f32 %v5207_v10, %v5207_v10 }
 0x4a0   : > { %v5446_v49 = vadd.f32 %v5445_v27, %v5444_v32  ;;  %v7043_v32 = vpop.permute.xlu2 %7042 }
 0x4a1   : > { %v5666_v21 = vsel %vm560_vm0, %v5570_v46, 0.0  ;;  %v7045_v57 = vunpack.i.h.bf16 %v7043_v32  ;;  %v7044_v10 = vunpack.i.l.bf16 %v7043_v32 }
 0x4a2   : > { %v5667_v8 = vadd.f32 %v5666_v21, %v5665_v58  ;;  %v5020_v60 = vpop.f32.mrf.mxu1  ;;  %v7048_v58 = vpop.permute.xlu0 %7047  ;;  %v14858_v21 = vld [vmem:[#allocation85_spill] sm:$0xff] }
 0x4a3   : > { %v5021_v25 = vadd.f32 %v5020_v60, %v12565_v62  ;;  %v7050_v46 = vunpack.i.h.bf16 %v7048_v58  ;;  %v4297_v60 = vsel %vm4035_vm2, %v4225_v29, %v7044_v10  ;;  %v4298_v31 = vsel %vm4035_vm2, %v4226_v63, %v7045_v57 }
 0x4a5   : > { %v5210_v54 = vadd.f32 %v14856_v4, %v5021_v25  ;;  %5059 = vmatmul.bf16.gmra.mxu1 %v14857_v19 }
 0x4a7   : > { %v12668_v50 = vpop.f32.mrf.mxu3  ;;  %5350 = vst.msk [vmem:[%s12060_s24 + $0xd0] sm:$0xff] %vm560_vm0, %v5210_v54  ;;  %v5447_v30 = vsel %vm560_vm0, %v5210_v54, 0.0  ;;  %v5571_v62 = vmul.f32 %v5210_v54, %v5210_v54  ;;  %v4370_v54 = vsel %vm4108_vm3, %v4298_v31, %v7050_v46  ;;  %v7300_v46 = vld [vmem:[#allocation2 + $0x191] sm:$0xff] }
 0x4a8   : > { %v5448_v44 = vadd.f32 %v5447_v30, %v5446_v49  ;;  %v7049_v49 = vunpack.i.l.bf16 %v7048_v58  ;;  %v7053_v30 = vpop.permute.xlu1 %7052  ;;  %v2161_v58 = vld [vmem:[#allocation2 + $0x262] sm:$0xff]  ;;  %v7058_v57 = vpop.permute.xlu2 %7057 }
 0x4a9   : > { %v5668_v28 = vsel %vm560_vm0, %v5571_v62, 0.0  ;;  %v7055_v6 = vunpack.i.h.bf16 %v7053_v30  ;;  %v7054_v63 = vunpack.i.l.bf16 %v7053_v30  ;;  %v2233_v29 = vmul.f32 %v2161_v58, %v14695_v33 }
 0x4aa   : > { %v5669_v40 = vadd.f32 %v5668_v28, %v5667_v8  ;;  %v5022_v14 = vpop.f32.mrf.mxu1  ;;  %v2234_v28 = vmul.f32 %v2162_v37, %v14693_v51  ;;  %v7063_v10 = vpop.permute.xlu0 %7062  ;;  %v7060_v31 = vunpack.i.h.bf16 %v7058_v57 }
 0x4ab   : > { %v5023_v27 = vadd.f32 %v5022_v14, %v12582_v48  ;;  %5970 = vmatmul.msk.bf16.gmra.mxu3 %vm560_vm0, %v4501_v24  ;;  %v4369_v48 = vsel %vm4108_vm3, %v4297_v60, %v7049_v49  ;;  %v4228_v49 = vsel %vm560_vm0, %v7300_v46, %v7055_v6 }
 0x4ac   : > { %v4464_v32 = vpack.c.bf16 %v4370_v54, %v4369_v48  ;;  %v4504_v51 = vpack.c.bf16 %v2234_v28, %v2233_v29  ;;  %v7064_v48 = vunpack.i.l.bf16 %v7063_v10  ;;  %v12708_v54 = vpop.f32.mrf.mxu0  ;;  %v4300_v30 = vsel %vm4035_vm2, %v4228_v49, %v7060_v31 }
 0x4ad   : > { %v5212_v34 = vadd.f32 %v14858_v21, %v5023_v27  ;;  %v7301_v21 = vld [vmem:[#allocation2 + $0x189] sm:$0xff] }
 0x4af   : > { %v12684_v25 = vpop.f32.mrf.mxu3  ;;  %5351 = vst.msk [vmem:[%s12060_s24 + $0xd8] sm:$0xff] %vm560_vm0, %v5212_v34  ;;  %v5449_v8 = vsel %vm560_vm0, %v5212_v34, 0.0  ;;  %v5572_v17 = vmul.f32 %v5212_v34, %v5212_v34  ;;  %v4227_v34 = vsel %vm560_vm0, %v7301_v21, %v7054_v63 }
 0x4b0   : > { %v5450_v4 = vadd.f32 %v5449_v8, %v5448_v44  ;;  %v14859_v44 = vld [vmem:[#allocation95_spill] sm:$0xff]  ;;  %v7059_v8 = vunpack.i.l.bf16 %v7058_v57  ;;  %v7068_v63 = vpop.permute.xlu1 %7067  ;;  %v7073_v21 = vpop.permute.xlu2 %7072 }
 0x4b1   : > { %v5670_v19 = vsel %vm560_vm0, %v5572_v17, 0.0 }
 0x4b2   : > { %v5671_v3 = vadd.f32 %v5670_v19, %v5669_v40  ;;  %v5025_v7 = vpop.f32.mrf.mxu1  ;;  %v14860_v19 = vld [vmem:[#allocation107_spill] sm:$0xff] }
 0x4b3   : > { %v5026_v62 = vadd.f32 %v5025_v7, %v12601_v38  ;;  %v4299_v7 = vsel %vm4035_vm2, %v4227_v34, %v7059_v8  ;;  %v7303_v8 = vld [vmem:[#allocation2 + $0x199] sm:$0xff] }
 0x4b4   : > { %v4371_v58 = vsel %vm4108_vm3, %v4299_v7, %v7064_v48 }
 0x4b5   : > { %v5215_v24 = vadd.f32 %v14859_v44, %v5026_v62  ;;  %5064 = vmatmul.bf16.gmra.mxu1 %v4464_v32 }
 0x4b7   : > { %v12697_v55 = vpop.f32.mrf.mxu3  ;;  %5352 = vst.msk [vmem:[%s12060_s24 + $0xe0] sm:$0xff] %vm560_vm0, %v5215_v24  ;;  %v5451_v40 = vsel %vm560_vm0, %v5215_v24, 0.0  ;;  %v5573_v14 = vmul.f32 %v5215_v24, %v5215_v24 }
 0x4b8   : > { %v5452_v38 = vadd.f32 %v5451_v40, %v5450_v4  ;;  %v7065_v4 = vunpack.i.h.bf16 %v7063_v10  ;;  %v7070_v10 = vunpack.i.h.bf16 %v7068_v63 }
 0x4b9   : > { %v5672_v27 = vsel %vm560_vm0, %v5573_v14, 0.0  ;;  %v14861_v14 = vld [vmem:[#allocation243_spill] sm:$0xff] }
 0x4ba   : > { %v5673_v60 = vadd.f32 %v5672_v27, %v5671_v3  ;;  %v5027_v33 = vpop.f32.mrf.mxu1  ;;  %v4372_v28 = vsel %vm4108_vm3, %v4300_v30, %v7065_v4  ;;  %v7069_v27 = vunpack.i.l.bf16 %v7068_v63 }
 0x4bb   : > { %v5028_v17 = vadd.f32 %v5027_v33, %v12618_v11  ;;  %5971 = vmatmul.msk.bf16.gmra.mxu3 %vm560_vm0, %v4504_v51  ;;  %v4467_v40 = vpack.c.bf16 %v4372_v28, %v4371_v58  ;;  %v12723_v51 = vpop.f32.mrf.mxu0  ;;  %v7302_v33 = vld [vmem:[#allocation2 + $0x1a1] sm:$0xff] }
 0x4bc   : > { %v4230_v31 = vsel %vm560_vm0, %v7302_v33, %v7070_v10 }
 0x4bd   : > { %v5217_v37 = vadd.f32 %v14860_v19, %v5028_v17  ;;  %v4229_v17 = vsel %vm560_vm0, %v7303_v8, %v7069_v27  ;;  %v7075_v19 = vunpack.i.h.bf16 %v7073_v21  ;;  %v7083_v27 = vpop.permute.xlu1 %7082 }
 0x4be   : > { %v7084_v33 = vunpack.i.l.bf16 %v7083_v27 }
 0x4bf   : > { %v12713_v62 = vpop.f32.mrf.mxu3  ;;  %5353 = vst.msk [vmem:[%s12060_s24 + $0xe8] sm:$0xff] %vm560_vm0, %v5217_v37  ;;  %v5453_v3 = vsel %vm560_vm0, %v5217_v37, 0.0  ;;  %v5574_v32 = vmul.f32 %v5217_v37, %v5217_v37  ;;  %v7074_v37 = vunpack.i.l.bf16 %v7073_v21  ;;  %v4302_v28 = vsel %vm4035_vm2, %v4230_v31, %v7075_v19  ;;  %v14863_v21 = vld [vmem:[#allocation250_spill] sm:$0xff] }
 0x4c0   : > { %v5454_v11 = vadd.f32 %v5453_v3, %v5452_v38 }
 0x4c1   : > { %v5674_v44 = vsel %vm560_vm0, %v5574_v32, 0.0  ;;  %v14862_v32 = vld [vmem:[#allocation162_spill] sm:$0xff]  ;;  %v4301_v58 = vsel %vm4035_vm2, %v4229_v17, %v7074_v37  ;;  %v7088_v17 = vpop.permute.xlu2 %7087 }
 0x4c2   : > { %v5675_v24 = vadd.f32 %v5674_v44, %v5673_v60  ;;  %v5030_v6 = vpop.f32.mrf.mxu1  ;;  %v7078_v60 = vpop.permute.xlu0 %7077  ;;  %v7304_v37 = vld [vmem:[#allocation2 + $0x1b1] sm:$0xff] }
 0x4c3   : > { %v5031_v29 = vadd.f32 %v5030_v6, %v12636_v16  ;;  %v7080_v30 = vunpack.i.h.bf16 %v7078_v60  ;;  %v7079_v3 = vunpack.i.l.bf16 %v7078_v60  ;;  %v12742_v63 = vpop.f32.mrf.mxu0 }
 0x4c5   : > { %v5220_v57 = vadd.f32 %v14861_v14, %v5031_v29  ;;  %5069 = vmatmul.bf16.gmra.mxu1 %v4467_v40  ;;  %v4374_v40 = vsel %vm4108_vm3, %v4302_v28, %v7080_v30  ;;  %v7089_v28 = vunpack.i.l.bf16 %v7088_v17 }
 0x4c7   : > { %v12725_v38 = vpop.f32.mrf.mxu3  ;;  %5354 = vst.msk [vmem:[%s12060_s24 + $0xf0] sm:$0xff] %vm560_vm0, %v5220_v57  ;;  %v5455_v46 = vsel %vm560_vm0, %v5220_v57, 0.0  ;;  %v5575_v49 = vmul.f32 %v5220_v57, %v5220_v57 }
 0x4c8   : > { %v5456_v34 = vadd.f32 %v5455_v46, %v5454_v11 }
 0x4c9   : > { %v5676_v16 = vsel %vm560_vm0, %v5575_v49, 0.0 }
 0x4ca   : > { %v5677_v4 = vadd.f32 %v5676_v16, %v5675_v24  ;;  %v5032_v48 = vpop.f32.mrf.mxu1  ;;  %v7085_v16 = vunpack.i.h.bf16 %v7083_v27 }
 0x4cb   : > { %v5033_v7 = vadd.f32 %v5032_v48, %v12654_v13  ;;  %v4373_v13 = vsel %vm4108_vm3, %v4301_v58, %v7079_v3  ;;  %v12757_v3 = vpop.f32.mrf.mxu0  ;;  %v7090_v58 = vunpack.i.h.bf16 %v7088_v17 }
 0x4cc   : > { %v4470_v49 = vpack.c.bf16 %v4374_v40, %v4373_v13  ;;  %v5101_v13 = vadd.f32 %v12568_v2, %v12110_v12  ;;  %v14864_v40 = vld [vmem:[#allocation212_spill] sm:$0xff] }
 0x4cd   : > { %v5222_v11 = vadd.f32 %v14862_v32, %v5033_v7  ;;  %v7305_v7 = vld [vmem:[#allocation2 + $0x1a9] sm:$0xff] }
 0x4ce   : > { %v4231_v30 = vsel %vm560_vm0, %v7305_v7, %v7084_v33 }
 0x4cf   : > { %v12737_v44 = vpop.f32.mrf.mxu3  ;;  %5355 = vst.msk [vmem:[%s12060_s24 + $0xf8] sm:$0xff] %vm560_vm0, %v5222_v11  ;;  %v5457_v6 = vsel %vm560_vm0, %v5222_v11, 0.0  ;;  %v5576_v24 = vmul.f32 %v5222_v11, %v5222_v11 }
 0x4d0   : > { %v5458_v29 = vadd.f32 %v5457_v6, %v5456_v34 }
 0x4d1   : > { %v5678_v14 = vsel %vm560_vm0, %v5576_v24, 0.0 }
 0x4d2   : > { %v5679_v57 = vadd.f32 %v5678_v14, %v5677_v4  ;;  %v5035_v10 = vpop.f32.mrf.mxu1  ;;  %v7093_v4 = vpop.permute.xlu0 %7092 }
 0x4d3   : > { %v5036_v46 = vadd.f32 %v5035_v10, %v12674_v45  ;;  %v4232_v45 = vsel %vm560_vm0, %v7304_v37, %v7085_v16  ;;  %v7095_v24 = vunpack.i.h.bf16 %v7093_v4  ;;  %v4303_v10 = vsel %vm4035_vm2, %v4231_v30, %v7089_v28 }
 0x4d4   : > { %v4304_v27 = vsel %vm4035_vm2, %v4232_v45, %v7090_v58 }
 0x4d5   : > { %v5225_v60 = vadd.f32 %v14863_v21, %v5036_v46  ;;  %5074 = vmatmul.bf16.gmra.mxu1 %v4470_v49  ;;  %v4376_v12 = vsel %vm4108_vm3, %v4304_v27, %v7095_v24 }
 0x4d7   : > { %v12749_v31 = vpop.f32.mrf.mxu3  ;;  %5356 = vst.msk [vmem:[%s12060_s24 + $0x100] sm:$0xff] %vm560_vm0, %v5225_v60  ;;  %v5459_v34 = vsel %vm560_vm0, %v5225_v60, 0.0  ;;  %v5577_v8 = vmul.f32 %v5225_v60, %v5225_v60 }
 0x4d8   : > { %v5460_v48 = vadd.f32 %v5459_v34, %v5458_v29  ;;  %v7094_v29 = vunpack.i.l.bf16 %v7093_v4  ;;  %v7098_v34 = vpop.permute.xlu1 %7097  ;;  %v12777_v4 = vpop.f32.mrf.mxu0 }
 0x4d9   : > { %v5680_v19 = vsel %vm560_vm0, %v5577_v8, 0.0  ;;  %v7100_v45 = vunpack.i.h.bf16 %v7098_v34  ;;  %v7099_v7 = vunpack.i.l.bf16 %v7098_v34 }
 0x4da   : > { %v5681_v32 = vadd.f32 %v5680_v19, %v5679_v57  ;;  %v5037_v11 = vpop.f32.mrf.mxu1  ;;  %v4375_v60 = vsel %vm4108_vm3, %v4303_v10, %v7094_v29  ;;  %v14865_v19 = vld [vmem:[#allocation206_spill] sm:$0xff]  ;;  %v7307_v29 = vld [vmem:[#allocation2 + $0x1b9] sm:$0xff] }
 0x4db   : > { %v5038_v6 = vadd.f32 %v5037_v11, %v12692_v0  ;;  %v4473_v17 = vpack.c.bf16 %v4376_v12, %v4375_v60  ;;  %v14866_v60 = vld [vmem:[#allocation173_spill] sm:$0xff] }
 0x4dd   : > { %v5227_v14 = vadd.f32 %v14864_v40, %v5038_v6  ;;  %v7108_v6 = vpop.permute.xlu0 %7107 }
 0x4df   : > { %v5289_v46 = vpop.f32.mrf.mxu3  ;;  %5357 = vst.msk [vmem:[%s12060_s24 + $0x108] sm:$0xff] %vm560_vm0, %v5227_v14  ;;  %v5461_v57 = vsel %vm560_vm0, %v5227_v14, 0.0  ;;  %v5578_v49 = vmul.f32 %v5227_v14, %v5227_v14 }
 0x4e0   : > { %v12768_v21 = vadd.f32 %v5289_v46, %v5101_v13  ;;  %v5462_v0 = vadd.f32 %v5461_v57, %v5460_v48  ;;  %v5103_v48 = vadd.f32 %v12584_v18, %v12147_v9  ;;  %v7306_v9 = vld [vmem:[#allocation2 + $0x1c1] sm:$0xff]  ;;  %v4233_v13 = vsel %vm560_vm0, %v7307_v29, %v7099_v7  ;;  %v4863_v34 = vpop.f32.mrf.mxu0 }
 0x4e1   : > { %v5682_v2 = vsel %vm560_vm0, %v5578_v49, 0.0  ;;  %v4234_v18 = vsel %vm560_vm0, %v7306_v9, %v7100_v45  ;;  %v7110_v57 = vunpack.i.h.bf16 %v7108_v6  ;;  %v7109_v49 = vunpack.i.l.bf16 %v7108_v6 }
 0x4e2   : > { %5382 = vst.msk [vmem:[%s12060_s24 + $0x1d0] sm:$0xff] %vm560_vm0, %v12768_v21  ;;  %v5683_v16 = vadd.f32 %v5682_v2, %v5681_v32  ;;  %v5040_v33 = vpop.f32.mrf.mxu1 }
 0x4e3   : > { %v5041_v8 = vadd.f32 %v5040_v33, %v12708_v54  ;;  %v7103_v54 = vpop.permute.xlu2 %7102 }
 0x4e4   : > { %v7105_v10 = vunpack.i.h.bf16 %v7103_v54  ;;  %v7104_v27 = vunpack.i.l.bf16 %v7103_v54 }
 0x4e5   : > { %v5230_v37 = vadd.f32 %v14865_v19, %v5041_v8  ;;  %5079 = vmatmul.bf16.gmra.mxu1 %v4473_v17 }
 0x4e6   : > { %v4305_v2 = vsel %vm4035_vm2, %v4233_v13, %v7104_v27  ;;  %v4306_v33 = vsel %vm4035_vm2, %v4234_v18, %v7105_v10 }
 0x4e7   : > { %v5291_v30 = vpop.f32.mrf.mxu3  ;;  %5358 = vst.msk [vmem:[%s12060_s24 + $0x110] sm:$0xff] %vm560_vm0, %v5230_v37  ;;  %v5463_v32 = vsel %vm560_vm0, %v5230_v37, 0.0  ;;  %v5579_v11 = vmul.f32 %v5230_v37, %v5230_v37  ;;  %v4377_v19 = vsel %vm4108_vm3, %v4305_v2, %v7109_v49 }
 0x4e8   : > { %v12785_v58 = vadd.f32 %v5291_v30, %v5103_v48  ;;  %v5464_v28 = vadd.f32 %v5463_v32, %v5462_v0  ;;  %v5106_v0 = vadd.f32 %v12596_v1, %v12187_v15  ;;  %v4378_v15 = vsel %vm4108_vm3, %v4306_v33, %v7110_v57  ;;  %v4866_v18 = vpop.f32.mrf.mxu0 }
 0x4e9   : > { %v5684_v24 = vsel %vm560_vm0, %v5579_v11, 0.0  ;;  %v4476_v30 = vpack.c.bf16 %v4378_v15, %v4377_v19  ;;  %v5108_v32 = vadd.f32 %v12612_v26, %v12225_v35  ;;  %v14867_v11 = vld [vmem:[#allocation237_spill] sm:$0xff] }
 0x4ea   : > { %5383 = vst.msk [vmem:[%s12060_s24 + $0x1d8] sm:$0xff] %vm560_vm0, %v12785_v58  ;;  %v5685_v40 = vadd.f32 %v5684_v24, %v5683_v16  ;;  %v5042_v14 = vpop.f32.mrf.mxu1 }
 0x4eb   : > { %v5043_v46 = vadd.f32 %v5042_v14, %v12723_v51 }
 0x4ed   : > { %v5232_v12 = vadd.f32 %v14866_v60, %v5043_v46  ;;  %v5113_v60 = vadd.f32 %v12642_v22, %v12280_v39 }
 0x4ef   : > { %v5294_v8 = vpop.f32.mrf.mxu3  ;;  %5359 = vst.msk [vmem:[%s12060_s24 + $0x118] sm:$0xff] %vm560_vm0, %v5232_v12  ;;  %v5465_v16 = vsel %vm560_vm0, %v5232_v12, 0.0  ;;  %v5580_v51 = vmul.f32 %v5232_v12, %v5232_v12  ;;  %v14868_v12 = vld [vmem:[#allocation223_spill] sm:$0xff] }
 0x4f0   : > { %v12802_v17 = vadd.f32 %v5294_v8, %v5106_v0  ;;  %v5466_v48 = vadd.f32 %v5465_v16, %v5464_v28 }
 0x4f1   : > { %v5686_v1 = vsel %vm560_vm0, %v5580_v51, 0.0 }
 0x4f2   : > { %5384 = vst.msk [vmem:[%s12060_s24 + $0x1e0] sm:$0xff] %vm560_vm0, %v12802_v17  ;;  %v5687_v37 = vadd.f32 %v5686_v1, %v5685_v40  ;;  %v5045_v45 = vpop.f32.mrf.mxu1  ;;  %v5111_v40 = vadd.f32 %v12626_v23, %v12256_v41  ;;  %v5116_v1 = vadd.f32 %v12656_v43, %v12310_v59 }
 0x4f3   : > { %v5046_v7 = vadd.f32 %v5045_v45, %v12742_v63 }
 0x4f5   : > { %v5235_v54 = vadd.f32 %v14867_v11, %v5046_v7  ;;  %5084 = vmatmul.bf16.gmra.mxu1 %v4476_v30 }
 0x4f7   : > { %v5296_v28 = vpop.f32.mrf.mxu3  ;;  %5360 = vst.msk [vmem:[%s12060_s24 + $0x120] sm:$0xff] %vm560_vm0, %v5235_v54  ;;  %v5467_v6 = vsel %vm560_vm0, %v5235_v54, 0.0  ;;  %v5581_v24 = vmul.f32 %v5235_v54, %v5235_v54 }
 0x4f8   : > { %v12817_v9 = vadd.f32 %v5296_v28, %v5108_v32  ;;  %v5468_v29 = vadd.f32 %v5467_v6, %v5466_v48  ;;  %v14870_v6 = vld [vmem:[#allocation254_spill] sm:$0xff] }
 0x4f9   : > { %v5688_v63 = vsel %vm560_vm0, %v5581_v24, 0.0  ;;  %v5118_v24 = vadd.f32 %v12668_v50, %v14870_v6 }
 0x4fa   : > { %5385 = vst.msk [vmem:[%s12060_s24 + $0x1e8] sm:$0xff] %vm560_vm0, %v12817_v9  ;;  %v5689_v35 = vadd.f32 %v5688_v63, %v5687_v37  ;;  %v5047_v26 = vpop.f32.mrf.mxu1  ;;  %v14869_v37 = vld [vmem:[#allocation36_spill] sm:$0xff] }
 0x4fb   : > { %v5048_v13 = vadd.f32 %v5047_v26, %v12757_v3  ;;  %v4868_v3 = vpop.f32.mrf.mxu0 }
 0x4fd   : > { %v5237_v14 = vadd.f32 %v11791_v61, %v5048_v13 }
 0x4ff   : > { %v5299_v10 = vpop.f32.mrf.mxu3  ;;  %5361 = vst.msk [vmem:[%s12060_s24 + $0x128] sm:$0xff] %vm560_vm0, %v5237_v14  ;;  %v5469_v27 = vsel %vm560_vm0, %v5237_v14, 0.0  ;;  %v5582_v46 = vmul.f32 %v5237_v14, %v5237_v14 }
 0x500   : > { %v12830_v57 = vadd.f32 %v5299_v10, %v5111_v40  ;;  %v5470_v49 = vadd.f32 %v5469_v27, %v5468_v29  ;;  %v14871_v29 = vld [vmem:[#allocation220_spill] sm:$0xff] }
 0x501   : > { %v5690_v0 = vsel %vm560_vm0, %v5582_v46, 0.0 }
 0x502   : > { %5386 = vst.msk [vmem:[%s12060_s24 + $0x1f0] sm:$0xff] %vm560_vm0, %v12830_v57  ;;  %v5691_v41 = vadd.f32 %v5690_v0, %v5689_v35  ;;  %v5050_v23 = vpop.f32.mrf.mxu1 }
 0x503   : > { %v5051_v61 = vadd.f32 %v5050_v23, %v12777_v4  ;;  %v4871_v15 = vpop.f32.mrf.mxu0 }
 0x505   : > { %v5240_v2 = vadd.f32 %v14868_v12, %v5051_v61 }
 0x507   : > { %v5301_v33 = vpop.f32.mrf.mxu3  ;;  %5362 = vst.msk [vmem:[%s12060_s24 + $0x130] sm:$0xff] %vm560_vm0, %v5240_v2  ;;  %v5471_v8 = vsel %vm560_vm0, %v5240_v2, 0.0  ;;  %v5583_v16 = vmul.f32 %v5240_v2, %v5240_v2 }
 0x508   : > { %v12843_v51 = vadd.f32 %v5301_v33, %v5113_v60  ;;  %v5472_v48 = vadd.f32 %v5471_v8, %v5470_v49  ;;  %v14872_v49 = vld [vmem:[#allocation238_spill] sm:$0xff] }
 0x509   : > { %v5692_v19 = vsel %vm560_vm0, %v5583_v16, 0.0  ;;  %v5121_v0 = vadd.f32 %v12684_v25, %v14872_v49 }
 0x50a   : > { %5387 = vst.msk [vmem:[%s12060_s24 + $0x1f8] sm:$0xff] %vm560_vm0, %v12843_v51  ;;  %v5693_v4 = vadd.f32 %v5692_v19, %v5691_v41  ;;  %v5052_v39 = vpop.f32.mrf.mxu1  ;;  %v14873_v41 = vld [vmem:[#allocation47_spill] sm:$0xff]  ;;  %v5123_v19 = vadd.f32 %v12697_v55, %v12384_v42 }
 0x50b   : > { %v5053_v22 = vadd.f32 %v5052_v39, %v4863_v34  ;;  %v4873_v35 = vpop.f32.mrf.mxu0 }
 0x50d   : > { %v5242_v45 = vadd.f32 %v14869_v37, %v5053_v22 }
 0x50f   : > { %v5304_v7 = vpop.f32.mrf.mxu3  ;;  %5363 = vst.msk [vmem:[%s12060_s24 + $0x138] sm:$0xff] %vm560_vm0, %v5242_v45  ;;  %v5473_v30 = vsel %vm560_vm0, %v5242_v45, 0.0  ;;  %v5584_v32 = vmul.f32 %v5242_v45, %v5242_v45 }
 0x510   : > { %v12855_v11 = vadd.f32 %v5304_v7, %v5116_v1  ;;  %v5474_v54 = vadd.f32 %v5473_v30, %v5472_v48 }
 0x511   : > { %v5694_v28 = vsel %vm560_vm0, %v5584_v32, 0.0 }
 0x512   : > { %5388 = vst.msk [vmem:[%s12060_s24 + $0x200] sm:$0xff] %vm560_vm0, %v12855_v11  ;;  %v5695_v34 = vadd.f32 %v5694_v28, %v5693_v4  ;;  %v5055_v59 = vpop.f32.mrf.mxu1  ;;  %v14874_v4 = vld [vmem:[#allocation229_spill] sm:$0xff] }
 0x513   : > { %v5056_v43 = vadd.f32 %v5055_v59, %v4866_v18  ;;  %v4876_v33 = vpop.f32.mrf.mxu0 }
 0x515   : > { %v5245_v63 = vadd.f32 %v14871_v29, %v5056_v43 }
 0x517   : > { %v5306_v26 = vpop.f32.mrf.mxu3  ;;  %5364 = vst.msk [vmem:[%s12060_s24 + $0x140] sm:$0xff] %vm560_vm0, %v5245_v63  ;;  %v5475_v13 = vsel %vm560_vm0, %v5245_v63, 0.0  ;;  %v5585_v40 = vmul.f32 %v5245_v63, %v5245_v63 }
 0x518   : > { %v12867_v14 = vadd.f32 %v5306_v26, %v5118_v24  ;;  %v5476_v10 = vadd.f32 %v5475_v13, %v5474_v54  ;;  %v14875_v54 = vld [vmem:[#allocation188_spill] sm:$0xff]  ;;  %v14877_v26 = vld [vmem:[#allocation147_spill] sm:$0xff] }
 0x519   : > { %v5696_v27 = vsel %vm560_vm0, %v5585_v40, 0.0  ;;  %v5126_v28 = vadd.f32 %v12713_v62, %v14875_v54 }
 0x51a   : > { %5389 = vst.msk [vmem:[%s12060_s24 + $0x208] sm:$0xff] %vm560_vm0, %v12867_v14  ;;  %v5697_v50 = vadd.f32 %v5696_v27, %v5695_v34  ;;  %v5057_v18 = vpop.f32.mrf.mxu1  ;;  %v14876_v34 = vld [vmem:[#allocation44_spill] sm:$0xff] }
 0x51b   : > { %v5058_v46 = vadd.f32 %v5057_v18, %v4868_v3  ;;  %v4878_v42 = vpop.f32.mrf.mxu0  ;;  %v14878_v18 = vld [vmem:[#allocation145_spill] sm:$0xff] }
 0x51d   : > { %v5247_v23 = vadd.f32 %v14873_v41, %v5058_v46 }
 0x51f   : > { %v5309_v61 = vpop.f32.mrf.mxu3  ;;  %5365 = vst.msk [vmem:[%s12060_s24 + $0x148] sm:$0xff] %vm560_vm0, %v5247_v23  ;;  %v5477_v60 = vsel %vm560_vm0, %v5247_v23, 0.0  ;;  %v5586_v12 = vmul.f32 %v5247_v23, %v5247_v23  ;;  %v5133_v23 = vadd.f32 %v12749_v31, %v12482_v36 }
 0x520   : > { %v12879_v2 = vadd.f32 %v5309_v61, %v5121_v0  ;;  %v5478_v8 = vadd.f32 %v5477_v60, %v5476_v10  ;;  %v14879_v61 = vld [vmem:[#allocation15_spill] sm:$0xff] }
 0x521   : > { %v5698_v16 = vsel %vm560_vm0, %v5586_v12, 0.0 }
 0x522   : > { %5390 = vst.msk [vmem:[%s12060_s24 + $0x210] sm:$0xff] %vm560_vm0, %v12879_v2  ;;  %v5699_v25 = vadd.f32 %v5698_v16, %v5697_v50  ;;  %v5060_v3 = vpop.f32.mrf.mxu1  ;;  %v5131_v50 = vadd.f32 %v12737_v44, %v12460_v53  ;;  %v14880_v16 = vld [vmem:[#allocation14_spill] sm:$0xff] }
 0x523   : > { %v5061_v48 = vadd.f32 %v5060_v3, %v4871_v15  ;;  %v4881_v63 = vpop.f32.mrf.mxu0 }
 0x525   : > { %v5250_v39 = vadd.f32 %v14874_v4, %v5061_v48  ;;  %v14881_v48 = vld [vmem:[#allocation255_spill] sm:$0xff] }
 0x527   : > { %v5311_v22 = vpop.f32.mrf.mxu3  ;;  %5366 = vst.msk [vmem:[%s12060_s24 + $0x150] sm:$0xff] %vm560_vm0, %v5250_v39  ;;  %v5479_v1 = vsel %vm560_vm0, %v5250_v39, 0.0  ;;  %v5587_v37 = vmul.f32 %v5250_v39, %v5250_v39 }
 0x528   : > { %v12891_v45 = vadd.f32 %v5311_v22, %v5123_v19  ;;  %v12893_v7 = vadd.f32 %v5479_v1, %v5478_v8  ;;  %v14882_v1 = vld [vmem:[#allocation245_spill] sm:$0xff] }
 0x529   : > { %v5700_v30 = vsel %vm560_vm0, %v5587_v37, 0.0 }
 0x52a   : > { %5391 = vst.msk [vmem:[%s12060_s24 + $0x218] sm:$0xff] %vm560_vm0, %v12891_v45  ;;  %v12899_v55 = vadd.f32 %v5700_v30, %v5699_v25  ;;  %v5062_v15 = vpop.f32.mrf.mxu1 }
 0x52b   : > { %v5063_v32 = vadd.f32 %v5062_v15, %v4873_v35  ;;  %v5128_v35 = vadd.f32 %v12725_v38, %v12434_v47  ;;  %v4883_v47 = vpop.f32.mrf.mxu0  ;;  %v14883_v15 = vld [vmem:[#allocation280_spill] sm:$0xff] }
 0x52d   : > { %v5252_v59 = vadd.f32 %v14876_v34, %v5063_v32 }
 0x52f   : > { %v5314_v43 = vpop.f32.mrf.mxu3  ;;  %5367 = vst.msk [vmem:[%s12060_s24 + $0x158] sm:$0xff] %vm560_vm0, %v5252_v59  ;;  %v5481_v34 = vsel %vm560_vm0, %v5252_v59, 0.0 }
 0x530   : > { %v12906_v6 = vadd.f32 %v5314_v43, %v5126_v28  ;;  %v5588_v28 = vmul.f32 %v5252_v59, %v5252_v59 }
 0x532   : > { %5392 = vst.msk [vmem:[%s12060_s24 + $0x220] sm:$0xff] %vm560_vm0, %v12906_v6  ;;  %v5065_v24 = vpop.f32.mrf.mxu1 }
 0x533   : > { %v5066_v29 = vadd.f32 %v5065_v24, %v4876_v33  ;;  %v4886_v12 = vpop.f32.mrf.mxu0 }
 0x535   : > { %v5255_v62 = vadd.f32 %v14877_v26, %v5066_v29  ;;  %v5702_v29 = vsel %vm560_vm0, %v5588_v28, 0.0 }
 0x536   : > { %v5703_v59 = vadd.f32 %v5702_v29, %v12899_v55 }
 0x537   : > { %v5316_v13 = vpop.f32.mrf.mxu3  ;;  %5368 = vst.msk [vmem:[%s12060_s24 + $0x160] sm:$0xff] %vm560_vm0, %v5255_v62  ;;  %v5589_v43 = vmul.f32 %v5255_v62, %v5255_v62 }
 0x538   : > { %v12916_v40 = vadd.f32 %v5316_v13, %v5128_v35  ;;  %v5482_v13 = vadd.f32 %v5481_v34, %v12893_v7 }
 0x53a   : > { %5393 = vst.msk [vmem:[%s12060_s24 + $0x228] sm:$0xff] %vm560_vm0, %v12916_v40  ;;  %v5067_v10 = vpop.f32.mrf.mxu1 }
 0x53b   : > { %v5068_v27 = vadd.f32 %v5067_v10, %v4878_v42  ;;  %v4888_v36 = vpop.f32.mrf.mxu0  ;;  %v5704_v10 = vsel %vm560_vm0, %v5589_v43, 0.0 }
 0x53d   : > { %v5257_v46 = vadd.f32 %v14878_v18, %v5068_v27  ;;  %v14884_v18 = vld [vmem:[#allocation91_spill] sm:$0xff] }
 0x53f   : > { %v5319_v38 = vpop.f32.mrf.mxu3  ;;  %5369 = vst.msk [vmem:[%s12060_s24 + $0x168] sm:$0xff] %vm560_vm0, %v5257_v46  ;;  %v5590_v35 = vmul.f32 %v5257_v46, %v5257_v46  ;;  %v5485_v27 = vsel %vm560_vm0, %v5257_v46, 0.0 }
 0x540   : > { %v12926_v49 = vadd.f32 %v5319_v38, %v5131_v50 }
 0x542   : > { %5394 = vst.msk [vmem:[%s12060_s24 + $0x230] sm:$0xff] %vm560_vm0, %v12926_v49  ;;  %v5070_v0 = vpop.f32.mrf.mxu1 }
 0x543   : > { %v5071_v41 = vadd.f32 %v5070_v0, %v4881_v63  ;;  %v4891_v22 = vpop.f32.mrf.mxu0  ;;  %v5483_v63 = vsel %vm560_vm0, %v5255_v62, 0.0  ;;  %v5706_v0 = vsel %vm560_vm0, %v5590_v35, 0.0 }
 0x544   : > { %v5484_v38 = vadd.f32 %v5483_v63, %v5482_v13 }
 0x545   : > { %v5260_v53 = vadd.f32 %v14879_v61, %v5071_v41  ;;  %v5705_v61 = vadd.f32 %v5704_v10, %v5703_v59  ;;  %v14886_v59 = vld [vmem:[#allocation148_spill] sm:$0xff] }
 0x546   : > { %v5486_v7 = vadd.f32 %v5485_v27, %v5484_v38 }
 0x547   : > { %v5321_v44 = vpop.f32.mrf.mxu3  ;;  %5370 = vst.msk [vmem:[%s12060_s24 + $0x170] sm:$0xff] %vm560_vm0, %v5260_v53  ;;  %v5591_v50 = vmul.f32 %v5260_v53, %v5260_v53  ;;  %v5487_v41 = vsel %vm560_vm0, %v5260_v53, 0.0 }
 0x548   : > { %v12936_v60 = vadd.f32 %v5321_v44, %v5133_v23 }
 0x549   : > { %v5708_v44 = vsel %vm560_vm0, %v5591_v50, 0.0 }
 0x54a   : > { %5395 = vst.msk [vmem:[%s12060_s24 + $0x238] sm:$0xff] %vm560_vm0, %v12936_v60  ;;  %v5072_v33 = vpop.f32.mrf.mxu1 }
 0x54b   : > { %v5073_v8 = vadd.f32 %v5072_v33, %v4883_v47  ;;  %v4893_v54 = vpop.f32.mrf.mxu0  ;;  %v5707_v33 = vadd.f32 %v5706_v0, %v5705_v61 }
 0x54d   : > { %v5262_v25 = vadd.f32 %v14880_v16, %v5073_v8  ;;  %v5488_v8 = vadd.f32 %v5487_v41, %v5486_v7 }
 0x54f   : > { %5371 = vst.msk [vmem:[%s12060_s24 + $0x178] sm:$0xff] %vm560_vm0, %v5262_v25  ;;  %v5592_v23 = vmul.f32 %v5262_v25, %v5262_v25  ;;  %v5489_v46 = vsel %vm560_vm0, %v5262_v25, 0.0 }
 0x551   : > { %v5710_v55 = vsel %vm560_vm0, %v5592_v23, 0.0 }
 0x552   : > { %v5075_v31 = vpop.f32.mrf.mxu1 }
 0x553   : > { %v5076_v3 = vadd.f32 %v5075_v31, %v4886_v12  ;;  %v4896_v62 = vpop.f32.mrf.mxu0 }
 0x555   : > { %v5265_v19 = vadd.f32 %v14881_v48, %v5076_v3  ;;  %v5709_v3 = vadd.f32 %v5708_v44, %v5707_v33  ;;  %v5490_v48 = vadd.f32 %v5489_v46, %v5488_v8  ;;  %v5503_v44 = vsel %vm560_vm0, %v12499_v52, 0.0 }
 0x556   : > { %v5600_v46 = vmul.f32 %v12519_v20, %v12519_v20 }
 0x557   : > { %5372 = vst.msk [vmem:[%s12060_s24 + $0x180] sm:$0xff] %vm560_vm0, %v5265_v19  ;;  %v5593_v12 = vmul.f32 %v5265_v19, %v5265_v19 }
 0x55a   : > { %v5077_v4 = vpop.f32.mrf.mxu1 }
 0x55b   : > { %v5078_v39 = vadd.f32 %v5077_v4, %v4888_v36  ;;  %v5491_v36 = vsel %vm560_vm0, %v5265_v19, 0.0  ;;  %v5712_v4 = vsel %vm560_vm0, %v5593_v12, 0.0  ;;  %v4898_v29 = vpop.f32.mrf.mxu0 }
 0x55d   : > { %v5267_v37 = vadd.f32 %v14882_v1, %v5078_v39  ;;  %v14885_v1 = vld [vmem:[#allocation216_spill] sm:$0xff] }
 0x55f   : > { %5373 = vst.msk [vmem:[%s12060_s24 + $0x188] sm:$0xff] %vm560_vm0, %v5267_v37  ;;  %v5594_v53 = vmul.f32 %v5267_v37, %v5267_v37  ;;  %v5493_v39 = vsel %vm560_vm0, %v5267_v37, 0.0 }
 0x562   : > { %v5080_v30 = vpop.f32.mrf.mxu1 }
 0x563   : > { %v5081_v42 = vadd.f32 %v5080_v30, %v4891_v22  ;;  %v5711_v30 = vadd.f32 %v5710_v55, %v5709_v3  ;;  %v5505_v55 = vsel %vm560_vm0, %v12519_v20, 0.0  ;;  %v5726_v3 = vsel %vm560_vm0, %v5600_v46, 0.0 }
 0x564   : > { %v5509_v20 = vsel %vm560_vm0, %v12555_v5, 0.0  ;;  %v5611_v46 = vmul.f32 %v12879_v2, %v12879_v2 }
 0x565   : > { %v5270_v32 = vadd.f32 %v14883_v15, %v5081_v42  ;;  %v5492_v42 = vadd.f32 %v5491_v36, %v5490_v48  ;;  %v5714_v15 = vsel %vm560_vm0, %v5594_v53, 0.0  ;;  %v5713_v19 = vadd.f32 %v5712_v4, %v5711_v30 }
 0x566   : > { %v5601_v36 = vmul.f32 %v12535_v56, %v12535_v56  ;;  %v5602_v48 = vmul.f32 %v12555_v5, %v12555_v5  ;;  %v5513_v5 = vsel %vm560_vm0, %v12785_v58, 0.0 }
 0x567   : > { %5374 = vst.msk [vmem:[%s12060_s24 + $0x190] sm:$0xff] %vm560_vm0, %v5270_v32  ;;  %v5595_v22 = vmul.f32 %v5270_v32, %v5270_v32  ;;  %v5494_v34 = vadd.f32 %v5493_v39, %v5492_v42  ;;  %v5715_v63 = vadd.f32 %v5714_v15, %v5713_v19  ;;  %v5604_v15 = vmul.f32 %v12785_v58, %v12785_v58 }
 0x568   : > { %v5730_v42 = vsel %vm560_vm0, %v5602_v48, 0.0  ;;  %v5517_v58 = vsel %vm560_vm0, %v12817_v9, 0.0 }
 0x569   : > { %v5716_v43 = vsel %vm560_vm0, %v5595_v22, 0.0  ;;  %v5728_v22 = vsel %vm560_vm0, %v5601_v36, 0.0 }
 0x56a   : > { %v5082_v24 = vpop.f32.mrf.mxu1  ;;  %v5717_v27 = vadd.f32 %v5716_v43, %v5715_v63 }
 0x56b   : > { %v5083_v26 = vadd.f32 %v5082_v24, %v4893_v54  ;;  %v5495_v54 = vsel %vm560_vm0, %v5270_v32, 0.0 }
 0x56c   : > { %v5496_v35 = vadd.f32 %v5495_v54, %v5494_v34  ;;  %v5605_v34 = vmul.f32 %v12802_v17, %v12802_v17 }
 0x56d   : > { %v5272_v47 = vadd.f32 %v14884_v18, %v5083_v26 }
 0x56f   : > { %5375 = vst.msk [vmem:[%s12060_s24 + $0x198] sm:$0xff] %vm560_vm0, %v5272_v47  ;;  %v5596_v28 = vmul.f32 %v5272_v47, %v5272_v47  ;;  %v5497_v24 = vsel %vm560_vm0, %v5272_v47, 0.0  ;;  %v5599_v47 = vmul.f32 %v12499_v52, %v12499_v52  ;;  %v5507_v52 = vsel %vm560_vm0, %v12535_v56, 0.0 }
 0x570   : > { %v5498_v50 = vadd.f32 %v5497_v24, %v5496_v35  ;;  %v5511_v56 = vsel %vm560_vm0, %v12768_v21, 0.0 }
 0x571   : > { %v5718_v13 = vsel %vm560_vm0, %v5596_v28, 0.0 }
 0x572   : > { %v5085_v16 = vpop.f32.mrf.mxu1  ;;  %v5719_v0 = vadd.f32 %v5718_v13, %v5717_v27  ;;  %v5607_v13 = vmul.f32 %v12830_v57, %v12830_v57 }
 0x573   : > { %v5086_v31 = vadd.f32 %v5085_v16, %v4896_v62  ;;  %v5724_v16 = vsel %vm560_vm0, %v5599_v47, 0.0 }
 0x575   : > { %v5275_v25 = vadd.f32 %v14885_v1, %v5086_v31  ;;  %v5603_v1 = vmul.f32 %v12768_v21, %v12768_v21  ;;  %v5515_v21 = vsel %vm560_vm0, %v12802_v17, 0.0  ;;  %v5519_v17 = vsel %vm560_vm0, %v12830_v57, 0.0 }
 0x576   : > { %v5523_v57 = vsel %vm560_vm0, %v12855_v11, 0.0 }
 0x577   : > { %5376 = vst.msk [vmem:[%s12060_s24 + $0x1a0] sm:$0xff] %vm560_vm0, %v5275_v25  ;;  %v5597_v37 = vmul.f32 %v5275_v25, %v5275_v25  ;;  %v5499_v10 = vsel %vm560_vm0, %v5275_v25, 0.0  ;;  %v5732_v19 = vsel %vm560_vm0, %v5603_v1, 0.0  ;;  %v5615_v1 = vmul.f32 %v12926_v49, %v12926_v49 }
 0x578   : > { %v5500_v41 = vadd.f32 %v5499_v10, %v5498_v50  ;;  %v5608_v50 = vmul.f32 %v12843_v51, %v12843_v51 }
 0x579   : > { %v5720_v18 = vsel %vm560_vm0, %v5597_v37, 0.0  ;;  %v5734_v37 = vsel %vm560_vm0, %v5604_v15, 0.0 }
 0x57a   : > { %v5087_v26 = vpop.f32.mrf.mxu1  ;;  %v5721_v61 = vadd.f32 %v5720_v18, %v5719_v0  ;;  %v5609_v0 = vmul.f32 %v12855_v11, %v12855_v11  ;;  %v5527_v11 = vsel %vm560_vm0, %v12879_v2, 0.0  ;;  %v5531_v2 = vsel %vm560_vm0, %v12906_v6, 0.0 }
 0x57b   : > { %v5088_v32 = vadd.f32 %v5087_v26, %v4898_v29  ;;  %v5606_v29 = vmul.f32 %v12817_v9, %v12817_v9  ;;  %v5736_v26 = vsel %vm560_vm0, %v5605_v34, 0.0  ;;  %v5521_v9 = vsel %vm560_vm0, %v12843_v51, 0.0 }
 0x57c   : > { %v5525_v51 = vsel %vm560_vm0, %v12867_v14, 0.0 }
 0x57d   : > { %v5277_v38 = vadd.f32 %v14886_v59, %v5088_v32  ;;  %v5738_v27 = vsel %vm560_vm0, %v5606_v29, 0.0 }
 0x57f   : > { %5377 = vst.msk [vmem:[%s12060_s24 + $0x1a8] sm:$0xff] %vm560_vm0, %v5277_v38  ;;  %v5501_v23 = vsel %vm560_vm0, %v5277_v38, 0.0  ;;  %v5598_v62 = vmul.f32 %v5277_v38, %v5277_v38  ;;  %v5740_v38 = vsel %vm560_vm0, %v5607_v13, 0.0 }
 0x580   : > { %v5502_v7 = vadd.f32 %v5501_v23, %v5500_v41  ;;  %v5742_v23 = vsel %vm560_vm0, %v5608_v50, 0.0 }
 0x581   : > { %v5722_v12 = vsel %vm560_vm0, %v5598_v62, 0.0  ;;  %v5610_v62 = vmul.f32 %v12867_v14, %v12867_v14  ;;  %v5529_v14 = vsel %vm560_vm0, %v12891_v45, 0.0 }
 0x582   : > { %v5504_v33 = vadd.f32 %v5503_v44, %v5502_v7  ;;  %v5723_v8 = vadd.f32 %v5722_v12, %v5721_v61  ;;  %v5744_v44 = vsel %vm560_vm0, %v5609_v0, 0.0 }
 0x584   : > { %v5506_v53 = vadd.f32 %v5505_v55, %v5504_v33  ;;  %v5725_v31 = vadd.f32 %v5724_v16, %v5723_v8  ;;  %v5746_v8 = vsel %vm560_vm0, %v5610_v62, 0.0  ;;  %v5612_v16 = vmul.f32 %v12891_v45, %v12891_v45 }
 0x585   : > { %v5533_v45 = vsel %vm560_vm0, %v12916_v40, 0.0 }
 0x586   : > { %v5508_v4 = vadd.f32 %v5507_v52, %v5506_v53  ;;  %v5727_v39 = vadd.f32 %v5726_v3, %v5725_v31  ;;  %v5748_v53 = vsel %vm560_vm0, %v5611_v46, 0.0  ;;  %v5613_v31 = vmul.f32 %v12906_v6, %v12906_v6 }
 0x587   : > { %v5750_v48 = vsel %vm560_vm0, %v5612_v16, 0.0  ;;  %v5535_v6 = vsel %vm560_vm0, %v12926_v49, 0.0 }
 0x588   : > { %v5510_v25 = vadd.f32 %v5509_v20, %v5508_v4  ;;  %v5729_v30 = vadd.f32 %v5728_v22, %v5727_v39  ;;  %v5614_v4 = vmul.f32 %v12916_v40, %v12916_v40  ;;  %v5752_v20 = vsel %vm560_vm0, %v5613_v31, 0.0 }
 0x589   : > { %v5537_v40 = vsel %vm560_vm0, %v12936_v60, 0.0 }
 0x58a   : > { %v5512_v54 = vadd.f32 %v5511_v56, %v5510_v25  ;;  %v5731_v28 = vadd.f32 %v5730_v42, %v5729_v30  ;;  %v5754_v42 = vsel %vm560_vm0, %v5614_v4, 0.0  ;;  %v5616_v56 = vmul.f32 %v12936_v60, %v12936_v60 }
 0x58c   : > { %v5514_v43 = vadd.f32 %v5513_v5, %v5512_v54  ;;  %v5733_v24 = vadd.f32 %v5732_v19, %v5731_v28  ;;  %v5756_v28 = vsel %vm560_vm0, %v5615_v1, 0.0  ;;  %v5758_v34 = vsel %vm560_vm0, %v5616_v56, 0.0 }
 0x58e   : > { %v5516_v63 = vadd.f32 %v5515_v21, %v5514_v43  ;;  %v5735_v35 = vadd.f32 %v5734_v37, %v5733_v24 }
 0x590   : > { %v5518_v10 = vadd.f32 %v5517_v58, %v5516_v63  ;;  %v5737_v32 = vadd.f32 %v5736_v26, %v5735_v35 }
 0x592   : > { %v5520_v18 = vadd.f32 %v5519_v17, %v5518_v10  ;;  %v5739_v59 = vadd.f32 %v5738_v27, %v5737_v32 }
 0x594   : > { %v5522_v41 = vadd.f32 %v5521_v9, %v5520_v18  ;;  %v5741_v47 = vadd.f32 %v5740_v38, %v5739_v59 }
 0x596   : > { %v5524_v61 = vadd.f32 %v5523_v57, %v5522_v41  ;;  %v5743_v7 = vadd.f32 %v5742_v23, %v5741_v47 }
 0x598   : > { %v5526_v12 = vadd.f32 %v5525_v51, %v5524_v61  ;;  %v5745_v33 = vadd.f32 %v5744_v44, %v5743_v7 }
 0x59a   : > { %v5528_v55 = vadd.f32 %v5527_v11, %v5526_v12  ;;  %v5747_v36 = vadd.f32 %v5746_v8, %v5745_v33 }
 0x59c   : > { %v5530_v3 = vadd.f32 %v5529_v14, %v5528_v55  ;;  %v5749_v52 = vadd.f32 %v5748_v53, %v5747_v36 }
 0x59e   : > { %v5532_v39 = vadd.f32 %v5531_v2, %v5530_v3  ;;  %v5751_v22 = vadd.f32 %v5750_v48, %v5749_v52 }
 0x5a0   : > { %v5534_v25 = vadd.f32 %v5533_v45, %v5532_v39  ;;  %v5753_v30 = vadd.f32 %v5752_v20, %v5751_v22 }
 0x5a2   : > { %v5536_v15 = vadd.f32 %v5535_v6, %v5534_v25  ;;  %v5755_v54 = vadd.f32 %v5754_v42, %v5753_v30 }
 0x5a4   : > { %v5538_v19 = vadd.f32 %v5537_v40, %v5536_v15  ;;  %v5757_v5 = vadd.f32 %v5756_v28, %v5755_v54 }
 0x5a6   : > { %v5539_v43 = vrot.slane %v5538_v19, 4  ;;  %v5759_v24 = vadd.f32 %v5758_v34, %v5757_v5 }
 0x5a8   : > { %v5540_v37 = vadd.f32 %v5539_v43, %v5538_v19  ;;  %v5760_v21 = vrot.slane %v5759_v24, 4 }
 0x5aa   : > { %v5541_v49 = vrot.slane %v5540_v37, 2  ;;  %v5761_v29 = vadd.f32 %v5760_v21, %v5759_v24 }
 0x5ac   : > { %v5542_v63 = vadd.f32 %v5541_v49, %v5540_v37  ;;  %v5762_v35 = vrot.slane %v5761_v29, 2 }
 0x5ae   : > { %v5543_v26 = vrot.slane %v5542_v63, 1  ;;  %v5763_v58 = vadd.f32 %v5762_v35, %v5761_v29 }
 0x5b0   : > { %v5764_v13 = vrot.slane %v5763_v58, 1  ;;  %v5544_v60 = vadd.f32 %v5543_v26, %v5542_v63 }
 0x5b2   : > { %v5765_v10 = vadd.f32 %v5764_v13, %v5763_v58 }
 0x5b4   : > { %v5767_v32 = vsel %vm5766_vm4, %v5544_v60, %v5765_v10 }
 0x5b5   : > { %5769 = vst.msk [vmem:[%s262_s18] sm:$0x3] %vm5768_vm5, %v5767_v32 }
 0x5b6 PF: > { %s17_s21 = sadd.s32 1, %s7314_s21  }
 0x5b7   : > { %p14_p4 = scmp.ge.s32.totalorder %s17_s21, 4  }
 0x5b9   :  { %16 = sbr.rel (!%p14_p4) target bundleno = 1 (0x1), region = 82 }

</bundles_post_ra>
